<compile_context>
chip_gen: v6e
topology: v6e:2x2x1
jax: 0.10.0
libtpu: 0.0.40
codegen_flags: <defaults>
</compile_context>

<pallas_src>
import functools

import jax
import jax.numpy as jnp
from jax.experimental import pallas as pl
from jax.experimental.pallas import tpu as pltpu

EPS = 1e-5


def _cdiv(a, b):
    return -(-a // b)


# ----------------------------------------------------------------------------
# Pallas kernel: fused BasicBlock, B images per grid step
# ----------------------------------------------------------------------------
def _basic_block_kernel(*refs, stride, Ho, Wo, planes, has_proj, B):
    """All spatial tensors are flattened "gapped" rows of length Wrow = Wo+2
    (the zero-padded image row).  Flat index m = ho*Wrow + wo; columns
    wo in {Wo, Wo+1} are wrap-around garbage that is zeroed via `mask` before
    feeding conv2 and discarded in the wrapper."""
    if has_proj:
        (ph_ref, w1_ref, w2_ref, b1_ref, b2_ref, mask_ref, wsc_ref,
         o_ref, p_scr) = refs
    else:
        ph_ref, w1_ref, w2_ref, b1_ref, b2_ref, mask_ref, o_ref, p_scr = refs
        wsc_ref = None

    Wrow = Wo + 2
    Mq = Ho * Wrow
    Mp = (Ho + 3) * Wrow
    top = Wrow + 1                       # first interior row of p_scr
    bot = Mp - (top + Mq)                # trailing halo rows

    # Re-establish the zero halo of the conv1-output scratch every step.  The
    # interior is fully overwritten (masked) per image, so only ~3*Wrow halo
    # rows need zeroing — much cheaper than zeroing the whole (Mp, planes)
    # buffer.  We do NOT zero only at program_id==0: under megacore splitting
    # of the "parallel" grid axis each TensorCore owns its own scratch and only
    # one core would ever see iteration 0.
    p_scr[pl.ds(0, top), :] = jnp.zeros((top, planes), p_scr.dtype)
    p_scr[pl.ds(top + Mq, bot), :] = jnp.zeros((bot, planes), p_scr.dtype)

    # Hoisted once per grid step (shared by all B images).
    mask = mask_ref[...]                 # (Mq, 1) f32: 1.0 valid col, 0.0 wrap col
    w1 = w1_ref[...]                     # (9*Cin,   planes) bf16, BN1 folded
    w2 = w2_ref[...]                     # (9*planes,planes) bf16, BN2 folded
    bias1 = b1_ref[...]                  # (1, planes) f32
    bias2 = b2_ref[...]                  # (1, planes) f32 (includes shortcut BN bias)

    # Shortcut read location inside the phases buffer.
    if stride == 1:
        sc_phase, sc_off = 0, Wrow + 1           # un-strided pixels of x
    else:
        sc_phase, sc_off = stride + 1, 0         # phase (1,1) == x[::s, ::s]

    for b in range(B):
        # ---- conv1 (3x3, stride) + bn1 + ReLU: ONE GEMM, K = 9*Cin ----------
        taps = []
        for kh in range(3):
            for kw in range(3):
                pidx = (kh % stride) * stride + (kw % stride)
                off = (kh // stride) * Wrow + (kw // stride)
                taps.append(ph_ref[pidx, b, pl.ds(off, Mq), :])   # (Mq, Cin)
        patches1 = jnp.concatenate(taps, axis=-1)                 # (Mq, 9*Cin)
        acc1 = jnp.dot(patches1, w1, preferred_element_type=jnp.float32)
        out1 = (jnp.maximum(acc1 + bias1, 0.0) * mask).astype(p_scr.dtype)

        # dropout(p=0.3): eval-mode identity.
        # TODO(synk): training-mode dropout is not implemented.

        # Scatter masked out1 into the zero-haloed padded scratch for conv2.
        p_scr[pl.ds(top, Mq), :] = out1

        # ---- conv2 (3x3, stride 1) + bn2: ONE GEMM, K = 9*planes ------------
        taps2 = [p_scr[pl.ds(kh * Wrow + kw, Mq), :]
                 for kh in range(3) for kw in range(3)]
        patches2 = jnp.concatenate(taps2, axis=-1)                # (Mq, 9*planes)
        acc2 = jnp.dot(patches2, w2, preferred_element_type=jnp.float32)

        # ---- shortcut (identity, or folded 1x1 conv + bn) -------------------
        xs = ph_ref[sc_phase, b, pl.ds(sc_off, Mq), :]            # (Mq, Cin) bf16
        if has_proj:
            res = jnp.dot(xs, wsc_ref[...], preferred_element_type=jnp.float32)
        else:
            # NOTE: identity residual rides the bf16 phases copy (one bf16
            # rounding vs the f32 PyTorch shortcut); within test tolerance.
            res = xs.astype(jnp.float32)

        o_ref[b] = jnp.maximum(acc2 + bias2 + res, 0.0).astype(o_ref.dtype)


# ----------------------------------------------------------------------------
# Glue: BN folding, phase layout, per-chip block planning
# ----------------------------------------------------------------------------
def fold_bn(gamma, beta, mean, var):
    scale = gamma / jnp.sqrt(var + EPS)
    return scale, beta - mean * scale


def _make_phases_flat(x, stride, Ho, Wo):
    """x: (N,H,W,C) f32 -> bf16 (stride^2, N, (Ho+3)*(Wo+2), C) flattened,
    zero-padded phase images; phase (ph,pw) holds x_pad[ph::stride, pw::stride].
    For stride==1 this is just the zero-padded image (no data blow-up)."""
    N, H, W, C = x.shape
    Hrow, Wrow = Ho + 3, Wo + 2
    xp = jnp.pad(x, ((0, 0), (1, stride + 2), (1, stride + 2), (0, 0)))
    phases = []
    for ph in range(stride):
        for pw in range(stride):
            t = xp[:, ph::stride, pw::stride, :][:, :Hrow, :Wrow, :]
            t = jnp.pad(t, ((0, 0), (0, Hrow - t.shape[1]),
                            (0, Wrow - t.shape[2]), (0, 0)))
            phases.append(t.reshape(N, Hrow * Wrow, C))
    return jnp.stack(phases, axis=0).astype(jnp.bfloat16)


def _vmem_capacity_bytes():
    try:
        info = pltpu.get_tpu_info()
        for name in ("vmem_capacity_bytes", "vmem_size_bytes", "vmem_bytes"):
            v = getattr(info, name, None)
            if v:
                return int(v)
    except Exception:
        pass
    return 64 * 1024 * 1024          # conservative fallback (v7x-sized VMEM)


def _plan(N, stride, Mp, Mq, Cin, planes):
    """Pick per-step image pack B and vmem_limit_bytes from chip VMEM size."""
    cap = _vmem_capacity_bytes()
    budget = max(32 * 1024 * 1024,
                 min(cap - 16 * 1024 * 1024, 112 * 1024 * 1024))
    # Batch-independent VMEM: double-buffered weights/biases/mask + scratch +
    # a rough allowance for in-kernel temporaries (patches, f32 accumulators).
    fixed = 2 * 2 * (9 * Cin * planes + 9 * planes * planes + Cin * planes)
    fixed += Mp * planes * 2                              # p_scr (bf16)
    fixed += 2 * Mq * 128 * 4                             # mask (lane-padded)
    fixed += 2 * Mq * 9 * max(Cin, planes) * 2 + 4 * Mq * planes * 4
    # Per-image: phases block (bf16) + f32 output block, both double-buffered.
    per_img = 2 * stride * stride * Mp * Cin * 2 + 2 * Mq * planes * 4
    avail = budget - fixed
    B = int(max(1, min(N, avail // max(per_img, 1), 16)))
    n_steps = _cdiv(N, B)
    # v7x megacore: prefer an even grid length so both TensorCores get work.
    if n_steps > 1 and n_steps % 2 == 1:
        b_alt = _cdiv(N, n_steps + 1)
        if b_alt >= 1 and _cdiv(N, b_alt) % 2 == 0:
            B = b_alt
            n_steps = _cdiv(N, B)
    return B, n_steps, int(budget)


def basic_block_forward(x_nchw, params, stride):
    # NCHW at the PyTorch boundary, NHWC (channels on the 128-lane axis) inside.
    x = jnp.transpose(x_nchw, (0, 2, 3, 1)).astype(jnp.float32)
    N, H, W, Cin = x.shape
    planes = params["w1"].shape[-1]
    Ho = (H - 1) // stride + 1
    Wo = (W - 1) // stride + 1
    Wrow = Wo + 2
    Mq, Mp = Ho * Wrow, (Ho + 3) * Wrow

    # Fold BN running stats; fold the scale into the (bf16) conv weights.
    s1, b1 = fold_bn(params["g1"], params["be1"], params["m1"], params["v1"])
    s2, b2 = fold_bn(params["g2"], params["be2"], params["m2"], params["v2"])
    w1f = (params["w1"] * s1).reshape(9 * Cin, planes).astype(jnp.bfloat16)
    w2f = (params["w2"] * s2).reshape(9 * planes, planes).astype(jnp.bfloat16)

    has_proj = (stride != 1) or (Cin != planes)
    b2_tot = b2
    wscf = None
    if has_proj:
        ssc, bsc = fold_bn(params["gsc"], params["besc"],
                           params["msc"], params["vsc"])
        wscf = (params["wsc"] * ssc).reshape(Cin, planes).astype(jnp.bfloat16)
        b2_tot = b2 + bsc

    B, n_steps, vmem_limit = _plan(N, stride, Mp, Mq, Cin, planes)
    Npad = B * n_steps
    if Npad > N:
        x = jnp.pad(x, ((0, Npad - N), (0, 0), (0, 0), (0, 0)))

    phases = _make_phases_flat(x, stride, Ho, Wo)   # (s^2, Npad, Mp, Cin) bf16

    # Wrap-column mask, built once host-side (no per-step iota/mod/select).
    col = jnp.arange(Mq, dtype=jnp.int32) % Wrow
    mask = (col < Wo).astype(jnp.float32).reshape(Mq, 1)

    args = [phases, w1f, w2f,
            b1.reshape(1, planes).astype(jnp.float32),
            b2_tot.reshape(1, planes).astype(jnp.float32),
            mask]
    in_specs = [
        pl.BlockSpec((stride * stride, B, Mp, Cin), lambda n: (0, n, 0, 0)),
        pl.BlockSpec((9 * Cin, planes), lambda n: (0, 0)),
        pl.BlockSpec((9 * planes, planes), lambda n: (0, 0)),
        pl.BlockSpec((1, planes), lambda n: (0, 0)),
        pl.BlockSpec((1, planes), lambda n: (0, 0)),
        pl.BlockSpec((Mq, 1), lambda n: (0, 0)),
    ]
    if has_proj:
        args.append(wscf)
        in_specs.append(pl.BlockSpec((Cin, planes), lambda n: (0, 0)))

    kernel = functools.partial(_basic_block_kernel, stride=stride, Ho=Ho,
                               Wo=Wo, planes=planes, has_proj=has_proj, B=B)
    out_flat = pl.pallas_call(
        kernel,
        out_shape=jax.ShapeDtypeStruct((Npad, Mq, planes), jnp.float32),
        grid=(n_steps,),
        in_specs=in_specs,
        out_specs=pl.BlockSpec((B, Mq, planes), lambda n: (n, 0, 0)),
        scratch_shapes=[pltpu.VMEM((Mp, planes), jnp.bfloat16)],
        compiler_params=pltpu.CompilerParams(
            dimension_semantics=("parallel",),
            vmem_limit_bytes=vmem_limit),
    )(*args)

    out = out_flat[:N].reshape(N, Ho, Wrow, planes)[:, :, :Wo, :]
    return jnp.transpose(out, (0, 3, 1, 2))               # back to NCHW


# ----------------------------------------------------------------------------
# Pure-JAX reference (lax.conv, f32) for correctness check
# ----------------------------------------------------------------------------
def reference_forward(x_nchw, params, stride):
    dn = ("NHWC", "HWIO", "NHWC")
    x = jnp.transpose(x_nchw, (0, 2, 3, 1)).astype(jnp.float32)
    planes = params["w1"].shape[-1]
    Cin = x.shape[-1]

    def bn(y, g, be, m, v):
        s, b = fold_bn(g, be, m, v)
        return y * s + b

    o = jax.lax.conv_general_dilated(x, params["w1"], (stride, stride),
                                     ((1, 1), (1, 1)), dimension_numbers=dn)
    o = jax.nn.relu(bn(o, params["g1"], params["be1"], params["m1"], params["v1"]))
    o = jax.lax.conv_general_dilated(o, params["w2"], (1, 1),
                                     ((1, 1), (1, 1)), dimension_numbers=dn)
    o = bn(o, params["g2"], params["be2"], params["m2"], params["v2"])
    if stride != 1 or Cin != planes:
        sc = jax.lax.conv_general_dilated(x, params["wsc"], (stride, stride),
                                          ((0, 0), (0, 0)),
                                          dimension_numbers=dn)
        sc = bn(sc, params["gsc"], params["besc"], params["msc"], params["vsc"])
    else:
        sc = x
    return jnp.transpose(jax.nn.relu(o + sc), (0, 3, 1, 2))


# ----------------------------------------------------------------------------
# Deterministic parameter construction
# ----------------------------------------------------------------------------
def make_params(key, in_planes, planes, stride):
    ks = jax.random.split(key, 12)
    p = {
        "w1": 0.1 * jax.random.normal(ks[0], (3, 3, in_planes, planes), jnp.float32),
        "g1": 1.0 + 0.1 * jax.random.normal(ks[1], (planes,), jnp.float32),
        "be1": 0.1 * jax.random.normal(ks[2], (planes,), jnp.float32),
        "m1": 0.1 * jax.random.normal(ks[3], (planes,), jnp.float32),
        "v1": jax.random.uniform(ks[4], (planes,), jnp.float32, 0.5, 1.5),
        "w2": 0.1 * jax.random.normal(ks[5], (3, 3, planes, planes), jnp.float32),
        "g2": 1.0 + 0.1 * jax.random.normal(ks[6], (planes,), jnp.float32),
        "be2": 0.1 * jax.random.normal(ks[7], (planes,), jnp.float32),
        "m2": 0.1 * jax.random.normal(ks[8], (planes,), jnp.float32),
        "v2": jax.random.uniform(ks[9], (planes,), jnp.float32, 0.5, 1.5),
    }
    if stride != 1 or in_planes != planes:
        ks2 = jax.random.split(ks[10], 5)
        p.update({
            "wsc": 0.1 * jax.random.normal(ks2[0], (1, 1, in_planes, planes), jnp.float32),
            "gsc": 1.0 + 0.1 * jax.random.normal(ks2[1], (planes,), jnp.float32),
            "besc": 0.1 * jax.random.normal(ks2[2], (planes,), jnp.float32),
            "msc": 0.1 * jax.random.normal(ks2[3], (planes,), jnp.float32),
            "vsc": jax.random.uniform(ks2[4], (planes,), jnp.float32, 0.5, 1.5),
        })
    return p


if __name__ == "__main__":
    key = jax.random.PRNGKey(0)
    # (in_planes, planes, stride): projection (1x1) shortcut, identity shortcut,
    # and strided projection shortcut — all three BasicBlock configurations.
    configs = [(4, 8, 1), (8, 8, 1), (4, 8, 2)]
    for idx, (in_planes, planes, stride) in enumerate(configs):
        k_x, k_p = jax.random.split(jax.random.fold_in(key, idx))
        x = jax.random.normal(k_x, (2, in_planes, 16, 16), jnp.float32)  # NCHW
        params = make_params(k_p, in_planes, planes, stride)

        out = jax.block_until_ready(basic_block_forward(x, params, stride))
        ref = reference_forward(x, params, stride)

        Ho = (16 - 1) // stride + 1
        assert out.shape == (2, planes, Ho, Ho), out.shape
        # Tolerance accounts for bf16 MXU operands (f32 accumulation) vs f32 ref.
        max_err = float(jnp.max(jnp.abs(out - ref)))
        assert jnp.allclose(out, ref, rtol=3e-2, atol=3e-2), (idx, max_err)

    print("KERNEL_OK")
</pallas_src>

<mosaic_0001>
module attributes {stable_mosaic.version = 11 : i64} {
  func.func @_basic_block_kernel(%arg0: i32, %arg1: memref<1x2x342x4xbf16, #tpu.memory_space<vmem>>, %arg2: memref<36x8xbf16, #tpu.memory_space<vmem>>, %arg3: memref<72x8xbf16, #tpu.memory_space<vmem>>, %arg4: memref<1x8xf32, #tpu.memory_space<vmem>>, %arg5: memref<1x8xf32, #tpu.memory_space<vmem>>, %arg6: memref<288x1xf32, #tpu.memory_space<vmem>>, %arg7: memref<4x8xbf16, #tpu.memory_space<vmem>>, %arg8: memref<2x288x8xf32, #tpu.memory_space<vmem>>, %arg9: memref<342x8xbf16, #tpu.memory_space<vmem>>) attributes {dimension_semantics = [#tpu.dimension_semantics<parallel>], iteration_bounds = array<i64: 1>, scalar_prefetch = 0 : i64, scratch_operands = 1 : i64, tpu.core_type = #tpu.core_type<tc>, window_params = [{transform_indices = @transform_0, window_bounds = array<i64: 1, 2, 342, 4>}, {pipeline_mode = #tpu.pipeline_mode<synchronous>, transform_indices = @transform_1, window_bounds = array<i64: 36, 8>}, {pipeline_mode = #tpu.pipeline_mode<synchronous>, transform_indices = @transform_2, window_bounds = array<i64: 72, 8>}, {pipeline_mode = #tpu.pipeline_mode<synchronous>, transform_indices = @transform_3, window_bounds = array<i64: 1, 8>}, {pipeline_mode = #tpu.pipeline_mode<synchronous>, transform_indices = @transform_4, window_bounds = array<i64: 1, 8>}, {pipeline_mode = #tpu.pipeline_mode<synchronous>, transform_indices = @transform_5, window_bounds = array<i64: 288, 1>}, {pipeline_mode = #tpu.pipeline_mode<synchronous>, transform_indices = @transform_6, window_bounds = array<i64: 4, 8>}, {transform_indices = @transform_7, window_bounds = array<i64: 2, 288, 8>}]} {
    %cst = arith.constant 0.000000e+00 : bf16
    %0 = vector.broadcast %cst : bf16 to vector<19x8xbf16>
    %c0 = arith.constant 0 : index
    %c0_0 = arith.constant 0 : index
    %1 = vector.load %arg9[%c0, %c0_0] : memref<342x8xbf16, #tpu.memory_space<vmem>>, vector<19x8xbf16>
    tpu.vector_store %arg9[%c0, %c0_0], %0 {strides = array<i32>} : memref<342x8xbf16, #tpu.memory_space<vmem>>, vector<19x8xbf16>,
    %cst_1 = arith.constant 0.000000e+00 : bf16
    %2 = vector.broadcast %cst_1 : bf16 to vector<35x8xbf16>
    %c307 = arith.constant 307 : index
    %c0_2 = arith.constant 0 : index
    %3 = vector.load %arg9[%c307, %c0_2] : memref<342x8xbf16, #tpu.memory_space<vmem>>, vector<35x8xbf16>
    tpu.vector_store %arg9[%c307, %c0_2], %2 {strides = array<i32>} : memref<342x8xbf16, #tpu.memory_space<vmem>>, vector<35x8xbf16>,
    %c0_3 = arith.constant 0 : index
    %c0_4 = arith.constant 0 : index
    %4 = vector.load %arg6[%c0_3, %c0_4] : memref<288x1xf32, #tpu.memory_space<vmem>>, vector<288x1xf32>
    %c0_5 = arith.constant 0 : index
    %c0_6 = arith.constant 0 : index
    %5 = vector.load %arg2[%c0_5, %c0_6] : memref<36x8xbf16, #tpu.memory_space<vmem>>, vector<36x8xbf16>
    %c0_7 = arith.constant 0 : index
    %c0_8 = arith.constant 0 : index
    %6 = vector.load %arg3[%c0_7, %c0_8] : memref<72x8xbf16, #tpu.memory_space<vmem>>, vector<72x8xbf16>
    %c0_9 = arith.constant 0 : index
    %c0_10 = arith.constant 0 : index
    %7 = vector.load %arg4[%c0_9, %c0_10] : memref<1x8xf32, #tpu.memory_space<vmem>>, vector<1x8xf32>
    %c0_11 = arith.constant 0 : index
    %c0_12 = arith.constant 0 : index
    %8 = vector.load %arg5[%c0_11, %c0_12] : memref<1x8xf32, #tpu.memory_space<vmem>>, vector<1x8xf32>
    %c0_13 = arith.constant 0 : index
    %c0_14 = arith.constant 0 : index
    %c0_15 = arith.constant 0 : index
    %c0_16 = arith.constant 0 : index
    %9 = vector.load %arg1[%c0_13, %c0_14, %c0_15, %c0_16] : memref<1x2x342x4xbf16, #tpu.memory_space<vmem>>, vector<1x1x288x4xbf16>
    %10 = vector.shape_cast %9 : vector<1x1x288x4xbf16> to vector<288x4xbf16>
    %c0_17 = arith.constant 0 : index
    %c0_18 = arith.constant 0 : index
    %c1 = arith.constant 1 : index
    %c0_19 = arith.constant 0 : index
    %11 = vector.load %arg1[%c0_17, %c0_18, %c1, %c0_19] : memref<1x2x342x4xbf16, #tpu.memory_space<vmem>>, vector<1x1x288x4xbf16>
    %12 = vector.shape_cast %11 : vector<1x1x288x4xbf16> to vector<288x4xbf16>
    %c0_20 = arith.constant 0 : index
    %c0_21 = arith.constant 0 : index
    %c2 = arith.constant 2 : index
    %c0_22 = arith.constant 0 : index
    %13 = vector.load %arg1[%c0_20, %c0_21, %c2, %c0_22] : memref<1x2x342x4xbf16, #tpu.memory_space<vmem>>, vector<1x1x288x4xbf16>
    %14 = vector.shape_cast %13 : vector<1x1x288x4xbf16> to vector<288x4xbf16>
    %c0_23 = arith.constant 0 : index
    %c0_24 = arith.constant 0 : index
    %c18 = arith.constant 18 : index
    %c0_25 = arith.constant 0 : index
    %15 = vector.load %arg1[%c0_23, %c0_24, %c18, %c0_25] : memref<1x2x342x4xbf16, #tpu.memory_space<vmem>>, vector<1x1x288x4xbf16>
    %16 = vector.shape_cast %15 : vector<1x1x288x4xbf16> to vector<288x4xbf16>
    %c0_26 = arith.constant 0 : index
    %c0_27 = arith.constant 0 : index
    %c19 = arith.constant 19 : index
    %c0_28 = arith.constant 0 : index
    %17 = vector.load %arg1[%c0_26, %c0_27, %c19, %c0_28] : memref<1x2x342x4xbf16, #tpu.memory_space<vmem>>, vector<1x1x288x4xbf16>
    %18 = vector.shape_cast %17 : vector<1x1x288x4xbf16> to vector<288x4xbf16>
    %c0_29 = arith.constant 0 : index
    %c0_30 = arith.constant 0 : index
    %c20 = arith.constant 20 : index
    %c0_31 = arith.constant 0 : index
    %19 = vector.load %arg1[%c0_29, %c0_30, %c20, %c0_31] : memref<1x2x342x4xbf16, #tpu.memory_space<vmem>>, vector<1x1x288x4xbf16>
    %20 = vector.shape_cast %19 : vector<1x1x288x4xbf16> to vector<288x4xbf16>
    %c0_32 = arith.constant 0 : index
    %c0_33 = arith.constant 0 : index
    %c36 = arith.constant 36 : index
    %c0_34 = arith.constant 0 : index
    %21 = vector.load %arg1[%c0_32, %c0_33, %c36, %c0_34] : memref<1x2x342x4xbf16, #tpu.memory_space<vmem>>, vector<1x1x288x4xbf16>
    %22 = vector.shape_cast %21 : vector<1x1x288x4xbf16> to vector<288x4xbf16>
    %c0_35 = arith.constant 0 : index
    %c0_36 = arith.constant 0 : index
    %c37 = arith.constant 37 : index
    %c0_37 = arith.constant 0 : index
    %23 = vector.load %arg1[%c0_35, %c0_36, %c37, %c0_37] : memref<1x2x342x4xbf16, #tpu.memory_space<vmem>>, vector<1x1x288x4xbf16>
    %24 = vector.shape_cast %23 : vector<1x1x288x4xbf16> to vector<288x4xbf16>
    %c0_38 = arith.constant 0 : index
    %c0_39 = arith.constant 0 : index
    %c38 = arith.constant 38 : index
    %c0_40 = arith.constant 0 : index
    %25 = vector.load %arg1[%c0_38, %c0_39, %c38, %c0_40] : memref<1x2x342x4xbf16, #tpu.memory_space<vmem>>, vector<1x1x288x4xbf16>
    %26 = vector.shape_cast %25 : vector<1x1x288x4xbf16> to vector<288x4xbf16>
    %27 = tpu.concatenate %10, %12, %14, %16, %18, %20, %22, %24, %26 in 1 : vector<288x4xbf16>, vector<288x4xbf16>, vector<288x4xbf16>, vector<288x4xbf16>, vector<288x4xbf16>, vector<288x4xbf16>, vector<288x4xbf16>, vector<288x4xbf16>, vector<288x4xbf16> -> vector<288x36xbf16>
    %cst_41 = arith.constant dense<0.000000e+00> : vector<288x8xf32>
    %28 = tpu.matmul %27, %5, %cst_41 {dimension_numbers = #tpu.dot_dimension_numbers<[1], [0], [0], [1], [0, 0, 1, 1], [], []>} : vector<288x36xbf16>, vector<36x8xbf16>, vector<288x8xf32> -> vector<288x8xf32>
    %29 = vector.broadcast %7 : vector<1x8xf32> to vector<288x8xf32>
    %30 = arith.addf %28, %29 : vector<288x8xf32>
    %cst_42 = arith.constant 0.000000e+00 : f32
    %31 = vector.broadcast %cst_42 : f32 to vector<288x8xf32>
    %32 = arith.maximumf %30, %31 : vector<288x8xf32>
    %33 = vector.broadcast %4 : vector<288x1xf32> to vector<288x8xf32>
    %34 = arith.mulf %32, %33 : vector<288x8xf32>
    %35 = arith.truncf %34 : vector<288x8xf32> to vector<288x8xbf16>
    %c19_43 = arith.constant 19 : index
    %c0_44 = arith.constant 0 : index
    %36 = vector.load %arg9[%c19_43, %c0_44] : memref<342x8xbf16, #tpu.memory_space<vmem>>, vector<288x8xbf16>
    tpu.vector_store %arg9[%c19_43, %c0_44], %35 {strides = array<i32>} : memref<342x8xbf16, #tpu.memory_space<vmem>>, vector<288x8xbf16>,
    %c0_45 = arith.constant 0 : index
    %c0_46 = arith.constant 0 : index
    %37 = vector.load %arg9[%c0_45, %c0_46] : memref<342x8xbf16, #tpu.memory_space<vmem>>, vector<288x8xbf16>
    %c1_47 = arith.constant 1 : index
    %c0_48 = arith.constant 0 : index
    %38 = vector.load %arg9[%c1_47, %c0_48] : memref<342x8xbf16, #tpu.memory_space<vmem>>, vector<288x8xbf16>
    %c2_49 = arith.constant 2 : index
    %c0_50 = arith.constant 0 : index
    %39 = vector.load %arg9[%c2_49, %c0_50] : memref<342x8xbf16, #tpu.memory_space<vmem>>, vector<288x8xbf16>
    %c18_51 = arith.constant 18 : index
    %c0_52 = arith.constant 0 : index
    %40 = vector.load %arg9[%c18_51, %c0_52] : memref<342x8xbf16, #tpu.memory_space<vmem>>, vector<288x8xbf16>
    %c19_53 = arith.constant 19 : index
    %c0_54 = arith.constant 0 : index
    %41 = vector.load %arg9[%c19_53, %c0_54] : memref<342x8xbf16, #tpu.memory_space<vmem>>, vector<288x8xbf16>
    %c20_55 = arith.constant 20 : index
    %c0_56 = arith.constant 0 : index
    %42 = vector.load %arg9[%c20_55, %c0_56] : memref<342x8xbf16, #tpu.memory_space<vmem>>, vector<288x8xbf16>
    %c36_57 = arith.constant 36 : index
    %c0_58 = arith.constant 0 : index
    %43 = vector.load %arg9[%c36_57, %c0_58] : memref<342x8xbf16, #tpu.memory_space<vmem>>, vector<288x8xbf16>
    %c37_59 = arith.constant 37 : index
    %c0_60 = arith.constant 0 : index
    %44 = vector.load %arg9[%c37_59, %c0_60] : memref<342x8xbf16, #tpu.memory_space<vmem>>, vector<288x8xbf16>
    %c38_61 = arith.constant 38 : index
    %c0_62 = arith.constant 0 : index
    %45 = vector.load %arg9[%c38_61, %c0_62] : memref<342x8xbf16, #tpu.memory_space<vmem>>, vector<288x8xbf16>
    %46 = tpu.concatenate %37, %38, %39, %40, %41, %42, %43, %44, %45 in 1 : vector<288x8xbf16>, vector<288x8xbf16>, vector<288x8xbf16>, vector<288x8xbf16>, vector<288x8xbf16>, vector<288x8xbf16>, vector<288x8xbf16>, vector<288x8xbf16>, vector<288x8xbf16> -> vector<288x72xbf16>
    %cst_63 = arith.constant dense<0.000000e+00> : vector<288x8xf32>
    %47 = tpu.matmul %46, %6, %cst_63 {dimension_numbers = #tpu.dot_dimension_numbers<[1], [0], [0], [1], [0, 0, 1, 1], [], []>} : vector<288x72xbf16>, vector<72x8xbf16>, vector<288x8xf32> -> vector<288x8xf32>
    %c0_64 = arith.constant 0 : index
    %c0_65 = arith.constant 0 : index
    %c19_66 = arith.constant 19 : index
    %c0_67 = arith.constant 0 : index
    %48 = vector.load %arg1[%c0_64, %c0_65, %c19_66, %c0_67] : memref<1x2x342x4xbf16, #tpu.memory_space<vmem>>, vector<1x1x288x4xbf16>
    %49 = vector.shape_cast %48 : vector<1x1x288x4xbf16> to vector<288x4xbf16>
    %c0_68 = arith.constant 0 : index
    %c0_69 = arith.constant 0 : index
    %50 = vector.load %arg7[%c0_68, %c0_69] : memref<4x8xbf16, #tpu.memory_space<vmem>>, vector<4x8xbf16>
    %cst_70 = arith.constant dense<0.000000e+00> : vector<288x8xf32>
    %51 = tpu.matmul %49, %50, %cst_70 {dimension_numbers = #tpu.dot_dimension_numbers<[1], [0], [0], [1], [0, 0, 1, 1], [], []>} : vector<288x4xbf16>, vector<4x8xbf16>, vector<288x8xf32> -> vector<288x8xf32>
    %52 = vector.broadcast %8 : vector<1x8xf32> to vector<288x8xf32>
    %53 = arith.addf %47, %52 : vector<288x8xf32>
    %54 = arith.addf %53, %51 : vector<288x8xf32>
    %cst_71 = arith.constant 0.000000e+00 : f32
    %55 = vector.broadcast %cst_71 : f32 to vector<288x8xf32>
    %56 = arith.maximumf %54, %55 : vector<288x8xf32>
    %c0_72 = arith.constant 0 : index
    %c0_73 = arith.constant 0 : index
    %c0_74 = arith.constant 0 : index
    %57 = vector.load %arg8[%c0_72, %c0_73, %c0_74] : memref<2x288x8xf32, #tpu.memory_space<vmem>>, vector<1x288x8xf32>
    %58 = vector.shape_cast %57 : vector<1x288x8xf32> to vector<288x8xf32>
    %59 = vector.shape_cast %56 : vector<288x8xf32> to vector<1x288x8xf32>
    tpu.vector_store %arg8[%c0_72, %c0_73, %c0_74], %59 {strides = array<i32>} : memref<2x288x8xf32, #tpu.memory_space<vmem>>, vector<1x288x8xf32>,
    %c0_75 = arith.constant 0 : index
    %c1_76 = arith.constant 1 : index
    %c0_77 = arith.constant 0 : index
    %c0_78 = arith.constant 0 : index
    %60 = vector.load %arg1[%c0_75, %c1_76, %c0_77, %c0_78] : memref<1x2x342x4xbf16, #tpu.memory_space<vmem>>, vector<1x1x288x4xbf16>
    %61 = vector.shape_cast %60 : vector<1x1x288x4xbf16> to vector<288x4xbf16>
    %c0_79 = arith.constant 0 : index
    %c1_80 = arith.constant 1 : index
    %c1_81 = arith.constant 1 : index
    %c0_82 = arith.constant 0 : index
    %62 = vector.load %arg1[%c0_79, %c1_80, %c1_81, %c0_82] : memref<1x2x342x4xbf16, #tpu.memory_space<vmem>>, vector<1x1x288x4xbf16>
    %63 = vector.shape_cast %62 : vector<1x1x288x4xbf16> to vector<288x4xbf16>
    %c0_83 = arith.constant 0 : index
    %c1_84 = arith.constant 1 : index
    %c2_85 = arith.constant 2 : index
    %c0_86 = arith.constant 0 : index
    %64 = vector.load %arg1[%c0_83, %c1_84, %c2_85, %c0_86] : memref<1x2x342x4xbf16, #tpu.memory_space<vmem>>, vector<1x1x288x4xbf16>
    %65 = vector.shape_cast %64 : vector<1x1x288x4xbf16> to vector<288x4xbf16>
    %c0_87 = arith.constant 0 : index
    %c1_88 = arith.constant 1 : index
    %c18_89 = arith.constant 18 : index
    %c0_90 = arith.constant 0 : index
    %66 = vector.load %arg1[%c0_87, %c1_88, %c18_89, %c0_90] : memref<1x2x342x4xbf16, #tpu.memory_space<vmem>>, vector<1x1x288x4xbf16>
    %67 = vector.shape_cast %66 : vector<1x1x288x4xbf16> to vector<288x4xbf16>
    %c0_91 = arith.constant 0 : index
    %c1_92 = arith.constant 1 : index
    %c19_93 = arith.constant 19 : index
    %c0_94 = arith.constant 0 : index
    %68 = vector.load %arg1[%c0_91, %c1_92, %c19_93, %c0_94] : memref<1x2x342x4xbf16, #tpu.memory_space<vmem>>, vector<1x1x288x4xbf16>
    %69 = vector.shape_cast %68 : vector<1x1x288x4xbf16> to vector<288x4xbf16>
    %c0_95 = arith.constant 0 : index
    %c1_96 = arith.constant 1 : index
    %c20_97 = arith.constant 20 : index
    %c0_98 = arith.constant 0 : index
    %70 = vector.load %arg1[%c0_95, %c1_96, %c20_97, %c0_98] : memref<1x2x342x4xbf16, #tpu.memory_space<vmem>>, vector<1x1x288x4xbf16>
    %71 = vector.shape_cast %70 : vector<1x1x288x4xbf16> to vector<288x4xbf16>
    %c0_99 = arith.constant 0 : index
    %c1_100 = arith.constant 1 : index
    %c36_101 = arith.constant 36 : index
    %c0_102 = arith.constant 0 : index
    %72 = vector.load %arg1[%c0_99, %c1_100, %c36_101, %c0_102] : memref<1x2x342x4xbf16, #tpu.memory_space<vmem>>, vector<1x1x288x4xbf16>
    %73 = vector.shape_cast %72 : vector<1x1x288x4xbf16> to vector<288x4xbf16>
    %c0_103 = arith.constant 0 : index
    %c1_104 = arith.constant 1 : index
    %c37_105 = arith.constant 37 : index
    %c0_106 = arith.constant 0 : index
    %74 = vector.load %arg1[%c0_103, %c1_104, %c37_105, %c0_106] : memref<1x2x342x4xbf16, #tpu.memory_space<vmem>>, vector<1x1x288x4xbf16>
    %75 = vector.shape_cast %74 : vector<1x1x288x4xbf16> to vector<288x4xbf16>
    %c0_107 = arith.constant 0 : index
    %c1_108 = arith.constant 1 : index
    %c38_109 = arith.constant 38 : index
    %c0_110 = arith.constant 0 : index
    %76 = vector.load %arg1[%c0_107, %c1_108, %c38_109, %c0_110] : memref<1x2x342x4xbf16, #tpu.memory_space<vmem>>, vector<1x1x288x4xbf16>
    %77 = vector.shape_cast %76 : vector<1x1x288x4xbf16> to vector<288x4xbf16>
    %78 = tpu.concatenate %61, %63, %65, %67, %69, %71, %73, %75, %77 in 1 : vector<288x4xbf16>, vector<288x4xbf16>, vector<288x4xbf16>, vector<288x4xbf16>, vector<288x4xbf16>, vector<288x4xbf16>, vector<288x4xbf16>, vector<288x4xbf16>, vector<288x4xbf16> -> vector<288x36xbf16>
    %cst_111 = arith.constant dense<0.000000e+00> : vector<288x8xf32>
    %79 = tpu.matmul %78, %5, %cst_111 {dimension_numbers = #tpu.dot_dimension_numbers<[1], [0], [0], [1], [0, 0, 1, 1], [], []>} : vector<288x36xbf16>, vector<36x8xbf16>, vector<288x8xf32> -> vector<288x8xf32>
    %80 = vector.broadcast %7 : vector<1x8xf32> to vector<288x8xf32>
    %81 = arith.addf %79, %80 : vector<288x8xf32>
    %cst_112 = arith.constant 0.000000e+00 : f32
    %82 = vector.broadcast %cst_112 : f32 to vector<288x8xf32>
    %83 = arith.maximumf %81, %82 : vector<288x8xf32>
    %84 = vector.broadcast %4 : vector<288x1xf32> to vector<288x8xf32>
    %85 = arith.mulf %83, %84 : vector<288x8xf32>
    %86 = arith.truncf %85 : vector<288x8xf32> to vector<288x8xbf16>
    %c19_113 = arith.constant 19 : index
    %c0_114 = arith.constant 0 : index
    %87 = vector.load %arg9[%c19_113, %c0_114] : memref<342x8xbf16, #tpu.memory_space<vmem>>, vector<288x8xbf16>
    tpu.vector_store %arg9[%c19_113, %c0_114], %86 {strides = array<i32>} : memref<342x8xbf16, #tpu.memory_space<vmem>>, vector<288x8xbf16>,
    %c0_115 = arith.constant 0 : index
    %c0_116 = arith.constant 0 : index
    %88 = vector.load %arg9[%c0_115, %c0_116] : memref<342x8xbf16, #tpu.memory_space<vmem>>, vector<288x8xbf16>
    %c1_117 = arith.constant 1 : index
    %c0_118 = arith.constant 0 : index
    %89 = vector.load %arg9[%c1_117, %c0_118] : memref<342x8xbf16, #tpu.memory_space<vmem>>, vector<288x8xbf16>
    %c2_119 = arith.constant 2 : index
    %c0_120 = arith.constant 0 : index
    %90 = vector.load %arg9[%c2_119, %c0_120] : memref<342x8xbf16, #tpu.memory_space<vmem>>, vector<288x8xbf16>
    %c18_121 = arith.constant 18 : index
    %c0_122 = arith.constant 0 : index
    %91 = vector.load %arg9[%c18_121, %c0_122] : memref<342x8xbf16, #tpu.memory_space<vmem>>, vector<288x8xbf16>
    %c19_123 = arith.constant 19 : index
    %c0_124 = arith.constant 0 : index
    %92 = vector.load %arg9[%c19_123, %c0_124] : memref<342x8xbf16, #tpu.memory_space<vmem>>, vector<288x8xbf16>
    %c20_125 = arith.constant 20 : index
    %c0_126 = arith.constant 0 : index
    %93 = vector.load %arg9[%c20_125, %c0_126] : memref<342x8xbf16, #tpu.memory_space<vmem>>, vector<288x8xbf16>
    %c36_127 = arith.constant 36 : index
    %c0_128 = arith.constant 0 : index
    %94 = vector.load %arg9[%c36_127, %c0_128] : memref<342x8xbf16, #tpu.memory_space<vmem>>, vector<288x8xbf16>
    %c37_129 = arith.constant 37 : index
    %c0_130 = arith.constant 0 : index
    %95 = vector.load %arg9[%c37_129, %c0_130] : memref<342x8xbf16, #tpu.memory_space<vmem>>, vector<288x8xbf16>
    %c38_131 = arith.constant 38 : index
    %c0_132 = arith.constant 0 : index
    %96 = vector.load %arg9[%c38_131, %c0_132] : memref<342x8xbf16, #tpu.memory_space<vmem>>, vector<288x8xbf16>
    %97 = tpu.concatenate %88, %89, %90, %91, %92, %93, %94, %95, %96 in 1 : vector<288x8xbf16>, vector<288x8xbf16>, vector<288x8xbf16>, vector<288x8xbf16>, vector<288x8xbf16>, vector<288x8xbf16>, vector<288x8xbf16>, vector<288x8xbf16>, vector<288x8xbf16> -> vector<288x72xbf16>
    %cst_133 = arith.constant dense<0.000000e+00> : vector<288x8xf32>
    %98 = tpu.matmul %97, %6, %cst_133 {dimension_numbers = #tpu.dot_dimension_numbers<[1], [0], [0], [1], [0, 0, 1, 1], [], []>} : vector<288x72xbf16>, vector<72x8xbf16>, vector<288x8xf32> -> vector<288x8xf32>
    %c0_134 = arith.constant 0 : index
    %c1_135 = arith.constant 1 : index
    %c19_136 = arith.constant 19 : index
    %c0_137 = arith.constant 0 : index
    %99 = vector.load %arg1[%c0_134, %c1_135, %c19_136, %c0_137] : memref<1x2x342x4xbf16, #tpu.memory_space<vmem>>, vector<1x1x288x4xbf16>
    %100 = vector.shape_cast %99 : vector<1x1x288x4xbf16> to vector<288x4xbf16>
    %c0_138 = arith.constant 0 : index
    %c0_139 = arith.constant 0 : index
    %101 = vector.load %arg7[%c0_138, %c0_139] : memref<4x8xbf16, #tpu.memory_space<vmem>>, vector<4x8xbf16>
    %cst_140 = arith.constant dense<0.000000e+00> : vector<288x8xf32>
    %102 = tpu.matmul %100, %101, %cst_140 {dimension_numbers = #tpu.dot_dimension_numbers<[1], [0], [0], [1], [0, 0, 1, 1], [], []>} : vector<288x4xbf16>, vector<4x8xbf16>, vector<288x8xf32> -> vector<288x8xf32>
    %103 = vector.broadcast %8 : vector<1x8xf32> to vector<288x8xf32>
    %104 = arith.addf %98, %103 : vector<288x8xf32>
    %105 = arith.addf %104, %102 : vector<288x8xf32>
    %cst_141 = arith.constant 0.000000e+00 : f32
    %106 = vector.broadcast %cst_141 : f32 to vector<288x8xf32>
    %107 = arith.maximumf %105, %106 : vector<288x8xf32>
    %c1_142 = arith.constant 1 : index
    %c0_143 = arith.constant 0 : index
    %c0_144 = arith.constant 0 : index
    %108 = vector.load %arg8[%c1_142, %c0_143, %c0_144] : memref<2x288x8xf32, #tpu.memory_space<vmem>>, vector<1x288x8xf32>
    %109 = vector.shape_cast %108 : vector<1x288x8xf32> to vector<288x8xf32>
    %110 = vector.shape_cast %107 : vector<288x8xf32> to vector<1x288x8xf32>
    tpu.vector_store %arg8[%c1_142, %c0_143, %c0_144], %110 {strides = array<i32>} : memref<2x288x8xf32, #tpu.memory_space<vmem>>, vector<1x288x8xf32>,
    return
  }
  func.func @transform_0(%arg0: i32) -> (i32, i32, i32, i32) {
    %c0_i32 = arith.constant 0 : i32
    %c0_i32_0 = arith.constant 0 : i32
    %c0_i32_1 = arith.constant 0 : i32
    %c0_i32_2 = arith.constant 0 : i32
    return %c0_i32, %arg0, %c0_i32_0, %c0_i32_1 : i32, i32, i32, i32
  }
  func.func @transform_1(%arg0: i32) -> (i32, i32) {
    %c0_i32 = arith.constant 0 : i32
    %c0_i32_0 = arith.constant 0 : i32
    %c0_i32_1 = arith.constant 0 : i32
    return %c0_i32, %c0_i32_0 : i32, i32
  }
  func.func @transform_2(%arg0: i32) -> (i32, i32) {
    %c0_i32 = arith.constant 0 : i32
    %c0_i32_0 = arith.constant 0 : i32
    %c0_i32_1 = arith.constant 0 : i32
    return %c0_i32, %c0_i32_0 : i32, i32
  }
  func.func @transform_3(%arg0: i32) -> (i32, i32) {
    %c0_i32 = arith.constant 0 : i32
    %c0_i32_0 = arith.constant 0 : i32
    %c0_i32_1 = arith.constant 0 : i32
    return %c0_i32, %c0_i32_0 : i32, i32
  }
  func.func @transform_4(%arg0: i32) -> (i32, i32) {
    %c0_i32 = arith.constant 0 : i32
    %c0_i32_0 = arith.constant 0 : i32
    %c0_i32_1 = arith.constant 0 : i32
    return %c0_i32, %c0_i32_0 : i32, i32
  }
  func.func @transform_5(%arg0: i32) -> (i32, i32) {
    %c0_i32 = arith.constant 0 : i32
    %c0_i32_0 = arith.constant 0 : i32
    %c0_i32_1 = arith.constant 0 : i32
    return %c0_i32, %c0_i32_0 : i32, i32
  }
  func.func @transform_6(%arg0: i32) -> (i32, i32) {
    %c0_i32 = arith.constant 0 : i32
    %c0_i32_0 = arith.constant 0 : i32
    %c0_i32_1 = arith.constant 0 : i32
    return %c0_i32, %c0_i32_0 : i32, i32
  }
  func.func @transform_7(%arg0: i32) -> (i32, i32, i32) {
    %c0_i32 = arith.constant 0 : i32
    %c0_i32_0 = arith.constant 0 : i32
    %c0_i32_1 = arith.constant 0 : i32
    return %arg0, %c0_i32, %c0_i32_0 : i32, i32, i32
  }
}

</mosaic_0001>

<bundles_post_ra>
// kernel: tpu_custom_call.1
= control target key start
LH: loop header
LB: loop body
LE: loop exit
PB: predicated region body
PF: predicated region fallthrough
CT: control target
= control target key end

     0   :  { %vm242_vm0 = vsmask.f32 7424  ;;  %s9740_s21 = smov 4   ;;  %vm16658_vm1 = vcmask 1046528   ;;  %vm16656_vm2 = vsmask.f32 6400  ;;  %s16526_s0 = inlined_call_operand.vmem [shape: bf16[1,2,342,4], index: 0, kind: input, shape index: {}]   ;;  %s16527_s1 = inlined_call_operand.vmem [shape: bf16[36,8], index: 1, kind: input, shape index: {}]   ;;  %s16528_s5 = inlined_call_operand.vmem [shape: f32[288,1], index: 5, kind: input, shape index: {}]   ;;  %s16529_s3 = inlined_call_operand.vmem [shape: f32[1,8], index: 3, kind: input, shape index: {}]   ;;  %s16530_s6 = inlined_call_operand.vmem [shape: bf16[4,8], index: 6, kind: input, shape index: {}]   ;;  %s16531_s2 = inlined_call_operand.vmem [shape: bf16[72,8], index: 2, kind: input, shape index: {}]   ;;  %s16532_s4 = inlined_call_operand.vmem [shape: f32[1,8], index: 4, kind: input, shape index: {}]   ;;  %s16533_s7 = inlined_call_operand.vmem [shape: f32[2,288,8], index: 7, kind: output, shape index: {}]  }
   0x1   :  { %v103_v0 = vld [vmem:[%s16526_s0 + $0x10] sm:$0xf]  ;;  %v104_v1 = vld [vmem:[%s16526_s0 + $0x14] sm:$0xf]  ;;  %v9804_v3 = vld [vmem:[%s16526_s0 + $0x18] sm:$0xff]   ;;  %s9741_s28 = smov 8  }
   0x2   :  { %v9799_v2 = vcombine.low %v103_v0, %v104_v1  ;;  %v99_v4 = vld [vmem:[%s16526_s0] sm:$0xf]  ;;  %v9812_v5 = vld [vmem:[%s16526_s0 + $0x4] sm:$0xf]  ;;  %v101_v6 = vld [vmem:[%s16526_s0 + $0x8] sm:$0xf] }
   0x3   :  { %v9820_v7 = vld [vmem:[%s16526_s0 + $0xc] sm:$0xf]  ;;  %v9825_v10 = vshll.u32 %v9804_v3, 16  ;;  %v9828_v11 = vcombine.low %v99_v4, %v9812_v5  ;;  %v9833_v12 = vld [vmem:[%s16526_s0 + $0x20] sm:$0xff]   ;;  %v9839_v14 = vshrl.u32 %v9804_v3, 16  ;;  %v9859_v23 = vld [vmem:[%s16526_s0 + $0x30] sm:$0xff]  }
   0x4   :  { %v16534_v8 = vshll.u32 %v9799_v2, 16  ;;  %v16535_v9 = vshrl.u32 %v9799_v2, 16  ;;  %v9836_v13 = vcombine.low %v101_v6, %v9820_v7  ;;  %v9844_v15 = vld [vmem:[%s16526_s0 + $0x28] sm:$0xff]   ;;  %v9853_v21 = vshll.u32 %v9833_v12, 16  ;;  %v9884_v38 = vld [vmem:[%s16526_s0 + $0x38] sm:$0xff]   ;;  %v9889_v39 = vld [vmem:[%s16526_s0 + $0x40] sm:$0xff]  }
   0x5   :  { %16679 = vst [vmem:[#allocation3_spill] sm:$0xff] %v9828_v11  ;;  %v269_v17 = vrot.slane %v9825_v10, 1  ;;  %v244_v18 = vshrl.u32 %v9828_v11, 16  ;;  %v246_v19 = vshll.u32 %v9828_v11, 16  ;;  %v9865_v27 = vshll.u32 %v9844_v15, 16  ;;  %v9908_v47 = vld [vmem:[%s16526_s0 + $0x48] sm:$0xff]  }
   0x6   :  { %16680 = vst [vmem:[#allocation4_spill] sm:$0xff] %v9836_v13  ;;  %v261_v16 = vrot.slane %v16534_v8, 1  ;;  %v251_v20 = vshll.u32 %v9836_v13, 16  ;;  %v255_v22 = vshrl.u32 %v9836_v13, 16  ;;  %v277_v29 = vrot.slane %v9853_v21, 1  ;;  %v9913_v48 = vld [vmem:[%s16526_s0 + $0x50] sm:$0xff]  }
   0x7   :  { %v248_v25 = vrot.slane %v246_v19, 1  ;;  %v273_v26 = vor.u32 %v9839_v14, %v269_v17  ;;  %v9869_v30 = vshrl.u32 %v9844_v15, 16  ;;  %v9872_v31 = vshll.u32 %v9859_v23, 16  ;;  %16681 = vst [vmem:[#allocation5_spill] sm:$0xff] %v9913_v48  ;;  %v9918_v49 = vld [vmem:[%s16526_s0 + $0x58] sm:$0xff]   ;;  %v9927_v52 = vld [vmem:[%s16526_s0 + $0x60] sm:$0xff]  }
   0x8   :  { %v265_v24 = vor.u32 %v16535_v9, %v261_v16  ;;  %v253_v28 = vrot.slane %v251_v20, 1  ;;  %v285_v34 = vrot.slane %v9865_v27, 1  ;;  %v9877_v35 = vshrl.u32 %v9833_v12, 16  ;;  %16682 = vst [vmem:[#allocation6_spill] sm:$0xff] %v9918_v49  ;;  %16683 = vst [vmem:[#allocation7_spill] sm:$0xff] %v9927_v52  ;;  %v9952_v63 = vld [vmem:[%s16526_s0 + $0x68] sm:$0xff]  }
   0x9   :  { %v249_v33 = vor.u32 %v248_v25, %v244_v18  ;;  %v293_v37 = vrot.slane %v9872_v31, 1  ;;  %v278_v41 = vsel %vm242_vm0, %v273_v26, %v277_v29  ;;  %v9897_v44 = vshll.u32 %v9884_v38, 16  ;;  %16684 = vst [vmem:[#allocation8_spill] sm:$0xff] %v9952_v63  ;;  %s9742_s29 = smov 12   ;;  %s9743_s11 = smov 16  }
   0xa   :  { %v270_v32 = vsel %vm242_vm0, %v265_v24, %v269_v17  ;;  %v257_v36 = vor.u32 %v255_v22, %v253_v28  ;;  %v289_v42 = vor.u32 %v9869_v30, %v285_v34  ;;  %v281_v43 = vor.u32 %v9877_v35, %v277_v29  ;;  %v9981_v24 = vld [vmem:[%s16526_s0 + $0x78] sm:$0xff]   ;;  %s9744_s16 = smov 20   ;;  %s9745_s22 = smov 24  }
   0xb   :  { %395 = vrot.lane.b32.xlu1 %v270_v32, %s9740_s21  ;;  %v254_v40 = vsel %vm242_vm0, %v249_v33, %v253_v28  ;;  %v9900_v45 = vshrl.u32 %v9884_v38, 16  ;;  %v9903_v46 = vshll.u32 %v9889_v39, 16  ;;  %v9922_v51 = vshrl.u32 %v9859_v23, 16  ;;  %16686 = vst [vmem:[#allocation10_spill] sm:$0xff] %v9981_v24  ;;  %s9746_s27 = smov 28   ;;  %s9748_s8 = smov 32  }
   0xc   :  { %391 = vrot.lane.b32.xlu0 %v254_v40, %s9740_s21  ;;  %v262_v50 = vsel %vm242_vm0, %v257_v36, %v261_v16  ;;  %v294_v53 = vsel %vm242_vm0, %v289_v42, %v293_v37  ;;  %v301_v54 = vrot.slane %v9897_v44, 1  ;;  %v9933_v55 = vshll.u32 %v9908_v47, 16  ;;  %v9968_v16 = vld [vmem:[%s16526_s0 + $0x70] sm:$0xff]   ;;  %v10002_v40 = vld [vmem:[%s16526_s0 + $0x80] sm:$0xff]   ;;  %v10010_v42 = vld [vmem:[%s16526_s0 + $0x88] sm:$0xff]   ;;  %s9749_s10 = smov 40  }
   0xd   :  { %v309_v56 = vrot.slane %v9903_v46, 1  ;;  %v9937_v57 = vshrl.u32 %v9908_v47, 16  ;;  %v9940_v58 = vshll.u32 %v9913_v48, 16  ;;  %v9943_v59 = vshll.u32 %v9918_v49, 16  ;;  %16685 = vst [vmem:[#allocation9_spill] sm:$0xff] %v9968_v16  ;;  %16687 = vst [vmem:[#allocation11_spill] sm:$0xff] %v10002_v40 }
   0xe   :  { %v286_v60 = vsel %vm242_vm0, %v281_v43, %v285_v34  ;;  %v305_v61 = vor.u32 %v9900_v45, %v301_v54  ;;  %v317_v62 = vrot.slane %v9933_v55, 1  ;;  %v297_v0 = vor.u32 %v9922_v51, %v293_v37  ;;  %s9750_s12 = smov 48   ;;  %s9751_s26 = smov 56  }
   0xf   :  { %397 = vrot.lane.b32.xlu1 %v278_v41, %s9740_s21  ;;  %v9956_v1 = vshrl.u32 %v9889_v39, 16  ;;  %v9959_v4 = vshrl.u32 %v9918_v49, 16  ;;  %v9962_v6 = vshll.u32 %v9927_v52, 16  ;;  %v9971_v17 = vshll.u32 %v9952_v63, 16  ;;  %s9752_s15 = smov 64  }
  0x10   :  { %393 = vrot.lane.b32.xlu0 %v262_v50, %s9740_s21  ;;  %v310_v18 = vsel %vm242_vm0, %v305_v61, %v309_v56  ;;  %v321_v19 = vor.u32 %v9937_v57, %v317_v62  ;;  %v325_v20 = vrot.slane %v9940_v58, 1  ;;  %v333_v22 = vrot.slane %v9943_v59, 1 }
  0x11   :  { %v302_v25 = vsel %vm242_vm0, %v297_v0, %v301_v54  ;;  %v313_v26 = vor.u32 %v9956_v1, %v309_v56  ;;  %v9986_v28 = vshrl.u32 %v9913_v48, 16  ;;  %v349_v29 = vrot.slane %v9971_v17, 1 }
  0x12   :  { %v9991_v32 = vshrl.u32 %v9952_v63, 16  ;;  %v9994_v33 = vshll.u32 %v9968_v16, 16  ;;  %v326_v34 = vsel %vm242_vm0, %v321_v19, %v325_v20  ;;  %v337_v36 = vor.u32 %v9959_v4, %v333_v22 }
  0x13   :  { %401 = vrot.lane.b32.xlu1 %v294_v53, %s9740_s21  ;;  %v341_v37 = vrot.slane %v9962_v6, 1  ;;  %v10005_v41 = vshll.u32 %v9981_v24, 16  ;;  %v318_v43 = vsel %vm242_vm0, %v313_v26, %v317_v62  ;;  %v329_v50 = vor.u32 %v9986_v28, %v325_v20 }
  0x14   :  { %399 = vrot.lane.b32.xlu0 %v286_v60, %s9740_s21  ;;  %v10016_v53 = vshrl.u32 %v9927_v52, 16  ;;  %v353_v54 = vor.u32 %v9991_v32, %v349_v29  ;;  %v357_v56 = vrot.slane %v9994_v33, 1  ;;  %v10022_v60 = vshrl.u32 %v9981_v24, 16 }
  0x15   :  { %16688 = vst [vmem:[#allocation12_spill] sm:$0xff] %v10005_v41  ;;  %v342_v61 = vsel %vm242_vm0, %v337_v36, %v341_v37  ;;  %v365_v0 = vrot.slane %v10005_v41, 1  ;;  %v10027_v62 = vshll.u32 %v10002_v40, 16  ;;  %v10035_v19 = vshll.u32 %v10010_v42, 16 }
  0x16   :  { %v334_v20 = vsel %vm242_vm0, %v329_v50, %v333_v22  ;;  %v10041_v26 = vshrl.u32 %v9968_v16, 16  ;;  %v10046_v36 = vshrl.u32 %v10010_v42, 16  ;;  %v432_v41 = vrot.slane %v9836_v13, 1 }
  0x17   :  { %405 = vrot.lane.b32.xlu1 %v310_v18, %s9740_s21  ;;  %16689 = vst [vmem:[#allocation13_spill] sm:$0xff] %v10027_v62  ;;  %v10032_v18 = vld [vmem:[%s16526_s0 + $0x90] ss:$0 sps:$4 sm:$0x11]   ;;  %16690 = vst [vmem:[#allocation14_spill] sm:$0xff] %v10035_v19  ;;  %v369_v8 = vor.u32 %v10022_v60, %v365_v0  ;;  %v373_v9 = vrot.slane %v10027_v62, 1 }
  0x18   :  { %403 = vrot.lane.b32.xlu0 %v302_v25, %s9740_s21  ;;  %v345_v25 = vor.u32 %v10016_v53, %v341_v37  ;;  %16691 = vst [vmem:[#allocation15_spill] sm:$0xff] %v10046_v36  ;;  %v387_v22 = vshll.u32 %v10032_v18, 16  ;;  %v361_v50 = vor.u32 %v10041_v26, %v357_v56  ;;  %vm690_vm3 = vcmask 1045504  }
  0x19   :  { %v374_v11 = vsel %vm242_vm0, %v369_v8, %v373_v9  ;;  %v16692_v8 = vshrl.u32 %v9799_v2, 16  ;;  %vm820_vm4 = vsmask.f32 5376  ;;  %vm16562_vm5 = vcmask 1041408  }
  0x1a   :  { %v350_v37 = vsel %vm242_vm0, %v345_v25, %v349_v29  ;;  %v389_v62 = vrot.slane %v387_v22, 1  ;;  %v137_v29 = vld [vmem:[%s16526_s0 + $0x8] sm:$0xe]  ;;  %vm16660_vm6 = vcmask 1044480   ;;  %vm16655_vm7 = vcmask 60416  }
  0x1b   :  { %409 = vrot.lane.b32.xlu1 %v326_v34, %s9740_s21  ;;  %v358_v34 = vsel %vm242_vm0, %v353_v54, %v357_v56  ;;  %v136_v54 = vld [vmem:[%s16526_s0] sm:$0xe]  ;;  %v366_v56 = vsel %vm242_vm0, %v361_v50, %v365_v0  ;;  %v569_v22 = vrot.slane %v16692_v8, 1  ;;  %v16693_v0 = vshll.u32 %v9799_v2, 16 }
  0x1c   :  { %407 = vrot.lane.b32.xlu0 %v318_v43, %s9740_s21  ;;  %v381_v43 = vrot.slane %v10035_v19, 1  ;;  %v8588_v25 = vcombine.low %v136_v54, %v9812_v5  ;;  %vm16564_vm8 = vcmask 31744   ;;  %vm16563_vm9 = vcmask 64512  }
  0x1d   :  { %vm16565_vm10 = vcmask 97280   ;;  %vm1135_vm11 = vcmask 130048   ;;  %vm16567_vm12 = vcmask 162816   ;;  %vm16566_vm13 = vcmask 195584  }
  0x1e   :  { %v385_v19 = vor.u32 %v10046_v36, %v381_v43  ;;  %v431_v54 = vrot.slane %v8588_v25, 1  ;;  %v440_v25 = vrot.slane %v9844_v15, 1  ;;  %vm16568_vm14 = vcmask 228352  }
  0x1f   :  { %413 = vrot.lane.b32.xlu1 %v342_v61, %s9740_s21  ;;  %v10056_v61 = vshrl.u32 %v10002_v40, 16  ;;  %vm1283_vm15 = vcmask 261120  }
  0x20   :  { %411 = vrot.lane.b32.xlu0 %v334_v20, %s9740_s21  ;;  %v390_v36 = vsel %vm242_vm0, %v385_v19, %v389_v62  ;;  %v436_v62 = vrot.slane %v9804_v3, 1  ;;  %v438_v19 = vrot.slane %v9833_v12, 1 }
  0x21   :  { %v377_v20 = vor.u32 %v10056_v61, %v373_v9  ;;  %v570_v9 = vrot.slane %v16693_v0, 2 }
  0x23   :  { %417 = vrot.lane.b32.xlu1 %v358_v34, %s9740_s21  ;;  %v10073_v34 = vcombine.low %v137_v29, %v9820_v7  ;;  %v382_v50 = vsel %vm242_vm0, %v377_v20, %v381_v43  ;;  %v10088_v29 = vor.u32 %v570_v9, %v569_v22  ;;  %v433_v43 = vsel %vm16658_vm1, %v431_v54, %v432_v41 }
  0x24   :  { %415 = vrot.lane.b32.xlu0 %v350_v37, %s9740_s21  ;;  %v10080_v37 = vrot.slane %v9799_v2, 1  ;;  %v439_v20 = vsel %vm16658_vm1, %v436_v62, %v438_v19  ;;  %v442_v22 = vrot.slane %v9859_v23, 1  ;;  %v448_v54 = vrot.slane %v9908_v47, 1 }
  0x25   :  { %v562_v5 = vshrl.u32 %v10073_v34, 16 }
  0x26   :  { %v437_v9 = vsel %vm16658_vm1, %v10080_v37, %v436_v62  ;;  %v450_v62 = vrot.slane %v9913_v48, 1  ;;  %v456_v48 = vrot.slane %v9952_v63, 1 }
  0x27   :  { %421 = vrot.lane.b32.xlu1 %v374_v11, %s9740_s21  ;;  %v565_v11 = vshll.u32 %v10073_v34, 16  ;;  %v564_v8 = vrot.slane %v562_v5, 1  ;;  %v444_v5 = vrot.slane %v9884_v38, 1 }
  0x28   :  { %419 = vrot.lane.b32.xlu0 %v366_v56, %s9740_s21  ;;  %v435_v56 = vsel %vm16658_vm1, %v432_v41, %v10080_v37  ;;  %v443_v41 = vsel %vm16658_vm1, %v440_v25, %v442_v22 }
  0x29   :  { %v567_v0 = vrot.slane %v565_v11, 2  ;;  %v441_v11 = vsel %vm16658_vm1, %v438_v19, %v440_v25  ;;  %v454_v19 = vrot.slane %v9927_v52, 1 }
  0x2b   :  { %425 = vrot.lane.b32.xlu1 %v390_v36, %s9740_s21  ;;  %v568_v13 = vor.u32 %v567_v0, %v564_v8  ;;  %v445_v8 = vsel %vm16658_vm1, %v442_v22, %v444_v5  ;;  %v451_v0 = vsel %vm16658_vm1, %v448_v54, %v450_v62  ;;  %v458_v22 = vrot.slane %v9968_v16, 1 }
  0x2c   :  { %423 = vrot.lane.b32.xlu0 %v382_v50, %s9740_s21  ;;  %v457_v63 = vsel %vm16658_vm1, %v454_v19, %v456_v48  ;;  %v466_v16 = vrot.slane %v10032_v18, 1 }
  0x2d   :  { %v10100_v36 = vsel %vm16656_vm2, %v568_v13, %v10088_v29  ;;  %v446_v13 = vrot.slane %v9889_v39, 1  ;;  %v459_v52 = vsel %vm16658_vm1, %v456_v48, %v458_v22 }
  0x2f   :  { %470 = vrot.lane.b32.xlu1 %v435_v56, %s9741_s28  ;;  %v447_v50 = vsel %vm16658_vm1, %v444_v5, %v446_v13  ;;  %v452_v56 = vrot.slane %v9918_v49, 1  ;;  %v460_v49 = vrot.slane %v9981_v24, 1 }
  0x30   :  { %468 = vrot.lane.b32.xlu0 %v433_v43, %s9741_s28  ;;  %v449_v43 = vsel %vm16658_vm1, %v446_v13, %v448_v54  ;;  %v462_v13 = vrot.slane %v10002_v40, 1  ;;  %v464_v54 = vrot.slane %v10010_v42, 1 }
  0x31   :  { %v455_v25 = vsel %vm16658_vm1, %v452_v56, %v454_v19  ;;  %v453_v5 = vsel %vm16658_vm1, %v450_v62, %v452_v56  ;;  %v515_v62 = vrot.slane %v10073_v34, 1  ;;  %v461_v24 = vsel %vm16658_vm1, %v458_v22, %v460_v49 }
  0x32   :  { %v463_v56 = vsel %vm16658_vm1, %v460_v49, %v462_v13  ;;  %v467_v40 = vsel %vm16658_vm1, %v464_v54, %v466_v16  ;;  %v465_v48 = vsel %vm16658_vm1, %v462_v13, %v464_v54  ;;  %v10167_v49 = vld [vmem:[%s16526_s0 + $0x90] sm:$0xff]   ;;  %v9533_v16 = vld [vmem:[%s16526_s0 + $0x98] ss:$0 sps:$4 sm:$0x11]   ;;  %v586_v19 = vrot.slane %v9872_v31, 2 }
  0x33   :  { %474 = vrot.lane.b32.xlu1 %v439_v20, %s9741_s28  ;;  %v516_v18 = vsel %vm16658_vm1, %v515_v62, %v10080_v37  ;;  %v519_v34 = vrot.slane %v9533_v16, 1  ;;  %v573_v37 = vrot.slane %v9839_v14, 1  ;;  %v589_v22 = vrot.slane %v9900_v45, 1 }
  0x34   :  { %472 = vrot.lane.b32.xlu0 %v437_v9, %s9741_s28 }
  0x37   :  { %478 = vrot.lane.b32.xlu1 %v443_v41, %s9741_s28 }
  0x38   :  { %476 = vrot.lane.b32.xlu0 %v441_v11, %s9741_s28 }
  0x3b   :  { %482 = vrot.lane.b32.xlu1 %v447_v50, %s9741_s28 }
  0x3c   :  { %480 = vrot.lane.b32.xlu0 %v445_v8, %s9741_s28 }
  0x3f   :  { %486 = vrot.lane.b32.xlu1 %v451_v0, %s9741_s28 }
  0x40   :  { %484 = vrot.lane.b32.xlu0 %v449_v43, %s9741_s28 }
  0x43   :  { %490 = vrot.lane.b32.xlu1 %v455_v25, %s9741_s28 }
  0x44   :  { %488 = vrot.lane.b32.xlu0 %v453_v5, %s9741_s28 }
  0x47   :  { %494 = vrot.lane.b32.xlu1 %v459_v52, %s9741_s28 }
  0x48   :  { %492 = vrot.lane.b32.xlu0 %v457_v63, %s9741_s28 }
  0x4b   :  { %498 = vrot.lane.b32.xlu1 %v463_v56, %s9741_s28 }
  0x4c   :  { %496 = vrot.lane.b32.xlu0 %v461_v24, %s9741_s28 }
  0x4f   :  { %502 = vrot.lane.b32.xlu1 %v467_v40, %s9741_s28  ;;  %v517_v40 = vrot.slane %v10167_v49, 1 }
  0x50   :  { %500 = vrot.lane.b32.xlu0 %v465_v48, %s9741_s28 }
  0x53   :  { %523 = vrot.lane.b32.xlu1 %v437_v9, %s9742_s29 }
  0x54   :  { %521 = vrot.lane.b32.xlu0 %v516_v18, %s9742_s29  ;;  %v598_v18 = vrot.slane %v9933_v55, 2 }
  0x57   :  { %527 = vrot.lane.b32.xlu1 %v441_v11, %s9742_s29  ;;  %v578_v11 = vrot.slane %v9853_v21, 2 }
  0x58   :  { %525 = vrot.lane.b32.xlu0 %v439_v20, %s9742_s29  ;;  %v520_v20 = vsel %vm16658_vm1, %v517_v40, %v519_v34  ;;  %v601_v34 = vrot.slane %v9986_v28, 1 }
  0x5b   :  { %531 = vrot.lane.b32.xlu1 %v445_v8, %s9742_s29  ;;  %v518_v8 = vsel %vm16658_vm1, %v464_v54, %v517_v40  ;;  %v593_v54 = vrot.slane %v9956_v1, 1 }
  0x5c   :  { %529 = vrot.lane.b32.xlu0 %v443_v41, %s9742_s29  ;;  %v577_v41 = vrot.slane %v9877_v35, 1 }
  0x5f   :  { %535 = vrot.lane.b32.xlu1 %v449_v43, %s9742_s29  ;;  %v579_v43 = vor.u32 %v578_v11, %v577_v41  ;;  %v605_v41 = vrot.slane %v9959_v4, 1  ;;  %v606_v11 = vrot.slane %v9943_v59, 2 }
  0x60   :  { %533 = vrot.lane.b32.xlu0 %v447_v50, %s9742_s29  ;;  %v582_v50 = vrot.slane %v9865_v27, 2 }
  0x63   :  { %539 = vrot.lane.b32.xlu1 %v453_v5, %s9742_s29  ;;  %v590_v5 = vrot.slane %v9897_v44, 2 }
  0x64   :  { %537 = vrot.lane.b32.xlu0 %v451_v0, %s9742_s29  ;;  %v585_v0 = vrot.slane %v9922_v51, 1 }
  0x66   :  { %v587_v13 = vor.u32 %v586_v19, %v585_v0  ;;  %v614_v0 = vrot.slane %v9971_v17, 2 }
  0x67   :  { %543 = vrot.lane.b32.xlu1 %v457_v63, %s9742_s29  ;;  %v574_v63 = vrot.slane %v9825_v10, 2 }
  0x68   :  { %541 = vrot.lane.b32.xlu0 %v455_v25, %s9742_s29 }
  0x69   :  { %v575_v9 = vor.u32 %v574_v63, %v573_v37  ;;  %v602_v37 = vrot.slane %v9940_v58, 2 }
  0x6b   :  { %547 = vrot.lane.b32.xlu1 %v461_v24, %s9742_s29  ;;  %v581_v24 = vrot.slane %v9869_v30, 1  ;;  %v580_v16 = vsel %vm16656_vm2, %v575_v9, %v579_v43 }
  0x6c   :  { %545 = vrot.lane.b32.xlu0 %v459_v52, %s9742_s29  ;;  %v576_v52 = vsel %vm16656_vm2, %v10088_v29, %v575_v9  ;;  %v594_v29 = vrot.slane %v9903_v46, 2 }
  0x6d   :  { %v583_v25 = vor.u32 %v582_v50, %v581_v24  ;;  %v609_v50 = vrot.slane %v10016_v53, 1 }
  0x6e   :  { %v595_v40 = vor.u32 %v594_v29, %v593_v54  ;;  %v618_v54 = vrot.slane %v9994_v33, 2 }
  0x6f   :  { %551 = vrot.lane.b32.xlu1 %v465_v48, %s9742_s29  ;;  %v584_v62 = vsel %vm16656_vm2, %v579_v43, %v583_v25  ;;  %v597_v48 = vrot.slane %v9937_v57, 1  ;;  %v603_v43 = vor.u32 %v602_v37, %v601_v34 }
  0x70   :  { %549 = vrot.lane.b32.xlu0 %v463_v56, %s9742_s29  ;;  %v591_v56 = vor.u32 %v590_v5, %v589_v22  ;;  %v607_v22 = vor.u32 %v606_v11, %v605_v41  ;;  %v625_v11 = vrot.slane %v10056_v61, 1 }
  0x72   :  { %v592_v63 = vsel %vm16656_vm2, %v587_v13, %v591_v56  ;;  %v608_v37 = vsel %vm16656_vm2, %v603_v43, %v607_v22 }
  0x73   :  { %555 = vrot.lane.b32.xlu1 %v520_v20, %s9742_s29  ;;  %v599_v20 = vor.u32 %v598_v18, %v597_v48  ;;  %v621_v18 = vrot.slane %v10022_v60, 1 }
  0x74   :  { %553 = vrot.lane.b32.xlu0 %v518_v8, %s9742_s29  ;;  %v610_v8 = vrot.slane %v9962_v6, 2 }
  0x75   :  { %v600_v19 = vsel %vm16656_vm2, %v595_v40, %v599_v20 }
  0x77   :  { %653 = vrot.lane.b32.xlu1 %v576_v52, %s9743_s11  ;;  %v613_v52 = vrot.slane %v9991_v32, 1 }
  0x78   :  { %651 = vrot.lane.b32.xlu0 %v10100_v36, %s9743_s11  ;;  %v588_v36 = vsel %vm16656_vm2, %v583_v25, %v587_v13  ;;  %v596_v25 = vsel %vm16656_vm2, %v591_v56, %v595_v40  ;;  %v617_v13 = vrot.slane %v10041_v26, 1  ;;  %v10236_v56 = vld [vmem:[%s16526_s0 + $0x98] ss:$0 sps:$4 sm:$0x33]  }
  0x79   :  { %v615_v48 = vor.u32 %v614_v0, %v613_v52 }
  0x7a   :  { %v619_v41 = vor.u32 %v618_v54, %v617_v13  ;;  %v646_v13 = vshll.u32 %v10236_v56, 16 }
  0x7b   :  { %657 = vrot.lane.b32.xlu1 %v584_v62, %s9743_s11  ;;  %v611_v62 = vor.u32 %v610_v8, %v609_v50 }
  0x7c   :  { %655 = vrot.lane.b32.xlu0 %v580_v16, %s9743_s11  ;;  %v16698_v16 = vld [vmem:[#allocation12_spill] sm:$0xff] }
  0x7d   :  { %v10210_v24 = vpop.permute.xlu1 %395  ;;  %v622_v34 = vrot.slane %v16698_v16, 2  ;;  %v616_v52 = vsel %vm16656_vm2, %v611_v62, %v615_v48 }
  0x7e   :  { %16694 = vst [vmem:[#allocation16_spill] sm:$0xff] %v10210_v24  ;;  %v10213_v9 = vpop.permute.xlu0 %391  ;;  %v16703_v24 = vld [vmem:[#allocation14_spill] sm:$0xff] }
  0x7f   :  { %16695 = vst [vmem:[#allocation17_spill] sm:$0xff] %v10213_v9  ;;  %661 = vrot.lane.b32.xlu1 %v592_v63, %s9743_s11  ;;  %v604_v63 = vsel %vm16656_vm2, %v599_v20, %v603_v43  ;;  %v623_v0 = vor.u32 %v622_v34, %v621_v18  ;;  %v643_v43 = vshrl.u32 %v10236_v56, 16  ;;  %v16705_v20 = vshrl.u32 %v10167_v49, 16 }
  0x80   :  { %659 = vrot.lane.b32.xlu0 %v588_v36, %s9743_s11  ;;  %v16700_v36 = vld [vmem:[#allocation13_spill] sm:$0xff] }
  0x81   :  { %v10222_v5 = vpop.permute.xlu1 %397  ;;  %v626_v50 = vrot.slane %v16700_v36, 2  ;;  %v624_v18 = vsel %vm16656_vm2, %v619_v41, %v623_v0  ;;  %v636_v9 = vrot.slane %v16705_v20, 1 }
  0x82   :  { %16696 = vst [vmem:[#allocation18_spill] sm:$0xff] %v10222_v5  ;;  %v10227_v29 = vpop.permute.xlu0 %393 }
  0x83   :  { %16697 = vst [vmem:[#allocation19_spill] sm:$0xff] %v10227_v29  ;;  %665 = vrot.lane.b32.xlu1 %v600_v19, %s9743_s11  ;;  %v16702_v19 = vld [vmem:[#allocation15_spill] sm:$0xff]  ;;  %v627_v34 = vor.u32 %v626_v50, %v625_v11  ;;  %v16706_v29 = vshll.u32 %v10167_v49, 16 }
  0x84   :  { %663 = vrot.lane.b32.xlu0 %v596_v25, %s9743_s11  ;;  %v629_v5 = vrot.slane %v16702_v19, 1  ;;  %v630_v25 = vrot.slane %v16703_v24, 2  ;;  %v645_v19 = vrot.slane %v643_v43, 1  ;;  %v692_v43 = vrot.slane %v9799_v2, 2 }
  0x85   :  { %v10239_v40 = vpop.permute.xlu1 %401  ;;  %v639_v24 = vrot.slane %v16706_v29, 2 }
  0x86   :  { %16699 = vst [vmem:[#allocation12_spill] sm:$0xff] %v10239_v40  ;;  %v10244_v8 = vpop.permute.xlu0 %399  ;;  %v631_v40 = vor.u32 %v630_v25, %v629_v5  ;;  %v142_v5 = vld [vmem:[%s16526_s0 + $0x8] sm:$0xc]  ;;  %v628_v25 = vsel %vm16656_vm2, %v623_v0, %v627_v34 }
  0x87   :  { %16701 = vst [vmem:[#allocation13_spill] sm:$0xff] %v10244_v8  ;;  %669 = vrot.lane.b32.xlu1 %v608_v37, %s9743_s11  ;;  %v612_v37 = vsel %vm16656_vm2, %v607_v22, %v611_v62  ;;  %v620_v22 = vsel %vm16656_vm2, %v615_v48, %v619_v41  ;;  %v640_v50 = vor.u32 %v639_v24, %v636_v9 }
  0x88   :  { %667 = vrot.lane.b32.xlu0 %v604_v63, %s9743_s11  ;;  %v648_v63 = vrot.slane %v646_v13, 2  ;;  %v632_v11 = vsel %vm16656_vm2, %v627_v34, %v631_v40  ;;  %v8593_v48 = vcombine.low %v142_v5, %v9820_v7  ;;  %v10288_v13 = vrot.slane %v9804_v3, 2 }
  0x89   :  { %v10255_v54 = vpop.permute.xlu1 %405  ;;  %v641_v9 = vsel %vm16656_vm2, %v631_v40, %v640_v50  ;;  %v698_v3 = vrot.slane %v9844_v15, 2 }
  0x8a   :  { %16704 = vst [vmem:[#allocation20_spill] sm:$0xff] %v10255_v54  ;;  %v10258_v8 = vpop.permute.xlu0 %403  ;;  %v649_v29 = vor.u32 %v648_v63, %v645_v19  ;;  %v691_v0 = vrot.slane %v8593_v48, 2  ;;  %v695_v19 = vsel %vm690_vm3, %v692_v43, %v10288_v13 }
  0x8b   :  { %673 = vrot.lane.b32.xlu1 %v616_v52, %s9743_s11 }
  0x8c   :  { %671 = vrot.lane.b32.xlu0 %v612_v37, %s9743_s11  ;;  %v650_v20 = vsel %vm16656_vm2, %v640_v50, %v649_v29  ;;  %v696_v37 = vrot.slane %v9833_v12, 2  ;;  %v693_v34 = vsel %vm690_vm3, %v691_v0, %v692_v43  ;;  %v702_v12 = vrot.slane %v9884_v38, 2  ;;  %v16717_v43 = vld [vmem:[#allocation5_spill] sm:$0xff] }
  0x8d   :  { %v10267_v54 = vpop.permute.xlu1 %409  ;;  %v706_v38 = vrot.slane %v9908_v47, 2 }
  0x8e   :  { %16707 = vst [vmem:[#allocation21_spill] sm:$0xff] %v10267_v54  ;;  %v10270_v62 = vpop.permute.xlu0 %407  ;;  %v10309_v40 = vsel %vm690_vm3, %v696_v37, %v698_v3  ;;  %v10318_v5 = vsel %vm690_vm3, %v10288_v13, %v696_v37  ;;  %v722_v54 = vrot.slane %v10010_v42, 2  ;;  %v10394_v42 = vrot.slane %v10167_v49, 2 }
  0x8f   :  { %16708 = vst [vmem:[#allocation22_spill] sm:$0xff] %v10270_v62  ;;  %677 = vrot.lane.b32.xlu1 %v624_v18, %s9743_s11 }
  0x90   :  { %675 = vrot.lane.b32.xlu0 %v620_v22, %s9743_s11  ;;  %v700_v22 = vrot.slane %v9859_v23, 2  ;;  %v704_v23 = vrot.slane %v9889_v39, 2  ;;  %v16718_v39 = vld [vmem:[#allocation6_spill] sm:$0xff] }
  0x91   :  { %v10278_v52 = vpop.permute.xlu1 %413  ;;  %v710_v0 = vrot.slane %v16718_v39, 2 }
  0x92   :  { %16709 = vst [vmem:[#allocation23_spill] sm:$0xff] %v10278_v52  ;;  %v10282_v41 = vpop.permute.xlu0 %411  ;;  %v10325_v50 = vsel %vm690_vm3, %v700_v22, %v702_v12 }
  0x93   :  { %16710 = vst [vmem:[#allocation24_spill] sm:$0xff] %v10282_v41  ;;  %681 = vrot.lane.b32.xlu1 %v632_v11, %s9743_s11 }
  0x94   :  { %679 = vrot.lane.b32.xlu0 %v628_v25, %s9743_s11  ;;  %v701_v25 = vsel %vm690_vm3, %v698_v3, %v700_v22 }
  0x95   :  { %v10291_v24 = vpop.permute.xlu1 %417 }
  0x96   :  { %16711 = vst [vmem:[#allocation25_spill] sm:$0xff] %v10291_v24  ;;  %v10294_v7 = vpop.permute.xlu0 %415  ;;  %v16722_v24 = vld [vmem:[#allocation10_spill] sm:$0xff] }
  0x97   :  { %16712 = vst [vmem:[#allocation26_spill] sm:$0xff] %v10294_v7  ;;  %685 = vrot.lane.b32.xlu1 %v650_v20, %s9743_s11  ;;  %v10339_v20 = vsel %vm690_vm3, %v704_v23, %v706_v38  ;;  %v718_v7 = vrot.slane %v16722_v24, 2 }
  0x98   :  { %683 = vrot.lane.b32.xlu0 %v641_v9, %s9743_s11  ;;  %v708_v9 = vrot.slane %v16717_v43, 2 }
  0x99   :  { %v10302_v18 = vpop.permute.xlu1 %421 }
  0x9a   :  { %16713 = vst [vmem:[#allocation27_spill] sm:$0xff] %v10302_v18  ;;  %v10305_v63 = vpop.permute.xlu0 %419  ;;  %v10352_v3 = vsel %vm690_vm3, %v708_v9, %v710_v0 }
  0x9b   :  { %16714 = vst [vmem:[#allocation28_spill] sm:$0xff] %v10305_v63  ;;  %730 = vrot.lane.b32.xlu1 %v695_v19, %s9744_s16  ;;  %v705_v19 = vsel %vm690_vm3, %v702_v12, %v704_v23  ;;  %v16721_v23 = vld [vmem:[#allocation9_spill] sm:$0xff] }
  0x9c   :  { %728 = vrot.lane.b32.xlu0 %v693_v34, %s9744_s16  ;;  %v16719_v34 = vld [vmem:[#allocation7_spill] sm:$0xff]  ;;  %v716_v63 = vrot.slane %v16721_v23, 2 }
  0x9d   :  { %v10314_v15 = vpop.permute.xlu1 %425  ;;  %v712_v22 = vrot.slane %v16719_v34, 2 }
  0x9e   :  { %16715 = vst [vmem:[#allocation29_spill] sm:$0xff] %v10314_v15  ;;  %v10320_v11 = vpop.permute.xlu0 %423  ;;  %v16720_v15 = vld [vmem:[#allocation8_spill] sm:$0xff] }
  0x9f   :  { %16716 = vst [vmem:[#allocation30_spill] sm:$0xff] %v10320_v11  ;;  %734 = vrot.lane.b32.xlu1 %v10309_v40, %s9744_s16  ;;  %v714_v43 = vrot.slane %v16720_v15, 2  ;;  %v709_v11 = vsel %vm690_vm3, %v706_v38, %v708_v9  ;;  %v713_v34 = vsel %vm690_vm3, %v710_v0, %v712_v22  ;;  %v10375_v38 = vsel %vm690_vm3, %v716_v63, %v718_v7  ;;  %v16725_v9 = vld [vmem:[#allocation11_spill] sm:$0xff] }
  0xa0   :  { %732 = vrot.lane.b32.xlu0 %v10318_v5, %s9744_s16  ;;  %v720_v41 = vrot.slane %v16725_v9, 2  ;;  %v143_v0 = vld [vmem:[%s16526_s0 + $0x10] sm:$0xc]  ;;  %v726_v9 = vrot.slane %v10236_v56, 2 }
  0xa1   :  { %v10331_v29 = vpop.permute.xlu1 %470  ;;  %v715_v12 = vsel %vm690_vm3, %v712_v22, %v714_v43  ;;  %v717_v23 = vsel %vm690_vm3, %v714_v43, %v716_v63 }
  0xa2   :  { %v10334_v48 = vpop.permute.xlu0 %468  ;;  %v10391_v22 = vsel %vm690_vm3, %v720_v41, %v722_v54  ;;  %v721_v43 = vsel %vm690_vm3, %v718_v7, %v720_v41  ;;  %v727_v56 = vsel %vm690_vm3, %v10394_v42, %v726_v9  ;;  %v725_v41 = vsel %vm690_vm3, %v722_v54, %v10394_v42 }
  0xa3   :  { %738 = vrot.lane.b32.xlu1 %v10325_v50, %s9744_s16 }
  0xa4   :  { %736 = vrot.lane.b32.xlu0 %v701_v25, %s9744_s16 }
  0xa5   :  { %v10344_v47 = vpop.permute.xlu1 %474 }
  0xa6   :  { %v10347_v37 = vpop.permute.xlu0 %472 }
  0xa7   :  { %742 = vrot.lane.b32.xlu1 %v10339_v20, %s9744_s16 }
  0xa8   :  { %740 = vrot.lane.b32.xlu0 %v705_v19, %s9744_s16 }
  0xa9   :  { %v10357_v39 = vpop.permute.xlu1 %478 }
  0xaa   :  { %v10360_v18 = vpop.permute.xlu0 %476 }
  0xab   :  { %746 = vrot.lane.b32.xlu1 %v10352_v3, %s9744_s16 }
  0xac   :  { %744 = vrot.lane.b32.xlu0 %v709_v11, %s9744_s16 }
  0xad   :  { %v10368_v15 = vpop.permute.xlu1 %482 }
  0xae   :  { %16723 = vst [vmem:[#allocation5_spill] sm:$0xff] %v10368_v15  ;;  %v10371_v52 = vpop.permute.xlu0 %480 }
  0xaf   :  { %16724 = vst [vmem:[#allocation6_spill] sm:$0xff] %v10371_v52  ;;  %750 = vrot.lane.b32.xlu1 %v715_v12, %s9744_s16 }
  0xb0   :  { %748 = vrot.lane.b32.xlu0 %v713_v34, %s9744_s16 }
  0xb1   :  { %v10380_v24 = vpop.permute.xlu1 %486 }
  0xb2   :  { %16726 = vst [vmem:[#allocation7_spill] sm:$0xff] %v10380_v24  ;;  %v10383_v15 = vpop.permute.xlu0 %484  ;;  %v10404_v24 = vld [vmem:[%s16526_s0 + $0x14] sm:$0xf] }
  0xb3   :  { %16727 = vst [vmem:[#allocation8_spill] sm:$0xff] %v10383_v15  ;;  %754 = vrot.lane.b32.xlu1 %v10375_v38, %s9744_s16  ;;  %v8594_v15 = vcombine.low %v143_v0, %v10404_v24 }
  0xb4   :  { %752 = vrot.lane.b32.xlu0 %v717_v23, %s9744_s16 }
  0xb5   :  { %v10398_v63 = vpop.permute.xlu1 %490  ;;  %v775_v7 = vrot.slane %v8594_v15, 2 }
  0xb6   :  { %16728 = vst [vmem:[#allocation9_spill] sm:$0xff] %v10398_v63  ;;  %v10407_v62 = vpop.permute.xlu0 %488 }
  0xb7   :  { %16729 = vst [vmem:[#allocation10_spill] sm:$0xff] %v10407_v62  ;;  %758 = vrot.lane.b32.xlu1 %v10391_v22, %s9744_s16  ;;  %v776_v62 = vsel %vm690_vm3, %v775_v7, %v10288_v13  ;;  %v825_v7 = vshll.u32 %v8594_v15, 16 }
  0xb8   :  { %756 = vrot.lane.b32.xlu0 %v721_v43, %s9744_s16 }
  0xb9   :  { %v10414_v63 = vpop.permute.xlu1 %494 }
  0xba   :  { %16730 = vst [vmem:[#allocation11_spill] sm:$0xff] %v10414_v63  ;;  %v10418_v52 = vpop.permute.xlu0 %492 }
  0xbb   :  { %16731 = vst [vmem:[#allocation31_spill] sm:$0xff] %v10418_v52  ;;  %762 = vrot.lane.b32.xlu1 %v727_v56, %s9744_s16  ;;  %v830_v52 = vrot.slane %v9825_v10, 3  ;;  %v837_v10 = vrot.slane %v9869_v30, 2  ;;  %v846_v30 = vrot.slane %v9897_v44, 3 }
  0xbc   :  { %760 = vrot.lane.b32.xlu0 %v725_v41, %s9744_s16 }
  0xbd   :  { %v10422_v0 = vpop.permute.xlu1 %498 }
  0xbe   :  { %16732 = vst [vmem:[#allocation32_spill] sm:$0xff] %v10422_v0  ;;  %v10426_v9 = vpop.permute.xlu0 %496 }
  0xbf   :  { %16733 = vst [vmem:[#allocation33_spill] sm:$0xff] %v10426_v9  ;;  %783 = vrot.lane.b32.xlu1 %v10318_v5, %s9745_s22  ;;  %v829_v9 = vrot.slane %v9839_v14, 2 }
  0xc0   :  { %781 = vrot.lane.b32.xlu0 %v776_v62, %s9745_s22 }
  0xc1   :  { %v10431_v54 = vpop.permute.xlu1 %502  ;;  %v831_v14 = vor.u32 %v830_v52, %v829_v9  ;;  %v845_v52 = vrot.slane %v9900_v45, 2 }
  0xc2   :  { %16734 = vst [vmem:[#allocation34_spill] sm:$0xff] %v10431_v54  ;;  %v10433_v63 = vpop.permute.xlu0 %500 }
  0xc3   :  { %16735 = vst [vmem:[#allocation35_spill] sm:$0xff] %v10433_v63  ;;  %787 = vrot.lane.b32.xlu1 %v701_v25, %s9745_s22 }
  0xc4   :  { %785 = vrot.lane.b32.xlu0 %v10309_v40, %s9745_s22 }
  0xc5   :  { %v10438_v56 = vpop.permute.xlu1 %523 }
  0xc6   :  { %v10440_v13 = vpop.permute.xlu0 %521 }
  0xc7   :  { %791 = vrot.lane.b32.xlu1 %v705_v19, %s9745_s22 }
  0xc8   :  { %789 = vrot.lane.b32.xlu0 %v10325_v50, %s9745_s22  ;;  %v10464_v50 = vld [vmem:[%s16526_s0 + $0x98] sm:$0xff]  }
  0xc9   :  { %v10445_v5 = vpop.permute.xlu1 %527  ;;  %v777_v54 = vrot.slane %v10464_v50, 2 }
  0xca   :  { %v10447_v62 = vpop.permute.xlu0 %525 }
  0xcb   :  { %795 = vrot.lane.b32.xlu1 %v709_v11, %s9745_s22  ;;  %v9538_v11 = vld [vmem:[%s16526_s0 + $0xa0] ss:$0 sps:$4 sm:$0x33]  }
  0xcc   :  { %793 = vrot.lane.b32.xlu0 %v10339_v20, %s9745_s22  ;;  %v779_v63 = vrot.slane %v9538_v11, 2 }
  0xcd   :  { %v10452_v25 = vpop.permute.xlu1 %531 }
  0xce   :  { %v10454_v40 = vpop.permute.xlu0 %529 }
  0xcf   :  { %799 = vrot.lane.b32.xlu1 %v713_v34, %s9745_s22 }
  0xd0   :  { %797 = vrot.lane.b32.xlu0 %v10352_v3, %s9745_s22  ;;  %v822_v3 = vshrl.u32 %v8594_v15, 16 }
  0xd1   :  { %v10459_v19 = vpop.permute.xlu1 %535 }
  0xd2   :  { %16736 = vst [vmem:[#allocation36_spill] sm:$0xff] %v10459_v19  ;;  %v10469_v20 = vpop.permute.xlu0 %533  ;;  %v833_v19 = vrot.slane %v9877_v35, 2  ;;  %v824_v15 = vrot.slane %v822_v3, 2  ;;  %v838_v35 = vrot.slane %v9865_v27, 3  ;;  %v849_v27 = vrot.slane %v9956_v1, 2 }
  0xd3   :  { %803 = vrot.lane.b32.xlu1 %v717_v23, %s9745_s22  ;;  %v834_v23 = vrot.slane %v9853_v21, 3  ;;  %v841_v21 = vrot.slane %v9922_v51, 2  ;;  %v850_v51 = vrot.slane %v9903_v46, 3  ;;  %v853_v46 = vrot.slane %v9937_v57, 2 }
  0xd4   :  { %801 = vrot.lane.b32.xlu0 %v715_v12, %s9745_s22  ;;  %v854_v1 = vrot.slane %v9933_v55, 3 }
  0xd5   :  { %v10473_v34 = vpop.permute.xlu1 %539  ;;  %v851_v44 = vor.u32 %v850_v51, %v849_v27 }
  0xd6   :  { %16737 = vst [vmem:[#allocation37_spill] sm:$0xff] %v10473_v34  ;;  %v10476_v0 = vpop.permute.xlu0 %537  ;;  %v827_v34 = vrot.slane %v825_v7, 3  ;;  %v857_v7 = vrot.slane %v9986_v28, 2  ;;  %v861_v28 = vrot.slane %v9959_v4, 2 }
  0xd7   :  { %16738 = vst [vmem:[#allocation38_spill] sm:$0xff] %v10476_v0  ;;  %807 = vrot.lane.b32.xlu1 %v721_v43, %s9745_s22  ;;  %v780_v43 = vsel %vm690_vm3, %v777_v54, %v779_v63  ;;  %v835_v0 = vor.u32 %v834_v23, %v833_v19  ;;  %v858_v23 = vrot.slane %v9940_v58, 3  ;;  %v862_v58 = vrot.slane %v9943_v59, 3 }
  0xd8   :  { %805 = vrot.lane.b32.xlu0 %v10375_v38, %s9745_s22  ;;  %v842_v38 = vrot.slane %v9872_v31, 3  ;;  %v828_v63 = vor.u32 %v827_v34, %v824_v15 }
  0xd9   :  { %v10485_v12 = vpop.permute.xlu1 %543  ;;  %v836_v31 = vsel %vm820_vm4, %v831_v14, %v835_v0  ;;  %v859_v55 = vor.u32 %v858_v23, %v857_v7 }
  0xda   :  { %16739 = vst [vmem:[#allocation39_spill] sm:$0xff] %v10485_v12  ;;  %v10487_v11 = vpop.permute.xlu0 %541  ;;  %v843_v19 = vor.u32 %v842_v38, %v841_v21  ;;  %v832_v45 = vsel %vm820_vm4, %v828_v63, %v831_v14  ;;  %v865_v21 = vrot.slane %v10016_v53, 2  ;;  %v866_v38 = vrot.slane %v9962_v6, 3 }
  0xdb   :  { %16740 = vst [vmem:[#allocation40_spill] sm:$0xff] %v10487_v11  ;;  %811 = vrot.lane.b32.xlu1 %v725_v41, %s9745_s22  ;;  %v778_v41 = vsel %vm690_vm3, %v10394_v42, %v777_v54  ;;  %v847_v54 = vor.u32 %v846_v30, %v845_v52  ;;  %v870_v63 = vrot.slane %v9971_v17, 3  ;;  %v873_v52 = vrot.slane %v10041_v26, 2 }
  0xdc   :  { %809 = vrot.lane.b32.xlu0 %v10391_v22, %s9745_s22  ;;  %v839_v22 = vor.u32 %v838_v35, %v837_v10  ;;  %v855_v35 = vor.u32 %v854_v1, %v853_v46  ;;  %v874_v30 = vrot.slane %v9994_v33, 3  ;;  %v863_v6 = vor.u32 %v862_v58, %v861_v28 }
  0xdd   :  { %v10497_v3 = vpop.permute.xlu1 %547  ;;  %v852_v57 = vsel %vm820_vm4, %v847_v54, %v851_v44  ;;  %v848_v4 = vsel %vm820_vm4, %v843_v19, %v847_v54  ;;  %v867_v53 = vor.u32 %v866_v38, %v865_v21  ;;  %v877_v33 = vrot.slane %v10022_v60, 2  ;;  %v10559_v54 = vld [vmem:[%s16526_s0 + $0xa0] ss:$0 sps:$4 sm:$0x77]  }
  0xde   :  { %16741 = vst [vmem:[#allocation41_spill] sm:$0xff] %v10497_v3  ;;  %v10505_v9 = vpop.permute.xlu0 %545  ;;  %v844_v15 = vsel %vm820_vm4, %v839_v22, %v843_v19  ;;  %v840_v14 = vsel %vm820_vm4, %v835_v0, %v839_v22  ;;  %v869_v0 = vrot.slane %v9991_v32, 2  ;;  %v860_v59 = vsel %vm820_vm4, %v855_v35, %v859_v55  ;;  %v9541_v60 = vld [vmem:[%s16527_s1 + $0x10] ss:$0 sps:$4 sm:$0x33]  }
  0xdf   :  { %16742 = vst [vmem:[#allocation42_spill] sm:$0xff] %v10505_v9  ;;  %815 = vrot.lane.b32.xlu1 %v780_v43, %s9745_s22  ;;  %v856_v17 = vsel %vm820_vm4, %v851_v44, %v855_v35  ;;  %v875_v26 = vor.u32 %v874_v30, %v873_v52  ;;  %v881_v22 = vrot.slane %v10056_v61, 2  ;;  %v882_v19 = vrot.slane %v16700_v36, 3  ;;  %9490 = vmatprep.subr.msk.bf16.mxu0 %vm16562_vm5, %v9541_v60  ;;  %v10591_v30 = vld [vmem:[%s16527_s1 + $0x8] sm:$0xff]  }
  0xe0   :  { %813 = vrot.lane.b32.xlu0 %v778_v41, %s9745_s22  ;;  %v871_v32 = vor.u32 %v870_v63, %v869_v0  ;;  %v868_v44 = vsel %vm820_vm4, %v863_v6, %v867_v53  ;;  %v10572_v7 = vsel %vm16562_vm5, %v9541_v60, 0  ;;  %v16749_v28 = vshrl.u32 %v10167_v49, 16 }
  0xe1   :  { %v10510_v42 = vpop.permute.xlu1 %551  ;;  %v883_v1 = vor.u32 %v882_v19, %v881_v22  ;;  %v16750_v58 = vshll.u32 %v10167_v49, 16  ;;  %9239 = vmatpush3.bf16.msra.mxu0 %v10572_v7  ;;  %v894_v38 = vshrl.u32 %v10464_v50, 16  ;;  %v897_v0 = vshll.u32 %v10464_v50, 16 }
  0xe2   :  { %16743 = vst [vmem:[#allocation43_spill] sm:$0xff] %v10510_v42  ;;  %v10513_v34 = vpop.permute.xlu0 %549  ;;  %v876_v36 = vsel %vm820_vm4, %v871_v32, %v875_v26  ;;  %v903_v63 = vshrl.u32 %v10559_v54, 16  ;;  %v906_v52 = vshll.u32 %v10559_v54, 16  ;;  %9240 = vmatprep.subr.bf16.mxu0 %v10591_v30  ;;  %v984_v12 = vrot.slane %v10464_v50, 3 }
  0xe3   :  { %16744 = vst [vmem:[#allocation44_spill] sm:$0xff] %v10513_v34  ;;  %913 = vrot.lane.b32.xlu1 %v836_v31, %s9746_s27  ;;  %v878_v31 = vrot.slane %v16698_v16, 3  ;;  %v864_v16 = vsel %vm820_vm4, %v859_v55, %v863_v6  ;;  %v889_v55 = vrot.slane %v16749_v28, 2  ;;  %v890_v21 = vrot.slane %v16750_v58, 3 }
  0xe4   :  { %911 = vrot.lane.b32.xlu0 %v832_v45, %s9746_s27  ;;  %v896_v22 = vrot.slane %v894_v38, 2  ;;  %v899_v19 = vrot.slane %v897_v0, 3 }
  0xe5   :  { %v10522_v43 = vpop.permute.xlu1 %555  ;;  %v879_v46 = vor.u32 %v878_v31, %v877_v33  ;;  %v891_v31 = vor.u32 %v890_v21, %v889_v55  ;;  %9241 = vmatpush3.bf16.msra.mxu0 %v10591_v30  ;;  %v10633_v21 = vld [vmem:[%s16526_s0 + $0x18] sm:$0xff]  }
  0xe6   :  { %16745 = vst [vmem:[#allocation45_spill] sm:$0xff] %v10522_v43  ;;  %v10525_v10 = vpop.permute.xlu0 %553  ;;  %v952_v38 = vrot.slane %v10633_v21, 3 }
  0xe7   :  { %16746 = vst [vmem:[#allocation46_spill] sm:$0xff] %v10525_v10  ;;  %917 = vrot.lane.b32.xlu1 %v844_v15, %s9746_s27  ;;  %v16747_v15 = vld [vmem:[#allocation15_spill] sm:$0xff] }
  0xe8   :  { %915 = vrot.lane.b32.xlu0 %v840_v14, %s9746_s27  ;;  %v885_v14 = vrot.slane %v16747_v15, 2 }
  0xe9   :  { %v10534_v41 = vpop.permute.xlu1 %653 }
  0xea   :  { %v10541_v27 = vpop.permute.xlu0 %651 }
  0xeb   :  { %921 = vrot.lane.b32.xlu1 %v852_v57, %s9746_s27  ;;  %v16748_v57 = vld [vmem:[#allocation14_spill] sm:$0xff] }
  0xec   :  { %919 = vrot.lane.b32.xlu0 %v848_v4, %s9746_s27  ;;  %v886_v35 = vrot.slane %v16748_v57, 3 }
  0xed   :  { %v10546_v51 = vpop.permute.xlu1 %657 }
  0xee   :  { %v10553_v45 = vpop.permute.xlu0 %655  ;;  %v887_v33 = vor.u32 %v886_v35, %v885_v14  ;;  %v148_v14 = vld [vmem:[%s16526_s0 + $0x10] sm:$0x8]  ;;  %v900_v35 = vor.u32 %v899_v19, %v896_v22 }
  0xef   :  { %925 = vrot.lane.b32.xlu1 %v860_v59, %s9746_s27  ;;  %v872_v59 = vsel %vm820_vm4, %v867_v53, %v871_v32  ;;  %v10606_v53 = vld [vmem:[%s16527_s1] sm:$0xff]   ;;  %v8598_v55 = vcombine.low %v148_v14, %v10404_v24  ;;  %v10660_v19 = vld [vmem:[%s16526_s0 + $0x30] sm:$0xff]  }
  0xf0   :  { %923 = vrot.lane.b32.xlu0 %v856_v17, %s9746_s27  ;;  %v884_v17 = vsel %vm820_vm4, %v879_v46, %v883_v1  ;;  %9242 = vmatprep.subr.bf16.mxu0 %v10606_v53  ;;  %v892_v57 = vsel %vm820_vm4, %v887_v33, %v891_v31 }
  0xf1   :  { %v10566_v61 = vpop.permute.xlu1 %661  ;;  %9243 = vmatpush3.bf16.msra.mxu0 %v10606_v53 }
  0xf2   :  { %v10574_v23 = vpop.permute.xlu0 %659  ;;  %9493 = vmatprep.subr.msk.bf16.mxu0 %vm16562_vm5, %v9541_v60  ;;  %v10639_v60 = vld [vmem:[%s16526_s0 + $0x20] sm:$0xff]   ;;  %vm1341_vm5 = vcmask 293888  }
  0xf3   :  { %929 = vrot.lane.b32.xlu1 %v868_v44, %s9746_s27  ;;  %v905_v44 = vrot.slane %v903_v63, 2  ;;  %v901_v63 = vsel %vm820_vm4, %v891_v31, %v900_v35  ;;  %v958_v31 = vrot.slane %v10660_v19, 3 }
  0xf4   :  { %927 = vrot.lane.b32.xlu0 %v864_v16, %s9746_s27  ;;  %v908_v16 = vrot.slane %v906_v52, 3  ;;  %v951_v52 = vrot.slane %v8598_v55, 3 }
  0xf5   :  { %v10594_v4 = vpop.permute.xlu1 %665 }
  0xf6   :  { %v10598_v6 = vpop.permute.xlu0 %663  ;;  %v909_v28 = vor.u32 %v908_v16, %v905_v44  ;;  %v9747_v44 = vmov 0  }
  0xf7   :  { %933 = vrot.lane.b32.xlu1 %v876_v36, %s9746_s27  ;;  %v880_v36 = vsel %vm820_vm4, %v875_v26, %v879_v46  ;;  %v888_v46 = vsel %vm820_vm4, %v883_v1, %v887_v33  ;;  %v954_v1 = vrot.slane %v10639_v60, 3  ;;  %v10654_v33 = vld [vmem:[%s16526_s0 + $0x28] sm:$0xff]   ;;  %9509 = vset.pattern.permute.xlu0 %v9747_v44  ;;  %28 = vst.msk [vmem:[#allocation2] sm:$0xf] %vm16655_vm7, %v9747_v44  ;;  %29 = vst.msk [vmem:[#allocation2 + $0x4] sm:$0xf] %vm16655_vm7, %v9747_v44 }
  0xf8   :  { %931 = vrot.lane.b32.xlu0 %v872_v59, %s9746_s27  ;;  %v910_v24 = vsel %vm820_vm4, %v900_v35, %v909_v28  ;;  %v956_v22 = vrot.slane %v10654_v33, 3  ;;  %9510 = vset.pattern.permute.xlu1 %v9747_v44  ;;  %42 = vst.msk [vmem:[#allocation2 + $0x9c] sm:$0xf] %vm16655_vm7, %v9747_v44  ;;  %43 = vst.msk [vmem:[#allocation2 + $0xa0] sm:$0xf] %vm16655_vm7, %v9747_v44  ;;  %v10678_v35 = vld [vmem:[%s16526_s0 + $0x38] sm:$0xff]  }
  0xf9   :  { %v10609_v32 = vpop.permute.xlu1 %669  ;;  %v960_v28 = vrot.slane %v10678_v35, 3 }
  0xfa   :  { %16751 = vst [vmem:[#allocation15_spill] sm:$0xff] %v10609_v32  ;;  %v10613_v15 = vpop.permute.xlu0 %667 }
  0xfb   :  { %16752 = vst [vmem:[#allocation14_spill] sm:$0xff] %v10613_v15  ;;  %937 = vrot.lane.b32.xlu1 %v884_v17, %s9746_s27  ;;  %v955_v17 = vsel %vm16660_vm6, %v952_v38, %v954_v1 }
  0xfc   :  { %935 = vrot.lane.b32.xlu0 %v880_v36, %s9746_s27  ;;  %v953_v36 = vsel %vm16660_vm6, %v951_v52, %v952_v38 }
  0xfd   :  { %v10623_v26 = vpop.permute.xlu1 %673 }
  0xfe   :  { %16753 = vst [vmem:[#allocation47_spill] sm:$0xff] %v10623_v26  ;;  %v10627_v58 = vpop.permute.xlu0 %671 }
  0xff   :  { %16754 = vst [vmem:[#allocation48_spill] sm:$0xff] %v10627_v58  ;;  %941 = vrot.lane.b32.xlu1 %v892_v57, %s9746_s27  ;;  %v959_v57 = vsel %vm16660_vm6, %v956_v22, %v958_v31 }
 0x100   :  { %939 = vrot.lane.b32.xlu0 %v888_v46, %s9746_s27  ;;  %v10684_v46 = vld [vmem:[%s16526_s0 + $0x40] sm:$0xff]  }
 0x101   :  { %v10644_v0 = vpop.permute.xlu1 %677  ;;  %v962_v55 = vrot.slane %v10684_v46, 3 }
 0x102   :  { %16755 = vst [vmem:[#allocation49_spill] sm:$0xff] %v10644_v0  ;;  %v10647_v59 = vpop.permute.xlu0 %675 }
 0x103   :  { %16756 = vst [vmem:[#allocation50_spill] sm:$0xff] %v10647_v59  ;;  %945 = vrot.lane.b32.xlu1 %v910_v24, %s9746_s27  ;;  %v957_v24 = vsel %vm16660_vm6, %v954_v1, %v956_v22  ;;  %v963_v52 = vsel %vm16660_vm6, %v960_v28, %v962_v55 }
 0x104   :  { %943 = vrot.lane.b32.xlu0 %v901_v63, %s9746_s27 }
 0x105   :  { %v10664_v16 = vpop.permute.xlu1 %681 }
 0x106   :  { %16757 = vst [vmem:[#allocation51_spill] sm:$0xff] %v10664_v16  ;;  %v10671_v14 = vpop.permute.xlu0 %679 }
 0x107   :  { %16758 = vst [vmem:[#allocation52_spill] sm:$0xff] %v10671_v14  ;;  %990 = vrot.lane.b32.xlu1 %v955_v17, %s9748_s8  ;;  %v10698_v17 = vld [vmem:[%s16526_s0 + $0x48] sm:$0xff]  }
 0x108   :  { %988 = vrot.lane.b32.xlu0 %v953_v36, %s9748_s8  ;;  %16761 = vst [vmem:[#allocation55_spill] sm:$0xff] %v10698_v17  ;;  %v964_v44 = vrot.slane %v10698_v17, 3  ;;  %v10704_v36 = vld [vmem:[%s16526_s0 + $0x50] sm:$0xff]   ;;  %v10738_v14 = vld [vmem:[%s16526_s0 + $0x68] sm:$0xff]  }
 0x109   :  { %v10688_v38 = vpop.permute.xlu1 %685  ;;  %16762 = vst [vmem:[#allocation56_spill] sm:$0xff] %v10704_v36  ;;  %v966_v1 = vrot.slane %v10704_v36, 3  ;;  %16765 = vst [vmem:[#allocation59_spill] sm:$0xff] %v10738_v14  ;;  %v972_v0 = vrot.slane %v10738_v14, 3  ;;  %v10758_v14 = vld [vmem:[%s16526_s0 + $0x78] sm:$0xff]  }
 0x10a   :  { %16759 = vst [vmem:[#allocation53_spill] sm:$0xff] %v10688_v38  ;;  %v10691_v63 = vpop.permute.xlu0 %683  ;;  %16767 = vst [vmem:[#allocation61_spill] sm:$0xff] %v10758_v14  ;;  %v976_v59 = vrot.slane %v10758_v14, 3  ;;  %v10778_v14 = vld [vmem:[%s16526_s0 + $0x88] sm:$0xff]  }
 0x10b   :  { %16760 = vst [vmem:[#allocation54_spill] sm:$0xff] %v10691_v63  ;;  %994 = vrot.lane.b32.xlu1 %v959_v57, %s9748_s8  ;;  %v961_v57 = vsel %vm16660_vm6, %v958_v31, %v960_v28  ;;  %v967_v43 = vsel %vm16660_vm6, %v964_v44, %v966_v1  ;;  %v10718_v63 = vld [vmem:[%s16526_s0 + $0x58] sm:$0xff]   ;;  %16770 = vst [vmem:[#allocation64_spill] sm:$0xff] %v10778_v14  ;;  %v980_v9 = vrot.slane %v10778_v14, 3 }
 0x10c   :  { %992 = vrot.lane.b32.xlu0 %v957_v24, %s9748_s8  ;;  %16763 = vst [vmem:[#allocation57_spill] sm:$0xff] %v10718_v63  ;;  %v968_v16 = vrot.slane %v10718_v63, 3  ;;  %v10724_v24 = vld [vmem:[%s16526_s0 + $0x60] sm:$0xff]  }
 0x10d   :  { %v10708_v22 = vpop.permute.xlu1 %730  ;;  %16764 = vst [vmem:[#allocation58_spill] sm:$0xff] %v10724_v24  ;;  %v970_v31 = vrot.slane %v10724_v24, 3  ;;  %v986_v24 = vrot.slane %v10559_v54, 3 }
 0x10e   :  { %v10711_v38 = vpop.permute.xlu0 %728 }
 0x10f   :  { %998 = vrot.lane.b32.xlu1 %v963_v52, %s9748_s8  ;;  %v965_v52 = vsel %vm16660_vm6, %v962_v55, %v964_v44  ;;  %v971_v42 = vsel %vm16660_vm6, %v968_v16, %v970_v31 }
 0x110   :  { %996 = vrot.lane.b32.xlu0 %v961_v57, %s9748_s8  ;;  %v10744_v57 = vld [vmem:[%s16526_s0 + $0x70] sm:$0xff]  }
 0x111   :  { %v10728_v28 = vpop.permute.xlu1 %734  ;;  %16766 = vst [vmem:[#allocation60_spill] sm:$0xff] %v10744_v57  ;;  %v974_v55 = vrot.slane %v10744_v57, 3 }
 0x112   :  { %v10731_v10 = vpop.permute.xlu0 %732 }
 0x113   :  { %1002 = vrot.lane.b32.xlu1 %v967_v43, %s9748_s8  ;;  %v969_v43 = vsel %vm16660_vm6, %v966_v1, %v968_v16  ;;  %v975_v3 = vsel %vm16660_vm6, %v972_v0, %v974_v55 }
 0x114   :  { %1000 = vrot.lane.b32.xlu0 %v965_v52, %s9748_s8  ;;  %v10764_v52 = vld [vmem:[%s16526_s0 + $0x80] sm:$0xff]  }
 0x115   :  { %v10748_v44 = vpop.permute.xlu1 %738  ;;  %16768 = vst [vmem:[#allocation62_spill] sm:$0xff] %v10764_v52  ;;  %v978_v16 = vrot.slane %v10764_v52, 3  ;;  %v982_v52 = vrot.slane %v10167_v49, 3 }
 0x116   :  { %v10751_v34 = vpop.permute.xlu0 %736 }
 0x117   :  { %1006 = vrot.lane.b32.xlu1 %v971_v42, %s9748_s8  ;;  %v973_v42 = vsel %vm16660_vm6, %v970_v31, %v972_v0  ;;  %v979_v26 = vsel %vm16660_vm6, %v976_v59, %v978_v16  ;;  %v977_v0 = vsel %vm16660_vm6, %v974_v55, %v976_v59  ;;  %v981_v49 = vsel %vm16660_vm6, %v978_v16, %v980_v9 }
 0x118   :  { %1004 = vrot.lane.b32.xlu0 %v969_v43, %s9748_s8  ;;  %v987_v59 = vsel %vm16660_vm6, %v984_v12, %v986_v24  ;;  %v985_v50 = vsel %vm16660_vm6, %v982_v52, %v984_v12  ;;  %v47_v24 = vld [vmem:[%s16528_s5] sm:$0xff]  ;;  %v49_v12 = vld [vmem:[%s16528_s5 + $0x10] sm:$0xff] }
 0x119   :  { %v10768_v1 = vpop.permute.xlu1 %742 }
 0x11a   :  { %16769 = vst [vmem:[#allocation63_spill] sm:$0xff] %v10768_v1  ;;  %v10771_v57 = vpop.permute.xlu0 %740  ;;  %v16803_v1 = vld [vmem:[#allocation3_spill] sm:$0xff] }
 0x11b   :  { %1010 = vrot.lane.b32.xlu1 %v975_v3, %s9748_s8  ;;  %v983_v3 = vsel %vm16660_vm6, %v980_v9, %v982_v52  ;;  %v48_v9 = vld [vmem:[%s16528_s5 + $0x8] sm:$0xff] }
 0x11c   :  { %1008 = vrot.lane.b32.xlu0 %v973_v42, %s9748_s8 }
 0x11d   :  { %v10783_v43 = vpop.permute.xlu1 %746 }
 0x11e   :  { %16771 = vst [vmem:[#allocation65_spill] sm:$0xff] %v10783_v43  ;;  %v10786_v31 = vpop.permute.xlu0 %744 }
 0x11f   :  { %16772 = vst [vmem:[#allocation66_spill] sm:$0xff] %v10786_v31  ;;  %1014 = vrot.lane.b32.xlu1 %v979_v26, %s9748_s8  ;;  %v16801_v31 = vld [vmem:[#allocation4_spill] sm:$0xff] }
 0x120   :  { %1012 = vrot.lane.b32.xlu0 %v977_v0, %s9748_s8  ;;  %v50_v0 = vld [vmem:[%s16528_s5 + $0x18] sm:$0xff] }
 0x121   :  { %v10793_v14 = vpop.permute.xlu1 %750 }
 0x122   :  { %16773 = vst [vmem:[#allocation67_spill] sm:$0xff] %v10793_v14  ;;  %v10796_v42 = vpop.permute.xlu0 %748 }
 0x123   :  { %16774 = vst [vmem:[#allocation68_spill] sm:$0xff] %v10796_v42  ;;  %1018 = vrot.lane.b32.xlu1 %v983_v3, %s9748_s8 }
 0x124   :  { %1016 = vrot.lane.b32.xlu0 %v981_v49, %s9748_s8  ;;  %v51_v49 = vld [vmem:[%s16528_s5 + $0x20] sm:$0xff] }
 0x125   :  { %v10801_v26 = vpop.permute.xlu1 %754 }
 0x126   :  { %16775 = vst [vmem:[#allocation69_spill] sm:$0xff] %v10801_v26  ;;  %v10804_v55 = vpop.permute.xlu0 %752 }
 0x127   :  { %16776 = vst [vmem:[#allocation70_spill] sm:$0xff] %v10804_v55  ;;  %1022 = vrot.lane.b32.xlu1 %v987_v59, %s9748_s8 }
 0x128   :  { %1020 = vrot.lane.b32.xlu0 %v985_v50, %s9748_s8  ;;  %v52_v50 = vld [vmem:[%s16528_s5 + $0x28] sm:$0xff] }
 0x129   :  { %v10811_v54 = vpop.permute.xlu1 %758 }
 0x12a   :  { %16777 = vst [vmem:[#allocation71_spill] sm:$0xff] %v10811_v54  ;;  %v10816_v16 = vpop.permute.xlu0 %756 }
 0x12b   :  { %16778 = vst [vmem:[#allocation72_spill] sm:$0xff] %v10816_v16  ;;  %1602 = vperm.xlu1 %9510, %v48_v9  }
 0x12c   :  { %1597 = vperm.xlu0 %9509, %v47_v24   ;;  %v53_v24 = vld [vmem:[%s16528_s5 + $0x30] sm:$0xff] }
 0x12d   :  { %v10821_v52 = vpop.permute.xlu1 %762 }
 0x12e   :  { %16779 = vst [vmem:[#allocation73_spill] sm:$0xff] %v10821_v52  ;;  %v10826_v3 = vpop.permute.xlu0 %760 }
 0x12f   :  { %16780 = vst [vmem:[#allocation74_spill] sm:$0xff] %v10826_v3  ;;  %1607 = vperm.xlu1 %9510, %v49_v12   ;;  %v54_v12 = vld [vmem:[%s16528_s5 + $0x38] sm:$0xff] }
 0x130   :  { %1612 = vperm.xlu0 %9509, %v50_v0   ;;  %v55_v0 = vld [vmem:[%s16528_s5 + $0x40] sm:$0xff] }
 0x131   :  { %v10831_v59 = vpop.permute.xlu1 %783 }
 0x132   :  { %v10836_v9 = vpop.permute.xlu0 %781 }
 0x133   :  { %1617 = vperm.xlu1 %9510, %v51_v49   ;;  %v56_v49 = vld [vmem:[%s16528_s5 + $0x48] sm:$0xff] }
 0x134   :  { %1622 = vperm.xlu0 %9509, %v52_v50   ;;  %v57_v50 = vld [vmem:[%s16528_s5 + $0x50] sm:$0xff] }
 0x135   :  { %v10841_v52 = vpop.permute.xlu1 %787 }
 0x136   :  { %v10846_v3 = vpop.permute.xlu0 %785 }
 0x137   :  { %1627 = vperm.xlu1 %9510, %v53_v24   ;;  %v58_v24 = vld [vmem:[%s16528_s5 + $0x58] sm:$0xff] }
 0x138   :  { %1632 = vperm.xlu0 %9509, %v54_v12   ;;  %v59_v12 = vld [vmem:[%s16528_s5 + $0x60] sm:$0xff] }
 0x139   :  { %v10851_v54 = vpop.permute.xlu1 %791 }
 0x13a   :  { %v10856_v16 = vpop.permute.xlu0 %789 }
 0x13b   :  { %1637 = vperm.xlu1 %9510, %v55_v0   ;;  %v60_v0 = vld [vmem:[%s16528_s5 + $0x68] sm:$0xff] }
 0x13c   :  { %1642 = vperm.xlu0 %9509, %v56_v49   ;;  %v61_v49 = vld [vmem:[%s16528_s5 + $0x70] sm:$0xff] }
 0x13d   :  { %v10861_v26 = vpop.permute.xlu1 %795 }
 0x13e   :  { %16781 = vst [vmem:[#allocation75_spill] sm:$0xff] %v10861_v26  ;;  %v10866_v55 = vpop.permute.xlu0 %793 }
 0x13f   :  { %1647 = vperm.xlu1 %9510, %v57_v50   ;;  %v62_v50 = vld [vmem:[%s16528_s5 + $0x78] sm:$0xff] }
 0x140   :  { %1652 = vperm.xlu0 %9509, %v58_v24   ;;  %v63_v24 = vld [vmem:[%s16528_s5 + $0x80] sm:$0xff] }
 0x141   :  { %v10871_v14 = vpop.permute.xlu1 %799 }
 0x142   :  { %16782 = vst [vmem:[#allocation76_spill] sm:$0xff] %v10871_v14  ;;  %v10876_v63 = vpop.permute.xlu0 %797 }
 0x143   :  { %16783 = vst [vmem:[#allocation77_spill] sm:$0xff] %v10876_v63  ;;  %1657 = vperm.xlu1 %9510, %v59_v12   ;;  %v64_v12 = vld [vmem:[%s16528_s5 + $0x88] sm:$0xff] }
 0x144   :  { %1662 = vperm.xlu0 %9509, %v60_v0   ;;  %v65_v0 = vld [vmem:[%s16528_s5 + $0x90] sm:$0xff] }
 0x145   :  { %v10881_v42 = vpop.permute.xlu1 %803 }
 0x146   :  { %16784 = vst [vmem:[#allocation78_spill] sm:$0xff] %v10881_v42  ;;  %v10886_v14 = vpop.permute.xlu0 %801 }
 0x147   :  { %16785 = vst [vmem:[#allocation79_spill] sm:$0xff] %v10886_v14  ;;  %1667 = vperm.xlu1 %9510, %v61_v49   ;;  %v66_v49 = vld [vmem:[%s16528_s5 + $0x98] sm:$0xff] }
 0x148   :  { %1672 = vperm.xlu0 %9509, %v62_v50   ;;  %v67_v50 = vld [vmem:[%s16528_s5 + $0xa0] sm:$0xff] }
 0x149   :  { %v10891_v43 = vpop.permute.xlu1 %807 }
 0x14a   :  { %16786 = vst [vmem:[#allocation80_spill] sm:$0xff] %v10891_v43  ;;  %v10896_v42 = vpop.permute.xlu0 %805 }
 0x14b   :  { %16787 = vst [vmem:[#allocation81_spill] sm:$0xff] %v10896_v42  ;;  %1677 = vperm.xlu1 %9510, %v63_v24   ;;  %v68_v24 = vld [vmem:[%s16528_s5 + $0xa8] sm:$0xff] }
 0x14c   :  { %1682 = vperm.xlu0 %9509, %v64_v12   ;;  %v69_v12 = vld [vmem:[%s16528_s5 + $0xb0] sm:$0xff] }
 0x14d   :  { %v10901_v14 = vpop.permute.xlu1 %811 }
 0x14e   :  { %16788 = vst [vmem:[#allocation82_spill] sm:$0xff] %v10901_v14  ;;  %v10906_v43 = vpop.permute.xlu0 %809 }
 0x14f   :  { %16789 = vst [vmem:[#allocation83_spill] sm:$0xff] %v10906_v43  ;;  %1687 = vperm.xlu1 %9510, %v65_v0   ;;  %v70_v0 = vld [vmem:[%s16528_s5 + $0xb8] sm:$0xff] }
 0x150   :  { %1692 = vperm.xlu0 %9509, %v66_v49   ;;  %v71_v49 = vld [vmem:[%s16528_s5 + $0xc0] sm:$0xff] }
 0x151   :  { %v10911_v42 = vpop.permute.xlu1 %815 }
 0x152   :  { %16790 = vst [vmem:[#allocation84_spill] sm:$0xff] %v10911_v42  ;;  %v10916_v14 = vpop.permute.xlu0 %813 }
 0x153   :  { %16791 = vst [vmem:[#allocation85_spill] sm:$0xff] %v10916_v14  ;;  %1697 = vperm.xlu1 %9510, %v67_v50   ;;  %v72_v50 = vld [vmem:[%s16528_s5 + $0xc8] sm:$0xff] }
 0x154   :  { %1702 = vperm.xlu0 %9509, %v68_v24   ;;  %v73_v24 = vld [vmem:[%s16528_s5 + $0xd0] sm:$0xff] }
 0x155   :  { %v10921_v43 = vpop.permute.xlu1 %913 }
 0x156   :  { %v10926_v42 = vpop.permute.xlu0 %911 }
 0x157   :  { %1707 = vperm.xlu1 %9510, %v69_v12   ;;  %v74_v12 = vld [vmem:[%s16528_s5 + $0xd8] sm:$0xff] }
 0x158   :  { %1712 = vperm.xlu0 %9509, %v70_v0   ;;  %v75_v0 = vld [vmem:[%s16528_s5 + $0xe0] sm:$0xff] }
 0x159   :  { %v10931_v14 = vpop.permute.xlu1 %917 }
 0x15a   :  { %v10936_v58 = vpop.permute.xlu0 %915 }
 0x15b   :  { %1717 = vperm.xlu1 %9510, %v71_v49   ;;  %v76_v49 = vld [vmem:[%s16528_s5 + $0xe8] sm:$0xff] }
 0x15c   :  { %1722 = vperm.xlu0 %9509, %v72_v50   ;;  %v77_v50 = vld [vmem:[%s16528_s5 + $0xf0] sm:$0xff] }
 0x15d   :  { %v10941_v32 = vpop.permute.xlu1 %921 }
 0x15e   :  { %v10946_v11 = vpop.permute.xlu0 %919 }
 0x15f   :  { %1727 = vperm.xlu1 %9510, %v73_v24   ;;  %v78_v24 = vld [vmem:[%s16528_s5 + $0xf8] sm:$0xff] }
 0x160   :  { %1732 = vperm.xlu0 %9509, %v74_v12   ;;  %v79_v12 = vld [vmem:[%s16528_s5 + $0x100] sm:$0xff] }
 0x161   :  { %v10951_v36 = vpop.permute.xlu1 %925 }
 0x162   :  { %16792 = vst [vmem:[#allocation86_spill] sm:$0xff] %v10951_v36  ;;  %v10956_v17 = vpop.permute.xlu0 %923 }
 0x163   :  { %1737 = vperm.xlu1 %9510, %v75_v0   ;;  %v80_v0 = vld [vmem:[%s16528_s5 + $0x108] sm:$0xff] }
 0x164   :  { %1742 = vperm.xlu0 %9509, %v76_v49   ;;  %v81_v49 = vld [vmem:[%s16528_s5 + $0x110] sm:$0xff] }
 0x165   :  { %v10961_v63 = vpop.permute.xlu1 %929 }
 0x166   :  { %16793 = vst [vmem:[#allocation87_spill] sm:$0xff] %v10961_v63  ;;  %v10966_v36 = vpop.permute.xlu0 %927 }
 0x167   :  { %16794 = vst [vmem:[#allocation88_spill] sm:$0xff] %v10966_v36  ;;  %1747 = vperm.xlu1 %9510, %v77_v50   ;;  %v82_v50 = vld [vmem:[%s16528_s5 + $0x118] sm:$0xff] }
 0x168   :  { %1752 = vperm.xlu0 %9509, %v78_v24  }
 0x169   :  { %v10971_v26 = vpop.permute.xlu1 %933 }
 0x16a   :  { %16795 = vst [vmem:[#allocation89_spill] sm:$0xff] %v10971_v26  ;;  %v10976_v63 = vpop.permute.xlu0 %931 }
 0x16b   :  { %16796 = vst [vmem:[#allocation90_spill] sm:$0xff] %v10976_v63  ;;  %1757 = vperm.xlu1 %9510, %v79_v12   ;;  %v16800_v63 = vld [vmem:[#allocation19_spill] sm:$0xff] }
 0x16c   :  { %1762 = vperm.xlu0 %9509, %v80_v0   ;;  %v16802_v0 = vld [vmem:[#allocation17_spill] sm:$0xff] }
 0x16d   :  { %v10981_v36 = vpop.permute.xlu1 %937  ;;  %v1026_v15 = vsel %vm16564_vm8, %v16803_v1, %v16802_v0 }
 0x16e   :  { %16797 = vst [vmem:[#allocation91_spill] sm:$0xff] %v10981_v36  ;;  %v10986_v26 = vpop.permute.xlu0 %935  ;;  %v1028_v36 = vsel %vm16564_vm8, %v16801_v31, %v16800_v63 }
 0x16f   :  { %1767 = vperm.xlu1 %9510, %v81_v49   ;;  %v1065_v49 = vsel %vm16563_vm9, %v1028_v36, %v10331_v29 }
 0x170   :  { %1772 = vperm.xlu0 %9509, %v82_v50   ;;  %v1063_v50 = vsel %vm16563_vm9, %v1026_v15, %v10334_v48  ;;  %v16804_v48 = vld [vmem:[#allocation16_spill] sm:$0xff] }
 0x171   :  { %v10988_v24 = vpop.permute.xlu1 %941  ;;  %v1100_v63 = vsel %vm16565_vm10, %v1063_v50, %v10440_v13  ;;  %v16806_v50 = vld [vmem:[#allocation13_spill] sm:$0xff] }
 0x172   :  { %16798 = vst [vmem:[#allocation92_spill] sm:$0xff] %v10988_v24  ;;  %v10990_v12 = vpop.permute.xlu0 %939  ;;  %v1137_v29 = vsel %vm1135_vm11, %v1100_v63, %v10541_v27 }
 0x173   :  { %16799 = vst [vmem:[#allocation93_spill] sm:$0xff] %v10990_v12  ;;  %v1102_v12 = vsel %vm16565_vm10, %v1065_v49, %v10438_v56  ;;  %v1030_v56 = vsel %vm16564_vm8, %v9799_v2, %v16804_v48  ;;  %v1174_v13 = vsel %vm16567_vm12, %v1137_v29, %v10711_v38 }
 0x174   :  { %v1139_v31 = vsel %vm1135_vm11, %v1102_v12, %v10534_v41  ;;  %v1067_v12 = vsel %vm16563_vm9, %v1030_v56, %v10347_v37  ;;  %v1211_v27 = vsel %vm16566_vm13, %v1174_v13, %v10836_v9 }
 0x175   :  { %v11000_v24 = vpop.permute.xlu1 %945  ;;  %v1176_v36 = vsel %vm16567_vm12, %v1139_v31, %v10708_v22  ;;  %v1104_v2 = vsel %vm16565_vm10, %v1067_v12, %v10447_v62  ;;  %v1248_v38 = vsel %vm16568_vm14, %v1211_v27, %v10926_v42 }
 0x176   :  { %v11010_v1 = vpop.permute.xlu0 %943  ;;  %v1213_v41 = vsel %vm16566_vm13, %v1176_v36, %v10831_v59  ;;  %v1141_v49 = vsel %vm1135_vm11, %v1104_v2, %v10553_v45  ;;  %v1034_v45 = vsel %vm16564_vm8, %v10639_v60, %v16806_v50 }
 0x177   :  { %v1250_v22 = vsel %vm16568_vm14, %v1213_v41, %v10921_v43  ;;  %v1178_v9 = vsel %vm16567_vm12, %v1141_v49, %v10731_v10  ;;  %v16805_v43 = vld [vmem:[#allocation18_spill] sm:$0xff] }
 0x178   :  { %v1032_v62 = vsel %vm16564_vm8, %v10633_v21, %v16805_v43  ;;  %v1215_v42 = vsel %vm16566_vm13, %v1178_v9, %v10846_v3  ;;  %v1071_v21 = vsel %vm16563_vm9, %v1034_v45, %v10360_v18  ;;  %v16816_v9 = vld [vmem:[#allocation63_spill] sm:$0xff] }
 0x179   :  { %v991_v15 = vpop.permute.xlu1 %990  ;;  %v1069_v63 = vsel %vm16563_vm9, %v1032_v62, %v10344_v47  ;;  %v1252_v10 = vsel %vm16568_vm14, %v1215_v42, %v10936_v58  ;;  %v1108_v60 = vsel %vm16565_vm10, %v1071_v21, %v10454_v40  ;;  %v16817_v42 = vld [vmem:[#allocation66_spill] sm:$0xff]  ;;  %v16818_v45 = vld [vmem:[#allocation75_spill] sm:$0xff] }
 0x17a   :  { %v1287_v0 = vsel %vm1283_vm15, %v1250_v22, %v991_v15  ;;  %v989_v59 = vpop.permute.xlu0 %988  ;;  %v1106_v3 = vsel %vm16565_vm10, %v1069_v63, %v10445_v5  ;;  %v16811_v22 = vld [vmem:[#allocation5_spill] sm:$0xff] }
 0x17b   :  { %v1285_v37 = vsel %vm1283_vm15, %v1248_v38, %v989_v59  ;;  %v1143_v47 = vsel %vm1135_vm11, %v1106_v3, %v10546_v51  ;;  %v16813_v38 = vld [vmem:[#allocation36_spill] sm:$0xff]  ;;  %v16820_v3 = vld [vmem:[#allocation86_spill] sm:$0xff] }
 0x17c   :  { %9244 = vmatprep.mubr.msk.bf16.mxu0 %vm1341_vm5, %v1285_v37  ;;  %v1180_v18 = vsel %vm16567_vm12, %v1143_v47, %v10728_v28  ;;  %v16815_v37 = vld [vmem:[#allocation14_spill] sm:$0xff] }
 0x17d   :  { %9245 = vmatmul.mubr.msk.bf16.vlgmr.msra.gmra.mxu0 %vm1341_vm5, %v1287_v0  ;;  %v995_v58 = vpop.permute.xlu1 %994  ;;  %v1217_v36 = vsel %vm16566_vm13, %v1180_v18, %v10841_v52  ;;  %v16823_v18 = vld [vmem:[#allocation55_spill] sm:$0xff] }
 0x17e   :  { %v993_v31 = vpop.permute.xlu0 %992  ;;  %9365 = vmatpush3.bf16.msra.mxu0 %v10572_v7  ;;  %v1145_v7 = vsel %vm1135_vm11, %v1108_v60, %v10574_v23  ;;  %v1254_v51 = vsel %vm16568_vm14, %v1217_v36, %v10931_v14  ;;  %v16824_v36 = vld [vmem:[#allocation24_spill] sm:$0xff] }
 0x17f   :  { %v1289_v29 = vsel %vm1283_vm15, %v1252_v10, %v993_v31  ;;  %9366 = vmatprep.subr.bf16.mxu0 %v10591_v30  ;;  %v1182_v5 = vsel %vm16567_vm12, %v1145_v7, %v10751_v34  ;;  %v1291_v28 = vsel %vm1283_vm15, %v1254_v51, %v995_v58  ;;  %v16807_v34 = vld [vmem:[#allocation12_spill] sm:$0xff]  ;;  %v16819_v31 = vld [vmem:[#allocation77_spill] sm:$0xff]  ;;  %v16826_v51 = vld [vmem:[#allocation7_spill] sm:$0xff] }
 0x180   :  { %9248 = vmatprep.mubr.msk.bf16.mxu0 %vm1341_vm5, %v1289_v29  ;;  %v1219_v40 = vsel %vm16566_vm13, %v1182_v5, %v10856_v16  ;;  %v1036_v52 = vsel %vm16564_vm8, %v10654_v33, %v16807_v34  ;;  %v16821_v29 = vld [vmem:[#allocation88_spill] sm:$0xff]  ;;  %v16822_v7 = vld [vmem:[#allocation21_spill] sm:$0xff] }
 0x181   :  { %v1256_v23 = vsel %vm16568_vm14, %v1219_v40, %v10946_v11  ;;  %v1073_v14 = vsel %vm16563_vm9, %v1036_v52, %v10357_v39  ;;  %v16808_v11 = vld [vmem:[#allocation6_spill] sm:$0xff]  ;;  %v1044_v58 = vsel %vm16564_vm8, %v16823_v18, %v16822_v7  ;;  %v16828_v52 = vld [vmem:[#allocation37_spill] sm:$0xff] }
 0x182   :  { %v997_v48 = vpop.permute.xlu0 %996  ;;  %9367 = vmatpush3.bf16.msra.mxu0 %v10591_v30  ;;  %v1038_v30 = vsel %vm16564_vm8, %v10660_v19, %v10258_v8  ;;  %v1110_v33 = vsel %vm16565_vm10, %v1073_v14, %v10452_v25  ;;  %v999_v19 = vpop.permute.xlu1 %998  ;;  %v16851_v7 = vld [vmem:[#allocation81_spill] sm:$0xff] }
 0x183   :  { %9368 = vmatprep.subr.bf16.mxu0 %v10606_v53  ;;  %v1293_v56 = vsel %vm1283_vm15, %v1256_v23, %v997_v48  ;;  %v1075_v16 = vsel %vm16563_vm9, %v1038_v30, %v16808_v11  ;;  %v1147_v41 = vsel %vm1135_vm11, %v1110_v33, %v10566_v61  ;;  %v16825_v48 = vld [vmem:[#allocation56_spill] sm:$0xff]  ;;  %v1081_v23 = vsel %vm16563_vm9, %v1044_v58, %v16826_v51  ;;  %v16830_v11 = vld [vmem:[#allocation15_spill] sm:$0xff]  ;;  %v16852_v58 = vld [vmem:[#allocation89_spill] sm:$0xff] }
 0x184   :  { %v1112_v13 = vsel %vm16565_vm10, %v1075_v16, %v10469_v20  ;;  %v1184_v39 = vsel %vm16567_vm12, %v1147_v41, %v10748_v44  ;;  %v16809_v44 = vld [vmem:[#allocation20_spill] sm:$0xff]  ;;  %v1046_v40 = vsel %vm16564_vm8, %v16825_v48, %v16824_v36  ;;  %v16832_v41 = vld [vmem:[#allocation65_spill] sm:$0xff]  ;;  %v16854_v51 = vld [vmem:[#allocation59_spill] sm:$0xff] }
 0x185   :  { %9249 = vmatmul.mubr.msk.bf16.gmra.mxu0 %vm1341_vm5, %v1291_v28  ;;  %v1149_v8 = vsel %vm1135_vm11, %v1112_v13, %v10598_v6  ;;  %v1221_v15 = vsel %vm16566_vm13, %v1184_v39, %v10851_v54  ;;  %v1040_v27 = vsel %vm16564_vm8, %v10678_v35, %v16809_v44  ;;  %v16810_v54 = vld [vmem:[#allocation22_spill] sm:$0xff]  ;;  %v16829_v30 = vld [vmem:[#allocation40_spill] sm:$0xff] }
 0x186   :  { %9252 = vmatprep.mubr.msk.bf16.mxu0 %vm1341_vm5, %v1293_v56  ;;  %9369 = vmatpush3.bf16.msra.mxu0 %v10606_v53  ;;  %v1186_v53 = vsel %vm16567_vm12, %v1149_v8, %v10771_v57  ;;  %v1001_v25 = vpop.permute.xlu0 %1000  ;;  %v1258_v61 = vsel %vm16568_vm14, %v1221_v15, %v10941_v32  ;;  %v1077_v32 = vsel %vm16563_vm9, %v1040_v27, %v16811_v22  ;;  %v16814_v35 = vld [vmem:[#allocation38_spill] sm:$0xff]  ;;  %v1003_v62 = vpop.permute.xlu1 %1002  ;;  %v16831_v33 = vld [vmem:[#allocation48_spill] sm:$0xff]  ;;  %v16839_v22 = vld [vmem:[#allocation57_spill] sm:$0xff] }
 0x187   :  { %v1223_v20 = vsel %vm16566_vm13, %v1186_v53, %v10866_v55  ;;  %v1295_v12 = vsel %vm1283_vm15, %v1258_v61, %v999_v19  ;;  %v1042_v55 = vsel %vm16564_vm8, %v10684_v46, %v16810_v54  ;;  %v1114_v0 = vsel %vm16565_vm10, %v1077_v32, %v16813_v38  ;;  %v16827_v28 = vld [vmem:[#allocation10_spill] sm:$0xff]  ;;  %v16833_v19 = vld [vmem:[#allocation68_spill] sm:$0xff]  ;;  %v16835_v61 = vld [vmem:[#allocation79_spill] sm:$0xff] }
 0x188   :  { %v1260_v6 = vsel %vm16568_vm14, %v1223_v20, %v10956_v17  ;;  %v16812_v17 = vld [vmem:[#allocation8_spill] sm:$0xff]  ;;  %v1151_v49 = vsel %vm1135_vm11, %v1114_v0, %v10594_v4  ;;  %v1083_v34 = vsel %vm16563_vm9, %v1046_v40, %v16827_v28  ;;  %v1118_v56 = vsel %vm16565_vm10, %v1081_v23, %v16828_v52  ;;  %v16837_v27 = vld [vmem:[#allocation90_spill] sm:$0xff]  ;;  %v16853_v40 = vld [vmem:[#allocation25_spill] sm:$0xff] }
 0x189   :  { %v1297_v57 = vsel %vm1283_vm15, %v1260_v6, %v1001_v25  ;;  %v1079_v2 = vsel %vm16563_vm9, %v1042_v55, %v16812_v17  ;;  %v1188_v43 = vsel %vm16567_vm12, %v1151_v49, %v16816_v9  ;;  %v1120_v14 = vsel %vm16565_vm10, %v1083_v34, %v16829_v30  ;;  %v16834_v15 = vld [vmem:[#allocation76_spill] sm:$0xff]  ;;  %v16838_v55 = vld [vmem:[#allocation23_spill] sm:$0xff]  ;;  %v16841_v38 = vld [vmem:[#allocation58_spill] sm:$0xff] }
 0x18a   :  { %v1116_v59 = vsel %vm16565_vm10, %v1079_v2, %v16814_v35  ;;  %v1225_v63 = vsel %vm16566_vm13, %v1188_v43, %v16818_v45  ;;  %v1005_v10 = vpop.permute.xlu0 %1004  ;;  %v1155_v16 = vsel %vm1135_vm11, %v1118_v56, %v16830_v11  ;;  %v1157_v13 = vsel %vm1135_vm11, %v1120_v14, %v16831_v33  ;;  %v1007_v39 = vpop.permute.xlu1 %1006  ;;  %v16840_v2 = vld [vmem:[#allocation26_spill] sm:$0xff]  ;;  %v16842_v35 = vld [vmem:[#allocation9_spill] sm:$0xff]  ;;  %v16843_v49 = vld [vmem:[#allocation31_spill] sm:$0xff] }
 0x18b   :  { %v1153_v46 = vsel %vm1135_vm11, %v1116_v59, %v16815_v37  ;;  %v1262_v4 = vsel %vm16568_vm14, %v1225_v63, %v16820_v3  ;;  %v1192_v8 = vsel %vm16567_vm12, %v1155_v16, %v16832_v41  ;;  %v1194_v53 = vsel %vm16567_vm12, %v1157_v13, %v16833_v19  ;;  %v16845_v43 = vld [vmem:[#allocation42_spill] sm:$0xff]  ;;  %v16855_v34 = vld [vmem:[#allocation28_spill] sm:$0xff]  ;;  %v16857_v30 = vld [vmem:[#allocation11_spill] sm:$0xff] }
 0x18c   :  { %v1190_v50 = vsel %vm16567_vm12, %v1153_v46, %v16817_v42  ;;  %v1299_v47 = vsel %vm1283_vm15, %v1262_v4, %v1003_v62  ;;  %v1229_v25 = vsel %vm16566_vm13, %v1192_v8, %v16834_v15  ;;  %v1231_v6 = vsel %vm16566_vm13, %v1194_v53, %v16835_v61  ;;  %v16844_v46 = vld [vmem:[#allocation39_spill] sm:$0xff]  ;;  %v16847_v45 = vld [vmem:[#allocation50_spill] sm:$0xff]  ;;  %v16856_v52 = vld [vmem:[#allocation60_spill] sm:$0xff] }
 0x18d   :  { %9253 = vmatmul.mubr.msk.bf16.gmra.mxu0 %vm1341_vm5, %v1295_v12  ;;  %v1227_v21 = vsel %vm16566_vm13, %v1190_v50, %v16819_v31  ;;  %v16836_v12 = vld [vmem:[#allocation87_spill] sm:$0xff]  ;;  %v1048_v32 = vsel %vm16564_vm8, %v16839_v22, %v16838_v55  ;;  %v1050_v0 = vsel %vm16564_vm8, %v16841_v38, %v16840_v2  ;;  %v16849_v3 = vld [vmem:[#allocation70_spill] sm:$0xff]  ;;  %v1052_v23 = vsel %vm16564_vm8, %v16854_v51, %v16853_v40  ;;  %v16859_v16 = vld [vmem:[#allocation41_spill] sm:$0xff] }
 0x18e   :  { %9256 = vmatprep.mubr.msk.bf16.mxu0 %vm1341_vm5, %v1297_v57  ;;  %v1264_v60 = vsel %vm16568_vm14, %v1227_v21, %v16821_v29  ;;  %v1009_v20 = vpop.permute.xlu0 %1008  ;;  %v1266_v44 = vsel %vm16568_vm14, %v1229_v25, %v16836_v12  ;;  %v1268_v57 = vsel %vm16568_vm14, %v1231_v6, %v16837_v27  ;;  %v1085_v59 = vsel %vm16563_vm9, %v1048_v32, %v16842_v35  ;;  %v16846_v42 = vld [vmem:[#allocation47_spill] sm:$0xff]  ;;  %v1011_v21 = vpop.permute.xlu1 %1010  ;;  %v16850_v29 = vld [vmem:[#allocation78_spill] sm:$0xff]  ;;  %v16860_v13 = vld [vmem:[#allocation44_spill] sm:$0xff] }
 0x18f   :  { %v1301_v5 = vsel %vm1283_vm15, %v1264_v60, %v1005_v10  ;;  %v1303_v54 = vsel %vm1283_vm15, %v1266_v44, %v1007_v39  ;;  %v1305_v17 = vsel %vm1283_vm15, %v1268_v57, %v1009_v20  ;;  %v1087_v37 = vsel %vm16563_vm9, %v1050_v0, %v16843_v49  ;;  %v16848_v10 = vld [vmem:[#allocation67_spill] sm:$0xff]  ;;  %v16861_v8 = vld [vmem:[#allocation49_spill] sm:$0xff]  ;;  %v16862_v19 = vld [vmem:[#allocation52_spill] sm:$0xff] }
 0x190   :  { %v1122_v9 = vsel %vm16565_vm10, %v1085_v59, %v16844_v46  ;;  %v1124_v62 = vsel %vm16565_vm10, %v1087_v37, %v16845_v43  ;;  %v1054_v56 = vsel %vm16564_vm8, %v16856_v52, %v16855_v34  ;;  %v1089_v14 = vsel %vm16563_vm9, %v1052_v23, %v16857_v30  ;;  %v16863_v15 = vld [vmem:[#allocation69_spill] sm:$0xff]  ;;  %v16864_v61 = vld [vmem:[#allocation72_spill] sm:$0xff]  ;;  %v16866_v57 = vld [vmem:[#allocation83_spill] sm:$0xff] }
 0x191   :  { %v1159_v50 = vsel %vm1135_vm11, %v1122_v9, %v16846_v42  ;;  %v1161_v63 = vsel %vm1135_vm11, %v1124_v62, %v16847_v45  ;;  %v1126_v33 = vsel %vm16565_vm10, %v1089_v14, %v16859_v16  ;;  %v16865_v12 = vld [vmem:[#allocation80_spill] sm:$0xff]  ;;  %v16867_v55 = vld [vmem:[#allocation91_spill] sm:$0xff]  ;;  %v16868_v32 = vld [vmem:[#allocation93_spill] sm:$0xff] }
 0x192   :  { %v1196_v31 = vsel %vm16567_vm12, %v1159_v50, %v16848_v10  ;;  %v1198_v4 = vsel %vm16567_vm12, %v1161_v63, %v16849_v3  ;;  %v1163_v39 = vsel %vm1135_vm11, %v1126_v33, %v16861_v8  ;;  %v1015_v20 = vpop.permute.xlu1 %1014  ;;  %v16869_v38 = vld [vmem:[#allocation27_spill] sm:$0xff]  ;;  %v16870_v0 = vld [vmem:[#allocation61_spill] sm:$0xff]  ;;  %v16871_v49 = vld [vmem:[#allocation30_spill] sm:$0xff] }
 0x193   :  { %v1233_v60 = vsel %vm16566_vm13, %v1196_v31, %v16850_v29  ;;  %v1235_v18 = vsel %vm16566_vm13, %v1198_v4, %v16851_v7  ;;  %v1200_v25 = vsel %vm16567_vm12, %v1163_v39, %v16863_v15  ;;  %v1056_v35 = vsel %vm16564_vm8, %v16870_v0, %v16869_v38  ;;  %v16872_v37 = vld [vmem:[#allocation62_spill] sm:$0xff]  ;;  %v16873_v9 = vld [vmem:[#allocation32_spill] sm:$0xff]  ;;  %v16874_v62 = vld [vmem:[#allocation35_spill] sm:$0xff] }
 0x194   :  { %v1272_v36 = vsel %vm16568_vm14, %v1235_v18, %v10986_v26  ;;  %v16858_v26 = vld [vmem:[#allocation33_spill] sm:$0xff]  ;;  %v1237_v44 = vsel %vm16566_vm13, %v1200_v25, %v16865_v12  ;;  %v1058_v46 = vsel %vm16564_vm8, %v16872_v37, %v16871_v49  ;;  %v1093_v43 = vsel %vm16563_vm9, %v1056_v35, %v16873_v9  ;;  %v16875_v50 = vld [vmem:[#allocation43_spill] sm:$0xff]  ;;  %v16876_v63 = vld [vmem:[#allocation46_spill] sm:$0xff] }
 0x195   :  { %9257 = vmatmul.mubr.msk.bf16.gmra.mxu0 %vm1341_vm5, %v1299_v47  ;;  %v1013_v47 = vpop.permute.xlu0 %1012  ;;  %v1091_v11 = vsel %vm16563_vm9, %v1054_v56, %v16858_v26  ;;  %v1274_v22 = vsel %vm16568_vm14, %v1237_v44, %v16867_v55  ;;  %v1095_v42 = vsel %vm16563_vm9, %v1058_v46, %v16874_v62  ;;  %v1130_v45 = vsel %vm16565_vm10, %v1093_v43, %v16875_v50  ;;  %v16877_v31 = vld [vmem:[#allocation51_spill] sm:$0xff]  ;;  %v16878_v3 = vld [vmem:[#allocation54_spill] sm:$0xff]  ;;  %v16883_v51 = vld [vmem:[#allocation92_spill] sm:$0xff] }
 0x196   :  { %9260 = vmatprep.mubr.msk.bf16.mxu0 %vm1341_vm5, %v1301_v5  ;;  %v1270_v5 = vsel %vm16568_vm14, %v1233_v60, %v16852_v58  ;;  %v1309_v28 = vsel %vm1283_vm15, %v1272_v36, %v1013_v47  ;;  %v1128_v41 = vsel %vm16565_vm10, %v1091_v11, %v16860_v13  ;;  %v1311_v2 = vsel %vm1283_vm15, %v1274_v22, %v1015_v20  ;;  %v16879_v29 = vld [vmem:[#allocation71_spill] sm:$0xff]  ;;  %v1019_v47 = vpop.permute.xlu1 %1018  ;;  %v16880_v7 = vld [vmem:[#allocation74_spill] sm:$0xff]  ;;  %v16884_v52 = vld [vmem:[#allocation29_spill] sm:$0xff] }
 0x197   :  { %v1307_v48 = vsel %vm1283_vm15, %v1270_v5, %v1011_v21  ;;  %v1165_v53 = vsel %vm1135_vm11, %v1128_v41, %v16862_v19  ;;  %v1132_v10 = vsel %vm16565_vm10, %v1095_v42, %v16876_v63  ;;  %v1167_v21 = vsel %vm1135_vm11, %v1130_v45, %v16877_v31  ;;  %v16881_v58 = vld [vmem:[#allocation82_spill] sm:$0xff]  ;;  %v16885_v56 = vld [vmem:[#allocation64_spill] sm:$0xff]  ;;  %v16887_v16 = vld [vmem:[#allocation45_spill] sm:$0xff] }
 0x198   :  { %v1202_v6 = vsel %vm16567_vm12, %v1165_v53, %v16864_v61  ;;  %v1169_v4 = vsel %vm1135_vm11, %v1132_v10, %v16878_v3  ;;  %v1204_v60 = vsel %vm16567_vm12, %v1167_v21, %v16879_v29  ;;  %v1060_v30 = vsel %vm16564_vm8, %v16885_v56, %v16884_v52  ;;  %v16886_v26 = vld [vmem:[#allocation34_spill] sm:$0xff]  ;;  %v16888_v13 = vld [vmem:[#allocation53_spill] sm:$0xff]  ;;  %v16890_v19 = vld [vmem:[#allocation84_spill] sm:$0xff] }
 0x199   :  { %v1017_v27 = vpop.permute.xlu0 %1016  ;;  %v1206_v18 = vsel %vm16567_vm12, %v1169_v4, %v16880_v7  ;;  %v1241_v5 = vsel %vm16566_vm13, %v1204_v60, %v16881_v58  ;;  %v1097_v11 = vsel %vm16563_vm9, %v1060_v30, %v16886_v26  ;;  %v16889_v41 = vld [vmem:[#allocation73_spill] sm:$0xff]  ;;  %vm30_vm9 = vcmask 58368   ;;  %v33_v61 = vld [vmem:[#allocation2 + $0x8] sm:$0x3]  ;;  %v39_v12 = vld [vmem:[#allocation2 + $0x98] sm:$0xe] }
 0x19a   :  { %v1278_v23 = vsel %vm16568_vm14, %v1241_v5, %v16883_v51  ;;  %v1134_v33 = vsel %vm16565_vm10, %v1097_v11, %v16887_v16  ;;  %v1023_v39 = vpop.permute.xlu1 %1022  ;;  %vm31_vm8 = vsmask.f32 1280  ;;  %v16891_v20 = vmov 0  ;;  %v11327_v22 = vld [vmem:[%s16529_s3] ss:$0 sm:$0xff] }
 0x19b   :  { %v1315_v34 = vsel %vm1283_vm15, %v1278_v23, %v1019_v47  ;;  %vm11308_vm10 = vmand %vm30_vm9, %vm31_vm8  ;;  %v2395_v37 = vld [vmem:[#allocation2] sm:$0xe]  ;;  %vm1919_vm9 = vsmask.f32 5392 }
 0x19c   :  { %v16892_v20 = vsel %vm11308_vm10, 4294967295, %v16891_v20 }
 0x19d   :  { %9261 = vmatmul.mubr.msk.bf16.gmra.mxu0 %vm1341_vm5, %v1303_v54  ;;  %v1239_v54 = vsel %vm16566_vm13, %v1202_v6, %v16866_v57  ;;  %v1021_v36 = vpop.permute.xlu0 %1020  ;;  %16893 = vst [vmem:[#allocation19_spill] sm:$0xff] %v16892_v20  ;;  %v34_v6 = vsel %vm11308_vm10, 0, %v33_v61  ;;  %v2358_v57 = vld [vmem:[#allocation2] sm:$0xf] }
 0x19e   :  { %9264 = vmatprep.mubr.msk.bf16.mxu0 %vm1341_vm5, %v1305_v17  ;;  %v1276_v17 = vsel %vm16568_vm14, %v1239_v54, %v16868_v32  ;;  %35 = vst [vmem:[#allocation2 + $0x8] sm:$0x3] %v34_v6  ;;  %v2359_v54 = vld [vmem:[#allocation2 + $0x4] sm:$0xf] }
 0x19f   :  { %v1313_v59 = vsel %vm1283_vm15, %v1276_v17, %v1017_v27  ;;  %v11329_v32 = vcombine.low %v2358_v57, %v2359_v54  ;;  %v8676_v63 = vcombine.low %v2395_v37, %v2359_v54  ;;  %v16907_v37 = vmov 0 }
 0x1a1   :  { %16899 = vst [vmem:[#allocation16_spill] sm:$0xff] %v11329_v32  ;;  %v2504_v35 = vshll.u32 %v11329_v32, 16  ;;  %v2502_v10 = vshrl.u32 %v11329_v32, 16  ;;  %v11349_v51 = vrot.slane %v8676_v63, 1 }
 0x1a3   :  { %v2506_v31 = vrot.slane %v2504_v35, 1 }
 0x1a5   :  { %9265 = vmatmul.mubr.msk.bf16.gmra.mxu0 %vm1341_vm5, %v1307_v48  ;;  %v16882_v48 = vld [vmem:[#allocation85_spill] sm:$0xff]  ;;  %v11351_v23 = vor.u32 %v2506_v31, %v2502_v10 }
 0x1a6   :  { %9268 = vmatprep.mubr.msk.bf16.mxu0 %vm1341_vm5, %v1309_v28  ;;  %v1243_v40 = vsel %vm16566_vm13, %v1206_v18, %v16882_v48  ;;  %v11320_v27 = vpop.permute.xlu1 %1602 }
 0x1a7   :  { %v1280_v28 = vsel %vm16568_vm14, %v1243_v40, %v11010_v1  ;;  %v1171_v1 = vsel %vm1135_vm11, %v1134_v33, %v16888_v13  ;;  %16897 = vst [vmem:[#allocation17_spill] sm:$0xff] %v11320_v27  ;;  %v11331_v17 = vpop.permute.xlu0 %1597 }
 0x1a8   :  { %v1317_v14 = vsel %vm1283_vm15, %v1280_v28, %v1021_v36  ;;  %v1208_v8 = vsel %vm16567_vm12, %v1171_v1, %v16889_v41  ;;  %vm37_vm12 = vsmask.f32 7942  ;;  %16900 = vst [vmem:[#allocation18_spill] sm:$0xff] %v11331_v17 }
 0x1a9   :  { %v1245_v53 = vsel %vm16566_vm13, %v1208_v8, %v16890_v19  ;;  %vm36_vm13 = vcmask 60417  }
 0x1aa   :  { %v1282_v15 = vsel %vm16568_vm14, %v1245_v53, %v11000_v24  ;;  %vm11314_vm14 = vmand %vm36_vm13, %vm37_vm12  ;;  %v16894_v24 = vmov 0  ;;  %v11322_v55 = vpop.permute.xlu1 %1607  ;;  %vm17111_vm13 = vcmask 64512  }
 0x1ab   :  { %v1319_v25 = vsel %vm1283_vm15, %v1282_v15, %v1023_v39  ;;  %v16895_v24 = vsel %vm11314_vm14, 4294967295, %v16894_v24  ;;  %v40_v44 = vsel %vm11314_vm14, 0, %v39_v12  ;;  %16898 = vst [vmem:[#allocation3_spill] sm:$0xff] %v11322_v55  ;;  %v11338_v43 = vpop.permute.xlu0 %1612  ;;  %v2317_v39 = vld [vmem:[#allocation2 + $0x8] sm:$0xe]  ;;  %vm11365_vm12 = vmor %vm31_vm8, %vm1919_vm9  ;;  %vm17110_vm8 = vcmask 31744  }
 0x1ac   :  { %16896 = vst [vmem:[#allocation4_spill] sm:$0xff] %v16895_v24  ;;  %41 = vst [vmem:[#allocation2 + $0x98] sm:$0xe] %v40_v44  ;;  %v16908_v37 = vsel %vm11365_vm12, 4294967295, %v16907_v37 }
 0x1ad   :  { %9269 = vmatmul.mubr.msk.bf16.gmra.mxu0 %vm1341_vm5, %v1311_v2  ;;  %16902 = vst [vmem:[#allocation12_spill] sm:$0xff] %v11338_v43  ;;  %16909 = vst [vmem:[#allocation8_spill] sm:$0xff] %v16908_v37 }
 0x1ae   :  { %9272 = vmatprep.mubr.msk.bf16.mxu0 %vm1341_vm5, %v1313_v59  ;;  %v11336_v46 = vpop.permute.xlu1 %1617  ;;  %vm17113_vm9 = vmmov %vm17110_vm8 }
 0x1af   :  { %16901 = vst [vmem:[#allocation13_spill] sm:$0xff] %v11336_v46  ;;  %v11353_v28 = vpop.permute.xlu0 %1622 }
 0x1b0   :  { %16904 = vst [vmem:[#allocation20_spill] sm:$0xff] %v11353_v28 }
 0x1b2   :  { %v11346_v5 = vpop.permute.xlu1 %1627 }
 0x1b3   :  { %16903 = vst [vmem:[#allocation6_spill] sm:$0xff] %v11346_v5 }
 0x1b5   :  { %9273 = vmatmul.mubr.msk.bf16.gmra.mxu0 %vm1341_vm5, %v1315_v34 }
 0x1b6   :  { %9276 = vmatprep.mubr.msk.bf16.mxu0 %vm1341_vm5, %v1317_v14  ;;  %v11359_v54 = vpop.permute.xlu1 %1637 }
 0x1b7   :  { %16905 = vst [vmem:[#allocation22_spill] sm:$0xff] %v11359_v54 }
 0x1bd   :  { %9277 = vmatmul.mubr.msk.bf16.gmra.mxu0 %vm1341_vm5, %v1319_v25 }
 0x23d   :  { %v9246_v2 = vpop.f32.mrf.mxu0 }
 0x23e   :  { %v1425_v38 = vadd.f32 %v9246_v2, %v11327_v22 }
 0x23f   :  { %v1416_v0 = vpop.f32.mrf.mxu0 }
 0x240   :  { %v1561_v59 = vmax.f32 %v1425_v38, 0.0  ;;  %v1417_v49 = vadd.f32 %v11327_v22, %v1416_v0 }
 0x241   :  { %v9247_v9 = vpop.f32.mrf.mxu0 }
 0x242   :  { %v1777_v62 = vmul.f32 %v11322_v55, %v1561_v59  ;;  %v1559_v42 = vmax.f32 %v1417_v49, 0.0  ;;  %v1428_v50 = vadd.f32 %v9247_v9, %v11327_v22  ;;  %v11361_v49 = vpop.permute.xlu0 %1632 }
 0x243   :  { %v1419_v45 = vpop.f32.mrf.mxu0  ;;  %16906 = vst [vmem:[#allocation5_spill] sm:$0xff] %v11361_v49 }
 0x244   :  { %v9042_v21 = vpack.c.bf16 %v1777_v62, %v1777_v62  ;;  %v1775_v3 = vmul.f32 %v11331_v17, %v1559_v42  ;;  %v1562_v4 = vmax.f32 %v1428_v50, 0.0  ;;  %v1420_v29 = vadd.f32 %v11327_v22, %v1419_v45 }
 0x245   :  { %v9250_v60 = vpop.f32.mrf.mxu0 }
 0x246   :  { %v1941_v47 = vshrl.u32 %v9042_v21, 16  ;;  %v1944_v7 = vshll.u32 %v9042_v21, 16  ;;  %v9040_v18 = vpack.c.bf16 %v1775_v3, %v1775_v3  ;;  %v1778_v58 = vmul.f32 %v11338_v43, %v1562_v4 }
 0x247   :  { %v1560_v36 = vmax.f32 %v1420_v29, 0.0  ;;  %v1441_v48 = vadd.f32 %v9250_v60, %v11327_v22  ;;  %v1432_v40 = vpop.f32.mrf.mxu0 }
 0x248   :  { %v1943_v34 = vrot.slane %v1941_v47, 6  ;;  %v1946_v52 = vrot.slane %v1944_v7, 7  ;;  %v1922_v56 = vshrl.u32 %v9040_v18, 16  ;;  %v1925_v30 = vshll.u32 %v9040_v18, 16 }
 0x249   :  { %v9043_v14 = vpack.c.bf16 %v1778_v58, %v1778_v58  ;;  %v1776_v26 = vmul.f32 %v11320_v27, %v1560_v36  ;;  %v1565_v11 = vmax.f32 %v1441_v48, 0.0  ;;  %v1433_v16 = vadd.f32 %v11327_v22, %v1432_v40  ;;  %v9251_v33 = vpop.f32.mrf.mxu0 }
 0x24a   :  { %v1947_v13 = vor.u32 %v1946_v52, %v1943_v34  ;;  %v1924_v1 = vrot.slane %v1922_v56, 6  ;;  %v1927_v41 = vrot.slane %v1925_v30, 7  ;;  %v1444_v8 = vadd.f32 %v9251_v33, %v11327_v22  ;;  %v11377_v56 = vpop.permute.xlu1 %1647  ;;  %v11381_v33 = vpop.permute.xlu0 %1642 }
 0x24b   :  { %v1951_v19 = vshrl.u32 %v9043_v14, 16  ;;  %v1954_v53 = vshll.u32 %v9043_v14, 16  ;;  %v9041_v15 = vpack.c.bf16 %v1776_v26, %v1776_v26  ;;  %v1781_v25 = vmul.f32 %v11346_v5, %v1565_v11  ;;  %v1435_v61 = vpop.f32.mrf.mxu0  ;;  %16910 = vst [vmem:[#allocation36_spill] sm:$0xff] %v11377_v56  ;;  %16911 = vst [vmem:[#allocation38_spill] sm:$0xff] %v11381_v33 }
 0x24c   :  { %v1949_v6 = vrot.slane %v1947_v13, 4  ;;  %v1928_v12 = vor.u32 %v1927_v41, %v1924_v1  ;;  %v1563_v44 = vmax.f32 %v1433_v16, 0.0  ;;  %v1566_v57 = vmax.f32 %v1444_v8, 0.0 }
 0x24d   :  { %v1953_v2 = vrot.slane %v1951_v19, 6  ;;  %v1956_v38 = vrot.slane %v1954_v53, 7  ;;  %v1931_v0 = vshrl.u32 %v9041_v15, 16  ;;  %v1934_v35 = vshll.u32 %v9041_v15, 16  ;;  %v9254_v59 = vpop.f32.mrf.mxu0 }
 0x24e   :  { %v1929_v9 = vrot.slane %v1928_v12, 4  ;;  %v2318_v62 = vsel %vm11314_vm14, %v1928_v12, %v2317_v39  ;;  %v9046_v42 = vpack.c.bf16 %v1781_v25, %v1781_v25  ;;  %v1779_v50 = vmul.f32 %v11336_v46, %v1563_v44 }
 0x24f   :  { %2319 = vst [vmem:[#allocation2 + $0x8] sm:$0xe] %v2318_v62  ;;  %v1957_v45 = vor.u32 %v1956_v38, %v1953_v2  ;;  %v1933_v63 = vrot.slane %v1931_v0, 6  ;;  %v1936_v10 = vrot.slane %v1934_v35, 7  ;;  %v1782_v31 = vmul.f32 %v11361_v49, %v1566_v57  ;;  %v1448_v21 = vpop.f32.mrf.mxu0 }
 0x250   :  { %v1981_v3 = vshrl.u32 %v9046_v42, 16  ;;  %v1984_v4 = vshll.u32 %v9046_v42, 16  ;;  %v9044_v29 = vpack.c.bf16 %v1779_v50, %v1779_v50  ;;  %v1436_v60 = vadd.f32 %v11327_v22, %v1435_v61  ;;  %v11399_v50 = vpop.permute.xlu1 %1657 }
 0x251   :  { %v1958_v47 = vsel %vm11365_vm12, %v1949_v6, %v1957_v45  ;;  %v1959_v7 = vrot.slane %v1957_v45, 4  ;;  %v1937_v18 = vor.u32 %v1936_v10, %v1933_v63  ;;  %v9047_v58 = vpack.c.bf16 %v1782_v31, %v1782_v31  ;;  %v9255_v36 = vpop.f32.mrf.mxu0  ;;  %16912 = vst [vmem:[#allocation14_spill] sm:$0xff] %v11399_v50 }
 0x252   :  { %2322 = vst.msk [vmem:[#allocation2 + $0x14] sm:$0xf] %vm16655_vm7, %v1958_v47  ;;  %v1983_v48 = vrot.slane %v1981_v3, 6  ;;  %v1986_v40 = vrot.slane %v1984_v4, 7  ;;  %v1961_v34 = vshrl.u32 %v9044_v29, 16  ;;  %v1964_v52 = vshll.u32 %v9044_v29, 16  ;;  %v11407_v3 = vpop.permute.xlu0 %1652 }
 0x253   :  { %v1938_v30 = vsel %vm11365_vm12, %v1929_v9, %v1937_v18  ;;  %v1939_v14 = vrot.slane %v1937_v18, 4  ;;  %v1991_v26 = vshrl.u32 %v9047_v58, 16  ;;  %v1994_v11 = vshll.u32 %v9047_v58, 16  ;;  %v1451_v16 = vpop.f32.mrf.mxu0  ;;  %16913 = vst [vmem:[#allocation63_spill] sm:$0xff] %v11407_v3 }
 0x254   :  { %2320 = vst.msk [vmem:[#allocation2 + $0xc] sm:$0xf] %vm16655_vm7, %v1938_v30  ;;  %v11384_v1 = vor.u32 %v1986_v40, %v1983_v48  ;;  %v1963_v41 = vrot.slane %v1961_v34, 6  ;;  %v1966_v8 = vrot.slane %v1964_v52, 7  ;;  %v1564_v39 = vmax.f32 %v1436_v60, 0.0 }
 0x255   :  { %v1948_v19 = vsel %vm11365_vm12, %v1939_v14, %v1947_v13  ;;  %v1993_v53 = vrot.slane %v1991_v26, 6  ;;  %v1996_v15 = vrot.slane %v1994_v11, 7  ;;  %v1457_v25 = vadd.f32 %v9254_v59, %v11327_v22  ;;  %v9258_v61 = vpop.f32.mrf.mxu0 }
 0x256   :  { %2321 = vst.msk [vmem:[#allocation2 + $0x10] sm:$0xf] %vm16655_vm7, %v1948_v19  ;;  %v1989_v6 = vrot.slane %v11384_v1, 4  ;;  %v1967_v12 = vor.u32 %v1966_v8, %v1963_v41  ;;  %v1780_v44 = vmul.f32 %v11353_v28, %v1564_v39  ;;  %v1449_v57 = vadd.f32 %v11327_v22, %v1448_v21 }
 0x257   :  { %v11393_v2 = vor.u32 %v1996_v15, %v1993_v53  ;;  %v1569_v38 = vmax.f32 %v1457_v25, 0.0  ;;  %v1460_v0 = vadd.f32 %v9255_v36, %v11327_v22  ;;  %v1452_v13 = vadd.f32 %v11327_v22, %v1451_v16  ;;  %v1464_v35 = vpop.f32.mrf.mxu0  ;;  %v11415_v15 = vpop.permute.xlu1 %1667 }
 0x258   :  { %v1968_v59 = vsel %vm11365_vm12, %v1959_v7, %v1967_v12  ;;  %v1969_v9 = vrot.slane %v1967_v12, 4  ;;  %v9045_v62 = vpack.c.bf16 %v1780_v44, %v1780_v44  ;;  %v1567_v42 = vmax.f32 %v1449_v57, 0.0  ;;  %16914 = vst [vmem:[#allocation66_spill] sm:$0xff] %v11415_v15 }
 0x259   :  { %2323 = vst.msk [vmem:[#allocation2 + $0x18] sm:$0xf] %vm16655_vm7, %v1968_v59  ;;  %v1998_v45 = vsel %vm11365_vm12, %v1989_v6, %v11393_v2  ;;  %v1999_v63 = vrot.slane %v11393_v2, 4  ;;  %v1785_v10 = vmul.f32 %v11377_v56, %v1569_v38  ;;  %v1570_v31 = vmax.f32 %v1460_v0, 0.0  ;;  %v9259_v21 = vpop.f32.mrf.mxu0 }
 0x25a   :  { %2326 = vst.msk [vmem:[#allocation2 + $0x24] sm:$0xf] %vm16655_vm7, %v1998_v45  ;;  %v1971_v4 = vshrl.u32 %v9045_v62, 16  ;;  %v1974_v29 = vshll.u32 %v9045_v62, 16  ;;  %v1783_v60 = vmul.f32 %v11359_v54, %v1567_v42  ;;  %v1568_v47 = vmax.f32 %v1452_v13, 0.0  ;;  %v11420_v42 = vpop.permute.xlu0 %1662 }
 0x25b   :  { %v9050_v7 = vpack.c.bf16 %v1785_v10, %v1785_v10  ;;  %v1786_v18 = vmul.f32 %v11407_v3, %v1570_v31  ;;  %v1473_v58 = vadd.f32 %v9258_v61, %v11327_v22  ;;  %v1465_v36 = vadd.f32 %v11327_v22, %v1464_v35  ;;  %v1467_v48 = vpop.f32.mrf.mxu0  ;;  %16915 = vst [vmem:[#allocation75_spill] sm:$0xff] %v11420_v42 }
 0x25c   :  { %v1973_v40 = vrot.slane %v1971_v4, 6  ;;  %v1976_v34 = vrot.slane %v1974_v29, 7  ;;  %v9048_v52 = vpack.c.bf16 %v1783_v60, %v1783_v60  ;;  %v1784_v30 = vmul.f32 %v11381_v33, %v1568_v47 }
 0x25d   :  { %v2021_v14 = vshrl.u32 %v9050_v7, 16  ;;  %v2024_v26 = vshll.u32 %v9050_v7, 16  ;;  %v9051_v11 = vpack.c.bf16 %v1786_v18, %v1786_v18  ;;  %v1573_v16 = vmax.f32 %v1473_v58, 0.0  ;;  %v9262_v41 = vpop.f32.mrf.mxu0 }
 0x25e   :  { %v1977_v8 = vor.u32 %v1976_v34, %v1973_v40  ;;  %v2001_v39 = vshrl.u32 %v9048_v52, 16  ;;  %v2004_v19 = vshll.u32 %v9048_v52, 16  ;;  %v9049_v53 = vpack.c.bf16 %v1784_v30, %v1784_v30  ;;  %v11429_v52 = vpop.permute.xlu1 %1677 }
 0x25f   :  { %v2023_v25 = vrot.slane %v2021_v14, 6  ;;  %v2026_v61 = vrot.slane %v2024_v26, 7  ;;  %v2031_v6 = vshrl.u32 %v9051_v11, 16  ;;  %v2034_v12 = vshll.u32 %v9051_v11, 16  ;;  %v1480_v0 = vpop.f32.mrf.mxu0  ;;  %16916 = vst [vmem:[#allocation77_spill] sm:$0xff] %v11429_v52 }
 0x260   :  { %v1978_v44 = vsel %vm11365_vm12, %v1969_v9, %v1977_v8  ;;  %v1979_v57 = vrot.slane %v1977_v8, 4  ;;  %v2003_v2 = vrot.slane %v2001_v39, 6  ;;  %v2006_v38 = vrot.slane %v2004_v19, 7 }
 0x261   :  { %2324 = vst.msk [vmem:[#allocation2 + $0x1c] sm:$0xf] %vm16655_vm7, %v1978_v44  ;;  %v2027_v13 = vor.u32 %v2026_v61, %v2023_v25  ;;  %v2033_v35 = vrot.slane %v2031_v6, 6  ;;  %v2036_v59 = vrot.slane %v2034_v12, 7  ;;  %v2011_v62 = vshrl.u32 %v9049_v53, 16  ;;  %v9263_v34 = vpop.f32.mrf.mxu0  ;;  %v11440_v25 = vpop.permute.xlu0 %1672 }
 0x262   :  { %v1988_v45 = vsel %vm11365_vm12, %v1979_v57, %v11384_v1  ;;  %v2007_v10 = vor.u32 %v2006_v38, %v2003_v2  ;;  %v2014_v31 = vshll.u32 %v9049_v53, 16  ;;  %v1789_v9 = vmul.f32 %v11415_v15, %v1573_v16  ;;  %16917 = vst [vmem:[#allocation86_spill] sm:$0xff] %v11440_v25 }
 0x263   :  { %2325 = vst.msk [vmem:[#allocation2 + $0x20] sm:$0xf] %vm16655_vm7, %v1988_v45  ;;  %v2029_v4 = vrot.slane %v2027_v13, 4  ;;  %v2037_v29 = vor.u32 %v2036_v59, %v2033_v35  ;;  %v2013_v60 = vrot.slane %v2011_v62, 6  ;;  %v1571_v47 = vmax.f32 %v1465_v36, 0.0  ;;  %v1483_v44 = vpop.f32.mrf.mxu0  ;;  %v11450_v45 = vpop.permute.xlu1 %1687 }
 0x264   :  { %v2008_v7 = vsel %vm11365_vm12, %v1999_v63, %v2007_v10  ;;  %v2009_v18 = vrot.slane %v2007_v10, 4  ;;  %v2016_v58 = vrot.slane %v2014_v31, 7  ;;  %v9054_v40 = vpack.c.bf16 %v1789_v9, %v1789_v9  ;;  %v2361_v35 = vld [vmem:[#allocation2 + $0xc] sm:$0xf]  ;;  %16918 = vst [vmem:[#allocation88_spill] sm:$0xff] %v11450_v45 }
 0x265   :  { %2327 = vst.msk [vmem:[#allocation2 + $0x28] sm:$0xf] %vm16655_vm7, %v2008_v7  ;;  %v2038_v1 = vsel %vm11365_vm12, %v2029_v4, %v2037_v29  ;;  %v2039_v30 = vrot.slane %v2037_v29, 4  ;;  %v1787_v14 = vmul.f32 %v11399_v50, %v1571_v47  ;;  %v1476_v26 = vadd.f32 %v9259_v21, %v11327_v22  ;;  %v2360_v29 = vld [vmem:[#allocation2 + $0x8] sm:$0xf] }
 0x266   :  { %2330 = vst.msk [vmem:[#allocation2 + $0x34] sm:$0xf] %vm16655_vm7, %v2038_v1  ;;  %v2017_v36 = vor.u32 %v2016_v58, %v2013_v60  ;;  %v2061_v63 = vshrl.u32 %v9054_v40, 16  ;;  %v2064_v11 = vshll.u32 %v9054_v40, 16  ;;  %v1468_v16 = vadd.f32 %v11327_v22, %v1467_v48 }
 0x267   :  { %v9052_v8 = vpack.c.bf16 %v1787_v14, %v1787_v14  ;;  %v1574_v39 = vmax.f32 %v1476_v26, 0.0  ;;  %v1489_v19 = vadd.f32 %v9262_v41, %v11327_v22  ;;  %v1481_v53 = vadd.f32 %v11327_v22, %v1480_v0 }
 0x268   :  { %v2018_v61 = vsel %vm11365_vm12, %v2009_v18, %v2017_v36  ;;  %v2019_v6 = vrot.slane %v2017_v36, 4  ;;  %v2063_v21 = vrot.slane %v2061_v63, 6  ;;  %v2066_v12 = vrot.slane %v2064_v11, 7  ;;  %v9266_v18 = vpop.f32.mrf.mxu0 }
 0x269   :  { %2328 = vst.msk [vmem:[#allocation2 + $0x2c] sm:$0xf] %vm16655_vm7, %v2018_v61  ;;  %v2041_v57 = vshrl.u32 %v9052_v8, 16  ;;  %v2044_v2 = vshll.u32 %v9052_v8, 16  ;;  %v1790_v48 = vmul.f32 %v11440_v25, %v1574_v39  ;;  %v1572_v38 = vmax.f32 %v1468_v16, 0.0  ;;  %v11461_v16 = vpop.permute.xlu0 %1682 }
 0x26a   :  { %v2028_v41 = vsel %vm11365_vm12, %v2019_v6, %v2027_v13  ;;  %v11448_v0 = vor.u32 %v2066_v12, %v2063_v21  ;;  %v1577_v59 = vmax.f32 %v1489_v19, 0.0  ;;  %v1575_v62 = vmax.f32 %v1481_v53, 0.0  ;;  %16920 = vst [vmem:[#allocation55_spill] sm:$0xff] %v11461_v16 }
 0x26b   :  { %2329 = vst.msk [vmem:[#allocation2 + $0x30] sm:$0xf] %vm16655_vm7, %v2028_v41  ;;  %v2043_v10 = vrot.slane %v2041_v57, 6  ;;  %v2046_v31 = vrot.slane %v2044_v2, 7  ;;  %v9055_v9 = vpack.c.bf16 %v1790_v48, %v1790_v48  ;;  %v1788_v4 = vmul.f32 %v11420_v42, %v1572_v38  ;;  %v1496_v57 = vpop.f32.mrf.mxu0 }
 0x26c   :  { %v2069_v60 = vrot.slane %v11448_v0, 4  ;;  %v1793_v47 = vmul.f32 %v11450_v45, %v1577_v59  ;;  %v1791_v13 = vmul.f32 %v11429_v52, %v1575_v62  ;;  %v11457_v7 = vcombine.low %v2360_v29, %v2361_v35  ;;  %v2362_v35 = vld [vmem:[#allocation2 + $0x10] sm:$0xf] }
 0x26d   :  { %v2047_v58 = vor.u32 %v2046_v31, %v2043_v10  ;;  %v2071_v40 = vshrl.u32 %v9055_v9, 16  ;;  %v2074_v1 = vshll.u32 %v9055_v9, 16  ;;  %v9053_v14 = vpack.c.bf16 %v1788_v4, %v1788_v4 }
 0x26e   :  { %16919 = vst [vmem:[#allocation21_spill] sm:$0xff] %v11457_v7  ;;  %v9058_v26 = vpack.c.bf16 %v1793_v47, %v1793_v47  ;;  %v9056_v36 = vpack.c.bf16 %v1791_v13, %v1791_v13  ;;  %v2689_v63 = vrot.slane %v11457_v7, 1  ;;  %v1492_v11 = vadd.f32 %v9263_v34, %v11327_v22 }
 0x26f   :  { %v2048_v8 = vsel %vm11365_vm12, %v2039_v30, %v2047_v58  ;;  %v2049_v39 = vrot.slane %v2047_v58, 4  ;;  %v2073_v19 = vrot.slane %v2071_v40, 6  ;;  %v2076_v53 = vrot.slane %v2074_v1, 7  ;;  %v2363_v58 = vld [vmem:[#allocation2 + $0x14] sm:$0xf]  ;;  %v9267_v40 = vpop.f32.mrf.mxu0  ;;  %v11477_v1 = vpop.permute.xlu0 %1692 }
 0x270   :  { %2331 = vst.msk [vmem:[#allocation2 + $0x38] sm:$0xf] %vm16655_vm7, %v2048_v8  ;;  %v2051_v61 = vshrl.u32 %v9053_v14, 16  ;;  %v2054_v6 = vshll.u32 %v9053_v14, 16  ;;  %v2101_v21 = vshrl.u32 %v9058_v26, 16  ;;  %v2104_v12 = vshll.u32 %v9058_v26, 16  ;;  %v11479_v14 = vpop.permute.xlu1 %1697 }
 0x271   :  { %v2077_v2 = vor.u32 %v2076_v53, %v2073_v19  ;;  %v2081_v48 = vshrl.u32 %v9056_v36, 16  ;;  %v2084_v38 = vshll.u32 %v9056_v36, 16  ;;  %v2690_v34 = vsel %vm16658_vm1, %v11349_v51, %v2689_v63  ;;  %16921 = vst [vmem:[#allocation24_spill] sm:$0xff] %v11477_v1  ;;  %16922 = vst [vmem:[#allocation56_spill] sm:$0xff] %v11479_v14 }
 0x272   :  { %v2053_v30 = vrot.slane %v2051_v61, 6  ;;  %v2056_v41 = vrot.slane %v2054_v6, 7  ;;  %v2103_v59 = vrot.slane %v2101_v21, 6  ;;  %v2106_v62 = vrot.slane %v2104_v12, 7  ;;  %2725 = vrot.lane.b32.xlu1 %v2690_v34, %s9743_s11 }
 0x273   :  { %v2078_v10 = vsel %vm11365_vm12, %v2069_v60, %v2077_v2  ;;  %v2079_v31 = vrot.slane %v2077_v2, 4  ;;  %v2083_v9 = vrot.slane %v2081_v48, 6  ;;  %v2086_v4 = vrot.slane %v2084_v38, 7  ;;  %v11496_v2 = vld [vmem:[#allocation2 + $0x18] sm:$0xff]  }
 0x274   :  { %2334 = vst.msk [vmem:[#allocation2 + $0x44] sm:$0xf] %vm16655_vm7, %v2078_v10  ;;  %v2057_v29 = vor.u32 %v2056_v41, %v2053_v30  ;;  %v11474_v47 = vor.u32 %v2106_v62, %v2103_v59  ;;  %v1578_v13 = vmax.f32 %v1492_v11, 0.0  ;;  %v1484_v51 = vadd.f32 %v11327_v22, %v1483_v44 }
 0x275   :  { %v11481_v26 = vor.u32 %v2086_v4, %v2083_v9  ;;  %v2509_v60 = vshll.u32 %v11457_v7, 16  ;;  %v11484_v36 = vcombine.low %v2362_v35, %v2363_v58  ;;  %v2513_v8 = vshrl.u32 %v11457_v7, 16  ;;  %v1499_v35 = vpop.f32.mrf.mxu0 }
 0x276   :  { %v2058_v19 = vsel %vm11365_vm12, %v2049_v39, %v2057_v29  ;;  %v2059_v11 = vrot.slane %v2057_v29, 4  ;;  %v2109_v44 = vrot.slane %v11474_v47, 4  ;;  %v1794_v53 = vmul.f32 %v11477_v1, %v1578_v13 }
 0x277   :  { %16923 = vst [vmem:[#allocation7_spill] sm:$0xff] %v11484_v36  ;;  %2332 = vst.msk [vmem:[#allocation2 + $0x3c] sm:$0xf] %vm16655_vm7, %v2058_v19  ;;  %v2088_v61 = vsel %vm11365_vm12, %v2079_v31, %v11481_v26  ;;  %v2089_v6 = vrot.slane %v11481_v26, 4  ;;  %v1576_v21 = vmax.f32 %v1484_v51, 0.0  ;;  %v2511_v12 = vrot.slane %v2509_v60, 1  ;;  %v11520_v19 = vpop.permute.xlu0 %1702 }
 0x278   :  { %v2068_v39 = vsel %vm11365_vm12, %v2059_v11, %v11448_v0  ;;  %2335 = vst.msk [vmem:[#allocation2 + $0x48] sm:$0xf] %vm16655_vm7, %v2088_v61  ;;  %v9059_v48 = vpack.c.bf16 %v1794_v53, %v1794_v53  ;;  %v16569_v38 = vshll.u32 %v11484_v36, 16  ;;  %v1505_v34 = vadd.f32 %v9266_v18, %v11327_v22  ;;  %v11512_v18 = vpop.permute.xlu1 %1707  ;;  %16925 = vst [vmem:[#allocation37_spill] sm:$0xff] %v11520_v19 }
 0x279   :  { %2333 = vst.msk [vmem:[#allocation2 + $0x40] sm:$0xf] %vm16655_vm7, %v2068_v39  ;;  %v1792_v30 = vmul.f32 %v11461_v16, %v1576_v21  ;;  %v2512_v41 = vsel %vm242_vm0, %v11351_v23, %v2511_v12  ;;  %v2515_v59 = vor.u32 %v2513_v8, %v2511_v12  ;;  %v1497_v62 = vadd.f32 %v11327_v22, %v1496_v57  ;;  %v9270_v8 = vpop.f32.mrf.mxu0 }
 0x27a   :  { %v2111_v10 = vshrl.u32 %v9059_v48, 16  ;;  %v2114_v0 = vshll.u32 %v9059_v48, 16  ;;  %2649 = vrot.lane.b32.xlu1 %v2512_v41, %s9741_s28  ;;  %v2519_v31 = vrot.slane %v16569_v38, 1  ;;  %v1581_v9 = vmax.f32 %v1505_v34, 0.0  ;;  %16924 = vst [vmem:[#allocation10_spill] sm:$0xff] %v11512_v18 }
 0x27b   :  { %v9057_v4 = vpack.c.bf16 %v1792_v30, %v1792_v30  ;;  %v1579_v29 = vmax.f32 %v1497_v62, 0.0  ;;  %v11515_v13 = vrot.slane %v11484_v36, 1  ;;  %v16571_v23 = vrot.slane %v11496_v2, 1 }
 0x27c   :  { %v2113_v51 = vrot.slane %v2111_v10, 6  ;;  %v2116_v58 = vrot.slane %v2114_v0, 7  ;;  %v2520_v57 = vsel %vm242_vm0, %v2515_v59, %v2519_v31  ;;  %v1797_v60 = vmul.f32 %v11512_v18, %v1581_v9 }
 0x27d   :  { %v2091_v11 = vshrl.u32 %v9057_v4, 16  ;;  %v2094_v53 = vshll.u32 %v9057_v4, 16  ;;  %2651 = vrot.lane.b32.xlu0 %v2520_v57, %s9741_s28  ;;  %v1795_v61 = vmul.f32 %v11479_v14, %v1579_v29  ;;  %v2692_v21 = vsel %vm16658_vm1, %v2689_v63, %v11515_v13  ;;  %v1512_v4 = vpop.f32.mrf.mxu0 }
 0x27e   :  { %v2117_v12 = vor.u32 %v2116_v58, %v2113_v51  ;;  %v9062_v39 = vpack.c.bf16 %v1797_v60, %v1797_v60  ;;  %v11532_v48 = vsel %vm16658_vm1, %v11515_v13, %v16571_v23  ;;  %v1508_v34 = vadd.f32 %v9267_v40, %v11327_v22  ;;  %v11649_v1 = vld [vmem:[#allocation2 + $0x38] sm:$0xff]  }
 0x27f   :  { %v2093_v30 = vrot.slane %v2091_v11, 6  ;;  %v2096_v41 = vrot.slane %v2094_v53, 7  ;;  %v9060_v59 = vpack.c.bf16 %v1795_v61, %v1795_v61  ;;  %2729 = vrot.lane.b32.xlu1 %v11532_v48, %s9743_s11  ;;  %v1500_v62 = vadd.f32 %v11327_v22, %v1499_v35  ;;  %v11543_v53 = vld [vmem:[#allocation2 + $0x20] sm:$0xff]   ;;  %16934 = vst [vmem:[#allocation87_spill] sm:$0xff] %v11649_v1 }
 0x280   :  { %v2118_v63 = vsel %vm11365_vm12, %v2109_v44, %v2117_v12  ;;  %v2119_v10 = vrot.slane %v2117_v12, 4  ;;  %v2141_v0 = vshrl.u32 %v9062_v39, 16  ;;  %v2144_v9 = vshll.u32 %v9062_v39, 16  ;;  %v11545_v44 = vpop.permute.xlu0 %1712 }
 0x281   :  { %2338 = vst.msk [vmem:[#allocation2 + $0x54] sm:$0xf] %vm16655_vm7, %v2118_v63  ;;  %v2097_v29 = vor.u32 %v2096_v41, %v2093_v30  ;;  %v2121_v51 = vshrl.u32 %v9060_v59, 16  ;;  %v2124_v40 = vshll.u32 %v9060_v59, 16  ;;  %2727 = vrot.lane.b32.xlu0 %v2692_v21, %s9743_s11  ;;  %v1582_v58 = vmax.f32 %v1508_v34, 0.0  ;;  %16926 = vst [vmem:[#allocation40_spill] sm:$0xff] %v11545_v44  ;;  %v11551_v41 = vpop.permute.xlu1 %1717  ;;  %v9271_v63 = vpop.f32.mrf.mxu0 }
 0x282   :  { %v2143_v57 = vrot.slane %v2141_v0, 6  ;;  %v2146_v60 = vrot.slane %v2144_v9, 7  ;;  %v1580_v11 = vmax.f32 %v1500_v62, 0.0  ;;  %v16570_v35 = vshrl.u32 %v11484_v36, 16  ;;  %16927 = vst [vmem:[#allocation15_spill] sm:$0xff] %v11551_v41 }
 0x283   :  { %v2098_v61 = vsel %vm11365_vm12, %v2089_v6, %v2097_v29  ;;  %v2099_v12 = vrot.slane %v2097_v29, 4  ;;  %v2123_v39 = vrot.slane %v2121_v51, 6  ;;  %v2126_v30 = vrot.slane %v2124_v40, 7 }
 0x284   :  { %2336 = vst.msk [vmem:[#allocation2 + $0x4c] sm:$0xf] %vm16655_vm7, %v2098_v61  ;;  %v2147_v21 = vor.u32 %v2146_v60, %v2143_v57  ;;  %v1798_v34 = vmul.f32 %v11545_v44, %v1582_v58  ;;  %v1796_v59 = vmul.f32 %v11520_v19, %v1580_v11  ;;  %v2523_v62 = vor.u32 %v16570_v35, %v2519_v31  ;;  %v11575_v11 = vld [vmem:[#allocation2 + $0x28] sm:$0xff]  }
 0x285   :  { %v2108_v26 = vsel %vm11365_vm12, %v2099_v12, %v11474_v47  ;;  %v2127_v6 = vor.u32 %v2126_v30, %v2123_v39  ;;  %v11562_v0 = vshll.u32 %v11496_v2, 16  ;;  %v11565_v9 = vshrl.u32 %v11496_v2, 16  ;;  %v11581_v38 = vpop.permute.xlu1 %1727 }
 0x286   :  { %2337 = vst.msk [vmem:[#allocation2 + $0x50] sm:$0xf] %vm16655_vm7, %v2108_v26  ;;  %v2149_v29 = vrot.slane %v2147_v21, 4  ;;  %v9063_v51 = vpack.c.bf16 %v1798_v34, %v1798_v34  ;;  %v9061_v40 = vpack.c.bf16 %v1796_v59, %v1796_v59  ;;  %v11569_v58 = vshll.u32 %v11543_v53, 16  ;;  %v1515_v34 = vpop.f32.mrf.mxu0  ;;  %16928 = vst [vmem:[#allocation48_spill] sm:$0xff] %v11581_v38 }
 0x287   :  { %v2128_v31 = vsel %vm11365_vm12, %v2119_v10, %v2127_v6  ;;  %v2129_v57 = vrot.slane %v2127_v6, 4  ;;  %v2527_v47 = vrot.slane %v11562_v0, 1  ;;  %v1521_v60 = vadd.f32 %v9270_v8, %v11327_v22 }
 0x288   :  { %2339 = vst.msk [vmem:[#allocation2 + $0x58] sm:$0xf] %vm16655_vm7, %v2128_v31  ;;  %v2151_v61 = vshrl.u32 %v9063_v51, 16  ;;  %v2154_v12 = vshll.u32 %v9063_v51, 16  ;;  %v2131_v39 = vshrl.u32 %v9061_v40, 16  ;;  %v2134_v30 = vshll.u32 %v9061_v40, 16  ;;  %v11584_v31 = vpop.permute.xlu0 %1722 }
 0x289   :  { %v2528_v59 = vsel %vm242_vm0, %v2523_v62, %v2527_v47  ;;  %v2531_v26 = vor.u32 %v11565_v9, %v2527_v47  ;;  %v2535_v10 = vrot.slane %v11569_v58, 1  ;;  %v1585_v6 = vmax.f32 %v1521_v60, 0.0  ;;  %16929 = vst [vmem:[#allocation65_spill] sm:$0xff] %v11584_v31 }
 0x28a   :  { %v2153_v35 = vrot.slane %v2151_v61, 6  ;;  %v2156_v8 = vrot.slane %v2154_v12, 7  ;;  %v2133_v23 = vrot.slane %v2131_v39, 6  ;;  %v2136_v19 = vrot.slane %v2134_v30, 7  ;;  %2653 = vrot.lane.b32.xlu1 %v2528_v59, %s9741_s28  ;;  %v9274_v39 = vpop.f32.mrf.mxu0 }
 0x28b   :  { %v2536_v51 = vsel %vm242_vm0, %v2531_v26, %v2535_v10  ;;  %v1801_v40 = vmul.f32 %v11581_v38, %v1585_v6  ;;  %v1513_v62 = vadd.f32 %v11327_v22, %v1512_v4  ;;  %v2695_v47 = vrot.slane %v11543_v53, 1 }
 0x28c   :  { %v11590_v44 = vor.u32 %v2156_v8, %v2153_v35  ;;  %v2137_v60 = vor.u32 %v2136_v19, %v2133_v23  ;;  %2655 = vrot.lane.b32.xlu0 %v2536_v51, %s9741_s28  ;;  %v16574_v61 = vrot.slane %v11575_v11, 1  ;;  %v1524_v12 = vadd.f32 %v9271_v63, %v11327_v22 }
 0x28d   :  { %v9066_v30 = vpack.c.bf16 %v1801_v40, %v1801_v40  ;;  %v1583_v59 = vmax.f32 %v1513_v62, 0.0  ;;  %v16930_v26 = vrot.slane %v11496_v2, 1  ;;  %v1516_v4 = vadd.f32 %v11327_v22, %v1515_v34  ;;  %v11624_v62 = vld [vmem:[#allocation2 + $0x30] sm:$0xff]  }
 0x28e   :  { %v2158_v23 = vsel %vm11365_vm12, %v2149_v29, %v11590_v44  ;;  %v2159_v19 = vrot.slane %v11590_v44, 4  ;;  %v2138_v35 = vsel %vm11365_vm12, %v2129_v57, %v2137_v60  ;;  %v2139_v63 = vrot.slane %v2137_v60, 4  ;;  %16931 = vst [vmem:[#allocation68_spill] sm:$0xff] %v11624_v62  ;;  %v1528_v60 = vpop.f32.mrf.mxu0 }
 0x28f   :  { %v11598_v6 = vsel %vm16658_vm1, %v16930_v26, %v2695_v47  ;;  %2342 = vst.msk [vmem:[#allocation2 + $0x64] sm:$0xf] %vm16655_vm7, %v2158_v23  ;;  %2340 = vst.msk [vmem:[#allocation2 + $0x5c] sm:$0xf] %vm16655_vm7, %v2138_v35  ;;  %v2181_v2 = vshrl.u32 %v9066_v30, 16  ;;  %v2184_v8 = vshll.u32 %v9066_v30, 16  ;;  %v1799_v51 = vmul.f32 %v11551_v41, %v1583_v59  ;;  %v11626_v30 = vpop.permute.xlu0 %1732  ;;  %v11632_v23 = vpop.permute.xlu1 %1737 }
 0x290   :  { %v11613_v34 = vsel %vm16658_vm1, %v2695_v47, %v16574_v61  ;;  %v2148_v44 = vsel %vm11365_vm12, %v2139_v63, %v2147_v21  ;;  %2731 = vrot.lane.b32.xlu0 %v11598_v6, %s9743_s11  ;;  %v1586_v29 = vmax.f32 %v1524_v12, 0.0  ;;  %v1584_v57 = vmax.f32 %v1516_v4, 0.0  ;;  %16932 = vst [vmem:[#allocation76_spill] sm:$0xff] %v11626_v30  ;;  %16933 = vst [vmem:[#allocation79_spill] sm:$0xff] %v11632_v23 }
 0x291   :  { %2733 = vrot.lane.b32.xlu1 %v11613_v34, %s9743_s11  ;;  %v11622_v40 = vshrl.u32 %v11543_v53, 16  ;;  %2341 = vst.msk [vmem:[#allocation2 + $0x60] sm:$0xf] %vm16655_vm7, %v2148_v44  ;;  %v2183_v47 = vrot.slane %v2181_v2, 6  ;;  %v2186_v21 = vrot.slane %v2184_v8, 7  ;;  %v9064_v59 = vpack.c.bf16 %v1799_v51, %v1799_v51 }
 0x292   :  { %v11630_v26 = vshll.u32 %v11575_v11, 16  ;;  %v1802_v12 = vmul.f32 %v11626_v30, %v1586_v29  ;;  %v1800_v53 = vmul.f32 %v11584_v31, %v1584_v57  ;;  %v11638_v35 = vshrl.u32 %v11575_v11, 16  ;;  %v9275_v29 = vpop.f32.mrf.mxu0 }
 0x293   :  { %v2539_v4 = vor.u32 %v11622_v40, %v2535_v10  ;;  %v2187_v63 = vor.u32 %v2186_v21, %v2183_v47  ;;  %v2161_v61 = vshrl.u32 %v9064_v59, 16  ;;  %v2164_v44 = vshll.u32 %v9064_v59, 16 }
 0x294   :  { %v2543_v2 = vrot.slane %v11630_v26, 1  ;;  %v9067_v8 = vpack.c.bf16 %v1802_v12, %v1802_v12  ;;  %v9065_v51 = vpack.c.bf16 %v1800_v53, %v1800_v53  ;;  %v11642_v41 = vshll.u32 %v11624_v62, 16  ;;  %v1531_v45 = vpop.f32.mrf.mxu0 }
 0x295   :  { %v1537_v38 = vadd.f32 %v9274_v39, %v11327_v22  ;;  %v2189_v30 = vrot.slane %v2187_v63, 4  ;;  %v2163_v57 = vrot.slane %v2161_v61, 6  ;;  %v2166_v31 = vrot.slane %v2164_v44, 7  ;;  %v11651_v39 = vpop.permute.xlu1 %1747 }
 0x296   :  { %v2544_v10 = vsel %vm242_vm0, %v2539_v4, %v2543_v2  ;;  %v2191_v14 = vshrl.u32 %v9067_v8, 16  ;;  %v2194_v18 = vshll.u32 %v9067_v8, 16  ;;  %v2171_v47 = vshrl.u32 %v9065_v51, 16  ;;  %16935 = vst [vmem:[#allocation90_spill] sm:$0xff] %v11651_v39  ;;  %v11653_v8 = vpop.permute.xlu0 %1742 }
 0x297   :  { %v2174_v21 = vshll.u32 %v9065_v51, 16  ;;  %2657 = vrot.lane.b32.xlu1 %v2544_v10, %s9741_s28  ;;  %v2167_v59 = vor.u32 %v2166_v31, %v2163_v57  ;;  %v2547_v12 = vor.u32 %v11638_v35, %v2543_v2  ;;  %v2551_v53 = vrot.slane %v11642_v41, 1  ;;  %16936 = vst [vmem:[#allocation23_spill] sm:$0xff] %v11653_v8 }
 0x298   :  { %v1589_v16 = vmax.f32 %v1537_v38, 0.0  ;;  %v2193_v61 = vrot.slane %v2191_v14, 6  ;;  %v2196_v44 = vrot.slane %v2194_v18, 7  ;;  %v2173_v52 = vrot.slane %v2171_v47, 6 }
 0x299   :  { %v2176_v4 = vrot.slane %v2174_v21, 7  ;;  %v2168_v51 = vsel %vm11365_vm12, %v2159_v19, %v2167_v59  ;;  %v2169_v31 = vrot.slane %v2167_v59, 4  ;;  %v2552_v2 = vsel %vm242_vm0, %v2547_v12, %v2551_v53 }
 0x29a   :  { %v1805_v57 = vmul.f32 %v11651_v39, %v1589_v16  ;;  %2343 = vst.msk [vmem:[#allocation2 + $0x68] sm:$0xf] %vm16655_vm7, %v2168_v51  ;;  %v11660_v38 = vor.u32 %v2196_v44, %v2193_v61  ;;  %2659 = vrot.lane.b32.xlu0 %v2552_v2, %s9741_s28  ;;  %v1529_v14 = vadd.f32 %v11327_v22, %v1528_v60  ;;  %v2699_v18 = vrot.slane %v11624_v62, 1 }
 0x29b   :  { %v2177_v10 = vor.u32 %v2176_v4, %v2173_v52  ;;  %v16585_v21 = vrot.slane %v11649_v1, 1  ;;  %v1540_v19 = vadd.f32 %v9275_v29, %v11327_v22  ;;  %v1532_v59 = vadd.f32 %v11327_v22, %v1531_v45  ;;  %v11681_v45 = vld [vmem:[#allocation2 + $0x40] sm:$0xff]  }
 0x29c   :  { %v9070_v47 = vpack.c.bf16 %v1805_v57, %v1805_v57  ;;  %v2198_v16 = vsel %vm11365_vm12, %v2189_v30, %v11660_v38  ;;  %v1587_v4 = vmax.f32 %v1529_v14, 0.0  ;;  %v16937_v29 = vrot.slane %v11575_v11, 1  ;;  %16938 = vst [vmem:[#allocation57_spill] sm:$0xff] %v11681_v45  ;;  %v9278_v30 = vpop.f32.mrf.mxu0  ;;  %v11692_v11 = vpop.permute.xlu0 %1752 }
 0x29d   :  { %v2178_v52 = vsel %vm11365_vm12, %v2169_v31, %v2177_v10  ;;  %v2179_v61 = vrot.slane %v2177_v10, 4  ;;  %2346 = vst.msk [vmem:[#allocation2 + $0x74] sm:$0xf] %vm16655_vm7, %v2198_v16  ;;  %v11690_v31 = vsel %vm16658_vm1, %v2699_v18, %v16585_v21  ;;  %v1590_v2 = vmax.f32 %v1540_v19, 0.0  ;;  %16939 = vst [vmem:[#allocation26_spill] sm:$0xff] %v11692_v11 }
 0x29e   :  { %2344 = vst.msk [vmem:[#allocation2 + $0x6c] sm:$0xf] %vm16655_vm7, %v2178_v52  ;;  %v2221_v60 = vshrl.u32 %v9070_v47, 16  ;;  %v2224_v44 = vshll.u32 %v9070_v47, 16  ;;  %v11679_v22 = vsel %vm16658_vm1, %v16937_v29, %v2699_v18  ;;  %v1588_v57 = vmax.f32 %v1532_v59, 0.0  ;;  %2737 = vrot.lane.b32.xlu1 %v11690_v31, %s9743_s11  ;;  %v11713_v29 = vpop.permute.xlu1 %1757 }
 0x29f   :  { %v2188_v51 = vsel %vm11365_vm12, %v2179_v61, %v2187_v63  ;;  %2735 = vrot.lane.b32.xlu0 %v11679_v22, %s9743_s11  ;;  %v1803_v47 = vmul.f32 %v11632_v23, %v1587_v4  ;;  %v11699_v63 = vshrl.u32 %v11624_v62, 16  ;;  %v1806_v16 = vmul.f32 %v11692_v11, %v1590_v2  ;;  %v1544_v4 = vpop.f32.mrf.mxu0  ;;  %16940 = vst [vmem:[#allocation58_spill] sm:$0xff] %v11713_v29  ;;  %v9684_v21 = vld [vmem:[%s16529_s3] ss:$0 sm:$0xff] }
 0x2a0   :  { %2345 = vst.msk [vmem:[#allocation2 + $0x70] sm:$0xf] %vm16655_vm7, %v2188_v51  ;;  %v2223_v10 = vrot.slane %v2221_v60, 6  ;;  %v2226_v14 = vrot.slane %v2224_v44, 7  ;;  %v1804_v18 = vmul.f32 %v11653_v8, %v1588_v57  ;;  %v11704_v19 = vshll.u32 %v11649_v1, 16 }
 0x2a1   :  { %v11707_v59 = vshrl.u32 %v11649_v1, 16  ;;  %v9068_v61 = vpack.c.bf16 %v1803_v47, %v1803_v47  ;;  %v2555_v60 = vor.u32 %v11699_v63, %v2551_v53  ;;  %v11711_v44 = vshll.u32 %v11681_v45, 16  ;;  %v11720_v47 = vld [vmem:[#allocation2 + $0x48] sm:$0xff]   ;;  %v9279_v15 = vpop.f32.mrf.mxu0 }
 0x2a2   :  { %v2227_v52 = vor.u32 %v2226_v14, %v2223_v10  ;;  %v9071_v51 = vpack.c.bf16 %v1806_v16, %v1806_v16  ;;  %v9069_v2 = vpack.c.bf16 %v1804_v18, %v1804_v18  ;;  %v2559_v57 = vrot.slane %v11704_v19, 1  ;;  %16941 = vst [vmem:[#allocation9_spill] sm:$0xff] %v11720_v47  ;;  %v11726_v49 = vpop.permute.xlu1 %1767 }
 0x2a3   :  { %v1553_v12 = vadd.f32 %v9684_v21, %v9278_v30  ;;  %v2201_v10 = vshrl.u32 %v9068_v61, 16  ;;  %v2204_v14 = vshll.u32 %v9068_v61, 16  ;;  %v2567_v53 = vrot.slane %v11711_v44, 1  ;;  %16942 = vst [vmem:[#allocation31_spill] sm:$0xff] %v11726_v49 }
 0x2a4   :  { %v2229_v8 = vrot.slane %v2227_v52, 4  ;;  %v2231_v11 = vshrl.u32 %v9071_v51, 16  ;;  %v2234_v23 = vshll.u32 %v9071_v51, 16  ;;  %v2211_v39 = vshrl.u32 %v9069_v2, 16 }
 0x2a5   :  { %v2214_v42 = vshll.u32 %v9069_v2, 16  ;;  %v2203_v16 = vrot.slane %v2201_v10, 6  ;;  %v2206_v18 = vrot.slane %v2204_v14, 7  ;;  %v2560_v25 = vsel %vm242_vm0, %v2555_v60, %v2559_v57 }
 0x2a6   :  { %v2563_v50 = vor.u32 %v11707_v59, %v2559_v57  ;;  %v2233_v33 = vrot.slane %v2231_v11, 6  ;;  %v2236_v30 = vrot.slane %v2234_v23, 7  ;;  %v2213_v3 = vrot.slane %v2211_v39, 6  ;;  %2661 = vrot.lane.b32.xlu1 %v2560_v25, %s9741_s28  ;;  %v11733_v39 = vpop.permute.xlu0 %1762 }
 0x2a7   :  { %v2216_v54 = vrot.slane %v2214_v42, 7  ;;  %v2207_v61 = vor.u32 %v2206_v18, %v2203_v16  ;;  %v1593_v28 = vmax.f32 %v1553_v12, 0.0  ;;  %v1545_v51 = vadd.f32 %v9684_v21, %v1544_v4  ;;  %16943 = vst [vmem:[#allocation39_spill] sm:$0xff] %v11733_v39  ;;  %v11829_v5 = vld [vmem:[#allocation2 + $0x70] sm:$0xff]  }
 0x2a8   :  { %v2568_v56 = vsel %vm242_vm0, %v2563_v50, %v2567_v53  ;;  %v11728_v2 = vor.u32 %v2236_v30, %v2233_v33  ;;  %v2703_v60 = vrot.slane %v11681_v45, 1  ;;  %v16600_v23 = vrot.slane %v11720_v47, 1  ;;  %v1547_v33 = vpop.f32.mrf.mxu0  ;;  %16952 = vst [vmem:[#allocation78_spill] sm:$0xff] %v11829_v5 }
 0x2a9   :  { %v2217_v10 = vor.u32 %v2216_v54, %v2213_v3  ;;  %2663 = vrot.lane.b32.xlu0 %v2568_v56, %s9741_s28  ;;  %v16944_v42 = vrot.slane %v11660_v38, 4  ;;  %v2209_v25 = vrot.slane %v2207_v61, 4  ;;  %v1809_v12 = vmul.f32 %v11726_v49, %v1593_v28 }
 0x2aa   :  { %v1591_v11 = vmax.f32 %v1545_v51, 0.0  ;;  %v2238_v54 = vsel %vm11365_vm12, %v2229_v8, %v11728_v2  ;;  %v16945_v3 = vrot.slane %v11649_v1, 1  ;;  %v11756_v14 = vsel %vm16658_vm1, %v2703_v60, %v16600_v23 }
 0x2ab   :  { %v2208_v50 = vsel %vm11365_vm12, %v16944_v42, %v2207_v61  ;;  %v2219_v56 = vrot.slane %v2217_v10, 4  ;;  %2350 = vst.msk [vmem:[#allocation2 + $0x84] sm:$0xf] %vm16655_vm7, %v2238_v54  ;;  %v2218_v38 = vsel %vm11365_vm12, %v2209_v25, %v2217_v10  ;;  %v9074_v28 = vpack.c.bf16 %v1809_v12, %v1809_v12  ;;  %2741 = vrot.lane.b32.xlu1 %v11756_v14, %s9743_s11  ;;  %v11768_v61 = vld [vmem:[#allocation2 + $0x50] sm:$0xff]  }
 0x2ac   :  { %2347 = vst.msk [vmem:[#allocation2 + $0x78] sm:$0xf] %vm16655_vm7, %v2208_v50  ;;  %v11747_v4 = vsel %vm16658_vm1, %v16945_v3, %v2703_v60  ;;  %v1807_v57 = vmul.f32 %v11713_v29, %v1591_v11  ;;  %2348 = vst.msk [vmem:[#allocation2 + $0x7c] sm:$0xf] %vm16655_vm7, %v2218_v38  ;;  %v1556_v16 = vadd.f32 %v9684_v21, %v9279_v15  ;;  %v11766_v30 = vshrl.u32 %v11681_v45, 16 }
 0x2ad   :  { %v2228_v8 = vsel %vm11365_vm12, %v2219_v56, %v2227_v52  ;;  %2739 = vrot.lane.b32.xlu0 %v11747_v4, %s9743_s11  ;;  %v1548_v18 = vadd.f32 %v9684_v21, %v1547_v33  ;;  %16946 = vst [vmem:[#allocation42_spill] sm:$0xff] %v11768_v61  ;;  %v2261_v51 = vshrl.u32 %v9074_v28, 16  ;;  %v2264_v10 = vshll.u32 %v9074_v28, 16  ;;  %v11778_v21 = vpop.permute.xlu0 %1772  ;;  %v11944_v45 = vld [vmem:[#allocation2 + $0xc] sm:$0xf] }
 0x2ae   :  { %2349 = vst.msk [vmem:[#allocation2 + $0x80] sm:$0xf] %vm16655_vm7, %v2228_v8  ;;  %v9072_v52 = vpack.c.bf16 %v1807_v57, %v1807_v57  ;;  %v11772_v60 = vshll.u32 %v11720_v47, 16  ;;  %v1594_v42 = vmax.f32 %v1556_v16, 0.0  ;;  %v2571_v25 = vor.u32 %v11766_v30, %v2567_v53  ;;  %16947 = vst [vmem:[#allocation47_spill] sm:$0xff] %v11778_v21  ;;  %v11786_v16 = vld [vmem:[#allocation2 + $0x58] sm:$0xff]  }
 0x2af   :  { %v1592_v50 = vmax.f32 %v1548_v18, 0.0  ;;  %v11776_v15 = vshrl.u32 %v11720_v47, 16  ;;  %v2263_v12 = vrot.slane %v2261_v51, 6  ;;  %v2266_v11 = vrot.slane %v2264_v10, 7  ;;  %16948 = vst [vmem:[#allocation50_spill] sm:$0xff] %v11786_v16  ;;  %16960 = vst [vmem:[#allocation33_spill] sm:$0xff] %v11944_v45 }
 0x2b0   :  { %v2241_v33 = vshrl.u32 %v9072_v52, 16  ;;  %v2244_v54 = vshll.u32 %v9072_v52, 16  ;;  %v1810_v56 = vmul.f32 %v11778_v21, %v1594_v42  ;;  %v2575_v38 = vrot.slane %v11772_v60, 1 }
 0x2b1   :  { %v1808_v3 = vmul.f32 %v11733_v39, %v1592_v50  ;;  %v11784_v28 = vshll.u32 %v11768_v61, 16  ;;  %v2267_v57 = vor.u32 %v2266_v11, %v2263_v12  ;;  %v2239_v52 = vrot.slane %v11728_v2, 4  ;;  %v11794_v12 = vld [vmem:[#allocation2 + $0x60] sm:$0xff]  }
 0x2b2   :  { %v2243_v53 = vrot.slane %v2241_v33, 6  ;;  %v2246_v8 = vrot.slane %v2244_v54, 7  ;;  %v9075_v18 = vpack.c.bf16 %v1810_v56, %v1810_v56  ;;  %v2576_v51 = vsel %vm242_vm0, %v2571_v25, %v2575_v38  ;;  %16949 = vst [vmem:[#allocation67_spill] sm:$0xff] %v11794_v12 }
 0x2b3   :  { %v9073_v23 = vpack.c.bf16 %v1808_v3, %v1808_v3  ;;  %v2579_v10 = vor.u32 %v11776_v15, %v2575_v38  ;;  %2665 = vrot.lane.b32.xlu1 %v2576_v51, %s9741_s28  ;;  %v2583_v50 = vrot.slane %v11784_v28, 1  ;;  %v2707_v39 = vrot.slane %v11768_v61, 1 }
 0x2b4   :  { %v2247_v42 = vor.u32 %v2246_v8, %v2243_v53  ;;  %v2271_v11 = vshrl.u32 %v9075_v18, 16  ;;  %v2274_v33 = vshll.u32 %v9075_v18, 16  ;;  %v2269_v3 = vrot.slane %v2267_v57, 4  ;;  %v11800_v53 = vld [vmem:[#allocation2 + $0x68] sm:$0xff]  }
 0x2b5   :  { %v2251_v54 = vshrl.u32 %v9073_v23, 16  ;;  %v2254_v56 = vshll.u32 %v9073_v23, 16  ;;  %v2584_v38 = vsel %vm242_vm0, %v2579_v10, %v2583_v50  ;;  %v2709_v2 = vrot.slane %v11786_v16, 1  ;;  %16950 = vst [vmem:[#allocation70_spill] sm:$0xff] %v11800_v53 }
 0x2b6   :  { %v2248_v25 = vsel %vm11365_vm12, %v2239_v52, %v2247_v42  ;;  %v2273_v8 = vrot.slane %v2271_v11, 6  ;;  %v2276_v51 = vrot.slane %v2274_v33, 7  ;;  %2667 = vrot.lane.b32.xlu0 %v2584_v38, %s9741_s28  ;;  %v16951_v23 = vrot.slane %v11720_v47, 1 }
 0x2b7   :  { %2351 = vst.msk [vmem:[#allocation2 + $0x88] sm:$0xf] %vm16655_vm7, %v2248_v25  ;;  %v2253_v21 = vrot.slane %v2251_v54, 6  ;;  %v2256_v29 = vrot.slane %v2254_v56, 7  ;;  %v11810_v52 = vsel %vm16658_vm1, %v2707_v39, %v2709_v2  ;;  %v11813_v10 = vshrl.u32 %v11768_v61, 16 }
 0x2b8   :  { %v11807_v18 = vsel %vm16658_vm1, %v16951_v23, %v2707_v39  ;;  %v11816_v49 = vshll.u32 %v11786_v16, 16  ;;  %v2249_v11 = vrot.slane %v2247_v42, 4  ;;  %v2277_v33 = vor.u32 %v2276_v51, %v2273_v8  ;;  %2745 = vrot.lane.b32.xlu1 %v11810_v52, %s9743_s11  ;;  %v2355_v25 = vld [vmem:[#allocation2 + $0x98] sm:$0x3] }
 0x2b9   :  { %v2257_v54 = vor.u32 %v2256_v29, %v2253_v21  ;;  %v11821_v56 = vshll.u32 %v11794_v12, 16  ;;  %v2587_v38 = vor.u32 %v11813_v10, %v2583_v50  ;;  %v11826_v23 = vshrl.u32 %v11786_v16, 16 }
 0x2ba   :  { %v2591_v39 = vrot.slane %v11816_v49, 1  ;;  %v2713_v46 = vrot.slane %v11800_v53, 1  ;;  %v2278_v29 = vsel %vm11365_vm12, %v2269_v3, %v2277_v33  ;;  %v2279_v21 = vrot.slane %v2277_v33, 4  ;;  %2743 = vrot.lane.b32.xlu0 %v11807_v18, %s9743_s11  ;;  %v11843_v33 = vld [vmem:[#allocation2 + $0x78] sm:$0xff]  }
 0x2bb   :  { %v2258_v42 = vsel %vm11365_vm12, %v2249_v11, %v2257_v54  ;;  %v2259_v8 = vrot.slane %v2257_v54, 4  ;;  %2354 = vst.msk [vmem:[#allocation2 + $0x94] sm:$0xf] %vm16655_vm7, %v2278_v29  ;;  %v2599_v24 = vrot.slane %v11821_v56, 1  ;;  %v2711_v3 = vrot.slane %v11794_v12, 1  ;;  %16953 = vst [vmem:[#allocation81_spill] sm:$0xff] %v11843_v33 }
 0x2bc   :  { %2352 = vst.msk [vmem:[#allocation2 + $0x8c] sm:$0xf] %vm16655_vm7, %v2258_v42  ;;  %v2592_v50 = vsel %vm242_vm0, %v2587_v38, %v2591_v39  ;;  %v2595_v51 = vor.u32 %v11826_v23, %v2591_v39  ;;  %v2356_v11 = vsel %vm11308_vm10, %v2279_v21, %v2355_v25  ;;  %v11851_v29 = vshll.u32 %v11800_v53, 16 }
 0x2bd   :  { %v2268_v54 = vsel %vm11365_vm12, %v2259_v8, %v2267_v57  ;;  %2669 = vrot.lane.b32.xlu1 %v2592_v50, %s9741_s28  ;;  %2357 = vst [vmem:[#allocation2 + $0x98] sm:$0x3] %v2356_v11  ;;  %v11856_v39 = vsel %vm16658_vm1, %v2711_v3, %v2713_v46  ;;  %v11859_v42 = vshll.u32 %v11829_v5, 16  ;;  %v11864_v25 = vshrl.u32 %v11800_v53, 16 }
 0x2be   :  { %2353 = vst.msk [vmem:[#allocation2 + $0x90] sm:$0xf] %vm16655_vm7, %v2268_v54  ;;  %v2600_v38 = vsel %vm242_vm0, %v2595_v51, %v2599_v24  ;;  %v2607_v57 = vrot.slane %v11851_v29, 1  ;;  %v11867_v21 = vshrl.u32 %v11794_v12, 16  ;;  %v11871_v50 = vshll.u32 %v11843_v33, 16  ;;  %v11873_v51 = vld [vmem:[#allocation2 + $0x80] sm:$0xff]  }
 0x2bf   :  { %2671 = vrot.lane.b32.xlu0 %v2600_v38, %s9741_s28  ;;  %v2615_v8 = vrot.slane %v11859_v42, 1  ;;  %16955 = vst [vmem:[#allocation25_spill] sm:$0xff] %v11873_v51  ;;  %v11879_v54 = vsel %vm16658_vm1, %v2709_v2, %v2711_v3  ;;  %v2717_v20 = vrot.slane %v11843_v33, 1  ;;  %v2715_v37 = vrot.slane %v11829_v5, 1 }
 0x2c0   :  { %16954 = vst [vmem:[#allocation89_spill] sm:$0xff] %v11871_v50  ;;  %v2611_v11 = vor.u32 %v11864_v25, %v2607_v57  ;;  %v2603_v38 = vor.u32 %v11867_v21, %v2599_v24  ;;  %v2623_v55 = vrot.slane %v11871_v50, 1  ;;  %v11892_v2 = vshll.u32 %v11873_v51, 16 }
 0x2c1   :  { %2749 = vrot.lane.b32.xlu1 %v11856_v39, %s9743_s11  ;;  %v11896_v24 = vsel %vm16658_vm1, %v2715_v37, %v2717_v20  ;;  %v11899_v3 = vshrl.u32 %v11843_v33, 16  ;;  %v2719_v47 = vrot.slane %v11873_v51, 1  ;;  %vm17114_vm7 = vcmask 97280  }
 0x2c2   :  { %v2608_v43 = vsel %vm242_vm0, %v2603_v38, %v2607_v57  ;;  %v2616_v17 = vsel %vm242_vm0, %v2611_v11, %v2615_v8  ;;  %v11906_v11 = vshrl.u32 %v11829_v5, 16  ;;  %v2631_v32 = vrot.slane %v11892_v2, 1 }
 0x2c3   :  { %2747 = vrot.lane.b32.xlu0 %v11879_v54, %s9743_s11  ;;  %v11886_v27 = vld [vmem:[#allocation2 + $0x88] sm:$0xff]   ;;  %16957 = vst [vmem:[#allocation28_spill] sm:$0xff] %v11899_v3  ;;  %v2627_v38 = vor.u32 %v11899_v3, %v2623_v55  ;;  %v2720_v1 = vsel %vm16658_vm1, %v2717_v20, %v2719_v47  ;;  %v2869_v3 = vrot.slane %v11864_v25, 1 }
 0x2c4   :  { %16956 = vst [vmem:[#allocation59_spill] sm:$0xff] %v11886_v27  ;;  %v11903_v57 = vshll.u32 %v11886_v27, 16  ;;  %v2619_v33 = vor.u32 %v11906_v11, %v2615_v8 }
 0x2c5   :  { %2673 = vrot.lane.b32.xlu1 %v2608_v43, %s9741_s28  ;;  %v9563_v7 = vld [vmem:[#allocation2 + $0x90] ss:$0 sps:$4 sm:$0x11]   ;;  %v11913_v43 = vsel %vm16658_vm1, %v2713_v46, %v2715_v37  ;;  %v2632_v12 = vsel %vm242_vm0, %v2627_v38, %v2631_v32  ;;  %v11927_v46 = vshrl.u32 %v11886_v27, 16  ;;  %v2853_v38 = vrot.slane %v11776_v15, 1 }
 0x2c6   :  { %16958 = vst [vmem:[#allocation60_spill] sm:$0xff] %v11903_v57  ;;  %v2639_v53 = vrot.slane %v11903_v57, 1  ;;  %v2645_v5 = vshll.u32 %v9563_v7, 16  ;;  %v2624_v16 = vsel %vm242_vm0, %v2619_v33, %v2623_v55  ;;  %v11936_v55 = vshrl.u32 %v11873_v51, 16  ;;  %v2396_v33 = vld [vmem:[#allocation2 + $0x8] sm:$0xe] }
 0x2c7   :  { %2675 = vrot.lane.b32.xlu0 %v2616_v17, %s9741_s28  ;;  %v11917_v17 = vrot.slane %v11886_v27, 1  ;;  %16959 = vst [vmem:[#allocation11_spill] sm:$0xff] %v11927_v46  ;;  %v2854_v27 = vrot.slane %v11772_v60, 2  ;;  %v2858_v51 = vrot.slane %v11784_v28, 2  ;;  %v2861_v57 = vrot.slane %v11826_v23, 1 }
 0x2c8   :  { %v2643_v8 = vor.u32 %v11927_v46, %v2639_v53  ;;  %v2647_v61 = vrot.slane %v2645_v5, 1  ;;  %v2857_v5 = vrot.slane %v11813_v10, 1  ;;  %v2862_v46 = vrot.slane %v11816_v49, 2 }
 0x2c9   :  { %2753 = vrot.lane.b32.xlu1 %v11896_v24, %s9743_s11  ;;  %v11931_v37 = vsel %vm16658_vm1, %v2719_v47, %v11917_v17  ;;  %v11954_v50 = vor.u32 %v2854_v27, %v2853_v38  ;;  %v2865_v47 = vrot.slane %v11867_v21, 1 }
 0x2ca   :  { %v2648_v62 = vsel %vm242_vm0, %v2643_v8, %v2647_v61  ;;  %v2859_v20 = vor.u32 %v2858_v51, %v2857_v5  ;;  %v2870_v61 = vrot.slane %v11851_v29, 2  ;;  %v2723_v8 = vrot.slane %v9563_v7, 1 }
 0x2cb   :  { %2751 = vrot.lane.b32.xlu0 %v11913_v43, %s9743_s11 }
 0x2cc   :  { %v11969_v38 = vor.u32 %v2870_v61, %v2869_v3  ;;  %v3112_v3 = vrot.slane %v11784_v28, 3  ;;  %v2833_v28 = vrot.slane %v11622_v40, 1 }
 0x2cd   :  { %2677 = vrot.lane.b32.xlu1 %v2624_v16, %s9741_s28  ;;  %v2635_v16 = vor.u32 %v11936_v55, %v2631_v32 }
 0x2cf   :  { %2679 = vrot.lane.b32.xlu0 %v2632_v12, %s9741_s28  ;;  %v8677_v12 = vcombine.low %v2396_v33, %v11944_v45  ;;  %v2640_v32 = vsel %vm242_vm0, %v2635_v16, %v2639_v53  ;;  %v2866_v33 = vrot.slane %v11821_v56, 2  ;;  %v2863_v45 = vor.u32 %v2862_v46, %v2861_v57 }
 0x2d0   :  { %v11963_v16 = vsel %vm16656_vm2, %v11954_v50, %v2859_v20 }
 0x2d1   :  { %2757 = vrot.lane.b32.xlu1 %v11931_v37, %s9743_s11  ;;  %v2772_v53 = vrot.slane %v8677_v12, 1  ;;  %v2867_v27 = vor.u32 %v2866_v33, %v2865_v47  ;;  %v11967_v51 = vsel %vm16656_vm2, %v2859_v20, %v2863_v45  ;;  %v3116_v33 = vrot.slane %v11816_v49, 3 }
 0x2d2   :  { %v2842_v49 = vrot.slane %v11642_v41, 2 }
 0x2d3   :  { %2755 = vrot.lane.b32.xlu0 %v2720_v1, %s9743_s11  ;;  %v2773_v57 = vsel %vm16658_vm1, %v2772_v53, %v11515_v13  ;;  %v11974_v46 = vsel %vm16656_vm2, %v2863_v45, %v2867_v27  ;;  %v11979_v7 = vsel %vm16656_vm2, %v2867_v27, %v11969_v38  ;;  %v12004_v13 = vld [vmem:[#allocation2 + $0x90] sm:$0xff]  }
 0x2d5   :  { %2681 = vrot.lane.b32.xlu1 %v2640_v32, %s9741_s28 }
 0x2d7   :  { %2683 = vrot.lane.b32.xlu0 %v2648_v62, %s9741_s28  ;;  %v2724_v62 = vsel %vm16658_vm1, %v11917_v17, %v2723_v8 }
 0x2d9   :  { %2778 = vrot.lane.b32.xlu1 %v2773_v57, %s9745_s22 }
 0x2db   :  { %2759 = vrot.lane.b32.xlu0 %v2724_v62, %s9743_s11  ;;  %v2841_v62 = vrot.slane %v11699_v63, 1 }
 0x2dd   :  { %2782 = vrot.lane.b32.xlu1 %v11598_v6, %s9745_s22  ;;  %v2818_v6 = vshrl.u32 %v8677_v12, 16 }
 0x2df   :  { %2780 = vrot.lane.b32.xlu0 %v11532_v48, %s9745_s22 }
 0x2e1   :  { %2786 = vrot.lane.b32.xlu1 %v11679_v22, %s9745_s22  ;;  %v16962_v22 = vshrl.u32 %v11484_v36, 16 }
 0x2e3   :  { %2784 = vrot.lane.b32.xlu0 %v11613_v34, %s9745_s22  ;;  %v2821_v34 = vshll.u32 %v8677_v12, 16  ;;  %v2825_v45 = vrot.slane %v16962_v22, 1 }
 0x2e4   :  { %v12006_v48 = vpop.permute.xlu1 %2725 }
 0x2e5   :  { %2790 = vrot.lane.b32.xlu1 %v11747_v4, %s9745_s22  ;;  %16961 = vst [vmem:[#allocation41_spill] sm:$0xff] %v12006_v48  ;;  %v16963_v4 = vshll.u32 %v11484_v36, 16  ;;  %v2823_v12 = vrot.slane %v2821_v34, 2  ;;  %v12940_v48 = vld [vmem:[%s16526_s0 + $0x10c] sm:$0xff]  }
 0x2e7   :  { %2788 = vrot.lane.b32.xlu0 %v11690_v31, %s9745_s22  ;;  %v2774_v31 = vrot.slane %v12004_v13, 1 }
 0x2e9   :  { %2794 = vrot.lane.b32.xlu1 %v11807_v18, %s9745_s22  ;;  %v3107_v18 = vrot.slane %v11776_v15, 2  ;;  %v2775_v15 = vsel %vm16658_vm1, %v11917_v17, %v2774_v31  ;;  %v2830_v17 = vrot.slane %v11562_v0, 2 }
 0x2eb   :  { %2792 = vrot.lane.b32.xlu0 %v11756_v14, %s9745_s22  ;;  %v2826_v14 = vrot.slane %v16963_v4, 2  ;;  %v2838_v4 = vrot.slane %v11630_v26, 2 }
 0x2ec   :  { %v12022_v5 = vpop.permute.xlu1 %2649 }
 0x2ed   :  { %2798 = vrot.lane.b32.xlu1 %v11879_v54, %s9745_s22  ;;  %v3111_v54 = vrot.slane %v11813_v10, 2  ;;  %16964 = vst [vmem:[#allocation44_spill] sm:$0xff] %v12022_v5  ;;  %v2827_v20 = vor.u32 %v2826_v14, %v2825_v45  ;;  %v3115_v10 = vrot.slane %v11826_v23, 2  ;;  %v3119_v14 = vrot.slane %v11867_v21, 2 }
 0x2ee   :  { %v3124_v21 = vrot.slane %v11851_v29, 3 }
 0x2ef   :  { %2796 = vrot.lane.b32.xlu0 %v11810_v52, %s9745_s22  ;;  %v3108_v52 = vrot.slane %v11772_v60, 3  ;;  %v3113_v32 = vor.u32 %v3112_v3, %v3111_v54  ;;  %v9565_v60 = vld [vmem:[#allocation2 + $0x98] ss:$0 sps:$4 sm:$0x11]   ;;  %v12041_v61 = vpop.permute.xlu0 %2651  ;;  %v3117_v53 = vor.u32 %v3116_v33, %v3115_v10  ;;  %v2843_v54 = vor.u32 %v2842_v49, %v2841_v62 }
 0x2f0   :  { %16965 = vst [vmem:[#allocation49_spill] sm:$0xff] %v12041_v61  ;;  %v2776_v23 = vrot.slane %v9565_v60, 1  ;;  %v2849_v3 = vrot.slane %v11766_v30, 1  ;;  %v2845_v60 = vrot.slane %v11707_v59, 1  ;;  %v2846_v10 = vrot.slane %v11704_v19, 2 }
 0x2f1   :  { %2802 = vrot.lane.b32.xlu1 %v11913_v43, %s9745_s22  ;;  %v2820_v43 = vrot.slane %v2818_v6, 1  ;;  %v12048_v6 = vpop.permute.xlu1 %2729  ;;  %v12053_v45 = vsel %vm820_vm4, %v3113_v32, %v3117_v53  ;;  %v2874_v49 = vrot.slane %v11859_v42, 2 }
 0x2f2   :  { %16966 = vst [vmem:[#allocation52_spill] sm:$0xff] %v12048_v6  ;;  %v2777_v34 = vsel %vm16658_vm1, %v2774_v31, %v2776_v23 }
 0x2f3   :  { %2800 = vrot.lane.b32.xlu0 %v11856_v39, %s9745_s22  ;;  %v12024_v39 = vor.u32 %v3108_v52, %v3107_v18  ;;  %v2824_v8 = vor.u32 %v2823_v12, %v2820_v43  ;;  %v3120_v18 = vrot.slane %v11821_v56, 3  ;;  %v12060_v52 = vpop.permute.xlu0 %2727  ;;  %v2850_v43 = vrot.slane %v11711_v44, 2 }
 0x2f4   :  { %16967 = vst [vmem:[#allocation69_spill] sm:$0xff] %v12060_v52 }
 0x2f5   :  { %2806 = vrot.lane.b32.xlu1 %v2720_v1, %s9745_s22  ;;  %v2834_v1 = vrot.slane %v11569_v58, 2  ;;  %v12035_v47 = vsel %vm820_vm4, %v12024_v39, %v3113_v32  ;;  %v2828_v27 = vsel %vm16656_vm2, %v2824_v8, %v2827_v20  ;;  %v3121_v12 = vor.u32 %v3120_v18, %v3119_v14 }
 0x2f6   :  { %v3123_v32 = vrot.slane %v11864_v25, 2  ;;  %v2851_v33 = vor.u32 %v2850_v43, %v2849_v3  ;;  %v2882_v14 = vrot.slane %v11892_v2, 2  ;;  %v2890_v18 = vshrl.u32 %v12004_v13, 16  ;;  %v16975_v3 = vld [vmem:[#allocation89_spill] sm:$0xff] }
 0x2f7   :  { %2804 = vrot.lane.b32.xlu0 %v11896_v24, %s9745_s22  ;;  %v2829_v24 = vrot.slane %v11565_v9, 1  ;;  %v2835_v57 = vor.u32 %v2834_v1, %v2833_v28  ;;  %v12079_v29 = vsel %vm820_vm4, %v3117_v53, %v3121_v12  ;;  %v2878_v43 = vrot.slane %v16975_v3, 2 }
 0x2f8   :  { %v12081_v25 = vor.u32 %v3124_v21, %v3123_v32 }
 0x2f9   :  { %2810 = vrot.lane.b32.xlu1 %v2775_v15, %s9745_s22  ;;  %v2831_v22 = vor.u32 %v2830_v17, %v2829_v24  ;;  %v2847_v17 = vor.u32 %v2846_v10, %v2845_v60  ;;  %v16977_v10 = vld [vmem:[#allocation11_spill] sm:$0xff] }
 0x2fa   :  { %v12087_v8 = vsel %vm820_vm4, %v3121_v12, %v12081_v25  ;;  %v12118_v12 = vld [vmem:[#allocation2 + $0x98] ss:$0 sps:$4 sm:$0x33]  }
 0x2fb   :  { %2808 = vrot.lane.b32.xlu0 %v11931_v37, %s9745_s22  ;;  %v2837_v37 = vrot.slane %v11638_v35, 1  ;;  %v2836_v31 = vsel %vm16656_vm2, %v2831_v22, %v2835_v57  ;;  %v2832_v56 = vsel %vm16656_vm2, %v2827_v20, %v2831_v22  ;;  %v2852_v23 = vsel %vm16656_vm2, %v2847_v17, %v2851_v33 }
 0x2fc   :  { %v12071_v28 = vpop.permute.xlu1 %2653  ;;  %v2848_v53 = vsel %vm16656_vm2, %v2843_v54, %v2847_v17  ;;  %v2899_v17 = vshrl.u32 %v12118_v12, 16 }
 0x2fd   :  { %2907 = vrot.lane.b32.xlu1 %v2828_v27, %s9748_s8  ;;  %v2839_v15 = vor.u32 %v2838_v4, %v2837_v37  ;;  %16968 = vst [vmem:[#allocation72_spill] sm:$0xff] %v12071_v28  ;;  %v2881_v4 = vrot.slane %v11936_v55, 1 }
 0x2fe   :  { %v12076_v24 = vpop.permute.xlu0 %2655 }
 0x2ff   :  { %2812 = vrot.lane.b32.xlu0 %v2777_v34, %s9745_s22  ;;  %v2844_v1 = vsel %vm16656_vm2, %v2839_v15, %v2843_v54  ;;  %16969 = vst [vmem:[#allocation80_spill] sm:$0xff] %v12076_v24  ;;  %v2840_v20 = vsel %vm16656_vm2, %v2835_v57, %v2839_v15  ;;  %v2873_v57 = vrot.slane %v11906_v11, 1  ;;  %v2856_v34 = vsel %vm16656_vm2, %v2851_v33, %v11954_v50  ;;  %v16974_v54 = vld [vmem:[#allocation28_spill] sm:$0xff] }
 0x300   :  { %v2877_v50 = vrot.slane %v16974_v54, 1  ;;  %v2883_v21 = vor.u32 %v2882_v14, %v2881_v4  ;;  %v2892_v15 = vrot.slane %v2890_v18, 1  ;;  %v16978_v33 = vld [vmem:[#allocation60_spill] sm:$0xff] }
 0x301   :  { %2911 = vrot.lane.b32.xlu1 %v2836_v31, %s9748_s8  ;;  %v2875_v37 = vor.u32 %v2874_v49, %v2873_v57  ;;  %v2893_v31 = vshll.u32 %v12004_v13, 16  ;;  %v3143_v57 = vrot.slane %v2890_v18, 2  ;;  %v2947_v18 = vrot.slane %v11484_v36, 2 }
 0x302   :  { %v12095_v62 = vpop.permute.xlu0 %2731 }
 0x303   :  { %2909 = vrot.lane.b32.xlu0 %v2832_v56, %s9748_s8  ;;  %v12090_v27 = vpop.permute.xlu1 %2733  ;;  %16971 = vst [vmem:[#allocation91_spill] sm:$0xff] %v12095_v62  ;;  %v2876_v32 = vsel %vm16656_vm2, %v11969_v38, %v2875_v37  ;;  %v2895_v60 = vrot.slane %v2893_v31, 2  ;;  %v2902_v38 = vshll.u32 %v12118_v12, 16  ;;  %v3144_v49 = vrot.slane %v2893_v31, 3 }
 0x304   :  { %16970 = vst [vmem:[#allocation83_spill] sm:$0xff] %v12090_v27 }
 0x305   :  { %2915 = vrot.lane.b32.xlu1 %v2844_v1, %s9748_s8  ;;  %v2885_v1 = vrot.slane %v16977_v10, 1 }
 0x307   :  { %2913 = vrot.lane.b32.xlu0 %v2840_v20, %s9748_s8  ;;  %v2886_v20 = vrot.slane %v16978_v33, 2 }
 0x309   :  { %2919 = vrot.lane.b32.xlu1 %v2852_v23, %s9748_s8  ;;  %v12103_v22 = vpop.permute.xlu1 %2657  ;;  %v2887_v14 = vor.u32 %v2886_v20, %v2885_v1 }
 0x30a   :  { %16972 = vst [vmem:[#allocation93_spill] sm:$0xff] %v12103_v22 }
 0x30b   :  { %2917 = vrot.lane.b32.xlu0 %v2848_v53, %s9748_s8  ;;  %v2896_v53 = vor.u32 %v2895_v60, %v2892_v15  ;;  %v2904_v15 = vrot.slane %v2902_v38, 2 }
 0x30d   :  { %2923 = vrot.lane.b32.xlu1 %v11963_v16, %s9748_s8  ;;  %v12112_v16 = vpop.permute.xlu0 %2659 }
 0x30e   :  { %16973 = vst [vmem:[#allocation27_spill] sm:$0xff] %v12112_v16 }
 0x30f   :  { %2921 = vrot.lane.b32.xlu0 %v2856_v34, %s9748_s8  ;;  %v2401_v34 = vld [vmem:[#allocation2 + $0x8] sm:$0xc] }
 0x310   :  { %v12122_v56 = vpop.permute.xlu1 %2737 }
 0x311   :  { %2927 = vrot.lane.b32.xlu1 %v11974_v46, %s9748_s8  ;;  %16976 = vst [vmem:[#allocation61_spill] sm:$0xff] %v12122_v56  ;;  %v2879_v46 = vor.u32 %v2878_v43, %v2877_v50  ;;  %v2897_v56 = vsel %vm16656_vm2, %v2887_v14, %v2896_v53 }
 0x313   :  { %2925 = vrot.lane.b32.xlu0 %v11967_v51, %s9748_s8  ;;  %v12129_v51 = vpop.permute.xlu0 %2735  ;;  %v2884_v23 = vsel %vm16656_vm2, %v2879_v46, %v2883_v21  ;;  %v2880_v4 = vsel %vm16656_vm2, %v2875_v37, %v2879_v46  ;;  %v2888_v37 = vsel %vm16656_vm2, %v2883_v21, %v2887_v14  ;;  %v9688_v14 = vld [vmem:[#allocation2 + $0x28] sm:$0xff]  }
 0x314   :  { %16979 = vst [vmem:[#allocation30_spill] sm:$0xff] %v12129_v51  ;;  %v2901_v51 = vrot.slane %v2899_v17, 1 }
 0x315   :  { %2931 = vrot.lane.b32.xlu1 %v2876_v32, %s9748_s8  ;;  %v12139_v32 = vor.u32 %v3144_v49, %v3143_v57  ;;  %v16986_v49 = vld [vmem:[#allocation68_spill] sm:$0xff] }
 0x316   :  { %v2905_v46 = vor.u32 %v2904_v15, %v2901_v51  ;;  %v16988_v15 = vld [vmem:[#allocation57_spill] sm:$0xff] }
 0x317   :  { %2929 = vrot.lane.b32.xlu0 %v11979_v7, %s9748_s8  ;;  %v16981_v7 = vld [vmem:[#allocation33_spill] sm:$0xff]  ;;  %16982 = vst [vmem:[#allocation32_spill] sm:$0xff] %v12139_v32 }
 0x318   :  { %v12136_v50 = vpop.permute.xlu1 %2661  ;;  %v8681_v43 = vcombine.low %v2401_v34, %v16981_v7  ;;  %v2906_v17 = vsel %vm16656_vm2, %v2896_v53, %v2905_v46  ;;  %v2955_v34 = vrot.slane %v16986_v49, 2  ;;  %v2953_v7 = vrot.slane %v9688_v14, 2 }
 0x319   :  { %2935 = vrot.lane.b32.xlu1 %v2884_v23, %s9748_s8  ;;  %16980 = vst [vmem:[#allocation62_spill] sm:$0xff] %v12136_v50  ;;  %v9686_v23 = vld [vmem:[#allocation2 + $0x20] sm:$0xff]  }
 0x31a   :  { %v2946_v60 = vrot.slane %v8681_v43, 2  ;;  %v2951_v57 = vrot.slane %v9686_v23, 2  ;;  %v12172_v43 = vsel %vm690_vm3, %v2953_v7, %v2955_v34 }
 0x31b   :  { %2933 = vrot.lane.b32.xlu0 %v2880_v4, %s9748_s8  ;;  %v12145_v31 = vpop.permute.xlu0 %2663 }
 0x31c   :  { %16983 = vst [vmem:[#allocation35_spill] sm:$0xff] %v12145_v31  ;;  %v2948_v1 = vsel %vm690_vm3, %v2946_v60, %v2947_v18  ;;  %v2954_v46 = vsel %vm690_vm3, %v2951_v57, %v2953_v7 }
 0x31d   :  { %2939 = vrot.lane.b32.xlu1 %v2897_v56, %s9748_s8  ;;  %v12150_v20 = vpop.permute.xlu1 %2741  ;;  %v9687_v56 = vld [vmem:[#allocation2 + $0x18] sm:$0xff]  }
 0x31e   :  { %16984 = vst [vmem:[#allocation43_spill] sm:$0xff] %v12150_v20  ;;  %v12154_v38 = vrot.slane %v9687_v56, 2  ;;  %v16992_v56 = vld [vmem:[#allocation42_spill] sm:$0xff] }
 0x31f   :  { %2937 = vrot.lane.b32.xlu0 %v2888_v37, %s9748_s8  ;;  %v12157_v21 = vpop.permute.xlu0 %2739  ;;  %v2959_v37 = vrot.slane %v16988_v15, 2  ;;  %v2963_v49 = vrot.slane %v16992_v56, 2  ;;  %v16994_v15 = vld [vmem:[#allocation9_spill] sm:$0xff] }
 0x320   :  { %16985 = vst [vmem:[#allocation46_spill] sm:$0xff] %v12157_v21  ;;  %v12161_v51 = vsel %vm690_vm3, %v12154_v38, %v2951_v57  ;;  %v2950_v4 = vsel %vm690_vm3, %v2947_v18, %v12154_v38  ;;  %v2961_v57 = vrot.slane %v16994_v15, 2 }
 0x321   :  { %2983 = vrot.lane.b32.xlu1 %v2948_v1, %s9749_s10  ;;  %v16990_v1 = vld [vmem:[#allocation87_spill] sm:$0xff] }
 0x322   :  { %v2957_v18 = vrot.slane %v16990_v1, 2  ;;  %v12198_v1 = vsel %vm690_vm3, %v2961_v57, %v2963_v49  ;;  %v2962_v56 = vsel %vm690_vm3, %v2959_v37, %v2961_v57  ;;  %v17004_v57 = vld [vmem:[#allocation25_spill] sm:$0xff] }
 0x323   :  { %2941 = vrot.lane.b32.xlu0 %v2906_v17, %s9748_s8 }
 0x324   :  { %v12185_v17 = vsel %vm690_vm3, %v2957_v18, %v2959_v37  ;;  %v2958_v14 = vsel %vm690_vm3, %v2955_v34, %v2957_v18 }
 0x325   :  { %2987 = vrot.lane.b32.xlu1 %v12161_v51, %s9749_s10  ;;  %v12168_v53 = vpop.permute.xlu1 %2665 }
 0x326   :  { %16987 = vst [vmem:[#allocation51_spill] sm:$0xff] %v12168_v53 }
 0x327   :  { %2985 = vrot.lane.b32.xlu0 %v2950_v4, %s9749_s10 }
 0x328   :  { %v12175_v60 = vpop.permute.xlu0 %2667 }
 0x329   :  { %16989 = vst [vmem:[#allocation54_spill] sm:$0xff] %v12175_v60  ;;  %2991 = vrot.lane.b32.xlu1 %v12172_v43, %s9749_s10 }
 0x32a   :  { %v12182_v23 = vpop.permute.xlu1 %2745 }
 0x32b   :  { %2989 = vrot.lane.b32.xlu0 %v2954_v46, %s9749_s10  ;;  %16991 = vst [vmem:[#allocation71_spill] sm:$0xff] %v12182_v23  ;;  %v16996_v23 = vld [vmem:[#allocation67_spill] sm:$0xff] }
 0x32c   :  { %v12188_v4 = vpop.permute.xlu0 %2743  ;;  %v2967_v20 = vrot.slane %v16996_v23, 2 }
 0x32d   :  { %16993 = vst [vmem:[#allocation74_spill] sm:$0xff] %v12188_v4  ;;  %2995 = vrot.lane.b32.xlu1 %v12185_v17, %s9749_s10  ;;  %v16998_v4 = vld [vmem:[#allocation50_spill] sm:$0xff] }
 0x32e   :  { %v2965_v34 = vrot.slane %v16998_v4, 2 }
 0x32f   :  { %2993 = vrot.lane.b32.xlu0 %v2958_v14, %s9749_s10  ;;  %v12195_v7 = vpop.permute.xlu1 %2669 }
 0x330   :  { %16995 = vst [vmem:[#allocation82_spill] sm:$0xff] %v12195_v7  ;;  %v2968_v15 = vsel %vm690_vm3, %v2965_v34, %v2967_v20  ;;  %v17000_v7 = vld [vmem:[#allocation78_spill] sm:$0xff]  ;;  %v2966_v23 = vsel %vm690_vm3, %v2963_v49, %v2965_v34 }
 0x331   :  { %v12201_v60 = vpop.permute.xlu0 %2671  ;;  %2999 = vrot.lane.b32.xlu1 %v12198_v1, %s9749_s10  ;;  %v2971_v21 = vrot.slane %v17000_v7, 2 }
 0x332   :  { %16997 = vst [vmem:[#allocation85_spill] sm:$0xff] %v12201_v60  ;;  %v17002_v60 = vld [vmem:[#allocation70_spill] sm:$0xff] }
 0x333   :  { %2997 = vrot.lane.b32.xlu0 %v2962_v56, %s9749_s10  ;;  %v12208_v18 = vpop.permute.xlu1 %2749  ;;  %v2969_v31 = vrot.slane %v17002_v60, 2  ;;  %v2402_v60 = vld [vmem:[#allocation2 + $0x10] sm:$0xc] }
 0x334   :  { %16999 = vst [vmem:[#allocation92_spill] sm:$0xff] %v12208_v18  ;;  %v2975_v18 = vrot.slane %v17004_v57, 2 }
 0x335   :  { %v12212_v53 = vpop.permute.xlu0 %2747  ;;  %3003 = vrot.lane.b32.xlu1 %v2968_v15, %s9749_s10  ;;  %v2972_v4 = vsel %vm690_vm3, %v2969_v31, %v2971_v21  ;;  %v2970_v7 = vsel %vm690_vm3, %v2967_v20, %v2969_v31  ;;  %v17009_v20 = vld [vmem:[#allocation59_spill] sm:$0xff] }
 0x336   :  { %17001 = vst [vmem:[#allocation29_spill] sm:$0xff] %v12212_v53  ;;  %v17006_v53 = vld [vmem:[#allocation81_spill] sm:$0xff] }
 0x337   :  { %3001 = vrot.lane.b32.xlu0 %v2966_v23, %s9749_s10  ;;  %v12218_v37 = vpop.permute.xlu1 %2673  ;;  %v2973_v50 = vrot.slane %v17006_v53, 2  ;;  %v2977_v53 = vrot.slane %v17009_v20, 2 }
 0x338   :  { %17003 = vst [vmem:[#allocation64_spill] sm:$0xff] %v12218_v37  ;;  %v12234_v37 = vrot.slane %v12004_v13, 2 }
 0x339   :  { %v12222_v27 = vpop.permute.xlu0 %2675  ;;  %3007 = vrot.lane.b32.xlu1 %v2972_v4, %s9749_s10  ;;  %v12231_v34 = vsel %vm690_vm3, %v2973_v50, %v2975_v18  ;;  %v2974_v31 = vsel %vm690_vm3, %v2971_v21, %v2973_v50 }
 0x33a   :  { %17005 = vst [vmem:[#allocation34_spill] sm:$0xff] %v12222_v27  ;;  %v9689_v27 = vld [vmem:[#allocation2 + $0x14] sm:$0xf]  ;;  %v12247_v62 = vsel %vm690_vm3, %v2977_v53, %v12234_v37 }
 0x33b   :  { %3005 = vrot.lane.b32.xlu0 %v2970_v7, %s9749_s10  ;;  %v12228_v49 = vpop.permute.xlu1 %2753  ;;  %v8682_v16 = vcombine.low %v2402_v60, %v9689_v27  ;;  %v2981_v27 = vrot.slane %v12118_v12, 2 }
 0x33c   :  { %17007 = vst [vmem:[#allocation45_spill] sm:$0xff] %v12228_v49 }
 0x33d   :  { %v12236_v57 = vpop.permute.xlu0 %2751  ;;  %3011 = vrot.lane.b32.xlu1 %v12231_v34, %s9749_s10  ;;  %v3030_v50 = vrot.slane %v8682_v16, 2 }
 0x33e   :  { %17008 = vst [vmem:[#allocation53_spill] sm:$0xff] %v12236_v57  ;;  %v2978_v57 = vsel %vm690_vm3, %v2975_v18, %v2977_v53 }
 0x33f   :  { %3009 = vrot.lane.b32.xlu0 %v2974_v31, %s9749_s10  ;;  %v12243_v49 = vpop.permute.xlu1 %2677  ;;  %v3031_v60 = vsel %vm690_vm3, %v3030_v50, %v12154_v38 }
 0x340   :  { %17010 = vst [vmem:[#allocation73_spill] sm:$0xff] %v12243_v49 }
 0x341   :  { %v12249_v13 = vpop.permute.xlu0 %2679  ;;  %3015 = vrot.lane.b32.xlu1 %v12247_v62, %s9749_s10 }
 0x342   :  { %17011 = vst [vmem:[#allocation84_spill] sm:$0xff] %v12249_v13  ;;  %v2982_v13 = vsel %vm690_vm3, %v12234_v37, %v2981_v27  ;;  %v9567_v27 = vld [vmem:[#allocation2 + $0x98] sm:$0xff]  }
 0x343   :  { %3013 = vrot.lane.b32.xlu0 %v2978_v57, %s9749_s10  ;;  %v12255_v21 = vpop.permute.xlu1 %2757 }
 0x344   :  { %17012 = vst [vmem:[#allocation28_spill] sm:$0xff] %v12255_v21  ;;  %v9568_v21 = vld [vmem:[#allocation2 + $0xa0] ss:$0 sps:$4 sm:$0x33]  }
 0x345   :  { %v12260_v20 = vpop.permute.xlu0 %2755  ;;  %3036 = vrot.lane.b32.xlu1 %v3031_v60, %s9750_s12  ;;  %v3076_v60 = vshrl.u32 %v8682_v16, 16 }
 0x346   :  { %17013 = vst [vmem:[#allocation89_spill] sm:$0xff] %v12260_v20 }
 0x347   :  { %3017 = vrot.lane.b32.xlu0 %v2982_v13, %s9749_s10  ;;  %v12266_v18 = vpop.permute.xlu1 %2681 }
 0x348   :  { %17014 = vst [vmem:[#allocation11_spill] sm:$0xff] %v12266_v18  ;;  %v3032_v18 = vrot.slane %v9567_v27, 2  ;;  %v12344_v27 = vld [vmem:[%s16526_s0 + $0xc0] sm:$0xf] }
 0x349   :  { %v12268_v53 = vpop.permute.xlu0 %2683  ;;  %3040 = vrot.lane.b32.xlu1 %v2954_v46, %s9750_s12 }
 0x34a   :  { %17015 = vst [vmem:[#allocation60_spill] sm:$0xff] %v12268_v53 }
 0x34b   :  { %3038 = vrot.lane.b32.xlu0 %v12161_v51, %s9750_s12  ;;  %v12273_v12 = vpop.permute.xlu1 %2778 }
 0x34c   :  { %17016 = vst [vmem:[#allocation33_spill] sm:$0xff] %v12273_v12 }
 0x34d   :  { %v12275_v38 = vpop.permute.xlu0 %2759  ;;  %3044 = vrot.lane.b32.xlu1 %v2958_v14, %s9750_s12 }
 0x34e   :  { %17017 = vst [vmem:[#allocation68_spill] sm:$0xff] %v12275_v38  ;;  %v8750_v38 = vld [vmem:[%s16526_s0 + $0xb4] sm:$0xf] }
 0x34f   :  { %3042 = vrot.lane.b32.xlu0 %v12172_v43, %s9750_s12  ;;  %v12280_v50 = vpop.permute.xlu1 %2782 }
 0x350   :  { %17018 = vst [vmem:[#allocation57_spill] sm:$0xff] %v12280_v50 }
 0x351   :  { %v12282_v13 = vpop.permute.xlu0 %2780  ;;  %3048 = vrot.lane.b32.xlu1 %v2962_v56, %s9750_s12 }
 0x352   :  { %17019 = vst [vmem:[#allocation87_spill] sm:$0xff] %v12282_v13 }
 0x353   :  { %3046 = vrot.lane.b32.xlu0 %v12185_v17, %s9750_s12  ;;  %v12287_v46 = vpop.permute.xlu1 %2786 }
 0x354   :  { %17020 = vst [vmem:[#allocation42_spill] sm:$0xff] %v12287_v46 }
 0x355   :  { %v12289_v51 = vpop.permute.xlu0 %2784  ;;  %3052 = vrot.lane.b32.xlu1 %v2966_v23, %s9750_s12  ;;  %v3079_v23 = vshll.u32 %v8682_v16, 16  ;;  %v8748_v16 = vld [vmem:[%s16526_s0 + $0xac] sm:$0xf] }
 0x356   :  { %17021 = vst [vmem:[#allocation9_spill] sm:$0xff] %v12289_v51 }
 0x357   :  { %3050 = vrot.lane.b32.xlu0 %v12198_v1, %s9750_s12  ;;  %v12294_v14 = vpop.permute.xlu1 %2790 }
 0x358   :  { %17022 = vst [vmem:[#allocation67_spill] sm:$0xff] %v12294_v14 }
 0x359   :  { %v12296_v43 = vpop.permute.xlu0 %2788  ;;  %3056 = vrot.lane.b32.xlu1 %v2970_v7, %s9750_s12  ;;  %v3083_v7 = vrot.slane %v11565_v9, 2 }
 0x35a   :  { %17023 = vst [vmem:[#allocation50_spill] sm:$0xff] %v12296_v43  ;;  %v3088_v43 = vrot.slane %v11569_v58, 3 }
 0x35b   :  { %3054 = vrot.lane.b32.xlu0 %v2968_v15, %s9750_s12  ;;  %v12300_v56 = vpop.permute.xlu1 %2794  ;;  %v12314_v15 = vld [vmem:[%s16526_s0 + $0xb8] sm:$0xf] }
 0x35c   :  { %17024 = vst [vmem:[#allocation78_spill] sm:$0xff] %v12300_v56  ;;  %v12330_v9 = vcombine.low %v8750_v38, %v12314_v15  ;;  %v8752_v56 = vld [vmem:[%s16526_s0 + $0xbc] sm:$0xf]  ;;  %v3033_v38 = vsel %vm690_vm3, %v12234_v37, %v3032_v18 }
 0x35d   :  { %v12302_v17 = vpop.permute.xlu0 %2792  ;;  %3060 = vrot.lane.b32.xlu1 %v2974_v31, %s9750_s12  ;;  %v3084_v31 = vrot.slane %v11562_v0, 3  ;;  %v12357_v14 = vcombine.low %v8752_v56, %v12344_v27 }
 0x35e   :  { %17025 = vst [vmem:[#allocation70_spill] sm:$0xff] %v12302_v17  ;;  %v3081_v17 = vrot.slane %v3079_v23, 3  ;;  %v4615_v51 = vshll.u32 %v12330_v9, 16 }
 0x35f   :  { %3058 = vrot.lane.b32.xlu0 %v2972_v4, %s9750_s12  ;;  %v12306_v1 = vpop.permute.xlu1 %2798  ;;  %v12327_v4 = vld [vmem:[%s16526_s0 + $0xb0] sm:$0xf] }
 0x360   :  { %17026 = vst [vmem:[#allocation25_spill] sm:$0xff] %v12306_v1  ;;  %v3078_v1 = vrot.slane %v3076_v60, 2  ;;  %v3085_v60 = vor.u32 %v3084_v31, %v3083_v7 }
 0x361   :  { %v12318_v53 = vpop.permute.xlu0 %2796  ;;  %3064 = vrot.lane.b32.xlu1 %v2978_v57, %s9750_s12  ;;  %v3091_v57 = vrot.slane %v11638_v35, 2  ;;  %v3087_v35 = vrot.slane %v11622_v40, 2  ;;  %v3100_v40 = vrot.slane %v11704_v19, 3 }
 0x362   :  { %17027 = vst [vmem:[#allocation81_spill] sm:$0xff] %v12318_v53  ;;  %v3092_v53 = vrot.slane %v11630_v26, 3  ;;  %v3034_v26 = vrot.slane %v9568_v21, 2  ;;  %v3099_v21 = vrot.slane %v11707_v59, 2  ;;  %v4623_v59 = vshll.u32 %v12357_v14, 16 }
 0x363   :  { %3062 = vrot.lane.b32.xlu0 %v12231_v34, %s9750_s12  ;;  %v12334_v0 = vpop.permute.xlu1 %2802  ;;  %v12349_v34 = vcombine.low %v8748_v16, %v12327_v4  ;;  %v4617_v16 = vrot.slane %v4615_v51, 1  ;;  %v8785_v51 = vld [vmem:[%s16526_s0 + $0xac] sm:$0xe] }
 0x364   :  { %17028 = vst [vmem:[#allocation59_spill] sm:$0xff] %v12334_v0  ;;  %v3082_v0 = vor.u32 %v3081_v17, %v3078_v1  ;;  %v3093_v7 = vor.u32 %v3092_v53, %v3091_v57  ;;  %v3035_v56 = vsel %vm690_vm3, %v3032_v18, %v3034_v26  ;;  %v3096_v1 = vrot.slane %v11642_v41, 3 }
 0x365   :  { %v12351_v23 = vpop.permute.xlu0 %2800  ;;  %3068 = vrot.lane.b32.xlu1 %v3033_v38, %s9750_s12  ;;  %v4610_v17 = vshll.u32 %v12349_v34, 16  ;;  %v3089_v53 = vor.u32 %v3088_v43, %v3087_v35  ;;  %v12380_v38 = vor.u32 %v3100_v40, %v3099_v21  ;;  %v4608_v18 = vshrl.u32 %v12349_v34, 16  ;;  %v8786_v43 = vld [vmem:[%s16526_s0 + $0xb4] sm:$0xe]  ;;  %v12398_v40 = vld [vmem:[%s16526_s0 + $0xc4] sm:$0xff]  }
 0x366   :  { %17029 = vst [vmem:[#allocation94_spill] sm:$0xff] %v12351_v23  ;;  %v3086_v31 = vsel %vm820_vm4, %v3082_v0, %v3085_v60  ;;  %v4619_v0 = vshrl.u32 %v12330_v9, 16  ;;  %v12393_v21 = vrot.slane %v4623_v59, 1 }
 0x367   :  { %3066 = vrot.lane.b32.xlu0 %v12247_v62, %s9750_s12  ;;  %v12362_v37 = vpop.permute.xlu1 %2806  ;;  %v3095_v62 = vrot.slane %v11699_v63, 2  ;;  %v3094_v57 = vsel %vm820_vm4, %v3089_v53, %v3093_v7  ;;  %v4612_v26 = vrot.slane %v4610_v17, 1  ;;  %v3090_v35 = vsel %vm820_vm4, %v3085_v60, %v3089_v53 }
 0x368   :  { %17030 = vst [vmem:[#allocation95_spill] sm:$0xff] %v12362_v37  ;;  %v8818_v60 = vcombine.low %v8786_v43, %v12314_v15  ;;  %v4932_v37 = vrot.slane %v4623_v59, 2  ;;  %v8791_v59 = vld [vmem:[%s16526_s0 + $0xb4] sm:$0xc] }
 0x369   :  { %v12368_v58 = vpop.permute.xlu0 %2804  ;;  %3165 = vrot.lane.b32.xlu1 %v3086_v31, %s9751_s26  ;;  %v3097_v41 = vor.u32 %v3096_v1, %v3095_v62  ;;  %v4621_v31 = vor.u32 %v4619_v0, %v4617_v16  ;;  %v4613_v62 = vor.u32 %v4612_v26, %v4608_v18  ;;  %v8817_v1 = vcombine.low %v8785_v51, %v12327_v4 }
 0x36a   :  { %17031 = vst [vmem:[#allocation96_spill] sm:$0xff] %v12368_v58  ;;  %v12417_v18 = vshll.u32 %v12398_v40, 16  ;;  %v12420_v4 = vshrl.u32 %v12398_v40, 16  ;;  %v4924_v51 = vshrl.u32 %v8818_v60, 16  ;;  %v4927_v43 = vshll.u32 %v8818_v60, 16 }
 0x36b   :  { %3070 = vrot.lane.b32.xlu0 %v3035_v56, %s9750_s12  ;;  %v12377_v19 = vpop.permute.xlu1 %2810  ;;  %v3102_v56 = vsel %vm820_vm4, %v3097_v41, %v12380_v38  ;;  %v3098_v0 = vsel %vm820_vm4, %v3093_v7, %v3097_v41  ;;  %v4618_v7 = vsel %vm242_vm0, %v4613_v62, %v4617_v16  ;;  %v4794_v41 = vrot.slane %v8817_v1, 1 }
 0x36c   :  { %17032 = vst [vmem:[#allocation97_spill] sm:$0xff] %v12377_v19  ;;  %v4626_v19 = vsel %vm242_vm0, %v4621_v31, %v12393_v21  ;;  %v4936_v23 = vrot.slane %v12417_v18, 2  ;;  %v4878_v1 = vrot.slane %v8818_v60, 1 }
 0x36d   :  { %v12383_v63 = vpop.permute.xlu0 %2808  ;;  %3169 = vrot.lane.b32.xlu1 %v3094_v57, %s9751_s26  ;;  %v4795_v57 = vrot.slane %v12330_v9, 1 }
 0x36e   :  { %17033 = vst [vmem:[#allocation98_spill] sm:$0xff] %v12383_v63  ;;  %v16638_v63 = vrot.slane %v12398_v40, 1 }
 0x36f   :  { %3167 = vrot.lane.b32.xlu0 %v3090_v35, %s9751_s26  ;;  %v12401_v17 = vpop.permute.xlu1 %2907  ;;  %v4797_v35 = vrot.slane %v12357_v14, 1  ;;  %v4796_v62 = vsel %vm16658_vm1, %v4794_v41, %v4795_v57  ;;  %v12458_v41 = vld [vmem:[%s16526_s0 + $0xcc] sm:$0xff]  }
 0x370   :  { %17034 = vst [vmem:[#allocation99_spill] sm:$0xff] %v12401_v17  ;;  %v5190_v17 = vrot.slane %v12417_v18, 3  ;;  %v17047_v13 = vrot.slane %v12458_v41, 2 }
 0x371   :  { %v12407_v53 = vpop.permute.xlu0 %2812  ;;  %3173 = vrot.lane.b32.xlu1 %v3102_v56, %s9751_s26  ;;  %v4798_v31 = vsel %vm16658_vm1, %v4795_v57, %v4797_v35 }
 0x372   :  { %17035 = vst [vmem:[#allocation100_spill] sm:$0xff] %v12407_v53  ;;  %v17038_v53 = vshrl.u32 %v12357_v14, 16 }
 0x373   :  { %3171 = vrot.lane.b32.xlu0 %v3098_v0, %s9751_s26  ;;  %v12423_v26 = vpop.permute.xlu1 %2911  ;;  %v4935_v0 = vrot.slane %v12420_v4, 1 }
 0x374   :  { %17036 = vst [vmem:[#allocation101_spill] sm:$0xff] %v12423_v26  ;;  %v4931_v58 = vrot.slane %v17038_v53, 1  ;;  %v8792_v53 = vld [vmem:[%s16526_s0 + $0xbc] sm:$0xc] }
 0x375   :  { %v12426_v56 = vpop.permute.xlu0 %2909  ;;  %4757 = vrot.lane.b32.xlu1 %v4626_v19, %s9740_s21  ;;  %v4926_v19 = vrot.slane %v4924_v51, 1  ;;  %v12453_v57 = vor.u32 %v4936_v23, %v4935_v0  ;;  %v5053_v23 = vrot.slane %v12357_v14, 2  ;;  %v12475_v0 = vshll.u32 %v12458_v41, 16 }
 0x376   :  { %17037 = vst [vmem:[#allocation102_spill] sm:$0xff] %v12426_v56  ;;  %v4929_v56 = vrot.slane %v4927_v43, 2  ;;  %v4933_v60 = vor.u32 %v4932_v37, %v4931_v58  ;;  %v4879_v43 = vsel %vm16658_vm1, %v4878_v1, %v4797_v35  ;;  %v5055_v37 = vrot.slane %v12398_v40, 2 }
 0x377   :  { %4755 = vrot.lane.b32.xlu0 %v4618_v7, %s9740_s21  ;;  %v12436_v16 = vpop.permute.xlu1 %2915  ;;  %v12451_v7 = vsel %vm16658_vm1, %v4797_v35, %v16638_v63  ;;  %v8823_v63 = vcombine.low %v8792_v53, %v12344_v27  ;;  %v12478_v35 = vshrl.u32 %v12458_v41, 16 }
 0x378   :  { %17039 = vst [vmem:[#allocation103_spill] sm:$0xff] %v12436_v16  ;;  %v4938_v58 = vsel %vm16656_vm2, %v4933_v60, %v12453_v57  ;;  %v5056_v53 = vsel %vm690_vm3, %v5053_v23, %v5055_v37  ;;  %v12506_v50 = vsel %vm690_vm3, %v5055_v37, %v17047_v13 }
 0x379   :  { %v12439_v26 = vpop.permute.xlu0 %2913  ;;  %4833 = vrot.lane.b32.xlu1 %v4798_v31, %s9741_s28  ;;  %v4930_v31 = vor.u32 %v4929_v56, %v4926_v19  ;;  %v5182_v1 = vshrl.u32 %v8823_v63, 16  ;;  %v5185_v19 = vshll.u32 %v8823_v63, 16 }
 0x37a   :  { %17040 = vst [vmem:[#allocation104_spill] sm:$0xff] %v12439_v26  ;;  %v8822_v26 = vcombine.low %v8791_v59, %v12314_v15 }
 0x37b   :  { %4831 = vrot.lane.b32.xlu0 %v4796_v62, %s9741_s28  ;;  %v12461_v51 = vpop.permute.xlu1 %2919  ;;  %v4934_v56 = vsel %vm16656_vm2, %v4930_v31, %v4933_v60  ;;  %v5136_v31 = vrot.slane %v8823_v63, 2 }
 0x37c   :  { %17041 = vst [vmem:[#allocation105_spill] sm:$0xff] %v12461_v51  ;;  %v5052_v62 = vrot.slane %v8822_v26, 2  ;;  %v5189_v51 = vrot.slane %v12420_v4, 2 }
 0x37d   :  { %v12466_v16 = vpop.permute.xlu0 %2917  ;;  %4886 = vrot.lane.b32.xlu1 %v12451_v7, %s9742_s29 }
 0x37e   :  { %17042 = vst [vmem:[#allocation106_spill] sm:$0xff] %v12466_v16  ;;  %v5054_v60 = vsel %vm690_vm3, %v5052_v62, %v5053_v23  ;;  %v8797_v16 = vld [vmem:[%s16526_s0 + $0xbc] sm:$0x8]  ;;  %v5137_v23 = vsel %vm690_vm3, %v5136_v31, %v5055_v37 }
 0x37f   :  { %4884 = vrot.lane.b32.xlu0 %v4879_v43, %s9742_s29  ;;  %v12481_v15 = vpop.permute.xlu1 %2923  ;;  %v5193_v43 = vrot.slane %v12478_v35, 2 }
 0x380   :  { %17043 = vst [vmem:[#allocation107_spill] sm:$0xff] %v12481_v15  ;;  %v5194_v15 = vrot.slane %v12475_v0, 3 }
 0x381   :  { %v12484_v59 = vpop.permute.xlu0 %2921  ;;  %5015 = vrot.lane.b32.xlu1 %v4938_v58, %s9743_s11  ;;  %v5184_v58 = vrot.slane %v5182_v1, 2  ;;  %v8827_v1 = vcombine.low %v8797_v16, %v12344_v27 }
 0x382   :  { %17044 = vst [vmem:[#allocation108_spill] sm:$0xff] %v12484_v59  ;;  %v5187_v59 = vrot.slane %v5185_v19, 3 }
 0x383   :  { %5013 = vrot.lane.b32.xlu0 %v4934_v56, %s9743_s11  ;;  %v12494_v26 = vpop.permute.xlu1 %2927  ;;  %v5191_v56 = vor.u32 %v5190_v17, %v5189_v51  ;;  %v17050_v17 = vshrl.u32 %v12357_v14, 16  ;;  %v5310_v16 = vrot.slane %v8827_v1, 3 }
 0x384   :  { %17045 = vst [vmem:[#allocation109_spill] sm:$0xff] %v12494_v26  ;;  %v12508_v26 = vor.u32 %v5194_v15, %v5193_v43  ;;  %v5188_v62 = vor.u32 %v5187_v59, %v5184_v58  ;;  %v4633_v15 = vrot.slane %v12417_v18, 1  ;;  %v5311_v59 = vrot.slane %v12398_v40, 3  ;;  %v12539_v18 = vld [vmem:[%s16526_s0 + $0xd4] sm:$0xff]  }
 0x385   :  { %v12497_v46 = vpop.permute.xlu0 %2925  ;;  %5091 = vrot.lane.b32.xlu1 %v5056_v53, %s9744_s16  ;;  %v4629_v51 = vor.u32 %v17050_v17, %v12393_v21  ;;  %v16639_v21 = vrot.slane %v12475_v0, 1  ;;  %v4647_v1 = vshll.u32 %v12539_v18, 16 }
 0x386   :  { %17046 = vst [vmem:[#allocation110_spill] sm:$0xff] %v12497_v46  ;;  %v5196_v13 = vsel %vm820_vm4, %v5191_v56, %v12508_v26  ;;  %v5192_v27 = vsel %vm820_vm4, %v5188_v62, %v5191_v56  ;;  %v5312_v58 = vsel %vm16660_vm6, %v5310_v16, %v5311_v59  ;;  %v16640_v56 = vrot.slane %v12458_v41, 3 }
 0x387   :  { %5089 = vrot.lane.b32.xlu0 %v5054_v60, %s9744_s16  ;;  %v12511_v63 = vpop.permute.xlu1 %2931  ;;  %v4634_v43 = vsel %vm242_vm0, %v4629_v51, %v4633_v15  ;;  %v4637_v60 = vor.u32 %v12420_v4, %v4633_v15  ;;  %v4801_v4 = vrot.slane %v12458_v41, 1 }
 0x388   :  { %17048 = vst [vmem:[#allocation111_spill] sm:$0xff] %v12511_v63  ;;  %v5314_v51 = vsel %vm16660_vm6, %v5311_v59, %v16640_v56 }
 0x389   :  { %v12515_v19 = vpop.permute.xlu0 %2929  ;;  %5144 = vrot.lane.b32.xlu1 %v12506_v50, %s9745_s22  ;;  %v4642_v62 = vsel %vm242_vm0, %v4637_v60, %v16639_v21  ;;  %v4939_v60 = vrot.slane %v12478_v35, 1 }
 0x38a   :  { %17049 = vst [vmem:[#allocation112_spill] sm:$0xff] %v12515_v19 }
 0x38b   :  { %5142 = vrot.lane.b32.xlu0 %v5137_v23, %s9745_s22  ;;  %v12526_v37 = vpop.permute.xlu1 %2935 }
 0x38c   :  { %17051 = vst [vmem:[#allocation113_spill] sm:$0xff] %v12526_v37  ;;  %v17064_v37 = vrot.slane %v12458_v41, 2 }
 0x38d   :  { %v12530_v53 = vpop.permute.xlu0 %2933  ;;  %5273 = vrot.lane.b32.xlu1 %v5196_v13, %s9746_s27  ;;  %v4651_v13 = vshrl.u32 %v12539_v18, 16 }
 0x38e   :  { %17052 = vst [vmem:[#allocation114_spill] sm:$0xff] %v12530_v53 }
 0x38f   :  { %5271 = vrot.lane.b32.xlu0 %v5192_v27, %s9746_s27  ;;  %v12542_v31 = vpop.permute.xlu1 %2939  ;;  %v17057_v27 = vrot.slane %v12398_v40, 1  ;;  %v4943_v21 = vrot.slane %v4651_v13, 1  ;;  %v5197_v46 = vrot.slane %v4651_v13, 2 }
 0x390   :  { %17053 = vst [vmem:[#allocation115_spill] sm:$0xff] %v12542_v31  ;;  %v4944_v31 = vrot.slane %v4647_v1, 2 }
 0x391   :  { %v12546_v23 = vpop.permute.xlu0 %2937  ;;  %4759 = vrot.lane.b32.xlu1 %v4634_v43, %s9740_s21  ;;  %v4802_v16 = vsel %vm16658_vm1, %v17057_v27, %v4801_v4  ;;  %v16641_v43 = vrot.slane %v12539_v18, 1 }
 0x392   :  { %17054 = vst [vmem:[#allocation116_spill] sm:$0xff] %v12546_v23  ;;  %v12581_v56 = vor.u32 %v4944_v31, %v4943_v21 }
 0x393   :  { %5347 = vrot.lane.b32.xlu0 %v5312_v58, %s9748_s8  ;;  %v12556_v17 = vpop.permute.xlu1 %2983  ;;  %v4940_v58 = vrot.slane %v12475_v0, 2 }
 0x394   :  { %17055 = vst [vmem:[#allocation117_spill] sm:$0xff] %v12556_v17 }
 0x395   :  { %v12561_v15 = vpop.permute.xlu0 %2941  ;;  %4761 = vrot.lane.b32.xlu1 %v4642_v62, %s9740_s21  ;;  %v12579_v62 = vsel %vm16658_vm1, %v4801_v4, %v16641_v43  ;;  %v4941_v27 = vor.u32 %v4940_v58, %v4939_v60  ;;  %v5059_v4 = vrot.slane %v12539_v18, 2 }
 0x396   :  { %17056 = vst [vmem:[#allocation118_spill] sm:$0xff] %v12561_v15  ;;  %v12586_v15 = vld [vmem:[%s16526_s0 + $0xdc] sm:$0xff]  }
 0x397   :  { %5349 = vrot.lane.b32.xlu0 %v5314_v51, %s9748_s8  ;;  %v12571_v23 = vpop.permute.xlu1 %2987  ;;  %v4946_v21 = vsel %vm16656_vm2, %v4941_v27, %v12581_v56  ;;  %v12600_v31 = vshll.u32 %v12586_v15, 16  ;;  %v12603_v60 = vshrl.u32 %v12586_v15, 16  ;;  %v4942_v58 = vsel %vm16656_vm2, %v12453_v57, %v4941_v27 }
 0x398   :  { %17058 = vst [vmem:[#allocation119_spill] sm:$0xff] %v12571_v23  ;;  %v5060_v19 = vsel %vm690_vm3, %v17064_v37, %v5059_v4  ;;  %v16642_v63 = vrot.slane %v12586_v15, 2 }
 0x399   :  { %v12573_v59 = vpop.permute.xlu0 %2985  ;;  %4837 = vrot.lane.b32.xlu1 %v4802_v16, %s9741_s28 }
 0x39a   :  { %17059 = vst [vmem:[#allocation120_spill] sm:$0xff] %v12573_v59  ;;  %v12628_v37 = vsel %vm690_vm3, %v5059_v4, %v16642_v63 }
 0x39b   :  { %4835 = vrot.lane.b32.xlu0 %v12451_v7, %s9741_s28  ;;  %v12590_v51 = vpop.permute.xlu1 %2991 }
 0x39c   :  { %17060 = vst [vmem:[#allocation121_spill] sm:$0xff] %v12590_v51  ;;  %v5201_v51 = vrot.slane %v12603_v60, 2 }
 0x39d   :  { %v12592_v53 = vpop.permute.xlu0 %2989  ;;  %4890 = vrot.lane.b32.xlu1 %v12579_v62, %s9742_s29 }
 0x39e   :  { %17061 = vst [vmem:[#allocation122_spill] sm:$0xff] %v12592_v53  ;;  %v5198_v53 = vrot.slane %v4647_v1, 3 }
 0x39f   :  { %4888 = vrot.lane.b32.xlu0 %v4802_v16, %s9742_s29  ;;  %v12606_v7 = vpop.permute.xlu1 %2995  ;;  %v5202_v16 = vrot.slane %v12600_v31, 3 }
 0x3a0   :  { %17062 = vst [vmem:[#allocation123_spill] sm:$0xff] %v12606_v7  ;;  %v5199_v27 = vor.u32 %v5198_v53, %v5197_v46  ;;  %v4649_v46 = vrot.slane %v4647_v1, 1 }
 0x3a1   :  { %v12610_v43 = vpop.permute.xlu0 %2993  ;;  %5019 = vrot.lane.b32.xlu1 %v4946_v21, %s9743_s11  ;;  %v12630_v21 = vor.u32 %v5202_v16, %v5201_v51  ;;  %v5315_v51 = vrot.slane %v12539_v18, 3 }
 0x3a2   :  { %17063 = vst [vmem:[#allocation124_spill] sm:$0xff] %v12610_v43 }
 0x3a3   :  { %5017 = vrot.lane.b32.xlu0 %v4942_v58, %s9743_s11  ;;  %v12620_v7 = vpop.permute.xlu1 %2999 }
 0x3a4   :  { %17065 = vst [vmem:[#allocation125_spill] sm:$0xff] %v12620_v7  ;;  %v17069_v7 = vrot.slane %v12475_v0, 1  ;;  %v16643_v0 = vrot.slane %v12600_v31, 1 }
 0x3a5   :  { %v12622_v57 = vpop.permute.xlu0 %2997  ;;  %5095 = vrot.lane.b32.xlu1 %v5060_v19, %s9744_s16 }
 0x3a6   :  { %17066 = vst [vmem:[#allocation126_spill] sm:$0xff] %v12622_v57  ;;  %v5204_v57 = vsel %vm820_vm4, %v5199_v27, %v12630_v21  ;;  %v4645_v4 = vor.u32 %v12478_v35, %v17069_v7  ;;  %v12659_v35 = vld [vmem:[%s16526_s0 + $0xe4] sm:$0xff]   ;;  %v16644_v7 = vrot.slane %v12586_v15, 3 }
 0x3a7   :  { %5093 = vrot.lane.b32.xlu0 %v12506_v50, %s9744_s16  ;;  %v12634_v43 = vpop.permute.xlu1 %3003  ;;  %v5200_v50 = vsel %vm820_vm4, %v12508_v26, %v5199_v27  ;;  %v17073_v26 = vrot.slane %v12458_v41, 3 }
 0x3a8   :  { %17067 = vst [vmem:[#allocation127_spill] sm:$0xff] %v12634_v43  ;;  %v4650_v63 = vsel %vm242_vm0, %v4645_v4, %v4649_v46  ;;  %v4653_v43 = vor.u32 %v4651_v13, %v4649_v46  ;;  %v4805_v13 = vrot.slane %v12586_v15, 1  ;;  %v4663_v4 = vshll.u32 %v12659_v35, 16 }
 0x3a9   :  { %v12636_v58 = vpop.permute.xlu0 %3001  ;;  %5148 = vrot.lane.b32.xlu1 %v12628_v37, %s9745_s22  ;;  %v5316_v1 = vsel %vm16660_vm6, %v17073_v26, %v5315_v51  ;;  %v4667_v46 = vshrl.u32 %v12659_v35, 16  ;;  %v5318_v26 = vsel %vm16660_vm6, %v5315_v51, %v16644_v7 }
 0x3aa   :  { %17068 = vst [vmem:[#allocation128_spill] sm:$0xff] %v12636_v58  ;;  %v4658_v27 = vsel %vm242_vm0, %v4653_v43, %v16643_v0  ;;  %v16645_v0 = vrot.slane %v12659_v35, 1  ;;  %v17084_v58 = vrot.slane %v12586_v15, 2  ;;  %v5206_v59 = vrot.slane %v4663_v4, 3 }
 0x3ab   :  { %5146 = vrot.lane.b32.xlu0 %v5060_v19, %s9745_s22  ;;  %v12646_v53 = vpop.permute.xlu1 %3007 }
 0x3ac   :  { %17070 = vst [vmem:[#allocation129_spill] sm:$0xff] %v12646_v53 }
 0x3ad   :  { %v12651_v16 = vpop.permute.xlu0 %3005  ;;  %5277 = vrot.lane.b32.xlu1 %v5204_v57, %s9746_s27 }
 0x3ae   :  { %17071 = vst [vmem:[#allocation130_spill] sm:$0xff] %v12651_v16  ;;  %v4951_v16 = vrot.slane %v4667_v46, 1 }
 0x3af   :  { %5275 = vrot.lane.b32.xlu0 %v5200_v50, %s9746_s27  ;;  %v12662_v19 = vpop.permute.xlu1 %3011 }
 0x3b0   :  { %17072 = vst [vmem:[#allocation131_spill] sm:$0xff] %v12662_v19  ;;  %v4947_v19 = vrot.slane %v12603_v60, 1 }
 0x3b1   :  { %v12668_v57 = vpop.permute.xlu0 %3009  ;;  %4763 = vrot.lane.b32.xlu1 %v4650_v63, %s9740_s21  ;;  %v17077_v63 = vrot.slane %v12539_v18, 1 }
 0x3b2   :  { %17074 = vst [vmem:[#allocation132_spill] sm:$0xff] %v12668_v57 }
 0x3b3   :  { %5351 = vrot.lane.b32.xlu0 %v5316_v1, %s9748_s8  ;;  %v12678_v50 = vpop.permute.xlu1 %3015  ;;  %v4806_v43 = vsel %vm16658_vm1, %v17077_v63, %v4805_v13  ;;  %v4948_v1 = vrot.slane %v12600_v31, 2 }
 0x3b4   :  { %17075 = vst [vmem:[#allocation133_spill] sm:$0xff] %v12678_v50  ;;  %v4952_v50 = vrot.slane %v4663_v4, 2 }
 0x3b5   :  { %v12683_v57 = vpop.permute.xlu0 %3013  ;;  %4765 = vrot.lane.b32.xlu1 %v4658_v27, %s9740_s21  ;;  %v12701_v27 = vsel %vm16658_vm1, %v4805_v13, %v16645_v0  ;;  %v4949_v63 = vor.u32 %v4948_v1, %v4947_v19  ;;  %v5063_v13 = vrot.slane %v12659_v35, 2 }
 0x3b6   :  { %17076 = vst [vmem:[#allocation134_spill] sm:$0xff] %v12683_v57  ;;  %v12703_v7 = vor.u32 %v4952_v50, %v4951_v16  ;;  %v12708_v57 = vld [vmem:[%s16526_s0 + $0xec] sm:$0xff]  }
 0x3b7   :  { %5353 = vrot.lane.b32.xlu0 %v5318_v26, %s9748_s8  ;;  %v12693_v53 = vpop.permute.xlu1 %3036  ;;  %v12722_v19 = vshll.u32 %v12708_v57, 16  ;;  %v12725_v50 = vshrl.u32 %v12708_v57, 16  ;;  %v4950_v1 = vsel %vm16656_vm2, %v12581_v56, %v4949_v63 }
 0x3b8   :  { %17078 = vst [vmem:[#allocation135_spill] sm:$0xff] %v12693_v53  ;;  %v4954_v16 = vsel %vm16656_vm2, %v4949_v63, %v12703_v7  ;;  %v5205_v53 = vrot.slane %v4667_v46, 2 }
 0x3b9   :  { %v12695_v51 = vpop.permute.xlu0 %3017  ;;  %4841 = vrot.lane.b32.xlu1 %v4806_v43, %s9741_s28  ;;  %v5209_v23 = vrot.slane %v12725_v50, 2 }
 0x3ba   :  { %17079 = vst [vmem:[#allocation136_spill] sm:$0xff] %v12695_v51  ;;  %v5207_v63 = vor.u32 %v5206_v59, %v5205_v53  ;;  %v4665_v59 = vrot.slane %v4663_v4, 1  ;;  %v5319_v53 = vrot.slane %v12659_v35, 3 }
 0x3bb   :  { %4839 = vrot.lane.b32.xlu0 %v12579_v62, %s9741_s28  ;;  %v12712_v26 = vpop.permute.xlu1 %3040 }
 0x3bc   :  { %17080 = vst [vmem:[#allocation137_spill] sm:$0xff] %v12712_v26  ;;  %v16646_v26 = vrot.slane %v12708_v57, 2 }
 0x3bd   :  { %v12714_v51 = vpop.permute.xlu0 %3038  ;;  %4894 = vrot.lane.b32.xlu1 %v12701_v27, %s9742_s29 }
 0x3be   :  { %17081 = vst [vmem:[#allocation138_spill] sm:$0xff] %v12714_v51  ;;  %v5064_v51 = vsel %vm690_vm3, %v17084_v58, %v5063_v13  ;;  %v12750_v58 = vsel %vm690_vm3, %v5063_v13, %v16646_v26 }
 0x3bf   :  { %4892 = vrot.lane.b32.xlu0 %v4806_v43, %s9742_s29  ;;  %v12728_v62 = vpop.permute.xlu1 %3044  ;;  %v5210_v43 = vrot.slane %v12722_v19, 3 }
 0x3c0   :  { %17082 = vst [vmem:[#allocation139_spill] sm:$0xff] %v12728_v62 }
 0x3c1   :  { %v12732_v0 = vpop.permute.xlu0 %3042  ;;  %5023 = vrot.lane.b32.xlu1 %v4954_v16, %s9743_s11  ;;  %v12752_v16 = vor.u32 %v5210_v43, %v5209_v23 }
 0x3c2   :  { %17083 = vst [vmem:[#allocation140_spill] sm:$0xff] %v12732_v0 }
 0x3c3   :  { %5021 = vrot.lane.b32.xlu0 %v4950_v1, %s9743_s11  ;;  %v12742_v62 = vpop.permute.xlu1 %3048 }
 0x3c4   :  { %17085 = vst [vmem:[#allocation141_spill] sm:$0xff] %v12742_v62  ;;  %v17089_v62 = vrot.slane %v12600_v31, 1  ;;  %v16647_v31 = vrot.slane %v12722_v19, 1 }
 0x3c5   :  { %v12744_v56 = vpop.permute.xlu0 %3046  ;;  %5099 = vrot.lane.b32.xlu1 %v5064_v51, %s9744_s16 }
 0x3c6   :  { %17086 = vst [vmem:[#allocation142_spill] sm:$0xff] %v12744_v56  ;;  %v5212_v56 = vsel %vm820_vm4, %v5207_v63, %v12752_v16  ;;  %v4661_v13 = vor.u32 %v12603_v60, %v17089_v62  ;;  %v12781_v60 = vld [vmem:[%s16526_s0 + $0xf4] sm:$0xff]   ;;  %v16648_v62 = vrot.slane %v12708_v57, 3 }
 0x3c7   :  { %5097 = vrot.lane.b32.xlu0 %v12628_v37, %s9744_s16  ;;  %v12756_v0 = vpop.permute.xlu1 %3052  ;;  %v5208_v37 = vsel %vm820_vm4, %v12630_v21, %v5207_v63  ;;  %v17093_v21 = vrot.slane %v12586_v15, 3 }
 0x3c8   :  { %17087 = vst [vmem:[#allocation143_spill] sm:$0xff] %v12756_v0  ;;  %v4666_v26 = vsel %vm242_vm0, %v4661_v13, %v4665_v59  ;;  %v4669_v0 = vor.u32 %v4667_v46, %v4665_v59  ;;  %v4809_v46 = vrot.slane %v12708_v57, 1  ;;  %v4679_v13 = vshll.u32 %v12781_v60, 16 }
 0x3c9   :  { %v12758_v1 = vpop.permute.xlu0 %3050  ;;  %5152 = vrot.lane.b32.xlu1 %v12750_v58, %s9745_s22  ;;  %v4683_v59 = vshrl.u32 %v12781_v60, 16 }
 0x3ca   :  { %17088 = vst [vmem:[#allocation144_spill] sm:$0xff] %v12758_v1  ;;  %v4674_v63 = vsel %vm242_vm0, %v4669_v0, %v16647_v31  ;;  %v16649_v31 = vrot.slane %v12781_v60, 1 }
 0x3cb   :  { %5150 = vrot.lane.b32.xlu0 %v5064_v51, %s9745_s22  ;;  %v12768_v23 = vpop.permute.xlu1 %3056  ;;  %v5320_v51 = vsel %vm16660_vm6, %v17093_v21, %v5319_v53  ;;  %v5213_v1 = vrot.slane %v4683_v59, 2 }
 0x3cc   :  { %17090 = vst [vmem:[#allocation145_spill] sm:$0xff] %v12768_v23 }
 0x3cd   :  { %v12773_v43 = vpop.permute.xlu0 %3054  ;;  %5281 = vrot.lane.b32.xlu1 %v5212_v56, %s9746_s27 }
 0x3ce   :  { %17091 = vst [vmem:[#allocation146_spill] sm:$0xff] %v12773_v43 }
 0x3cf   :  { %5279 = vrot.lane.b32.xlu0 %v5208_v37, %s9746_s27  ;;  %v12784_v4 = vpop.permute.xlu1 %3060  ;;  %v5322_v37 = vsel %vm16660_vm6, %v5319_v53, %v16648_v62 }
 0x3d0   :  { %17092 = vst [vmem:[#allocation147_spill] sm:$0xff] %v12784_v4  ;;  %v4959_v4 = vrot.slane %v4683_v59, 1 }
 0x3d1   :  { %v12790_v56 = vpop.permute.xlu0 %3058  ;;  %4767 = vrot.lane.b32.xlu1 %v4666_v26, %s9740_s21  ;;  %v17097_v26 = vrot.slane %v12659_v35, 1 }
 0x3d2   :  { %17094 = vst [vmem:[#allocation148_spill] sm:$0xff] %v12790_v56  ;;  %v4955_v56 = vrot.slane %v12725_v50, 1 }
 0x3d3   :  { %5355 = vrot.lane.b32.xlu0 %v5320_v51, %s9748_s8  ;;  %v12800_v15 = vpop.permute.xlu1 %3064  ;;  %v4810_v0 = vsel %vm16658_vm1, %v17097_v26, %v4809_v46  ;;  %v4956_v51 = vrot.slane %v12722_v19, 2 }
 0x3d4   :  { %17095 = vst [vmem:[#allocation149_spill] sm:$0xff] %v12800_v15  ;;  %v4960_v15 = vrot.slane %v4679_v13, 2 }
 0x3d5   :  { %v12805_v21 = vpop.permute.xlu0 %3062  ;;  %4769 = vrot.lane.b32.xlu1 %v4674_v63, %s9740_s21  ;;  %v12823_v63 = vsel %vm16658_vm1, %v4809_v46, %v16649_v31  ;;  %v4957_v26 = vor.u32 %v4956_v51, %v4955_v56  ;;  %v5067_v46 = vrot.slane %v12781_v60, 2 }
 0x3d6   :  { %17096 = vst [vmem:[#allocation150_spill] sm:$0xff] %v12805_v21  ;;  %v12825_v62 = vor.u32 %v4960_v15, %v4959_v4  ;;  %v12830_v21 = vld [vmem:[%s16526_s0 + $0xfc] sm:$0xff]  }
 0x3d7   :  { %5357 = vrot.lane.b32.xlu0 %v5322_v37, %s9748_s8  ;;  %v12815_v23 = vpop.permute.xlu1 %3068  ;;  %v12844_v56 = vshll.u32 %v12830_v21, 16  ;;  %v12847_v15 = vshrl.u32 %v12830_v21, 16  ;;  %v4958_v51 = vsel %vm16656_vm2, %v12703_v7, %v4957_v26  ;;  %v16650_v43 = vrot.slane %v12830_v21, 2 }
 0x3d8   :  { %17098 = vst [vmem:[#allocation151_spill] sm:$0xff] %v12815_v23  ;;  %v4962_v4 = vsel %vm16656_vm2, %v4957_v26, %v12825_v62  ;;  %v17112_v22 = vrot.slane %v12830_v21, 2 }
 0x3d9   :  { %v12817_v53 = vpop.permute.xlu0 %3066  ;;  %4845 = vrot.lane.b32.xlu1 %v4810_v0, %s9741_s28  ;;  %v5217_v17 = vrot.slane %v12847_v15, 2  ;;  %v4963_v20 = vrot.slane %v12847_v15, 1  ;;  %v4964_v49 = vrot.slane %v12844_v56, 2 }
 0x3da   :  { %17099 = vst [vmem:[#allocation152_spill] sm:$0xff] %v12817_v53 }
 0x3db   :  { %4843 = vrot.lane.b32.xlu0 %v12701_v27, %s9741_s28  ;;  %v12834_v37 = vpop.permute.xlu1 %3165 }
 0x3dc   :  { %17100 = vst [vmem:[#allocation153_spill] sm:$0xff] %v12834_v37  ;;  %v5214_v37 = vrot.slane %v4679_v13, 3 }
 0x3dd   :  { %v12836_v23 = vpop.permute.xlu0 %3070  ;;  %4898 = vrot.lane.b32.xlu1 %v12823_v63, %s9742_s29 }
 0x3de   :  { %17101 = vst [vmem:[#allocation154_spill] sm:$0xff] %v12836_v23  ;;  %v17104_v23 = vrot.slane %v12708_v57, 2  ;;  %v5215_v26 = vor.u32 %v5214_v37, %v5213_v1  ;;  %v5323_v1 = vrot.slane %v12781_v60, 3 }
 0x3df   :  { %4896 = vrot.lane.b32.xlu0 %v4810_v0, %s9742_s29  ;;  %v12850_v27 = vpop.permute.xlu1 %3169  ;;  %v5218_v0 = vrot.slane %v12844_v56, 3 }
 0x3e0   :  { %17102 = vst [vmem:[#allocation155_spill] sm:$0xff] %v12850_v27  ;;  %v5068_v53 = vsel %vm690_vm3, %v17104_v23, %v5067_v46  ;;  %v12872_v23 = vsel %vm690_vm3, %v5067_v46, %v16650_v43  ;;  %v4681_v46 = vrot.slane %v4679_v13, 1 }
 0x3e1   :  { %v12854_v31 = vpop.permute.xlu0 %3167  ;;  %5027 = vrot.lane.b32.xlu1 %v4962_v4, %s9743_s11  ;;  %v12874_v4 = vor.u32 %v5218_v0, %v5217_v17 }
 0x3e2   :  { %17103 = vst [vmem:[#allocation156_spill] sm:$0xff] %v12854_v31  ;;  %v4685_v43 = vor.u32 %v4683_v59, %v4681_v46  ;;  %v4813_v59 = vrot.slane %v12830_v21, 1 }
 0x3e3   :  { %5025 = vrot.lane.b32.xlu0 %v4958_v51, %s9743_s11  ;;  %v12864_v27 = vpop.permute.xlu1 %3173  ;;  %v5220_v51 = vsel %vm820_vm4, %v5215_v26, %v12874_v4 }
 0x3e4   :  { %17105 = vst [vmem:[#allocation157_spill] sm:$0xff] %v12864_v27 }
 0x3e5   :  { %v12866_v7 = vpop.permute.xlu0 %3171  ;;  %5103 = vrot.lane.b32.xlu1 %v5068_v53, %s9744_s16 }
 0x3e6   :  { %17106 = vst [vmem:[#allocation158_spill] sm:$0xff] %v12866_v7  ;;  %v17107_v7 = vrot.slane %v12722_v19, 1  ;;  %v16651_v19 = vrot.slane %v12844_v56, 1 }
 0x3e7   :  { %5101 = vrot.lane.b32.xlu0 %v12750_v58, %s9744_s16  ;;  %v4758_v31 = vpop.permute.xlu1 %4757  ;;  %v5216_v58 = vsel %vm820_vm4, %v12752_v16, %v5215_v26  ;;  %v17108_v16 = vrot.slane %v12708_v57, 3 }
 0x3e8   :  { %v4677_v27 = vor.u32 %v12725_v50, %v17107_v7  ;;  %v12897_v50 = vld [vmem:[%s16526_s0 + $0x104] sm:$0xff]   ;;  %v16652_v7 = vrot.slane %v12830_v21, 3  ;;  %v5386_v36 = vsel %vm17113_vm9, %v12330_v9, %v4758_v31  ;;  %vm17118_vm9 = vcmask 97280  }
 0x3e9   :  { %v4756_v12 = vpop.permute.xlu0 %4755  ;;  %5156 = vrot.lane.b32.xlu1 %v12872_v23, %s9745_s22  ;;  %v5071_v24 = vrot.slane %v12897_v50, 2 }
 0x3ea   :  { %v4682_v0 = vsel %vm242_vm0, %v4677_v27, %v4681_v46  ;;  %v4690_v27 = vsel %vm242_vm0, %v4685_v43, %v16651_v19  ;;  %v12913_v46 = vshrl.u32 %v12897_v50, 16  ;;  %v16653_v19 = vrot.slane %v12897_v50, 1 }
 0x3eb   :  { %5154 = vrot.lane.b32.xlu0 %v5068_v53, %s9745_s22  ;;  %v12886_v17 = vpop.permute.xlu1 %4833  ;;  %v5324_v53 = vsel %vm16660_vm6, %v17108_v16, %v5323_v1  ;;  %v17109_v16 = vrot.slane %v12781_v60, 1  ;;  %v5072_v61 = vsel %vm690_vm3, %v17112_v22, %v5071_v24 }
 0x3ec   :  { %v12933_v60 = vsel %vm16658_vm1, %v4813_v59, %v16653_v19 }
 0x3ed   :  { %v4832_v37 = vpop.permute.xlu0 %4831  ;;  %5285 = vrot.lane.b32.xlu1 %v5220_v51, %s9746_s27  ;;  %v12910_v51 = vshll.u32 %v12897_v50, 16  ;;  %v4814_v43 = vsel %vm16658_vm1, %v17109_v16, %v4813_v59  ;;  %v5384_v59 = vsel %vm17110_vm8, %v12349_v34, %v4756_v12  ;;  %v5073_v12 = vrot.slane %v12940_v48, 2 }
 0x3ee   :  { %v5221_v34 = vrot.slane %v12913_v46, 2  ;;  %vm17115_vm8 = vcmask 162816  }
 0x3ef   :  { %5283 = vrot.lane.b32.xlu0 %v5216_v58, %s9746_s27  ;;  %v4887_v13 = vpop.permute.xlu1 %4886  ;;  %v5326_v58 = vsel %vm16660_vm6, %v5323_v1, %v16652_v7  ;;  %v4968_v6 = vrot.slane %v12910_v51, 2 }
 0x3f1   :  { %v4885_v26 = vpop.permute.xlu0 %4884  ;;  %4771 = vrot.lane.b32.xlu1 %v4682_v0, %s9740_s21 }
 0x3f3   :  { %5359 = vrot.lane.b32.xlu0 %v5324_v53, %s9748_s8  ;;  %v5016_v57 = vpop.permute.xlu1 %5015  ;;  %v4967_v53 = vrot.slane %v12913_v46, 1 }
 0x3f5   :  { %v5014_v0 = vpop.permute.xlu0 %5013  ;;  %4773 = vrot.lane.b32.xlu1 %v4690_v27, %s9740_s21  ;;  %v4965_v27 = vor.u32 %v4964_v49, %v4963_v20  ;;  %v12935_v16 = vor.u32 %v4968_v6, %v4967_v53  ;;  %v12950_v6 = vshll.u32 %v12940_v48, 16  ;;  %v12953_v20 = vshrl.u32 %v12940_v48, 16 }
 0x3f6   :  { %v5420_v53 = vsel %vm17111_vm13, %v5384_v59, %v4832_v37 }
 0x3f7   :  { %5361 = vrot.lane.b32.xlu0 %v5326_v58, %s9748_s8  ;;  %v5092_v1 = vpop.permute.xlu1 %5091  ;;  %v4970_v49 = vsel %vm16656_vm2, %v4965_v27, %v12935_v16  ;;  %v4966_v19 = vsel %vm16656_vm2, %v12825_v62, %v4965_v27  ;;  %v5456_v28 = vsel %vm17114_vm7, %v5420_v53, %v4885_v26  ;;  %v5222_v62 = vrot.slane %v12910_v51, 3  ;;  %vm17116_vm7 = vmmov %vm17111_vm13 }
 0x3f8   :  { %v5492_v37 = vsel %vm1135_vm11, %v5456_v28, %v5014_v0  ;;  %v5226_v22 = vrot.slane %v12950_v6, 3  ;;  %v5422_v31 = vsel %vm17116_vm7, %v5386_v36, %v12886_v17  ;;  %vm17117_vm13 = vcmask 195584  }
 0x3f9   :  { %v5090_v7 = vpop.permute.xlu0 %5089  ;;  %4849 = vrot.lane.b32.xlu1 %v4814_v43, %s9741_s28  ;;  %vm17119_vm2 = vcmask 228352   ;;  %v5223_v53 = vor.u32 %v5222_v62, %v5221_v34  ;;  %vm17121_vm7 = vcmask 228352   ;;  %v17122_v34 = vrot.slane %v12844_v56, 1 }
 0x3fa   :  { %v5528_v27 = vsel %vm17115_vm8, %v5492_v37, %v5090_v7  ;;  %v12987_v7 = vsel %vm690_vm3, %v5071_v24, %v5073_v12  ;;  %v4697_v37 = vrot.slane %v12910_v51, 1  ;;  %v5327_v62 = vrot.slane %v12897_v50, 3 }
 0x3fb   :  { %4847 = vrot.lane.b32.xlu0 %v12823_v63, %s9741_s28  ;;  %v5145_v58 = vpop.permute.xlu1 %5144  ;;  %v4705_v51 = vrot.slane %v12950_v6, 1 }
 0x3fd   :  { %v5143_v52 = vpop.permute.xlu0 %5142  ;;  %4902 = vrot.lane.b32.xlu1 %v12933_v60, %s9742_s29 }
 0x3fe   :  { %v5564_v26 = vsel %vm17117_vm13, %v5528_v27, %v5143_v52 }
 0x3ff   :  { %4900 = vrot.lane.b32.xlu0 %v4814_v43, %s9742_s29  ;;  %v5274_v63 = vpop.permute.xlu1 %5273  ;;  %v5225_v43 = vrot.slane %v12953_v20, 2 }
 0x401   :  { %v5272_v5 = vpop.permute.xlu0 %5271  ;;  %5031 = vrot.lane.b32.xlu1 %v4970_v49, %s9743_s11  ;;  %v5458_v49 = vsel %vm17118_vm9, %v5422_v31, %v4887_v13  ;;  %v12991_v36 = vor.u32 %v5226_v22, %v5225_v43  ;;  %v5329_v31 = vrot.slane %v12940_v48, 3  ;;  %vm17126_vm9 = vcmask 31744  }
 0x402   :  { %v5600_v28 = vsel %vm17119_vm2, %v5564_v26, %v5272_v5  ;;  %vm17120_vm2 = vmmov %vm17117_vm13  ;;  %vm17125_vm13 = vsmask.f32 6400 }
 0x403   :  { %5029 = vrot.lane.b32.xlu0 %v4966_v19, %s9743_s11  ;;  %v12976_v9 = vpop.permute.xlu1 %4759  ;;  %v5494_v19 = vsel %vm1135_vm11, %v5458_v49, %v5016_v57 }
 0x404   :  { %v5530_v52 = vsel %vm17115_vm8, %v5494_v19, %v5092_v1  ;;  %v5228_v1 = vsel %vm820_vm4, %v5223_v53, %v12991_v36  ;;  %v5330_v19 = vsel %vm16660_vm6, %v5327_v62, %v5329_v31  ;;  %vm17127_vm8 = vcmask 64512  }
 0x405   :  { %v5348_v0 = vpop.permute.xlu0 %5347  ;;  %5107 = vrot.lane.b32.xlu1 %v5072_v61, %s9744_s16  ;;  %v5566_v17 = vsel %vm17120_vm2, %v5530_v52, %v5145_v58  ;;  %vm17128_vm2 = vmmov %vm17125_vm13 }
 0x406   :  { %v5636_v59 = vsel %vm1283_vm15, %v5600_v28, %v5348_v0  ;;  %v5602_v24 = vsel %vm17121_vm7, %v5566_v17, %v5274_v63  ;;  %v5224_v63 = vsel %vm820_vm4, %v12874_v4, %v5223_v53  ;;  %v17123_v4 = vrot.slane %v12830_v21, 3  ;;  %vm17129_vm7 = vmmov %vm17126_vm9 }
 0x407   :  { %5105 = vrot.lane.b32.xlu0 %v12872_v23, %s9744_s16  ;;  %9370 = vmatprep.mubr.msk.bf16.mxu0 %vm1341_vm5, %v5636_v59  ;;  %v12997_v5 = vpop.permute.xlu1 %4761  ;;  %v4693_v23 = vor.u32 %v12847_v15, %v17122_v34  ;;  %v4701_v15 = vor.u32 %v12913_v46, %v4697_v37  ;;  %v4817_v46 = vrot.slane %v12940_v48, 1  ;;  %v17124_v53 = vrot.slane %v12897_v50, 1 }
 0x408   :  { %v5328_v27 = vsel %vm16660_vm6, %v17123_v4, %v5327_v62  ;;  %v13067_v62 = vld [vmem:[%s16526_s0 + $0x11c] sm:$0xff]  }
 0x409   :  { %v5350_v13 = vpop.permute.xlu0 %5349  ;;  %5160 = vrot.lane.b32.xlu1 %v12987_v7, %s9745_s22  ;;  %v4698_v56 = vsel %vm242_vm0, %v4693_v23, %v4697_v37  ;;  %v4706_v49 = vsel %vm242_vm0, %v4701_v15, %v4705_v51  ;;  %v4818_v52 = vsel %vm16658_vm1, %v17124_v53, %v4817_v46 }
 0x40a   :  { %v5638_v57 = vsel %vm1283_vm15, %v5602_v24, %v5350_v13  ;;  %v4971_v24 = vrot.slane %v12953_v20, 1  ;;  %v4972_v13 = vrot.slane %v12950_v6, 2 }
 0x40b   :  { %5158 = vrot.lane.b32.xlu0 %v5072_v61, %s9745_s22  ;;  %9371 = vmatmul.mubr.msk.bf16.vlgmr.msra.gmra.mxu0 %vm1341_vm5, %v5638_v57  ;;  %v13012_v58 = vpop.permute.xlu1 %4837  ;;  %v13024_v61 = vld [vmem:[%s16526_s0 + $0x114] sm:$0xff]  }
 0x40c   :  { %v13037_v28 = vshll.u32 %v13024_v61, 16  ;;  %v13040_v0 = vshrl.u32 %v13024_v61, 16  ;;  %v16657_v17 = vrot.slane %v13024_v61, 1  ;;  %v4973_v37 = vor.u32 %v4972_v13, %v4971_v24 }
 0x40d   :  { %v4836_v43 = vpop.permute.xlu0 %4835  ;;  %5289 = vrot.lane.b32.xlu1 %v5228_v1, %s9746_s27  ;;  %v5075_v15 = vrot.slane %v13024_v61, 2 }
 0x40e   :  { %v4975_v57 = vrot.slane %v13040_v0, 1  ;;  %v4976_v1 = vrot.slane %v13037_v28, 2  ;;  %v13060_v50 = vsel %vm16658_vm1, %v4817_v46, %v16657_v17  ;;  %v13077_v46 = vshll.u32 %v13067_v62, 16 }
 0x40f   :  { %5287 = vrot.lane.b32.xlu0 %v5224_v63, %s9746_s27  ;;  %v4891_v22 = vpop.permute.xlu1 %4890  ;;  %v4974_v24 = vsel %vm17128_vm2, %v12935_v16, %v4973_v37  ;;  %v5076_v13 = vsel %vm690_vm3, %v5073_v12, %v5075_v15  ;;  %v5230_v16 = vrot.slane %v13037_v28, 3  ;;  %vm17132_vm2 = vcmask 195584  }
 0x410   :  { %v13062_v63 = vor.u32 %v4976_v1, %v4975_v57  ;;  %v5390_v57 = vsel %vm17129_vm7, %v12398_v40, %v12997_v5  ;;  %v5234_v12 = vrot.slane %v13077_v46, 3 }
 0x411   :  { %v4889_v26 = vpop.permute.xlu0 %4888  ;;  %4775 = vrot.lane.b32.xlu1 %v4698_v56, %s9740_s21  ;;  %v5426_v5 = vsel %vm17127_vm8, %v5390_v57, %v13012_v58 }
 0x413   :  { %5363 = vrot.lane.b32.xlu0 %v5328_v27, %s9748_s8  ;;  %v5020_v21 = vpop.permute.xlu1 %5019  ;;  %v4978_v27 = vsel %vm17125_vm13, %v4973_v37, %v13062_v63  ;;  %vm17130_vm13 = vcmask 97280  }
 0x414   :  { %vm17133_vm7 = vmmov %vm17130_vm13 }
 0x415   :  { %v5018_v59 = vpop.permute.xlu0 %5017  ;;  %4777 = vrot.lane.b32.xlu1 %v4706_v49, %s9740_s21  ;;  %v13080_v49 = vshrl.u32 %v13067_v62, 16 }
 0x417   :  { %5365 = vrot.lane.b32.xlu0 %v5330_v19, %s9748_s8  ;;  %v5096_v34 = vpop.permute.xlu1 %5095 }
 0x419   :  { %v5094_v23 = vpop.permute.xlu0 %5093  ;;  %4853 = vrot.lane.b32.xlu1 %v4818_v52, %s9741_s28 }
 0x41b   :  { %4851 = vrot.lane.b32.xlu0 %v12933_v60, %s9741_s28  ;;  %v5149_v56 = vpop.permute.xlu1 %5148  ;;  %v5388_v60 = vsel %vm17126_vm9, %v12357_v14, %v12976_v9  ;;  %v5077_v14 = vrot.slane %v13067_v62, 2  ;;  %v5229_v9 = vrot.slane %v13040_v0, 2  ;;  %vm17131_vm9 = vcmask 162816  }
 0x41c   :  { %v5424_v53 = vsel %vm17127_vm8, %v5388_v60, %v4836_v43  ;;  %vm17135_vm8 = vmmov %vm17132_vm2 }
 0x41d   :  { %v5147_v4 = vpop.permute.xlu0 %5146  ;;  %4906 = vrot.lane.b32.xlu1 %v13060_v50, %s9742_s29  ;;  %v5460_v1 = vsel %vm17130_vm13, %v5424_v53, %v4889_v26  ;;  %vm17134_vm13 = vcmask 228352  }
 0x41e   :  { %v5496_v43 = vsel %vm1135_vm11, %v5460_v1, %v5018_v59  ;;  %v5231_v1 = vor.u32 %v5230_v16, %v5229_v9 }
 0x41f   :  { %4904 = vrot.lane.b32.xlu0 %v4818_v52, %s9742_s29  ;;  %v5278_v19 = vpop.permute.xlu1 %5277  ;;  %v5233_v52 = vrot.slane %v13080_v49, 2  ;;  %v5532_v37 = vsel %vm17131_vm9, %v5496_v43, %v5094_v23  ;;  %v13116_v23 = vsel %vm690_vm3, %v5075_v15, %v5077_v14  ;;  %v5331_v43 = vrot.slane %v13024_v61, 3 }
 0x420   :  { %v5568_v26 = vsel %vm17132_vm2, %v5532_v37, %v5147_v4  ;;  %vm17136_vm2 = vmmov %vm17134_vm13 }
 0x421   :  { %v5276_v17 = vpop.permute.xlu0 %5275  ;;  %5035 = vrot.lane.b32.xlu1 %v4978_v27, %s9743_s11  ;;  %v5462_v27 = vsel %vm17133_vm7, %v5426_v5, %v4891_v22  ;;  %v13120_v58 = vor.u32 %v5234_v12, %v5233_v52  ;;  %vm17138_vm7 = vcmask 31744  }
 0x422   :  { %v5604_v59 = vsel %vm17134_vm13, %v5568_v26, %v5276_v17  ;;  %v5498_v53 = vsel %vm1135_vm11, %v5462_v27, %v5020_v21  ;;  %vm17139_vm13 = vsmask.f32 6400 }
 0x423   :  { %5033 = vrot.lane.b32.xlu0 %v4974_v24, %s9743_s11  ;;  %v13105_v40 = vpop.permute.xlu1 %4763  ;;  %v5534_v4 = vsel %vm17131_vm9, %v5498_v53, %v5096_v34  ;;  %v5236_v9 = vsel %vm820_vm4, %v5231_v1, %v13120_v58  ;;  %v4713_v34 = vrot.slane %v13037_v28, 1  ;;  %vm17140_vm9 = vmmov %vm17138_vm7 }
 0x424   :  { %v5570_v17 = vsel %vm17135_vm8, %v5534_v4, %v5149_v56  ;;  %vm17141_vm8 = vcmask 64512  }
 0x425   :  { %v5352_v60 = vpop.permute.xlu0 %5351  ;;  %5111 = vrot.lane.b32.xlu1 %v5076_v13, %s9744_s16  ;;  %v5606_v15 = vsel %vm17136_vm2, %v5570_v17, %v5278_v19  ;;  %v5232_v19 = vsel %vm820_vm4, %v12991_v36, %v5231_v1  ;;  %v4717_v6 = vor.u32 %v13040_v0, %v4713_v34  ;;  %v5332_v36 = vsel %vm16660_vm6, %v5329_v31, %v5331_v43  ;;  %vm17142_vm2 = vmmov %vm17139_vm13 }
 0x426   :  { %v5640_v24 = vsel %vm1283_vm15, %v5604_v59, %v5352_v60  ;;  %v4821_v0 = vrot.slane %v13067_v62, 1  ;;  %v17137_v59 = vrot.slane %v13024_v61, 1  ;;  %v4980_v1 = vrot.slane %v13077_v46, 2  ;;  %v13186_v61 = vld [vmem:[%s16526_s0 + $0x12c] sm:$0xff]  }
 0x427   :  { %5109 = vrot.lane.b32.xlu0 %v12987_v7, %s9744_s16  ;;  %9374 = vmatprep.mubr.msk.bf16.mxu0 %vm1341_vm5, %v5640_v24  ;;  %v4766_v22 = vpop.permute.xlu1 %4765  ;;  %v4709_v7 = vor.u32 %v12953_v20, %v4705_v51  ;;  %v4721_v20 = vrot.slane %v13077_v46, 1  ;;  %v13149_v51 = vld [vmem:[%s16526_s0 + $0x124] sm:$0xff]   ;;  %v4979_v24 = vrot.slane %v13080_v49, 1 }
 0x428   :  { %v13162_v5 = vshll.u32 %v13149_v51, 16  ;;  %v13165_v26 = vshrl.u32 %v13149_v51, 16  ;;  %v4822_v60 = vsel %vm16658_vm1, %v17137_v59, %v4821_v0  ;;  %v16659_v53 = vrot.slane %v13149_v51, 1  ;;  %v9602_v46 = vld [vmem:[%s16526_s0 + $0x20] sm:$0xff]  }
 0x429   :  { %v5354_v57 = vpop.permute.xlu0 %5353  ;;  %5164 = vrot.lane.b32.xlu1 %v13116_v23, %s9745_s22  ;;  %v4714_v52 = vsel %vm242_vm0, %v4709_v7, %v4713_v34  ;;  %v4722_v37 = vsel %vm242_vm0, %v4717_v6, %v4721_v20  ;;  %v5079_v6 = vrot.slane %v13149_v51, 2 }
 0x42a   :  { %v5642_v21 = vsel %vm1283_vm15, %v5606_v15, %v5354_v57  ;;  %v4983_v4 = vrot.slane %v13165_v26, 1  ;;  %v4984_v17 = vrot.slane %v13162_v5, 2 }
 0x42b   :  { %5162 = vrot.lane.b32.xlu0 %v5076_v13, %s9745_s22  ;;  %9375 = vmatmul.mubr.msk.bf16.gmra.mxu0 %vm1341_vm5, %v5642_v21  ;;  %v4842_v56 = vpop.permute.xlu1 %4841  ;;  %v5333_v13 = vrot.slane %v13067_v62, 3  ;;  %v13192_v21 = vsel %vm16658_vm1, %v4821_v0, %v16659_v53 }
 0x42c   :  { %v13194_v7 = vor.u32 %v4984_v17, %v4983_v4  ;;  %v3606_v17 = vld [vmem:[%s16530_s6] sm:$0x3] }
 0x42d   :  { %v4840_v16 = vpop.permute.xlu0 %4839  ;;  %5293 = vrot.lane.b32.xlu1 %v5236_v9, %s9746_s27  ;;  %v5334_v31 = vsel %vm16660_vm6, %v5331_v43, %v5333_v13  ;;  %v4981_v9 = vor.u32 %v4980_v1, %v4979_v24  ;;  %v13202_v43 = vshrl.u32 %v13186_v61, 16  ;;  %v5238_v24 = vrot.slane %v13162_v5, 3 }
 0x42f   :  { %5291 = vrot.lane.b32.xlu0 %v5232_v19, %s9746_s27  ;;  %v4895_v28 = vpop.permute.xlu1 %4894  ;;  %v13199_v19 = vshll.u32 %v13186_v61, 16  ;;  %v4986_v0 = vsel %vm17139_vm13, %v4981_v9, %v13194_v7  ;;  %v5241_v1 = vrot.slane %v13202_v43, 2  ;;  %v4982_v4 = vsel %vm17142_vm2, %v13062_v63, %v4981_v9 }
 0x430   :  { %vm17144_vm13 = vcmask 97280   ;;  %v5080_v63 = vsel %vm690_vm3, %v5077_v14, %v5079_v6 }
 0x431   :  { %v4893_v12 = vpop.permute.xlu0 %4892  ;;  %4779 = vrot.lane.b32.xlu1 %v4714_v52, %s9740_s21  ;;  %vm17147_vm6 = vmmov %vm17144_vm13 }
 0x433   :  { %5367 = vrot.lane.b32.xlu0 %v5332_v36, %s9748_s8  ;;  %v5024_v48 = vpop.permute.xlu1 %5023  ;;  %v5394_v36 = vsel %vm17138_vm7, %v12539_v18, %v4766_v22  ;;  %v5242_v18 = vrot.slane %v13199_v19, 3  ;;  %vm17143_vm7 = vmmov %vm17141_vm8 }
 0x435   :  { %v5022_v27 = vpop.permute.xlu0 %5021  ;;  %4781 = vrot.lane.b32.xlu1 %v4722_v37, %s9740_s21  ;;  %v5237_v37 = vrot.slane %v13165_v26, 2 }
 0x437   :  { %5369 = vrot.lane.b32.xlu0 %v5334_v31, %s9748_s8  ;;  %v13181_v15 = vpop.permute.xlu1 %5099  ;;  %v5392_v31 = vsel %vm17140_vm9, %v12458_v41, %v13105_v40  ;;  %v5430_v41 = vsel %vm17143_vm7, %v5394_v36, %v4842_v56  ;;  %vm17145_vm9 = vcmask 1041408   ;;  %v5239_v36 = vor.u32 %v5238_v24, %v5237_v37 }
 0x438   :  { %v5428_v22 = vsel %vm17141_vm8, %v5392_v31, %v4840_v16  ;;  %9491 = vmatprep.subr.msk.bf16.mxu1 %vm17145_vm9, %v3606_v17  ;;  %vm17146_vm1 = vmmov %vm17145_vm9  ;;  %v5466_v16 = vsel %vm17147_vm6, %v5430_v41, %v4895_v28  ;;  %v9600_v28 = vld [vmem:[%s16526_s0 + $0x10] sm:$0xff]   ;;  %vm17149_vm6 = vcmask 195584   ;;  %vm17150_vm8 = vcmask 228352  }
 0x439   :  { %v5098_v57 = vpop.permute.xlu0 %5097  ;;  %4857 = vrot.lane.b32.xlu1 %v4822_v60, %s9741_s28  ;;  %v5464_v40 = vsel %vm17144_vm13, %v5428_v22, %v4893_v12  ;;  %v3925_v53 = vsel %vm17146_vm1, %v3606_v17, 0  ;;  %v9599_v12 = vld [vmem:[%s16526_s0 + $0x8] sm:$0xfe]   ;;  %vm17148_vm1 = vcmask 162816   ;;  %v3709_v41 = vshrl.u32 %v9600_v28, 16  ;;  %vm17152_vm7 = vmmov %vm17149_vm6 }
 0x43a   :  { %v5500_v31 = vsel %vm1135_vm11, %v5464_v40, %v5022_v27  ;;  %9281 = vmatpush3.bf16.msra.mxu1 %v3925_v53  ;;  %v5502_v27 = vsel %vm1135_vm11, %v5466_v16, %v5024_v48  ;;  %v9601_v53 = vld [vmem:[%s16526_s0 + $0x18] sm:$0xff]   ;;  %v3701_v22 = vshrl.u32 %v9599_v12, 16  ;;  %v3704_v17 = vshll.u32 %v9599_v12, 16  ;;  %vm17151_vm2 = vmmov %vm17148_vm1 }
 0x43b   :  { %4855 = vrot.lane.b32.xlu0 %v13060_v50, %s9741_s28  ;;  %v5153_v34 = vpop.permute.xlu1 %5152  ;;  %v16665_v50 = vrot.slane %v13186_v61, 2  ;;  %v5536_v9 = vsel %vm17148_vm1, %v5500_v31, %v5098_v57  ;;  %v3712_v57 = vshll.u32 %v9600_v28, 16  ;;  %v3721_v16 = vshll.u32 %v9601_v53, 16  ;;  %vm17153_vm13 = vmmov %vm17150_vm8 }
 0x43c   :  { %v3703_v24 = vrot.slane %v3701_v22, 1  ;;  %v5538_v31 = vsel %vm17151_vm2, %v5502_v27, %v13181_v15  ;;  %vm17154_vm9 = vsmask.f32 6400  ;;  %vm17158_vm2 = vcmask 1044480  }
 0x43d   :  { %v5151_v52 = vpop.permute.xlu0 %5150  ;;  %4910 = vrot.lane.b32.xlu1 %v13192_v21, %s9742_s29  ;;  %v13239_v56 = vsel %vm690_vm3, %v5079_v6, %v16665_v50  ;;  %v13252_v6 = vor.u32 %v5242_v18, %v5241_v1  ;;  %v3706_v1 = vrot.slane %v3704_v17, 2  ;;  %v3711_v18 = vrot.slane %v3709_v41, 1  ;;  %vm17155_vm1 = vmmov %vm17154_vm9 }
 0x43e   :  { %v3723_v28 = vrot.slane %v3721_v16, 2 }
 0x43f   :  { %4908 = vrot.lane.b32.xlu0 %v4822_v60, %s9742_s29  ;;  %v5282_v59 = vpop.permute.xlu1 %5281 }
 0x441   :  { %v5280_v60 = vpop.permute.xlu0 %5279  ;;  %5039 = vrot.lane.b32.xlu1 %v4986_v0, %s9743_s11  ;;  %v5572_v0 = vsel %vm17149_vm6, %v5536_v9, %v5151_v52  ;;  %v5574_v9 = vsel %vm17152_vm7, %v5538_v31, %v5153_v34  ;;  %v5244_v34 = vsel %vm820_vm4, %v5239_v36, %v13252_v6  ;;  %vm17156_vm6 = vcmask 31744   ;;  %vm17159_vm7 = vmmov %vm17155_vm1 }
 0x442   :  { %v5608_v48 = vsel %vm17150_vm8, %v5572_v0, %v5280_v60  ;;  %v3714_v60 = vrot.slane %v3712_v57, 2  ;;  %v3707_v0 = vor.u32 %v3706_v1, %v3703_v24  ;;  %v5610_v22 = vsel %vm17153_vm13, %v5574_v9, %v5282_v59  ;;  %vm17157_vm8 = vmmov %vm17156_vm6 }
 0x443   :  { %5037 = vrot.lane.b32.xlu0 %v4982_v4, %s9743_s11  ;;  %v13250_v14 = vpop.permute.xlu1 %4767  ;;  %v3718_v4 = vshrl.u32 %v9601_v53, 16  ;;  %v4725_v53 = vor.u32 %v13080_v49, %v4721_v20  ;;  %v5240_v59 = vsel %vm820_vm4, %v13120_v58, %v5239_v36  ;;  %v3730_v57 = vshll.u32 %v9602_v46, 16  ;;  %v13302_v58 = vld [vmem:[%s16526_s0 + $0x134] sm:$0xff]   ;;  %vm17160_vm13 = vmmov %vm17156_vm6 }
 0x444   :  { %v3715_v27 = vor.u32 %v3714_v60, %v3711_v18  ;;  %v16661_v31 = vrot.slane %v13186_v61, 3  ;;  %v13319_v9 = vshll.u32 %v13302_v58, 16  ;;  %v13322_v62 = vshrl.u32 %v13302_v58, 16 }
 0x445   :  { %v5356_v40 = vpop.permute.xlu0 %5355  ;;  %5115 = vrot.lane.b32.xlu1 %v5080_v63, %s9744_s16  ;;  %v3720_v12 = vrot.slane %v3718_v4, 1  ;;  %v3732_v24 = vrot.slane %v3730_v57, 2 }
 0x446   :  { %v5644_v37 = vsel %vm1283_vm15, %v5608_v48, %v5356_v40  ;;  %v3716_v20 = vsel %vm17154_vm9, %v3707_v0, %v3715_v27  ;;  %v5335_v48 = vrot.slane %v13149_v51, 3  ;;  %v3727_v40 = vshrl.u32 %v9602_v46, 16  ;;  %vm17161_vm9 = vmmov %vm17158_vm2 }
 0x447   :  { %5113 = vrot.lane.b32.xlu0 %v13116_v23, %s9744_s16  ;;  %9378 = vmatprep.mubr.msk.bf16.mxu0 %vm1341_vm5, %v5644_v37  ;;  %v13266_v52 = vpop.permute.xlu1 %4769  ;;  %v4729_v23 = vrot.slane %v13162_v5, 1  ;;  %v3724_v17 = vor.u32 %v3723_v28, %v3720_v12  ;;  %v16664_v37 = vrot.slane %v13199_v19, 1  ;;  %v4825_v12 = vrot.slane %v13186_v61, 1 }
 0x448   :  { %9282 = vmatprep.mubr.msk.bf16.mxu1 %vm17156_vm6, %v3716_v20  ;;  %v3729_v36 = vrot.slane %v3727_v40, 1  ;;  %v5336_v18 = vsel %vm17158_vm2, %v5333_v13, %v5335_v48  ;;  %v5338_v0 = vsel %vm17161_vm9, %v5335_v48, %v16661_v31  ;;  %v4991_v46 = vrot.slane %v13322_v62, 1  ;;  %vm17166_vm2 = vmmov %vm17160_vm13 }
 0x449   :  { %v5358_v15 = vpop.permute.xlu0 %5357  ;;  %5168 = vrot.lane.b32.xlu1 %v13239_v56, %s9745_s22  ;;  %v3725_v5 = vsel %vm17155_vm1, %v3715_v27, %v3724_v17  ;;  %v4733_v16 = vor.u32 %v13165_v26, %v4729_v23  ;;  %vm17163_vm1 = vcmask 1046528   ;;  %v13338_v27 = vrot.slane %v13302_v58, 1 }
 0x44a   :  { %v5646_v41 = vsel %vm1283_vm15, %v5610_v22, %v5358_v15  ;;  %9283 = vmatmul.mubr.msk.bf16.vlgmr.msra.gmra.mxu1 %vm17157_vm8, %v3725_v5  ;;  %v13311_v26 = vor.u32 %v3732_v24, %v3729_v36  ;;  %v17162_v15 = vrot.slane %v13149_v51, 1  ;;  %v4992_v20 = vrot.slane %v13319_v9, 2  ;;  %vm17164_vm6 = vmmov %vm17163_vm1 }
 0x44b   :  { %5166 = vrot.lane.b32.xlu0 %v5080_v63, %s9745_s22  ;;  %9379 = vmatmul.mubr.msk.bf16.gmra.mxu0 %vm1341_vm5, %v5646_v41  ;;  %v13284_v49 = vpop.permute.xlu1 %4845  ;;  %v4730_v63 = vsel %vm242_vm0, %v4725_v53, %v4729_v23  ;;  %v4738_v28 = vsel %vm242_vm0, %v4733_v16, %v16664_v37  ;;  %v4987_v41 = vrot.slane %v13202_v43, 1  ;;  %v13355_v40 = vsel %vm17164_vm6, %v4825_v12, %v13338_v27  ;;  %v9603_v16 = vld [vmem:[%s16526_s0 + $0x28] sm:$0xff]   ;;  %vm17165_vm8 = vmmov %vm17159_vm7 }
 0x44c   :  { %v3734_v13 = vsel %vm17159_vm7, %v3724_v17, %v13311_v26  ;;  %v4826_v23 = vsel %vm17163_vm1, %v17162_v15, %v4825_v12  ;;  %v13343_v17 = vld [vmem:[%s16526_s0 + $0x13c] sm:$0xff]   ;;  %v5083_v24 = vrot.slane %v13302_v58, 2  ;;  %v5245_v12 = vrot.slane %v13322_v62, 2  ;;  %vm17167_vm7 = vmmov %vm17166_vm2 }
 0x44d   :  { %v13292_v4 = vpop.permute.xlu0 %4843  ;;  %5297 = vrot.lane.b32.xlu1 %v5244_v34, %s9746_s27  ;;  %9286 = vmatprep.mubr.msk.bf16.mxu1 %vm17160_vm13, %v3734_v13  ;;  %v4988_v34 = vrot.slane %v13199_v19, 2  ;;  %v16663_v48 = vshll.u32 %v13343_v17, 16  ;;  %vm17168_vm13 = vcmask 64512   ;;  %vm17169_vm9 = vmmov %vm17165_vm8  ;;  %vm17170_vm1 = vcmask 97280  }
 0x44e   :  { %vm17172_vm6 = vmmov %vm17168_vm13 }
 0x44f   :  { %5295 = vrot.lane.b32.xlu0 %v5240_v59, %s9746_s27  ;;  %v13305_v1 = vpop.permute.xlu1 %4898  ;;  %v16662_v59 = vshrl.u32 %v13343_v17, 16  ;;  %v4989_v57 = vor.u32 %v4988_v34, %v4987_v41  ;;  %v13378_v34 = vrot.slane %v13343_v17, 2 }
 0x451   :  { %v4897_v60 = vpop.permute.xlu0 %4896  ;;  %4783 = vrot.lane.b32.xlu1 %v4730_v63, %s9740_s21  ;;  %v13357_v63 = vor.u32 %v4992_v20, %v4991_v46  ;;  %v5249_v15 = vrot.slane %v16662_v59, 2  ;;  %v5398_v59 = vsel %vm17167_vm7, %v12659_v35, %v13266_v52  ;;  %vm17174_vm7 = vcmask 162816  }
 0x453   :  { %5371 = vrot.lane.b32.xlu0 %v5336_v18, %s9748_s8  ;;  %v13327_v53 = vpop.permute.xlu1 %5027  ;;  %v3736_v18 = vshrl.u32 %v9603_v16, 16  ;;  %v4994_v41 = vsel %vm17165_vm8, %v4989_v57, %v13357_v63 }
 0x455   :  { %v5026_v22 = vpop.permute.xlu0 %5025  ;;  %4785 = vrot.lane.b32.xlu1 %v4738_v28, %s9740_s21  ;;  %v3739_v28 = vshll.u32 %v9603_v16, 16  ;;  %v3738_v46 = vrot.slane %v3736_v18, 1  ;;  %v9690_v16 = vld [vmem:[%s16526_s0 + $0xdc] sm:$0xff]   ;;  %v4990_v18 = vsel %vm17169_vm9, %v13194_v7, %v4989_v57  ;;  %v5434_v7 = vsel %vm17172_vm6, %v5398_v59, %v13284_v49  ;;  %v9605_v59 = vld [vmem:[%s16526_s0 + $0x30] sm:$0xff]  }
 0x456   :  { %v5396_v31 = vsel %vm17166_vm2, %v9690_v16, %v13250_v14  ;;  %v17171_v14 = vrot.slane %v13186_v61, 2  ;;  %vm17173_vm2 = vmmov %vm17170_vm1  ;;  %v17175_v49 = vrot.slane %v13199_v19, 1  ;;  %vm17177_vm9 = vcmask 195584   ;;  %v9606_v19 = vld [vmem:[%s16526_s0 + $0x38] sm:$0xff]  }
 0x457   :  { %5373 = vrot.lane.b32.xlu0 %v5338_v0, %s9748_s8  ;;  %v5104_v51 = vpop.permute.xlu1 %5103  ;;  %v5246_v0 = vrot.slane %v13319_v9, 3  ;;  %v3741_v20 = vrot.slane %v3739_v28, 2  ;;  %v5432_v37 = vsel %vm17168_vm13, %v5396_v31, %v13292_v4  ;;  %v13405_v4 = vld [vmem:[%s16526_s0 + $0x13c] ss:$0 sps:$4 sm:$0x11]   ;;  %v13412_v31 = vsel %vm690_vm3, %v5083_v24, %v13378_v34 }
 0x458   :  { %v5468_v50 = vsel %vm17170_vm1, %v5432_v37, %v4897_v60  ;;  %v5084_v35 = vsel %vm690_vm3, %v17171_v14, %v5083_v24  ;;  %v5470_v57 = vsel %vm17173_vm2, %v5434_v7, %v13305_v1  ;;  %vm17176_vm13 = vcmask 31744   ;;  %vm17178_vm1 = vmmov %vm17174_vm7 }
 0x459   :  { %v5102_v5 = vpop.permute.xlu0 %5101  ;;  %4861 = vrot.lane.b32.xlu1 %v4826_v23, %s9741_s28  ;;  %v13393_v28 = vor.u32 %v3741_v20, %v3738_v46  ;;  %v5247_v52 = vor.u32 %v5246_v0, %v5245_v12  ;;  %v5504_v37 = vsel %vm1135_vm11, %v5468_v50, %v5026_v22  ;;  %v13426_v50 = vor.u32 %v13202_v43, %v17175_v49  ;;  %v9607_v43 = vld [vmem:[%s16526_s0 + $0x40] sm:$0xff]  }
 0x45a   :  { %v5540_v12 = vsel %vm17174_vm7, %v5504_v37, %v5102_v5  ;;  %v5506_v22 = vsel %vm1135_vm11, %v5470_v57, %v13327_v53  ;;  %v4745_v1 = vrot.slane %v13319_v9, 1  ;;  %v5339_v5 = vrot.slane %v13302_v58, 3 }
 0x45b   :  { %4859 = vrot.lane.b32.xlu0 %v13192_v21, %s9741_s28  ;;  %v13364_v36 = vpop.permute.xlu1 %5156  ;;  %v5250_v21 = vrot.slane %v16663_v48, 3  ;;  %v3743_v60 = vsel %vm17165_vm8, %v13311_v26, %v13393_v28  ;;  %v5542_v53 = vsel %vm17178_vm1, %v5506_v22, %v5104_v51  ;;  %vm17179_vm6 = vcmask 228352   ;;  %vm17180_vm8 = vmmov %vm17177_vm9 }
 0x45c   :  { %9287 = vmatmul.mubr.msk.bf16.gmra.mxu1 %vm17176_vm13, %v3743_v60  ;;  %v3745_v46 = vshrl.u32 %v9605_v59, 16  ;;  %v3748_v20 = vshll.u32 %v9605_v59, 16  ;;  %v3754_v16 = vshrl.u32 %v9606_v19, 16  ;;  %v3763_v14 = vshrl.u32 %v9607_v43, 16  ;;  %vm17181_vm2 = vmmov %vm17179_vm6 }
 0x45d   :  { %v5155_v13 = vpop.permute.xlu0 %5154  ;;  %4914 = vrot.lane.b32.xlu1 %v13355_v40, %s9742_s29  ;;  %v3766_v7 = vshll.u32 %v9607_v43, 16  ;;  %v5578_v60 = vsel %vm17180_vm8, %v5542_v53, %v13364_v36  ;;  %vm17182_vm7 = vsmask.f32 6400  ;;  %vm17187_vm8 = vcmask 1044480  }
 0x45e   :  { %v5576_v26 = vsel %vm17177_vm9, %v5540_v12, %v5155_v13  ;;  %v3747_v57 = vrot.slane %v3745_v46, 1  ;;  %v3750_v12 = vrot.slane %v3748_v20, 2  ;;  %v3756_v49 = vrot.slane %v3754_v16, 1  ;;  %v9610_v16 = vld [vmem:[%s16526_s0 + $0x58] sm:$0xff]   ;;  %vm17183_vm9 = vmmov %vm17182_vm7 }
 0x45f   :  { %4912 = vrot.lane.b32.xlu0 %v4826_v23, %s9742_s29  ;;  %v5286_v48 = vpop.permute.xlu1 %5285  ;;  %v13400_v23 = vor.u32 %v5250_v21, %v5249_v15  ;;  %v4751_v15 = vshll.u32 %v13405_v4, 16  ;;  %v9608_v21 = vld [vmem:[%s16526_s0 + $0x48] sm:$0xff]   ;;  %v3765_v59 = vrot.slane %v3763_v14, 1  ;;  %vm17184_vm1 = vmmov %vm17182_vm7 }
 0x460   :  { %v3772_v37 = vshrl.u32 %v9608_v21, 16  ;;  %v5614_v22 = vsel %vm17181_vm2, %v5578_v60, %v5286_v48  ;;  %v3775_v43 = vshll.u32 %v9608_v21, 16 }
 0x461   :  { %v5284_v32 = vpop.permute.xlu0 %5283  ;;  %5043 = vrot.lane.b32.xlu1 %v4994_v41, %s9743_s11  ;;  %v5252_v9 = vsel %vm820_vm4, %v5247_v52, %v13400_v23 }
 0x462   :  { %v5612_v24 = vsel %vm17179_vm6, %v5576_v26, %v5284_v32  ;;  %v9609_v32 = vld [vmem:[%s16526_s0 + $0x50] sm:$0xff]   ;;  %v3774_v46 = vrot.slane %v3772_v37, 1  ;;  %v3777_v14 = vrot.slane %v3775_v43, 2  ;;  %v4746_v37 = vsel %vm242_vm0, %v13426_v50, %v4745_v1  ;;  %vm17185_vm6 = vmmov %vm17176_vm13 }
 0x463   :  { %5041 = vrot.lane.b32.xlu0 %v4990_v18, %s9743_s11  ;;  %v13421_v0 = vpop.permute.xlu1 %4771  ;;  %v3757_v18 = vshll.u32 %v9606_v19, 16  ;;  %v3784_v20 = vshll.u32 %v9609_v32, 16  ;;  %vm17188_vm2 = vmmov %vm17185_vm6  ;;  %v3793_v50 = vshll.u32 %v9610_v16, 16  ;;  %v4829_v43 = vrot.slane %v13405_v4, 1 }
 0x465   :  { %v5360_v13 = vpop.permute.xlu0 %5359  ;;  %5119 = vrot.lane.b32.xlu1 %v5084_v35, %s9744_s16 }
 0x466   :  { %v5648_v41 = vsel %vm1283_vm15, %v5612_v24, %v5360_v13  ;;  %v3768_v24 = vrot.slane %v3766_v7, 2  ;;  %v3751_v13 = vor.u32 %v3750_v12, %v3747_v57  ;;  %v9611_v7 = vld [vmem:[%s16526_s0 + $0x60] sm:$0xff]   ;;  %v4749_v57 = vor.u32 %v13322_v62, %v4745_v1 }
 0x467   :  { %5117 = vrot.lane.b32.xlu0 %v13239_v56, %s9744_s16  ;;  %9382 = vmatprep.mubr.msk.bf16.mxu0 %vm1341_vm5, %v5648_v41  ;;  %v13459_v51 = vpop.permute.xlu1 %4773  ;;  %v3759_v56 = vrot.slane %v3757_v18, 2  ;;  %v3781_v41 = vshrl.u32 %v9609_v32, 16  ;;  %v5248_v18 = vsel %vm820_vm4, %v13252_v6, %v5247_v52  ;;  %v13487_v32 = vld [vmem:[%s16526_s0 + $0x144] ss:$0 sps:$4 sm:$0x33]   ;;  %v3786_v52 = vrot.slane %v3784_v20, 2 }
 0x468   :  { %v3769_v48 = vor.u32 %v3768_v24, %v3765_v59  ;;  %v3752_v21 = vsel %vm17182_vm7, %v13393_v28, %v3751_v13  ;;  %v4753_v12 = vrot.slane %v4751_v15, 1  ;;  %v5341_v62 = vrot.slane %v13343_v17, 3  ;;  %vm17189_vm7 = vmmov %vm17184_vm1 }
 0x469   :  { %v5362_v26 = vpop.permute.xlu0 %5361  ;;  %5172 = vrot.lane.b32.xlu1 %v13412_v31, %s9745_s22  ;;  %v3760_v53 = vor.u32 %v3759_v56, %v3756_v49  ;;  %9290 = vmatprep.mubr.msk.bf16.mxu1 %vm17176_vm13, %v3752_v21  ;;  %v17186_v49 = vrot.slane %v13186_v61, 3  ;;  %v3790_v56 = vshrl.u32 %v9610_v16, 16  ;;  %v3799_v15 = vshrl.u32 %v9611_v7, 16  ;;  %vm17190_vm13 = vmmov %vm17187_vm8 }
 0x46a   :  { %v5650_v19 = vsel %vm1283_vm15, %v5614_v22, %v5362_v26  ;;  %v3778_v26 = vor.u32 %v3777_v14, %v3774_v46  ;;  %v3802_v59 = vshll.u32 %v9611_v7, 16  ;;  %v5008_v61 = vshll.u32 %v13487_v32, 16 }
 0x46b   :  { %5170 = vrot.lane.b32.xlu0 %v5084_v35, %s9745_s22  ;;  %9383 = vmatmul.mubr.msk.bf16.gmra.mxu0 %vm1341_vm5, %v5650_v19  ;;  %v13469_v36 = vpop.permute.xlu1 %4849  ;;  %v3783_v35 = vrot.slane %v3781_v41, 1  ;;  %v3761_v6 = vsel %vm17183_vm9, %v3751_v13, %v3760_v53  ;;  %v3770_v28 = vsel %vm17184_vm1, %v3760_v53, %v3769_v48  ;;  %v5340_v22 = vsel %vm17187_vm8, %v17186_v49, %v5339_v5  ;;  %v9594_v41 = vld [vmem:[%s16526_s0 + $0x144] ss:$0 sps:$4 sm:$0x11]   ;;  %vm17191_vm9 = vmmov %vm17184_vm1 }
 0x46c   :  { %9291 = vmatmul.mubr.msk.bf16.gmra.mxu1 %vm17185_vm6, %v3761_v6  ;;  %v5005_v19 = vshrl.u32 %v13487_v32, 16  ;;  %v4754_v13 = vsel %vm242_vm0, %v4749_v57, %v4753_v12  ;;  %v3779_v46 = vsel %vm17189_vm7, %v3769_v48, %v3778_v26  ;;  %v3792_v20 = vrot.slane %v3790_v56, 1  ;;  %vm17195_vm6 = vmmov %vm17188_vm2 }
 0x46d   :  { %v13481_v60 = vpop.permute.xlu0 %4847  ;;  %5301 = vrot.lane.b32.xlu1 %v5252_v9, %s9746_s27  ;;  %9294 = vmatprep.mubr.msk.bf16.mxu1 %vm17188_vm2, %v3770_v28  ;;  %v3787_v1 = vor.u32 %v3786_v52, %v3783_v35  ;;  %v3795_v16 = vrot.slane %v3793_v50, 2  ;;  %v3801_v21 = vrot.slane %v3799_v15, 1  ;;  %v3804_v14 = vrot.slane %v3802_v59, 2  ;;  %vm17196_vm8 = vmmov %vm17188_vm2  ;;  %v13550_v59 = vld [vmem:[%s16526_s0 + $0x14c] ss:$0 sps:$4 sm:$0x77]  }
 0x46e   :  { %v17192_v7 = vshrl.u32 %v13343_v17, 16  ;;  %v17193_v48 = vshll.u32 %v13343_v17, 16  ;;  %v5007_v52 = vrot.slane %v5005_v19, 1  ;;  %vm17194_vm1 = vcmask 1046528  }
 0x46f   :  { %5299 = vrot.lane.b32.xlu0 %v5248_v18, %s9746_s27  ;;  %v13497_v9 = vpop.permute.xlu1 %4902  ;;  %v5342_v18 = vsel %vm17190_vm13, %v5339_v5, %v5341_v62  ;;  %v3788_v4 = vsel %vm17191_vm9, %v3778_v26, %v3787_v1  ;;  %v4830_v58 = vsel %vm17194_vm1, %v13338_v27, %v4829_v43  ;;  %v4880_v5 = vrot.slane %v13343_v17, 1  ;;  %vm17197_vm2 = vmmov %vm17194_vm1 }
 0x470   :  { %v4998_v6 = vrot.slane %v17192_v7, 1  ;;  %v5001_v28 = vrot.slane %v17193_v48, 2  ;;  %v4882_v57 = vrot.slane %v9594_v41, 1  ;;  %v3796_v49 = vor.u32 %v3795_v16, %v3792_v20  ;;  %vm17198_vm7 = vmmov %vm17194_vm1 }
 0x471   :  { %v13506_v24 = vpop.permute.xlu0 %4900  ;;  %4787 = vrot.lane.b32.xlu1 %v4746_v37, %s9740_s21  ;;  %v5010_v37 = vrot.slane %v5008_v61, 2  ;;  %v3805_v26 = vor.u32 %v3804_v14, %v3801_v21  ;;  %v9597_v61 = vld [vmem:[%s16526_s0 + $0x14c] ss:$0 sps:$4 sm:$0x33]   ;;  %v4881_v41 = vsel %vm17198_vm7, %v13338_v27, %v4880_v5  ;;  %vm17199_vm13 = vmmov %vm17191_vm9  ;;  %v5266_v27 = vshll.u32 %v13550_v59, 16 }
 0x472   :  { %v5002_v50 = vor.u32 %v5001_v28, %v4998_v6  ;;  %v4883_v19 = vsel %vm17197_vm2, %v4880_v5, %v4882_v57  ;;  %v3797_v20 = vsel %vm17199_vm13, %v3787_v1, %v3796_v49  ;;  %vm17200_vm1 = vmmov %vm17191_vm9  ;;  %v5263_v6 = vshrl.u32 %v13550_v59, 16 }
 0x473   :  { %5375 = vrot.lane.b32.xlu0 %v5340_v22, %s9748_s8  ;;  %v13517_v53 = vpop.permute.xlu1 %5031  ;;  %v13544_v22 = vld [vmem:[%s16526_s0 + $0x144] sm:$0xff]   ;;  %v5011_v15 = vor.u32 %v5010_v37, %v5007_v52  ;;  %v5140_v1 = vrot.slane %v9597_v61, 2  ;;  %v9691_v52 = vld [vmem:[%s16526_s0 + $0xec] sm:$0xff]   ;;  %vm17202_vm2 = vmmov %vm17195_vm6  ;;  %vm17204_vm13 = vcmask 64512  }
 0x474   :  { %9295 = vmatmul.mubr.msk.bf16.gmra.mxu1 %vm17195_vm6, %v3779_v46  ;;  %v5087_v46 = vrot.slane %v13487_v32, 2  ;;  %v5254_v16 = vshrl.u32 %v13544_v22, 16  ;;  %v5257_v7 = vshll.u32 %v13544_v22, 16  ;;  %v5138_v32 = vrot.slane %v13544_v22, 2  ;;  %vm17203_vm7 = vmmov %vm17202_vm2 }
 0x475   :  { %v13526_v35 = vpop.permute.xlu0 %5029  ;;  %4789 = vrot.lane.b32.xlu1 %v4754_v13, %s9740_s21  ;;  %9298 = vmatprep.mubr.msk.bf16.mxu1 %vm17196_vm8, %v3788_v4  ;;  %v9612_v13 = vld [vmem:[%s16526_s0 + $0x68] sm:$0xff]   ;;  %vm17201_vm8 = vmmov %vm17195_vm6 }
 0x476   :  { %v3808_v4 = vshrl.u32 %v9612_v13, 16  ;;  %v3811_v21 = vshll.u32 %v9612_v13, 16  ;;  %v5400_v37 = vsel %vm17201_vm8, %v9691_v52, %v13421_v0 }
 0x477   :  { %5377 = vrot.lane.b32.xlu0 %v5342_v18, %s9748_s8  ;;  %v13538_v12 = vpop.permute.xlu1 %5107  ;;  %v3806_v18 = vsel %vm17191_vm9, %v3796_v49, %v3805_v26  ;;  %v5436_v49 = vsel %vm17204_vm13, %v5400_v37, %v13481_v60  ;;  %vm17205_vm9 = vmmov %vm17200_vm1 }
 0x478   :  { %v3810_v48 = vrot.slane %v3808_v4, 1  ;;  %v3813_v28 = vrot.slane %v3811_v21, 2 }
 0x479   :  { %v5106_v56 = vpop.permute.xlu0 %5105  ;;  %4865 = vrot.lane.b32.xlu1 %v4830_v58, %s9741_s28  ;;  %v9692_v58 = vld [vmem:[%s16526_s0 + $0xf4] sm:$0xff]  }
 0x47a   :  { %v5402_v5 = vsel %vm17202_vm2, %v9692_v58, %v13459_v51  ;;  %v13592_v0 = vor.u32 %v3813_v28, %v3810_v48  ;;  %v5259_v51 = vrot.slane %v5257_v7, 3  ;;  %vm17209_vm2 = vcmask 162816   ;;  %v9620_v28 = vld [vmem:[%s16526_s0 + $0x88] sm:$0xff]  }
 0x47b   :  { %4863 = vrot.lane.b32.xlu0 %v13355_v40, %s9741_s28  ;;  %v13561_v43 = vpop.permute.xlu1 %5160  ;;  %v5012_v40 = vsel %vm17200_vm1, %v5002_v50, %v5011_v15  ;;  %v5003_v15 = vsel %vm17205_vm9, %v13357_v63, %v5002_v50  ;;  %vm17206_vm1 = vcmask 97280   ;;  %v5088_v63 = vsel %vm690_vm3, %v13378_v34, %v5087_v46 }
 0x47c   :  { %9299 = vmatmul.mubr.msk.bf16.gmra.mxu1 %vm17195_vm6, %v3797_v20  ;;  %v5472_v61 = vsel %vm17206_vm1, %v5436_v49, %v13506_v24  ;;  %v5268_v20 = vrot.slane %v5266_v27, 3  ;;  %vm17207_vm6 = vmmov %vm17204_vm13  ;;  %v5141_v50 = vsel %vm690_vm3, %v5138_v32, %v5140_v1  ;;  %vm17211_vm13 = vcmask 195584   ;;  %v9619_v27 = vld [vmem:[%s16526_s0 + $0x80] sm:$0xff]  }
 0x47d   :  { %v5159_v14 = vpop.permute.xlu0 %5158  ;;  %4918 = vrot.lane.b32.xlu1 %v4883_v19, %s9742_s29  ;;  %9302 = vmatprep.mubr.msk.bf16.mxu1 %vm17203_vm7, %v3806_v18  ;;  %v5256_v19 = vrot.slane %v5254_v16, 2  ;;  %v5438_v18 = vsel %vm17207_vm6, %v5402_v5, %v13469_v36  ;;  %v5508_v60 = vsel %vm1135_vm11, %v5472_v61, %v13526_v35  ;;  %vm17208_vm8 = vmmov %vm17206_vm1  ;;  %v5139_v36 = vsel %vm690_vm3, %v13378_v34, %v5138_v32 }
 0x47e   :  { %v5474_v24 = vsel %vm17208_vm8, %v5438_v18, %v13497_v9  ;;  %v5544_v16 = vsel %vm17209_vm2, %v5508_v60, %v5106_v56  ;;  %vm17210_vm7 = vmmov %vm17205_vm9  ;;  %v9616_v9 = vld [vmem:[%s16526_s0 + $0x70] sm:$0xff]   ;;  %v9617_v56 = vld [vmem:[%s16526_s0 + $0x78] sm:$0xff]   ;;  %vm4174_vm9 = vcmask 1043456   ;;  %vm17213_vm6 = vcmask 228352  }
 0x47f   :  { %4916 = vrot.lane.b32.xlu0 %v4881_v41, %s9742_s29  ;;  %v5290_v57 = vpop.permute.xlu1 %5289  ;;  %v5265_v41 = vrot.slane %v5263_v6, 2  ;;  %v3815_v35 = vsel %vm17210_vm7, %v3805_v26, %v13592_v0  ;;  %v5510_v46 = vsel %vm1135_vm11, %v5474_v24, %v13517_v53  ;;  %v5580_v21 = vsel %vm17211_vm13, %v5544_v16, %v5159_v14  ;;  %vm17212_vm1 = vmmov %vm17209_vm2  ;;  %v9618_v6 = vld [vmem:[%s16531_s2 + $0x20] ss:$0 sps:$4 sm:$0xff]   ;;  %v9623_v24 = vld [vmem:[%s16526_s0 + $0x90] sm:$0xff]  }
 0x480   :  { %v5546_v34 = vsel %vm17212_vm1, %v5510_v46, %v13538_v12  ;;  %v5260_v53 = vor.u32 %v5259_v51, %v5256_v19  ;;  %vm17214_vm8 = vcmask 31744   ;;  %v3817_v12 = vshrl.u32 %v9616_v9, 16  ;;  %vm17215_vm2 = vmmov %vm17211_vm13  ;;  %9492 = vmatprep.subr.msk.bf16.mxu1 %vm4174_vm9, %v9618_v6  ;;  %9495 = vmatprep.subr.msk.bf16.mxu0 %vm4174_vm9, %v9618_v6 }
 0x481   :  { %v5288_v13 = vpop.permute.xlu0 %5287  ;;  %5047 = vrot.lane.b32.xlu1 %v5012_v40, %s9743_s11  ;;  %v5343_v40 = vrot.slane %v13544_v22, 3  ;;  %v5269_v14 = vor.u32 %v5268_v20, %v5265_v41  ;;  %v3820_v1 = vshll.u32 %v9616_v9, 16  ;;  %v3826_v48 = vshrl.u32 %v9617_v56, 16  ;;  %vm17216_vm7 = vmmov %vm17213_vm6 }
 0x482   :  { %v5616_v26 = vsel %vm17213_vm6, %v5580_v21, %v5288_v13  ;;  %v5582_v52 = vsel %vm17215_vm2, %v5546_v34, %v13561_v43  ;;  %v5345_v58 = vrot.slane %v13550_v59, 3  ;;  %v3829_v5 = vshll.u32 %v9617_v56, 16  ;;  %v9622_v56 = vld [vmem:[%s16531_s2 + $0x10] sm:$0xff]  }
 0x483   :  { %5045 = vrot.lane.b32.xlu0 %v5003_v15, %s9743_s11  ;;  %v13608_v4 = vpop.permute.xlu1 %4775  ;;  %v4176_v49 = vsel %vm4174_vm9, %v9618_v6, 0  ;;  %v9621_v15 = vld [vmem:[%s16531_s2 + $0x18] sm:$0xff]   ;;  %v5618_v19 = vsel %vm17216_vm7, %v5582_v52, %v5290_v57  ;;  %v3819_v61 = vrot.slane %v3817_v12, 1  ;;  %v3822_v43 = vrot.slane %v3820_v1, 2  ;;  %v2407_v6 = vld [vmem:[#allocation2 + $0x10] sm:$0x8]  ;;  %vm17218_vm9 = vmmov %vm17214_vm8 }
 0x484   :  { %9303 = vmatmul.mubr.msk.bf16.gmra.mxu1 %vm17214_vm8, %v3815_v35  ;;  %v3828_v13 = vrot.slane %v3826_v48, 1  ;;  %v3831_v59 = vrot.slane %v3829_v5, 2  ;;  %v3835_v51 = vshrl.u32 %v9619_v27, 16  ;;  %v3838_v41 = vshll.u32 %v9619_v27, 16  ;;  %9445 = vmatpush3.bf16.msra.mxu0 %v4176_v49 }
 0x485   :  { %v5364_v7 = vpop.permute.xlu0 %5363  ;;  %5123 = vrot.lane.b32.xlu1 %v5088_v63, %s9744_s16  ;;  %9319 = vmatpush3.bf16.msra.mxu1 %v4176_v49  ;;  %v3844_v20 = vshrl.u32 %v9620_v28, 16  ;;  %v5270_v60 = vsel %vm820_vm4, %v5260_v53, %v5269_v14  ;;  %v3823_v57 = vor.u32 %v3822_v43, %v3819_v61  ;;  %v3847_v63 = vshll.u32 %v9620_v28, 16  ;;  %v13692_v49 = vld [vmem:[#allocation2 + $0x20] sm:$0xff]   ;;  %v9694_v61 = vld [vmem:[#allocation2 + $0x14] sm:$0xf] }
 0x486   :  { %v5652_v32 = vsel %vm1283_vm15, %v5616_v26, %v5364_v7  ;;  %9320 = vmatprep.subr.bf16.mxu1 %v9621_v15  ;;  %v3832_v35 = vor.u32 %v3831_v59, %v3828_v13  ;;  %v3837_v46 = vrot.slane %v3835_v51, 1  ;;  %v3840_v21 = vrot.slane %v3838_v41, 2  ;;  %9446 = vmatprep.subr.bf16.mxu0 %v9621_v15 }
 0x487   :  { %5121 = vrot.lane.b32.xlu0 %v13412_v31, %s9744_s16  ;;  %9386 = vmatprep.mubr.msk.bf16.mxu0 %vm1341_vm5, %v5652_v32  ;;  %v13644_v37 = vpop.permute.xlu1 %4777  ;;  %v3846_v9 = vrot.slane %v3844_v20, 1  ;;  %v5261_v34 = vsel %vm820_vm4, %v13400_v23, %v5260_v53  ;;  %vm17217_vm13 = vsmask.f32 6400  ;;  %v3849_v7 = vrot.slane %v3847_v63, 2 }
 0x488   :  { %v3824_v26 = vsel %vm17217_vm13, %v13592_v0, %v3823_v57  ;;  %vm17219_vm1 = vmmov %vm17217_vm13  ;;  %v3841_v32 = vor.u32 %v3840_v21, %v3837_v46  ;;  %v3856_v12 = vshll.u32 %v9623_v24, 16  ;;  %vm17220_vm6 = vcmask 1044480   ;;  %9447 = vmatpush3.bf16.msra.mxu0 %v9621_v15 }
 0x489   :  { %v5366_v31 = vpop.permute.xlu0 %5365  ;;  %5176 = vrot.lane.b32.xlu1 %v5141_v50, %s9745_s22  ;;  %v9624_v50 = vld [vmem:[%s16526_s0 + $0x98] ss:$0 sps:$4 sm:$0x33]   ;;  %9306 = vmatprep.mubr.msk.bf16.mxu1 %vm17218_vm9, %v3824_v26  ;;  %v3833_v27 = vsel %vm17219_vm1, %v3823_v57, %v3832_v35  ;;  %v5346_v23 = vsel %vm17220_vm6, %v5343_v40, %v5345_v58  ;;  %vm17221_vm2 = vmmov %vm17219_vm1  ;;  %v3850_v28 = vor.u32 %v3849_v7, %v3846_v9  ;;  %v3103_v21 = vrot.slane %v11766_v30, 2 }
 0x48a   :  { %v5654_v18 = vsel %vm1283_vm15, %v5618_v19, %v5366_v31  ;;  %v3862_v53 = vshrl.u32 %v9624_v50, 16  ;;  %v3842_v48 = vsel %vm17221_vm2, %v3832_v35, %v3841_v32  ;;  %9321 = vmatpush3.bf16.msra.mxu1 %v9621_v15  ;;  %v3858_v52 = vrot.slane %v3856_v12, 2  ;;  %vm17222_vm7 = vmmov %vm17220_vm6  ;;  %v9625_v15 = vld [vmem:[%s16531_s2 + $0x8] sm:$0xff]   ;;  %9448 = vmatprep.subr.bf16.mxu0 %v9622_v56  ;;  %v13728_v7 = vld [vmem:[#allocation2 + $0x38] sm:$0xff]  }
 0x48b   :  { %5174 = vrot.lane.b32.xlu0 %v5139_v36, %s9745_s22  ;;  %9387 = vmatmul.mubr.msk.bf16.gmra.mxu0 %vm1341_vm5, %v5654_v18  ;;  %v13665_v16 = vpop.permute.xlu1 %4853  ;;  %v3853_v36 = vshrl.u32 %v9623_v24, 16  ;;  %v3865_v5 = vshll.u32 %v9624_v50, 16  ;;  %v5344_v58 = vsel %vm17222_vm7, %v5341_v62, %v5343_v40  ;;  %v3207_v19 = vrot.slane %v13692_v49, 3  ;;  %vm17223_vm13 = vmmov %vm17214_vm8  ;;  %v13702_v62 = vld [vmem:[#allocation2 + $0x18] sm:$0xff]   ;;  %v13710_v18 = vld [vmem:[#allocation2 + $0x30] sm:$0xff]  }
 0x48c   :  { %9307 = vmatmul.mubr.msk.bf16.gmra.mxu1 %vm17214_vm8, %v3833_v27  ;;  %v8686_v43 = vcombine.low %v2407_v6, %v9694_v61  ;;  %9322 = vmatprep.subr.bf16.mxu1 %v9622_v56  ;;  %v3205_v22 = vrot.slane %v13702_v62, 3  ;;  %vm17224_vm9 = vmmov %vm17219_vm1  ;;  %v3864_v59 = vrot.slane %v3862_v53, 1  ;;  %v9626_v24 = vld [vmem:[%s16531_s2] sm:$0xff]   ;;  %v13719_v35 = vld [vmem:[#allocation2 + $0x28] sm:$0xff]   ;;  %v3104_v9 = vrot.slane %v11711_v44, 3 }
 0x48d   :  { %v13674_v14 = vpop.permute.xlu0 %4851  ;;  %5305 = vrot.lane.b32.xlu1 %v5270_v60, %s9746_s27  ;;  %v3855_v0 = vrot.slane %v3853_v36, 1  ;;  %9310 = vmatprep.mubr.msk.bf16.mxu1 %vm17223_vm13, %v3842_v48  ;;  %v3851_v31 = vsel %vm17224_vm9, %v3841_v32, %v3850_v28  ;;  %v3867_v51 = vrot.slane %v3865_v5, 2  ;;  %vm17225_vm1 = vmmov %vm17220_vm6  ;;  %v3211_v60 = vrot.slane %v13710_v18, 3  ;;  %v7745_v27 = vld [vmem:[%s16530_s6] sm:$0x3]  ;;  %v13757_v61 = vld [vmem:[#allocation2 + $0x48] sm:$0xff]  }
 0x48e   :  { %9449 = vmatpush3.bf16.msra.mxu0 %v9622_v56  ;;  %9323 = vmatpush3.bf16.msra.mxu1 %v9622_v56  ;;  %v3208_v41 = vsel %vm17225_vm1, %v3205_v22, %v3207_v19  ;;  %v3204_v20 = vrot.slane %v8686_v43, 3  ;;  %vm17226_vm6 = vmmov %vm17221_vm2  ;;  %v3209_v46 = vrot.slane %v13719_v35, 3  ;;  %v3213_v36 = vrot.slane %v13728_v7, 3  ;;  %v13743_v48 = vld [vmem:[#allocation2 + $0x40] sm:$0xff]  }
 0x48f   :  { %5303 = vrot.lane.b32.xlu0 %v5261_v34, %s9746_s27  ;;  %v13684_v1 = vpop.permute.xlu1 %4906  ;;  %v3859_v17 = vor.u32 %v3858_v52, %v3855_v0  ;;  %9324 = vmatprep.subr.bf16.mxu1 %v9625_v15  ;;  %vm17227_vm8 = vmmov %vm17225_vm1  ;;  %v3868_v34 = vor.u32 %v3867_v51, %v3864_v59  ;;  %v3105_v6 = vor.u32 %v3104_v9, %v3103_v21  ;;  %v9700_v52 = vld [vmem:[%s16526_s0 + $0xfc] sm:$0xff]   ;;  %v3217_v43 = vrot.slane %v13757_v61, 3 }
 0x490   :  { %9450 = vmatprep.subr.bf16.mxu0 %v9625_v15  ;;  %v3206_v50 = vsel %vm17227_vm8, %v3204_v20, %v3205_v22  ;;  %vm17228_vm2 = vmmov %vm17223_vm13  ;;  %v13795_v21 = vld [vmem:[#allocation2 + $0x58] sm:$0xff]  }
 0x491   :  { %v13699_v13 = vpop.permute.xlu0 %4904  ;;  %5381 = vrot.lane.b32.xlu1 %v5346_v23, %s9748_s8  ;;  %v3860_v57 = vsel %vm17226_vm6, %v3850_v28, %v3859_v17  ;;  %vm17229_vm7 = vmmov %vm17228_vm2  ;;  %v3106_v53 = vsel %vm820_vm4, %v12380_v38, %v3105_v6  ;;  %v3215_v28 = vrot.slane %v13743_v48, 3  ;;  %v3110_v38 = vsel %vm820_vm4, %v3105_v6, %v12024_v39 }
 0x492   :  { %9451 = vmatpush3.bf16.msra.mxu0 %v9625_v15  ;;  %vm17230_vm13 = vmmov %vm17225_vm1  ;;  %9325 = vmatpush3.bf16.msra.mxu1 %v9625_v15  ;;  %v9702_v15 = vld [vmem:[%s16526_s0 + $0x104] sm:$0xff]  }
 0x493   :  { %5379 = vrot.lane.b32.xlu0 %v5344_v58, %s9748_s8  ;;  %v13706_v40 = vpop.permute.xlu1 %5035  ;;  %v3212_v26 = vsel %vm17230_vm13, %v3209_v46, %v3211_v60  ;;  %9452 = vmatprep.subr.bf16.mxu0 %v9626_v24  ;;  %vm17231_vm9 = vmmov %vm17225_vm1  ;;  %vm17236_vm13 = vcmask 64512  }
 0x494   :  { %9311 = vmatmul.mubr.msk.bf16.gmra.mxu1 %vm17228_vm2, %v3851_v31  ;;  %9326 = vmatprep.subr.bf16.mxu1 %v9626_v24  ;;  %v3210_v44 = vsel %vm17231_vm9, %v3207_v19, %v3209_v46  ;;  %vm17232_vm1 = vmmov %vm17226_vm6 }
 0x495   :  { %v5034_v63 = vpop.permute.xlu0 %5033  ;;  %3243 = vrot.lane.b32.xlu1 %v3208_v41, %s9752_s15  ;;  %9314 = vmatprep.mubr.msk.bf16.mxu1 %vm17229_vm7, %v3860_v57  ;;  %v3869_v12 = vsel %vm17232_vm1, %v3859_v17, %v3868_v34  ;;  %vm17233_vm6 = vmmov %vm17227_vm8  ;;  %vm17234_vm8 = vcmask 1041408   ;;  %vm17238_vm1 = vcmask 97280  }
 0x496   :  { %9453 = vmatpush3.bf16.msra.mxu0 %v9626_v24  ;;  %v3214_v23 = vsel %vm17233_vm6, %v3211_v60, %v3213_v36  ;;  %9327 = vmatpush3.bf16.msra.mxu1 %v9626_v24  ;;  %vm17235_vm7 = vmmov %vm17228_vm2  ;;  %v3216_v39 = vsel %vm17233_vm6, %v3213_v36, %v3215_v28  ;;  %v13785_v24 = vld [vmem:[#allocation2 + $0x50] sm:$0xff]  }
 0x497   :  { %3241 = vrot.lane.b32.xlu0 %v3206_v50, %s9752_s15  ;;  %v5112_v56 = vpop.permute.xlu1 %5111  ;;  %9494 = vmatprep.subr.msk.bf16.mxu1 %vm17234_vm8, %v7745_v27  ;;  %v5404_v5 = vsel %vm17235_vm7, %v9700_v52, %v13608_v4  ;;  %vm17237_vm9 = vmmov %vm17228_vm2  ;;  %vm17239_vm8 = vcmask 162816   ;;  %vm17241_vm7 = vcmask 195584   ;;  %v3128_v27 = vrot.slane %v11859_v42, 3 }
 0x498   :  { %v5440_v19 = vsel %vm17236_vm13, %v5404_v5, %v13674_v14  ;;  %v5406_v4 = vsel %vm17237_vm9, %v9702_v15, %v13644_v37  ;;  %vm17243_vm9 = vmmov %vm17238_vm1 }
 0x499   :  { %v5110_v30 = vpop.permute.xlu0 %5109  ;;  %3247 = vrot.lane.b32.xlu1 %v3212_v26, %s9752_s15  ;;  %v5476_v17 = vsel %vm17238_vm1, %v5440_v19, %v13699_v13  ;;  %vm17244_vm1 = vcmask 228352   ;;  %v3135_v19 = vrot.slane %v11936_v55, 2 }
 0x49a   :  { %v5512_v14 = vsel %vm1135_vm11, %v5476_v17, %v5034_v63 }
 0x49b   :  { %3245 = vrot.lane.b32.xlu0 %v3210_v44, %s9752_s15  ;;  %v5165_v32 = vpop.permute.xlu1 %5164  ;;  %v5548_v31 = vsel %vm17239_vm8, %v5512_v14, %v5110_v30  ;;  %v13809_v44 = vld [vmem:[#allocation2 + $0x60] sm:$0xff]  }
 0x49c   :  { %9315 = vmatmul.mubr.msk.bf16.gmra.mxu1 %vm17228_vm2, %v3869_v12  ;;  %vm17240_vm2 = vmmov %vm17236_vm13  ;;  %v3223_v6 = vrot.slane %v13809_v44, 3  ;;  %v13818_v12 = vld [vmem:[#allocation2 + $0x68] sm:$0xff]  }
 0x49d   :  { %v5163_v0 = vpop.permute.xlu0 %5162  ;;  %3249 = vrot.lane.b32.xlu1 %v3214_v23, %s9752_s15  ;;  %v5442_v51 = vsel %vm17240_vm2, %v5406_v4, %v13665_v16  ;;  %vm17242_vm13 = vmmov %vm17233_vm6  ;;  %v3219_v16 = vrot.slane %v13785_v24, 3  ;;  %v3225_v23 = vrot.slane %v13818_v12, 3  ;;  %v13840_v4 = vld [vmem:[#allocation2 + $0x78] sm:$0xff]  }
 0x49e   :  { %v5584_v37 = vsel %vm17241_vm7, %v5548_v31, %v5163_v0  ;;  %v3218_v13 = vsel %vm17242_vm13, %v3215_v28, %v3217_v43  ;;  %v5478_v41 = vsel %vm17243_vm9, %v5442_v51, %v13684_v1  ;;  %vm17245_vm6 = vmmov %vm17239_vm8  ;;  %v3131_v0 = vrot.slane %v16974_v54, 2 }
 0x49f   :  { %3175 = vrot.lane.b32.xlu0 %v3106_v53, %s9751_s26  ;;  %v5294_v58 = vpop.permute.xlu1 %5293  ;;  %v5514_v57 = vsel %vm1135_vm11, %v5478_v41, %v13706_v40  ;;  %vm17246_vm8 = vmmov %vm17241_vm7  ;;  %v3221_v40 = vrot.slane %v13795_v21, 3  ;;  %v3132_v53 = vrot.slane %v16975_v3, 3  ;;  %v13833_v3 = vld [vmem:[#allocation2 + $0x70] sm:$0xff]   ;;  %v3229_v17 = vrot.slane %v13840_v4, 3 }
 0x4a0   :  { %v5550_v50 = vsel %vm17245_vm6, %v5514_v57, %v5112_v56  ;;  %vm17247_vm2 = vmmov %vm17244_vm1 }
 0x4a1   :  { %v5292_v22 = vpop.permute.xlu0 %5291  ;;  %3177 = vrot.lane.b32.xlu1 %v3110_v38, %s9751_s26  ;;  %v5586_v46 = vsel %vm17246_vm8, %v5550_v50, %v5165_v32  ;;  %vm17248_vm7 = vmmov %vm17242_vm13  ;;  %v3133_v5 = vor.u32 %v3132_v53, %v3131_v0  ;;  %v3136_v38 = vrot.slane %v11892_v2, 3 }
 0x4a2   :  { %v5620_v20 = vsel %vm17244_vm1, %v5584_v37, %v5292_v22  ;;  %v5622_v9 = vsel %vm17247_vm2, %v5586_v46, %v5294_v58  ;;  %vm17249_vm13 = vmmov %vm17248_vm7  ;;  %v3139_v22 = vrot.slane %v16977_v10, 2  ;;  %v13849_v37 = vld [vmem:[#allocation2 + $0xa0] ss:$0 sps:$4 sm:$0x77]   ;;  %vm17254_vm2 = vcmask 31744   ;;  %v9712_v46 = vld [vmem:[#allocation2 + $0x88] sm:$0xff]  }
 0x4a3   :  { %3251 = vrot.lane.b32.xlu0 %v3216_v39, %s9752_s15  ;;  %v13772_v59 = vpop.permute.xlu1 %4779  ;;  %v3222_v36 = vsel %vm17249_vm13, %v3219_v16, %v3221_v40  ;;  %vm17250_vm9 = vmmov %vm17248_vm7  ;;  %v3137_v39 = vor.u32 %v3136_v38, %v3135_v19  ;;  %v13888_v19 = vld [vmem:[#allocation2 + $0x90] sm:$0xff]  }
 0x4a4   :  { %vm17251_vm1 = vmmov %vm17248_vm7  ;;  %v3235_v38 = vrot.slane %v13888_v19, 3  ;;  %v6460_v19 = vld [vmem:[#allocation2 + $0x8] sm:$0xe] }
 0x4a5   :  { %v5368_v60 = vpop.permute.xlu0 %5367  ;;  %3253 = vrot.lane.b32.xlu1 %v3218_v13, %s9752_s15  ;;  %v3226_v52 = vsel %vm17251_vm1, %v3223_v6, %v3225_v23  ;;  %vm17252_vm6 = vmmov %vm17251_vm1  ;;  %v3138_v10 = vsel %vm820_vm4, %v3133_v5, %v3137_v39 }
 0x4a6   :  { %v5656_v63 = vsel %vm1283_vm15, %v5620_v20, %v5368_v60  ;;  %vm17253_vm8 = vmmov %vm17251_vm1  ;;  %v13853_v20 = vld [vmem:[#allocation2 + $0x98] sm:$0xff]  }
 0x4a7   :  { %3179 = vrot.lane.b32.xlu0 %v12035_v47, %s9751_s26  ;;  %9390 = vmatprep.mubr.msk.bf16.mxu0 %vm1341_vm5, %v5656_v63  ;;  %v13792_v1 = vpop.permute.xlu1 %4781  ;;  %v3220_v47 = vsel %vm17248_vm7, %v3217_v43, %v3219_v16  ;;  %v3148_v60 = vshrl.u32 %v13853_v20, 16  ;;  %v3151_v57 = vshll.u32 %v13853_v20, 16  ;;  %v9711_v63 = vld [vmem:[%s16526_s0 + $0x10c] sm:$0xff]   ;;  %vm17255_vm7 = vcmask 64512   ;;  %vm17256_vm13 = vmmov %vm17254_vm2 }
 0x4a8   :  { %v5408_v16 = vsel %vm17254_vm2, %v9711_v63, %v13772_v59  ;;  %vm17260_vm2 = vmmov %vm17255_vm7 }
 0x4a9   :  { %v5370_v34 = vpop.permute.xlu0 %5369  ;;  %3181 = vrot.lane.b32.xlu1 %v12053_v45, %s9751_s26  ;;  %v3127_v45 = vrot.slane %v11906_v11, 2  ;;  %v3224_v11 = vsel %vm17250_vm9, %v3221_v40, %v3223_v6  ;;  %v3233_v40 = vrot.slane %v9712_v46, 3  ;;  %vm17257_vm9 = vcmask 97280  }
 0x4aa   :  { %v5658_v56 = vsel %vm1283_vm15, %v5622_v9, %v5370_v34  ;;  %v3153_v0 = vrot.slane %v3151_v57, 3 }
 0x4ab   :  { %3255 = vrot.lane.b32.xlu0 %v3220_v47, %s9752_s15  ;;  %9391 = vmatmul.mubr.msk.bf16.gmra.mxu0 %vm1341_vm5, %v5658_v56  ;;  %v13805_v26 = vpop.permute.xlu1 %4857  ;;  %v3129_v42 = vor.u32 %v3128_v27, %v3127_v45  ;;  %v3157_v56 = vshrl.u32 %v13849_v37, 16  ;;  %v3160_v47 = vshll.u32 %v13849_v37, 16 }
 0x4ad   :  { %v4856_v30 = vpop.permute.xlu0 %4855  ;;  %3257 = vrot.lane.b32.xlu1 %v3222_v36, %s9752_s15  ;;  %v3130_v54 = vsel %vm820_vm4, %v12081_v25, %v3129_v42  ;;  %v3134_v15 = vsel %vm820_vm4, %v3129_v42, %v3133_v5  ;;  %v3140_v25 = vrot.slane %v16978_v33, 3  ;;  %v9709_v33 = vld [vmem:[#allocation2 + $0x80] sm:$0xff]   ;;  %v9713_v36 = vld [vmem:[%s16526_s0 + $0x114] sm:$0xff]   ;;  %v3162_v5 = vrot.slane %v3160_v47, 3 }
 0x4ae   :  { %v3231_v41 = vrot.slane %v9709_v33, 3  ;;  %v5444_v9 = vsel %vm17255_vm7, %v5408_v16, %v4856_v30  ;;  %v5410_v59 = vsel %vm17256_vm13, %v9713_v36, %v13792_v1  ;;  %vm17261_vm7 = vcmask 195584   ;;  %vm17262_vm13 = vmmov %vm17257_vm9  ;;  %v13917_v33 = vld [vmem:[%s16529_s3] ss:$0 sm:$0xff]  ;;  %v17269_v16 = vld [vmem:[#allocation44_spill] sm:$0xff] }
 0x4af   :  { %3183 = vrot.lane.b32.xlu0 %v12079_v29, %s9751_s26  ;;  %v13816_v32 = vpop.permute.xlu1 %4910  ;;  %v3141_v51 = vor.u32 %v3140_v25, %v3139_v22  ;;  %v5446_v1 = vsel %vm17260_vm2, %v5410_v59, %v13805_v26  ;;  %vm17268_vm2 = vcmask 1044480   ;;  %v17275_v36 = vld [vmem:[#allocation49_spill] sm:$0xff] }
 0x4b0   :  { %v3232_v27 = vsel %vm17251_vm1, %v3229_v17, %v3231_v41  ;;  %v17276_v59 = vld [vmem:[#allocation21_spill] sm:$0xff] }
 0x4b1   :  { %v4909_v28 = vpop.permute.xlu0 %4908  ;;  %3185 = vrot.lane.b32.xlu1 %v12087_v8, %s9751_s26  ;;  %v3227_v8 = vrot.slane %v13833_v3, 3  ;;  %v3142_v34 = vsel %vm820_vm4, %v3137_v39, %v3141_v51 }
 0x4b2   :  { %v5480_v6 = vsel %vm17257_vm9, %v5444_v9, %v4909_v28  ;;  %vm17263_vm9 = vcmask 228352   ;;  %v17273_v9 = vld [vmem:[#allocation7_spill] sm:$0xff] }
 0x4b3   :  { %3259 = vrot.lane.b32.xlu0 %v3224_v11, %s9752_s15  ;;  %v13827_v29 = vpop.permute.xlu1 %5039  ;;  %v3228_v55 = vsel %vm17252_vm6, %v3225_v23, %v3227_v8  ;;  %v3230_v31 = vsel %vm17253_vm8, %v3227_v8, %v3229_v17  ;;  %v3150_v23 = vrot.slane %v3148_v60, 2  ;;  %vm17258_vm6 = vcmask 162816   ;;  %vm17259_vm8 = vmmov %vm17251_vm1  ;;  %v17264_v17 = vld [vmem:[#allocation32_spill] sm:$0xff] }
 0x4b4   :  { %v3234_v42 = vsel %vm17259_vm8, %v3231_v41, %v3233_v40  ;;  %v3146_v22 = vsel %vm820_vm4, %v3141_v51, %v17264_v17  ;;  %vm17265_vm1 = vmmov %vm17258_vm6 }
 0x4b5   :  { %v5038_v58 = vpop.permute.xlu0 %5037  ;;  %3261 = vrot.lane.b32.xlu1 %v3226_v52, %s9752_s15  ;;  %v3159_v52 = vrot.slane %v3157_v56, 2  ;;  %v3154_v25 = vor.u32 %v3153_v0, %v3150_v23  ;;  %vm17267_vm8 = vmmov %vm17263_vm9  ;;  %v17280_v0 = vld [vmem:[#allocation3_spill] sm:$0xff] }
 0x4b6   :  { %v5516_v30 = vsel %vm1135_vm11, %v5480_v6, %v5038_v58  ;;  %v5482_v58 = vsel %vm17262_vm13, %v5446_v1, %v13816_v32 }
 0x4b7   :  { %3187 = vrot.lane.b32.xlu0 %v3130_v54, %s9751_s26  ;;  %v5116_v43 = vpop.permute.xlu1 %5115  ;;  %v3155_v39 = vsel %vm820_vm4, %v17264_v17, %v3154_v25 }
 0x4b9   :  { %v5114_v14 = vpop.permute.xlu0 %5113  ;;  %3189 = vrot.lane.b32.xlu1 %v3134_v15, %s9751_s26  ;;  %v5518_v15 = vsel %vm1135_vm11, %v5482_v58, %v13827_v29  ;;  %v3163_v29 = vor.u32 %v3162_v5, %v3159_v52  ;;  %v17282_v5 = vld [vmem:[#allocation80_spill] sm:$0xff] }
 0x4ba   :  { %v5552_v53 = vsel %vm17258_vm6, %v5516_v30, %v5114_v14  ;;  %v5554_v32 = vsel %vm17265_vm1, %v5518_v15, %v5116_v43  ;;  %vm17266_vm6 = vmmov %vm17261_vm7  ;;  %v3236_v43 = vsel %vm17268_vm2, %v3233_v40, %v3235_v38  ;;  %v17272_v40 = vld [vmem:[#allocation72_spill] sm:$0xff] }
 0x4bb   :  { %3263 = vrot.lane.b32.xlu0 %v3228_v55, %s9752_s15  ;;  %v5169_v2 = vpop.permute.xlu1 %5168  ;;  %v3164_v60 = vsel %vm820_vm4, %v3154_v25, %v3163_v29  ;;  %v17285_v15 = vld [vmem:[#allocation52_spill] sm:$0xff]  ;;  %v17286_v25 = vld [vmem:[#allocation18_spill] sm:$0xff]  ;;  %v17287_v29 = vld [vmem:[#allocation91_spill] sm:$0xff] }
 0x4bc   :  { %v5590_v55 = vsel %vm17266_vm6, %v5554_v32, %v5169_v2 }
 0x4bd   :  { %v5167_v13 = vpop.permute.xlu0 %5166  ;;  %3265 = vrot.lane.b32.xlu1 %v3230_v31, %s9752_s15 }
 0x4be   :  { %v5588_v28 = vsel %vm17261_vm7, %v5552_v53, %v5167_v13  ;;  %vm17271_vm7 = vcmask 64512  }
 0x4bf   :  { %3191 = vrot.lane.b32.xlu0 %v3138_v10, %s9751_s26  ;;  %v5298_v50 = vpop.permute.xlu1 %5297  ;;  %vm17274_vm13 = vmmov %vm17271_vm7 }
 0x4c0   :  { %v5626_v31 = vsel %vm17267_vm8, %v5590_v55, %v5298_v50  ;;  %v17270_v50 = vld [vmem:[#allocation16_spill] sm:$0xff]  ;;  %vm17279_vm1 = vmmov %vm17271_vm7 }
 0x4c1   :  { %v5296_v45 = vpop.permute.xlu0 %5295  ;;  %3193 = vrot.lane.b32.xlu1 %v3142_v34, %s9751_s26  ;;  %v3278_v46 = vsel %vm17271_vm7, %v17270_v50, %v17269_v16  ;;  %v3282_v34 = vsel %vm17274_vm13, %v17273_v9, %v17272_v40  ;;  %vm17283_vm6 = vmmov %vm17279_vm1  ;;  %v17294_v9 = vld [vmem:[#allocation30_spill] sm:$0xff] }
 0x4c2   :  { %v5624_v54 = vsel %vm17263_vm9, %v5588_v28, %v5296_v45  ;;  %vm17277_vm9 = vmmov %vm17271_vm7  ;;  %v17281_v28 = vld [vmem:[#allocation69_spill] sm:$0xff]  ;;  %v3284_v58 = vsel %vm17283_vm6, %v13702_v62, %v17282_v5 }
 0x4c3   :  { %3267 = vrot.lane.b32.xlu0 %v3232_v27, %s9752_s15  ;;  %v13878_v11 = vpop.permute.xlu1 %4783  ;;  %v3280_v6 = vsel %vm17277_vm9, %v17276_v59, %v17275_v36  ;;  %v17278_v27 = vld [vmem:[#allocation93_spill] sm:$0xff]  ;;  %v13962_v62 = vsel %vm1135_vm11, %v3284_v58, %v17287_v29  ;;  %vm17289_vm8 = vmmov %vm17279_vm1  ;;  %vm17301_vm9 = vcmask 1044480   ;;  %v17303_v29 = vld [vmem:[#allocation82_spill] sm:$0xff] }
 0x4c4   :  { %v3286_v23 = vsel %vm17279_vm1, %v13692_v49, %v17278_v27  ;;  %v13943_v52 = vsel %vm1135_vm11, %v3280_v6, %v17281_v28  ;;  %v13954_v49 = vsel %vm1135_vm11, %v3282_v34, %v17285_v15  ;;  %vm17291_vm2 = vmmov %vm17279_vm1  ;;  %v17295_v27 = vld [vmem:[#allocation35_spill] sm:$0xff] }
 0x4c5   :  { %v5372_v8 = vpop.permute.xlu0 %5371  ;;  %3269 = vrot.lane.b32.xlu1 %v3234_v42, %s9752_s15  ;;  %vm17296_vm7 = vmmov %vm17279_vm1 }
 0x4c6   :  { %v5660_v26 = vsel %vm1283_vm15, %v5624_v54, %v5372_v8  ;;  %v17284_v54 = vld [vmem:[#allocation41_spill] sm:$0xff]  ;;  %vm17300_vm13 = vmmov %vm17279_vm1 }
 0x4c7   :  { %3195 = vrot.lane.b32.xlu0 %v3146_v22, %s9751_s26  ;;  %9394 = vmatprep.mubr.msk.bf16.mxu0 %vm1341_vm5, %v5660_v26  ;;  %v13899_v14 = vpop.permute.xlu1 %4785  ;;  %v13950_v8 = vsel %vm1135_vm11, %v3278_v46, %v17284_v54  ;;  %v17293_v46 = vld [vmem:[#allocation12_spill] sm:$0xff]  ;;  %vm17304_vm6 = vmmov %vm17301_vm9 }
 0x4c9   :  { %v5374_v13 = vpop.permute.xlu0 %5373  ;;  %3197 = vrot.lane.b32.xlu1 %v3155_v39, %s9751_s26 }
 0x4ca   :  { %v5662_v51 = vsel %vm1283_vm15, %v5626_v31, %v5374_v13  ;;  %v17288_v31 = vld [vmem:[#allocation27_spill] sm:$0xff] }
 0x4cb   :  { %v9372_v10 = vpop.f32.mrf.mxu0  ;;  %3271 = vrot.lane.b32.xlu0 %v3236_v43, %s9752_s15  ;;  %9395 = vmatmul.mubr.msk.bf16.gmra.mxu0 %vm1341_vm5, %v5662_v51  ;;  %v13912_v2 = vpop.permute.xlu1 %4861  ;;  %v3288_v13 = vsel %vm17289_vm8, %v13719_v35, %v17288_v31  ;;  %v17290_v51 = vld [vmem:[#allocation62_spill] sm:$0xff]  ;;  %vm17306_vm8 = vmmov %vm17279_vm1 }
 0x4cc   :  { %v5750_v41 = vadd.f32 %v13917_v33, %v9372_v10  ;;  %v3290_v43 = vsel %vm17291_vm2, %v13710_v18, %v17290_v51  ;;  %v17292_v10 = vld [vmem:[#allocation83_spill] sm:$0xff]  ;;  %v13979_v34 = vsel %vm1135_vm11, %v3288_v13, %v17294_v9  ;;  %v3237_v18 = vrot.slane %v13853_v20, 3  ;;  %vm17308_vm2 = vmmov %vm17279_vm1 }
 0x4cd   :  { %v5741_v57 = vpop.f32.mrf.mxu0  ;;  %v13921_v63 = vpop.permute.xlu0 %4859  ;;  %3199 = vrot.lane.b32.xlu1 %v3164_v60, %s9751_s26  ;;  %v17299_v20 = vld [vmem:[#allocation51_spill] sm:$0xff] }
 0x4ce   :  { %v5886_v56 = vmax.f32 %v5750_v41, 0.0  ;;  %v5742_v47 = vadd.f32 %v13917_v33, %v5741_v57  ;;  %v13972_v41 = vsel %vm1135_vm11, %v3286_v23, %v17292_v10  ;;  %v3292_v23 = vsel %vm17296_vm7, %v13728_v7, %v17295_v27 }
 0x4cf   :  { %v9373_v45 = vpop.f32.mrf.mxu0  ;;  %v13934_v30 = vpop.permute.xlu1 %4914  ;;  %v14001_v15 = vsel %vm17301_vm9, %v3235_v38, %v3237_v18  ;;  %vm17316_vm7 = vcmask 31744   ;;  %vm17321_vm9 = vmmov %vm17279_vm1 }
 0x4d0   :  { %v5922_v53 = vmul.f32 %v5886_v56, %v17280_v0  ;;  %v5884_v42 = vmax.f32 %v5742_v47, 0.0  ;;  %v5753_v1 = vadd.f32 %v13917_v33, %v9373_v45  ;;  %v3239_v47 = vrot.slane %v13849_v37, 3  ;;  %v17297_v0 = vld [vmem:[#allocation61_spill] sm:$0xff] }
 0x4d1   :  { %v5744_v26 = vpop.f32.mrf.mxu0  ;;  %v13956_v17 = vpop.permute.xlu0 %4912  ;;  %v3294_v37 = vsel %vm17300_vm13, %v13743_v48, %v17299_v20  ;;  %v3298_v48 = vsel %vm17279_vm1, %v13785_v24, %v17303_v29  ;;  %v17309_v24 = vld [vmem:[#allocation43_spill] sm:$0xff]  ;;  %vm17319_vm13 = vmmov %vm17279_vm1 }
 0x4d2   :  { %v9078_v22 = vpack.c.bf16 %v5922_v53, %v5922_v53  ;;  %v5920_v32 = vmul.f32 %v5884_v42, %v17286_v25  ;;  %v5887_v55 = vmax.f32 %v5753_v1, 0.0  ;;  %v5745_v39 = vadd.f32 %v13917_v33, %v5744_v26  ;;  %v17298_v1 = vld [vmem:[#allocation17_spill] sm:$0xff]  ;;  %v17315_v20 = vld [vmem:[#allocation71_spill] sm:$0xff] }
 0x4d3   :  { %v13974_v60 = vpop.permute.xlu1 %5043  ;;  %v13990_v53 = vsel %vm1135_vm11, %v3290_v43, %v17297_v0  ;;  %v14011_v13 = vsel %vm17304_vm6, %v3237_v18, %v3239_v47  ;;  %v3330_v9 = vsel %vm1135_vm11, %v3294_v37, %v17309_v24  ;;  %v6501_v47 = vld [vmem:[#allocation2] sm:$0xf]  ;;  %v3334_v37 = vsel %vm1135_vm11, %v3298_v48, %v17315_v20  ;;  %v17328_v24 = vld [vmem:[#allocation92_spill] sm:$0xff] }
 0x4d4   :  { %v6084_v57 = vshrl.u32 %v9078_v22, 16  ;;  %v6087_v16 = vshll.u32 %v9078_v22, 16  ;;  %v9076_v50 = vpack.c.bf16 %v5920_v32, %v5920_v32  ;;  %v5923_v40 = vmul.f32 %v5887_v55, %v17293_v46  ;;  %v17302_v55 = vld [vmem:[#allocation46_spill] sm:$0xff]  ;;  %v17307_v46 = vld [vmem:[#allocation85_spill] sm:$0xff] }
 0x4d5   :  { %v5885_v35 = vmax.f32 %v5745_v39, 0.0  ;;  %v13981_v56 = vpop.permute.xlu0 %5041  ;;  %v14005_v39 = vsel %vm1135_vm11, %v3292_v23, %v17302_v55  ;;  %v14027_v23 = vld [vmem:[#allocation2 + $0x4] sm:$0xf]  ;;  %vm17322_vm6 = vcmask 60416   ;;  %v17338_v20 = vld [vmem:[#allocation57_spill] sm:$0xff] }
 0x4d6   :  { %v6086_v36 = vrot.slane %v6084_v57, 6  ;;  %v6089_v59 = vrot.slane %v6087_v16, 7  ;;  %v6065_v6 = vshrl.u32 %v9076_v50, 16  ;;  %v6068_v45 = vshll.u32 %v9076_v50, 16  ;;  %v17305_v16 = vld [vmem:[#allocation54_spill] sm:$0xff] }
 0x4d7   :  { %v9079_v42 = vpack.c.bf16 %v5923_v40, %v5923_v40  ;;  %v5921_v28 = vmul.f32 %v5885_v35, %v17298_v1  ;;  %v13993_v5 = vpop.permute.xlu1 %5119  ;;  %v3296_v50 = vsel %vm17306_vm8, %v13757_v61, %v17305_v16  ;;  %v3300_v40 = vsel %vm17308_vm2, %v13795_v21, %v17307_v46  ;;  %v17311_v61 = vld [vmem:[#allocation74_spill] sm:$0xff]  ;;  %v17312_v21 = vld [vmem:[#allocation29_spill] sm:$0xff]  ;;  %v17313_v1 = vld [vmem:[#allocation64_spill] sm:$0xff] }
 0x4d8   :  { %v6067_v58 = vrot.slane %v6065_v6, 6  ;;  %v6070_v54 = vrot.slane %v6068_v45, 7  ;;  %v6090_v7 = vor.u32 %v6089_v59, %v6086_v36  ;;  %v14031_v0 = vsel %vm1135_vm11, %v3296_v50, %v17311_v61  ;;  %vm17323_vm8 = vmmov %vm17316_vm7  ;;  %v17325_v16 = vld [vmem:[#allocation53_spill] sm:$0xff]  ;;  %v17326_v46 = vld [vmem:[#allocation84_spill] sm:$0xff] }
 0x4d9   :  { %v6094_v26 = vshrl.u32 %v9079_v42, 16  ;;  %v6097_v22 = vshll.u32 %v9079_v42, 16  ;;  %v9077_v25 = vpack.c.bf16 %v5921_v28, %v5921_v28  ;;  %v5118_v32 = vpop.permute.xlu0 %5117  ;;  %v14035_v42 = vsel %vm1135_vm11, %v3300_v40, %v17312_v21  ;;  %v17333_v61 = vld [vmem:[#allocation33_spill] sm:$0xff] }
 0x4da   :  { %v6071_v31 = vor.u32 %v6070_v54, %v6067_v58  ;;  %v6092_v36 = vrot.slane %v6090_v7, 4  ;;  %v9716_v58 = vld [vmem:[%s16526_s0 + $0x11c] sm:$0xff]   ;;  %vm17324_vm2 = vcmask 97280  }
 0x4db   :  { %v6096_v38 = vrot.slane %v6094_v26, 6  ;;  %v6099_v51 = vrot.slane %v6097_v22, 7  ;;  %v6074_v43 = vshrl.u32 %v9077_v25, 16  ;;  %v6077_v10 = vshll.u32 %v9077_v25, 16  ;;  %v14013_v57 = vpop.permute.xlu1 %5172 }
 0x4dc   :  { %v6461_v18 = vsel %vm11314_vm14, %v6071_v31, %v6460_v19  ;;  %vm17314_vm14 = vmmov %vm17279_vm1  ;;  %v5412_v54 = vsel %vm17316_vm7, %v9716_v58, %v13878_v11  ;;  %v6072_v26 = vrot.slane %v6071_v31, 4  ;;  %v17318_v19 = vld [vmem:[#allocation34_spill] sm:$0xff]  ;;  %v14060_v11 = vcombine.low %v6501_v47, %v14027_v23  ;;  %v17331_v47 = vld [vmem:[#allocation45_spill] sm:$0xff] }
 0x4dd   :  { %6462 = vst [vmem:[#allocation2 + $0x8] sm:$0xe] %v6461_v18  ;;  %v14025_v59 = vor.u32 %v6099_v51, %v6096_v38  ;;  %v6076_v6 = vrot.slane %v6074_v43, 6  ;;  %v6079_v45 = vrot.slane %v6077_v10, 7  ;;  %v5171_v27 = vpop.permute.xlu0 %5170  ;;  %v3302_v28 = vsel %vm17314_vm14, %v13809_v44, %v17313_v1  ;;  %v17320_v38 = vld [vmem:[#allocation73_spill] sm:$0xff]  ;;  %v9717_v31 = vld [vmem:[%s16526_s0 + $0x124] sm:$0xff]   ;;  %vm17327_vm14 = vmmov %vm17279_vm1 }
 0x4de   :  { %v3304_v44 = vsel %vm17319_vm13, %v13818_v12, %v17318_v19  ;;  %v3306_v48 = vsel %vm17321_vm9, %v13833_v3, %v17320_v38  ;;  %v5448_v51 = vsel %vm17279_vm1, %v5412_v54, %v13921_v63  ;;  %v5414_v43 = vsel %vm17323_vm8, %v9717_v31, %v13899_v14  ;;  %vm17329_vm13 = vmmov %vm17322_vm6  ;;  %v17354_v31 = vld [vmem:[#allocation70_spill] sm:$0xff] }
 0x4df   :  { %v6101_v25 = vsel %vm11365_vm12, %v6092_v36, %v14025_v59  ;;  %v6080_v55 = vor.u32 %v6079_v45, %v6076_v6  ;;  %v5302_v29 = vpop.permute.xlu1 %5301  ;;  %v5484_v3 = vsel %vm17324_vm2, %v5448_v51, %v13956_v17  ;;  %v14073_v50 = vsel %vm1135_vm11, %v3304_v44, %v17325_v16  ;;  %v17330_v17 = vld [vmem:[#allocation89_spill] sm:$0xff]  ;;  %vm17336_vm8 = vmmov %vm17329_vm13  ;;  %v17349_v44 = vld [vmem:[#allocation50_spill] sm:$0xff] }
 0x4e0   :  { %6465 = vst.msk [vmem:[#allocation2 + $0x14] sm:$0xf] %vm17322_vm6, %v6101_v25  ;;  %v3308_v40 = vsel %vm17327_vm14, %v13840_v4, %v17326_v46  ;;  %v14080_v35 = vsel %vm1135_vm11, %v3302_v28, %v17328_v24  ;;  %vm3421_vm7 = vcmask 326656   ;;  %v5520_v14 = vsel %vm1135_vm11, %v5484_v3, %v13981_v56  ;;  %vm17335_vm6 = vmmov %vm17327_vm14  ;;  %v17346_v25 = vld [vmem:[#allocation9_spill] sm:$0xff]  ;;  %v17359_v3 = vld [vmem:[#allocation99_spill] sm:$0xff] }
 0x4e1   :  { %v6081_v12 = vsel %vm11365_vm12, %v6072_v26, %v6080_v55  ;;  %v6082_v10 = vrot.slane %v6080_v55, 4  ;;  %v5300_v63 = vpop.permute.xlu0 %5299  ;;  %v14087_v18 = vsel %vm1135_vm11, %v3308_v40, %v17330_v17  ;;  %v14091_v36 = vsel %vm1135_vm11, %v3306_v48, %v17331_v47  ;;  %v17344_v26 = vld [vmem:[#allocation42_spill] sm:$0xff] }
 0x4e2   :  { %6463 = vst.msk [vmem:[#allocation2 + $0xc] sm:$0xf] %vm17329_vm13, %v6081_v12  ;;  %vm17332_vm9 = vcmask 162816   ;;  %vm17334_vm1 = vcmask 195584   ;;  %v5450_v56 = vsel %vm17335_vm6, %v5414_v43, %v13912_v2  ;;  %v6647_v28 = vshll.u32 %v14060_v11, 16  ;;  %v17351_v48 = vld [vmem:[#allocation78_spill] sm:$0xff] }
 0x4e3   :  { %v6091_v4 = vsel %vm11365_vm12, %v6082_v10, %v6090_v7  ;;  %v5556_v6 = vsel %vm17332_vm9, %v5520_v14, %v5118_v32  ;;  %v14096_v45 = vpop.permute.xlu1 %4787  ;;  %v3350_v21 = vsel %vm17334_vm1, %v13950_v8, %v17333_v61  ;;  %vm17337_vm2 = vmmov %vm17334_vm1  ;;  %v17340_v32 = vld [vmem:[#allocation87_spill] sm:$0xff]  ;;  %vm17342_vm9 = vcmask 97280   ;;  %v17357_v10 = vld [vmem:[#allocation25_spill] sm:$0xff] }
 0x4e4   :  { %6464 = vst.msk [vmem:[#allocation2 + $0x10] sm:$0xf] %vm17336_vm8, %v6091_v4  ;;  %v5592_v1 = vsel %vm17337_vm2, %v5556_v6, %v5171_v27  ;;  %vm17339_vm14 = vmmov %vm17334_vm1  ;;  %v5486_v8 = vsel %vm17342_vm9, %v5450_v56, %v13934_v30  ;;  %vm17353_vm9 = vcmask 162816   ;;  %v6645_v12 = vshrl.u32 %v14060_v11, 16  ;;  %v17363_v4 = vld [vmem:[#allocation103_spill] sm:$0xff] }
 0x4e5   :  { %v3354_v7 = vsel %vm17339_vm14, %v13954_v49, %v17338_v20  ;;  %vm17341_vm13 = vmmov %vm17334_vm1  ;;  %vm17343_vm1 = vcmask 228352   ;;  %v5376_v2 = vpop.permute.xlu0 %5375  ;;  %v5522_v49 = vsel %vm1135_vm11, %v5486_v8, %v13974_v60  ;;  %v6538_v60 = vld [vmem:[#allocation2] sm:$0xe] }
 0x4e6   :  { %v3352_v58 = vsel %vm17341_vm13, %v13943_v52, %v17340_v32  ;;  %v5628_v54 = vsel %vm17343_vm1, %v5592_v1, %v5300_v63  ;;  %vm17345_vm6 = vmmov %vm17337_vm2  ;;  %v17348_v52 = vld [vmem:[#allocation67_spill] sm:$0xff]  ;;  %v5558_v51 = vsel %vm17353_vm9, %v5522_v49, %v13993_v5  ;;  %v3386_v5 = vsel %vm1283_vm15, %v3350_v21, %v17359_v3  ;;  %v17360_v63 = vld [vmem:[#allocation101_spill] sm:$0xff] }
 0x4e7   :  { %v3358_v27 = vsel %vm17345_vm6, %v13972_v41, %v17344_v26  ;;  %vm17347_vm8 = vmmov %vm17337_vm2  ;;  %v5664_v19 = vsel %vm1283_vm15, %v5628_v54, %v5376_v2  ;;  %v3362_v30 = vsel %vm17337_vm2, %v13990_v53, %v17348_v52  ;;  %v3390_v16 = vsel %vm1283_vm15, %v3354_v7, %v17360_v63  ;;  %v17365_v21 = vld [vmem:[#allocation105_spill] sm:$0xff]  ;;  %v17366_v1 = vld [vmem:[#allocation106_spill] sm:$0xff] }
 0x4e8   :  { %v3356_v55 = vsel %vm17347_vm8, %v13962_v62, %v17346_v25  ;;  %vm17350_vm14 = vmmov %vm17337_vm2  ;;  %9398 = vmatprep.mubr.msk.bf16.mxu0 %vm1341_vm5, %v5664_v19  ;;  %v4790_v62 = vpop.permute.xlu1 %4789  ;;  %v8901_v47 = vcombine.low %v6538_v60, %v14027_v23  ;;  %v14163_v6 = vsel %vm1283_vm15, %v3358_v27, %v17363_v4  ;;  %v14171_v56 = vsel %vm1283_vm15, %v3362_v30, %v17365_v21  ;;  %v14180_v32 = vld [vmem:[#allocation2 + $0x14] sm:$0xf]  ;;  %v17367_v26 = vld [vmem:[#allocation107_spill] sm:$0xff] }
 0x4e9   :  { %v3360_v38 = vsel %vm17350_vm14, %v13979_v34, %v17349_v44  ;;  %vm17352_vm13 = vmmov %vm17337_vm2  ;;  %v6649_v34 = vrot.slane %v6647_v28, 1  ;;  %v5378_v40 = vpop.permute.xlu0 %5377  ;;  %v14150_v24 = vld [vmem:[#allocation2 + $0xc] sm:$0xf]  ;;  %v17368_v25 = vld [vmem:[#allocation108_spill] sm:$0xff]  ;;  %vm17372_vm14 = vcmask 31744   ;;  %vm17377_vm9 = vcmask 1046528  }
 0x4ea   :  { %v3366_v41 = vsel %vm17352_vm13, %v3330_v9, %v17351_v48  ;;  %vm17355_vm1 = vmmov %vm17337_vm2  ;;  %vm17361_vm2 = vcmask 228352   ;;  %v14175_v28 = vsel %vm1283_vm15, %v3360_v38, %v17366_v1  ;;  %v17369_v49 = vld [vmem:[#allocation117_spill] sm:$0xff]  ;;  %v17370_v52 = vld [vmem:[#allocation119_spill] sm:$0xff]  ;;  %v6831_v60 = vrot.slane %v8901_v47, 1 }
 0x4eb   :  { %v3364_v43 = vsel %vm17355_vm1, %v14005_v39, %v17354_v31  ;;  %vm17356_vm6 = vmmov %vm17355_vm1  ;;  %v6503_v39 = vld [vmem:[#allocation2 + $0x8] sm:$0xf]  ;;  %v9376_v20 = vpop.f32.mrf.mxu0  ;;  %v6505_v7 = vld [vmem:[#allocation2 + $0x10] sm:$0xf]  ;;  %v6650_v8 = vor.u32 %v6649_v34, %v6645_v12  ;;  %v14189_v27 = vsel %vm1283_vm15, %v3366_v41, %v17367_v26  ;;  %v14197_v19 = vsel %vm3421_vm7, %v3386_v5, %v17369_v49 }
 0x4ec   :  { %v5594_v53 = vsel %vm17356_vm6, %v5558_v51, %v14013_v57  ;;  %vm17358_vm8 = vmmov %vm17355_vm1  ;;  %v17362_v57 = vld [vmem:[#allocation102_spill] sm:$0xff]  ;;  %v14178_v23 = vpop.permute.xlu1 %4865  ;;  %v14185_v2 = vcombine.low %v6505_v7, %v14180_v32  ;;  %v14201_v30 = vsel %vm3421_vm7, %v3390_v16, %v17370_v52  ;;  %v17374_v7 = vld [vmem:[#allocation13_spill] sm:$0xff]  ;;  %vm3458_vm1 = vcmask 392192  }
 0x4ed   :  { %v14143_v9 = vsel %vm17358_vm8, %v3334_v37, %v17357_v10  ;;  %v5630_v46 = vsel %vm17361_vm2, %v5594_v53, %v5302_v29  ;;  %v14154_v14 = vsel %vm1283_vm15, %v3352_v58, %v17362_v57  ;;  %v14158_v37 = vcombine.low %v6503_v39, %v14150_v24  ;;  %v17364_v29 = vld [vmem:[#allocation104_spill] sm:$0xff]  ;;  %v5757_v44 = vpop.f32.mrf.mxu0  ;;  %v14203_v38 = vpop.permute.xlu0 %4863  ;;  %v6539_v31 = vld [vmem:[#allocation2 + $0x8] sm:$0xe]  ;;  %v9718_v39 = vld [vmem:[%s16526_s0 + $0x12c] sm:$0xff]  }
 0x4ee   :  { %v5666_v17 = vsel %vm1283_vm15, %v5630_v46, %v5378_v40  ;;  %v14167_v61 = vsel %vm1283_vm15, %v3356_v55, %v17364_v29  ;;  %v5766_v58 = vadd.f32 %v13917_v33, %v9376_v20  ;;  %v14193_v55 = vsel %vm1283_vm15, %v3364_v43, %v17368_v25  ;;  %v17371_v5 = vld [vmem:[#allocation6_spill] sm:$0xff]  ;;  %vm17373_vm13 = vmmov %vm17372_vm14 }
 0x4ef   :  { %9399 = vmatmul.mubr.msk.bf16.gmra.mxu0 %vm1341_vm5, %v5666_v17  ;;  %v6652_v54 = vshll.u32 %v14158_v37, 16  ;;  %v5758_v51 = vadd.f32 %v13917_v33, %v5757_v44  ;;  %v6102_v43 = vrot.slane %v14025_v59, 4  ;;  %v9377_v53 = vpop.f32.mrf.mxu0  ;;  %v6656_v34 = vshrl.u32 %v14158_v37, 16  ;;  %v9719_v17 = vld [vmem:[%s16526_s0 + $0x134] sm:$0xff]   ;;  %vm17378_vm6 = vmmov %vm17377_vm9 }
 0x4f0   :  { %v5890_v48 = vmax.f32 %v5766_v58, 0.0  ;;  %v14207_v12 = vpop.permute.xlu1 %4918  ;;  %v6660_v10 = vshll.u32 %v14185_v2, 16  ;;  %v8902_v3 = vcombine.low %v6539_v31, %v14150_v24  ;;  %v5769_v46 = vadd.f32 %v13917_v33, %v9377_v53  ;;  %vm17379_vm8 = vmmov %vm17378_vm6 }
 0x4f1   :  { %v6654_v41 = vrot.slane %v6652_v54, 1  ;;  %v5888_v16 = vmax.f32 %v5758_v51, 0.0  ;;  %v14220_v57 = vsel %vm17372_vm14, %v9718_v39, %v14096_v45  ;;  %v14226_v47 = vsel %vm17373_vm13, %v9719_v17, %v4790_v62  ;;  %v5760_v4 = vpop.f32.mrf.mxu0  ;;  %v14229_v29 = vpop.permute.xlu0 %4916  ;;  %v17375_v51 = vld [vmem:[#allocation5_spill] sm:$0xff] }
 0x4f2   :  { %v5926_v63 = vmul.f32 %v5890_v48, %v17371_v5  ;;  %v14231_v1 = vrot.slane %v6660_v10, 1  ;;  %v5891_v45 = vmax.f32 %v5769_v46, 0.0  ;;  %v6832_v62 = vrot.slane %v14158_v37, 1 }
 0x4f3   :  { %v6655_v40 = vsel %vm242_vm0, %v6650_v8, %v6654_v41  ;;  %v6658_v21 = vor.u32 %v6656_v34, %v6654_v41  ;;  %v5924_v58 = vmul.f32 %v5888_v16, %v17374_v7  ;;  %v5761_v8 = vadd.f32 %v13917_v33, %v5760_v4  ;;  %v17376_v4 = vld [vmem:[#allocation20_spill] sm:$0xff] }
 0x4f4   :  { %6792 = vrot.lane.b32.xlu0 %v6655_v40, %s9741_s28  ;;  %v9082_v20 = vpack.c.bf16 %v5926_v63, %v5926_v63  ;;  %v14237_v26 = vpop.permute.xlu1 %5047  ;;  %v6664_v25 = vshrl.u32 %v14185_v2, 16  ;;  %v6961_v49 = vshrl.u32 %v8902_v3, 16  ;;  %v5927_v41 = vmul.f32 %v5891_v45, %v17375_v51 }
 0x4f5   :  { %v6663_v54 = vsel %vm242_vm0, %v6658_v21, %v14231_v1  ;;  %v9080_v48 = vpack.c.bf16 %v5924_v58, %v5924_v58  ;;  %v5889_v31 = vmax.f32 %v5761_v8, 0.0  ;;  %v14245_v53 = vpop.permute.xlu0 %5045  ;;  %v14248_v34 = vrot.slane %v14185_v2, 1 }
 0x4f6   :  { %v6124_v52 = vshrl.u32 %v9082_v20, 16  ;;  %v6127_v44 = vshll.u32 %v9082_v20, 16  ;;  %6794 = vrot.lane.b32.xlu1 %v6663_v54, %s9741_s28  ;;  %v6915_v5 = vrot.slane %v8902_v3, 1  ;;  %v6964_v63 = vshll.u32 %v8902_v3, 16 }
 0x4f7   :  { %v6104_v40 = vshrl.u32 %v9080_v48, 16  ;;  %v6107_v39 = vshll.u32 %v9080_v48, 16  ;;  %v9083_v17 = vpack.c.bf16 %v5927_v41, %v5927_v41  ;;  %v5925_v21 = vmul.f32 %v5889_v31, %v17376_v4  ;;  %v6544_v41 = vld [vmem:[#allocation2 + $0x8] sm:$0xc] }
 0x4f8   :  { %3273 = vrot.lane.b32.xlu0 %v14001_v15, %s9752_s15  ;;  %v6126_v16 = vrot.slane %v6124_v52, 6  ;;  %v6129_v46 = vrot.slane %v6127_v44, 7  ;;  %v6833_v20 = vsel %vm17377_vm9, %v6831_v60, %v6832_v62  ;;  %v5124_v7 = vpop.permute.xlu1 %5123  ;;  %v6963_v58 = vrot.slane %v6961_v49, 1 }
 0x4f9   :  { %v6106_v45 = vrot.slane %v6104_v40, 6  ;;  %v6109_v15 = vrot.slane %v6107_v39, 7  ;;  %v6966_v8 = vrot.slane %v6964_v63, 2  ;;  %v6968_v3 = vrot.slane %v6664_v25, 1  ;;  %v5122_v51 = vpop.permute.xlu0 %5121 }
 0x4fa   :  { %3275 = vrot.lane.b32.xlu1 %v14011_v13, %s9752_s15  ;;  %v6130_v54 = vor.u32 %v6129_v46, %v6126_v16  ;;  %v6134_v52 = vshrl.u32 %v9083_v17, 16  ;;  %v6137_v44 = vshll.u32 %v9083_v17, 16  ;;  %v9081_v48 = vpack.c.bf16 %v5925_v21, %v5925_v21 }
 0x4fb   :  { %v6110_v60 = vor.u32 %v6109_v15, %v6106_v45  ;;  %v6916_v49 = vsel %vm17378_vm6, %v6915_v5, %v14248_v34  ;;  %v6969_v31 = vrot.slane %v6660_v10, 2  ;;  %v8906_v13 = vcombine.low %v6544_v41, %v14150_v24  ;;  %v17381_v15 = vld [vmem:[#allocation120_spill] sm:$0xff]  ;;  %v6545_v41 = vld [vmem:[#allocation2 + $0x10] sm:$0xc] }
 0x4fc   :  { %6868 = vrot.lane.b32.xlu0 %v6833_v20, %s9743_s11  ;;  %v6136_v63 = vrot.slane %v6134_v52, 6  ;;  %v6139_v40 = vrot.slane %v6137_v44, 7  ;;  %v6114_v39 = vshrl.u32 %v9081_v48, 16  ;;  %v6117_v4 = vshll.u32 %v9081_v48, 16  ;;  %v5177_v16 = vpop.permute.xlu1 %5176 }
 0x4fd   :  { %v6111_v46 = vsel %vm11365_vm12, %v6102_v43, %v6110_v60  ;;  %v6835_v17 = vsel %vm17379_vm8, %v6832_v62, %v14248_v34  ;;  %v6967_v21 = vor.u32 %v6966_v8, %v6963_v58  ;;  %v14267_v5 = vor.u32 %v6969_v31, %v6968_v3  ;;  %v5175_v59 = vpop.permute.xlu0 %5174 }
 0x4fe   :  { %6921 = vrot.lane.b32.xlu1 %v6916_v49, %s9745_s22  ;;  %v6132_v10 = vrot.slane %v6130_v54, 4  ;;  %vm17380_vm2 = vcmask 60416   ;;  %v14270_v24 = vor.u32 %v6139_v40, %v6136_v63  ;;  %v6116_v20 = vrot.slane %v6114_v39, 6  ;;  %v17385_v49 = vld [vmem:[#allocation121_spill] sm:$0xff] }
 0x4ff   :  { %6466 = vst.msk [vmem:[#allocation2 + $0x18] sm:$0xf] %vm17380_vm2, %v6111_v46  ;;  %v6119_v45 = vrot.slane %v6117_v4, 7  ;;  %v3425_v43 = vsel %vm3421_vm7, %v14154_v14, %v17381_v15  ;;  %vm3495_vm14 = vcmask 457728   ;;  %vm17382_vm13 = vcmask 64512   ;;  %vm17387_vm8 = vmmov %vm17380_vm2  ;;  %v17401_v15 = vld [vmem:[#allocation135_spill] sm:$0xff] }
 0x500   :  { %6870 = vrot.lane.b32.xlu0 %v6835_v17, %s9743_s11  ;;  %v5454_v62 = vsel %vm17382_vm13, %v14226_v47, %v14178_v23  ;;  %v6112_v58 = vrot.slane %v6110_v60, 4  ;;  %vm17383_vm9 = vmmov %vm17382_vm13  ;;  %v6141_v3 = vsel %vm11365_vm12, %v6132_v10, %v14270_v24  ;;  %vm17384_vm6 = vsmask.f32 6400  ;;  %v5306_v48 = vpop.permute.xlu1 %5305  ;;  %v17386_v47 = vld [vmem:[#allocation122_spill] sm:$0xff]  ;;  %v17395_v10 = vld [vmem:[#allocation124_spill] sm:$0xff] }
 0x501   :  { %v5452_v8 = vsel %vm17383_vm9, %v14220_v57, %v14203_v38  ;;  %v6120_v52 = vor.u32 %v6119_v45, %v6116_v20  ;;  %v6971_v44 = vsel %vm17384_vm6, %v6967_v21, %v14267_v5  ;;  %v7090_v14 = vrot.slane %v14185_v2, 2  ;;  %6469 = vst.msk [vmem:[#allocation2 + $0x24] sm:$0xf] %vm17387_vm8, %v6141_v3  ;;  %v5304_v40 = vpop.permute.xlu0 %5303  ;;  %vm17391_vm9 = vmmov %vm17387_vm8  ;;  %v17396_v20 = vld [vmem:[#allocation125_spill] sm:$0xff] }
 0x502   :  { %v3431_v23 = vsel %vm3421_vm7, %v14163_v6, %v17385_v49  ;;  %v3429_v38 = vsel %vm3421_vm7, %v14167_v61, %v17386_v47  ;;  %vm17388_vm2 = vcmask 97280   ;;  %7050 = vrot.lane.b32.xlu1 %v6971_v44, %s9748_s8  ;;  %v7089_v39 = vrot.slane %v8906_v13, 2  ;;  %v17390_v61 = vld [vmem:[#allocation123_spill] sm:$0xff]  ;;  %v17403_v44 = vld [vmem:[#allocation137_spill] sm:$0xff]  ;;  %v17406_v47 = vld [vmem:[#allocation140_spill] sm:$0xff] }
 0x503   :  { %v5490_v57 = vsel %vm17388_vm2, %v5454_v62, %v14207_v12  ;;  %vm17389_vm13 = vmmov %vm17388_vm2  ;;  %v6121_v31 = vsel %vm11365_vm12, %v6112_v58, %v6120_v52  ;;  %v6122_v63 = vrot.slane %v6120_v52, 4  ;;  %v3435_v4 = vsel %vm3421_vm7, %v14171_v56, %v17390_v61  ;;  %v6550_v52 = vld [vmem:[#allocation2 + $0x10] sm:$0x8] }
 0x504   :  { %v5488_v60 = vsel %vm17389_vm13, %v5452_v8, %v14229_v29  ;;  %v5526_v6 = vsel %vm1135_vm11, %v5490_v57, %v14237_v26  ;;  %6467 = vst.msk [vmem:[#allocation2 + $0x1c] sm:$0xf] %vm17391_vm9, %v6121_v31  ;;  %vm17392_vm6 = vcmask 162816   ;;  %v8907_v46 = vcombine.low %v6545_v41, %v14180_v32  ;;  %v5382_v21 = vpop.permute.xlu1 %5381  ;;  %vm17397_vm13 = vmmov %vm17391_vm9  ;;  %v17405_v49 = vld [vmem:[#allocation139_spill] sm:$0xff]  ;;  %v17407_v31 = vld [vmem:[#allocation141_spill] sm:$0xff] }
 0x505   :  { %v5524_v12 = vsel %vm1135_vm11, %v5488_v60, %v14245_v53  ;;  %v5562_v29 = vsel %vm17392_vm6, %v5526_v6, %v5124_v7  ;;  %v6131_v17 = vsel %vm11365_vm12, %v6122_v63, %v6130_v54  ;;  %vm17393_vm8 = vmmov %vm17392_vm6  ;;  %vm17394_vm2 = vcmask 195584   ;;  %v5380_v58 = vpop.permute.xlu0 %5379  ;;  %v17408_v6 = vld [vmem:[#allocation142_spill] sm:$0xff] }
 0x506   :  { %v5560_v26 = vsel %vm17393_vm8, %v5524_v12, %v5122_v51  ;;  %v5598_v13 = vsel %vm17394_vm2, %v5562_v29, %v5177_v16  ;;  %v7091_v56 = vsel %vm690_vm3, %v7089_v39, %v7090_v14  ;;  %v3433_v53 = vsel %vm3421_vm7, %v14175_v28, %v17395_v10  ;;  %6468 = vst.msk [vmem:[#allocation2 + $0x20] sm:$0xf] %vm17397_vm13, %v6131_v17  ;;  %vm17398_vm9 = vmmov %vm17394_vm2  ;;  %v17400_v16 = vld [vmem:[#allocation126_spill] sm:$0xff]  ;;  %v17411_v39 = vld [vmem:[#allocation155_spill] sm:$0xff] }
 0x507   :  { %v14325_v7 = vsel %vm3421_vm7, %v14189_v27, %v17396_v20  ;;  %v5596_v54 = vsel %vm17398_vm9, %v5560_v26, %v5175_v59  ;;  %vm17399_vm6 = vcmask 228352   ;;  %7126 = vrot.lane.b32.xlu1 %v7091_v56, %s9749_s10  ;;  %v14334_v45 = vsel %vm3421_vm7, %v14193_v55, %v17400_v16 }
 0x508   :  { %v5634_v51 = vsel %vm17399_vm6, %v5598_v13, %v5306_v48  ;;  %v3460_v28 = vsel %vm3458_vm1, %v14197_v19, %v17401_v15  ;;  %vm17402_vm8 = vmmov %vm17399_vm6  ;;  %vm3532_vm2 = vcmask 523264   ;;  %v7219_v8 = vshrl.u32 %v8907_v46, 16  ;;  %v17404_v48 = vld [vmem:[#allocation138_spill] sm:$0xff]  ;;  %v3244_v60 = vpop.permute.xlu1 %3243 }
 0x509   :  { %v5632_v27 = vsel %vm17402_vm8, %v5596_v54, %v5304_v40  ;;  %v5670_v62 = vsel %vm1283_vm15, %v5634_v51, %v5382_v21  ;;  %v7222_v3 = vshll.u32 %v8907_v46, 16  ;;  %v3464_v55 = vsel %vm3458_vm1, %v14201_v30, %v17403_v44  ;;  %v17409_v30 = vld [vmem:[#allocation156_spill] sm:$0xff]  ;;  %v17413_v15 = vld [vmem:[#allocation158_spill] sm:$0xff] }
 0x50a   :  { %v5668_v59 = vsel %vm1283_vm15, %v5632_v27, %v5380_v58  ;;  %v3462_v41 = vsel %vm3458_vm1, %v3425_v43, %v17404_v48  ;;  %v3468_v19 = vsel %vm3458_vm1, %v3431_v23, %v17405_v49  ;;  %v3466_v57 = vsel %vm3458_vm1, %v3429_v38, %v17406_v47  ;;  %v17410_v23 = vld [vmem:[#allocation153_spill] sm:$0xff] }
 0x50b   :  { %9402 = vmatprep.mubr.msk.bf16.mxu0 %vm1341_vm5, %v5668_v59  ;;  %v14354_v63 = vsel %vm3458_vm1, %v3435_v4, %v17407_v31  ;;  %v14358_v40 = vsel %vm3458_vm1, %v3433_v53, %v17408_v6  ;;  %v3499_v43 = vsel %vm3495_vm14, %v3462_v41, %v17409_v30  ;;  %vm4137_vm13 = vcmask 588800   ;;  %v3242_v4 = vpop.permute.xlu0 %3241  ;;  %v14368_v29 = vld [vmem:[#allocation2 + $0x18] sm:$0xff]   ;;  %v9380_v10 = vpop.f32.mrf.mxu0 }
 0x50c   :  { %9403 = vmatmul.mubr.msk.bf16.gmra.mxu0 %vm1341_vm5, %v5670_v62  ;;  %v3497_v38 = vsel %vm3495_vm14, %v3460_v28, %v17410_v23  ;;  %v3501_v61 = vsel %vm3495_vm14, %v3464_v55, %v17411_v39  ;;  %v3536_v12 = vsel %vm3532_vm2, %v3499_v43, %v3244_v60  ;;  %v8911_v17 = vcombine.low %v6550_v52, %v14180_v32  ;;  %v3248_v53 = vpop.permute.xlu1 %3247  ;;  %v17412_v32 = vld [vmem:[#allocation157_spill] sm:$0xff]  ;;  %v17415_v43 = vld [vmem:[#allocation36_spill] sm:$0xff] }
 0x50d   :  { %v3534_v26 = vsel %vm3532_vm2, %v3497_v38, %v3242_v4  ;;  %v7173_v13 = vrot.slane %v8907_v46, 2  ;;  %v7221_v56 = vrot.slane %v7219_v8, 2  ;;  %v7224_v21 = vrot.slane %v7222_v3, 3  ;;  %v5773_v58 = vpop.f32.mrf.mxu0  ;;  %v14410_v6 = vld [vmem:[#allocation2 + $0x20] sm:$0xff]  }
 0x50e   :  { %9328 = vmatprep.mubr.msk.bf16.mxu1 %vm4137_vm13, %v3534_v26  ;;  %v14374_v20 = vrot.slane %v14368_v29, 2  ;;  %v6836_v54 = vrot.slane %v14368_v29, 1  ;;  %v14378_v51 = vshll.u32 %v14368_v29, 16  ;;  %v14381_v16 = vshrl.u32 %v14368_v29, 16 }
 0x50f   :  { %v3505_v46 = vsel %vm3495_vm14, %v3468_v19, %v17412_v32  ;;  %v3503_v28 = vsel %vm3495_vm14, %v3466_v57, %v17413_v15  ;;  %v5782_v27 = vadd.f32 %v13917_v33, %v9380_v10  ;;  %9329 = vmatmul.mubr.msk.bf16.vlgmr.msra.gmra.mxu1 %vm4137_vm13, %v3536_v12  ;;  %v7348_v62 = vrot.slane %v14368_v29, 3  ;;  %v3246_v59 = vpop.permute.xlu0 %3245 }
 0x510   :  { %v7174_v8 = vsel %vm690_vm3, %v7173_v13, %v14374_v20  ;;  %vm17414_vm5 = vcmask 1046528   ;;  %v7226_v52 = vrot.slane %v14381_v16, 2  ;;  %v7227_v44 = vrot.slane %v14378_v51, 3  ;;  %v3250_v19 = vpop.permute.xlu1 %3249 }
 0x511   :  { %v14396_v3 = vsel %vm17414_vm5, %v14248_v34, %v6836_v54  ;;  %v5894_v55 = vmax.f32 %v5782_v27, 0.0  ;;  %v5774_v48 = vadd.f32 %v13917_v33, %v5773_v58  ;;  %v3538_v41 = vsel %vm3532_vm2, %v3501_v61, %v3246_v59  ;;  %7179 = vrot.lane.b32.xlu1 %v7174_v8, %s9750_s12  ;;  %v9381_v34 = vpop.f32.mrf.mxu0 }
 0x512   :  { %6923 = vrot.lane.b32.xlu0 %v14396_v3, %s9745_s22  ;;  %v6972_v49 = vrot.slane %v14381_v16, 1  ;;  %9332 = vmatprep.mubr.msk.bf16.mxu1 %vm4137_vm13, %v3538_v41  ;;  %v7225_v47 = vor.u32 %v7224_v21, %v7221_v56  ;;  %v14407_v57 = vor.u32 %v7227_v44, %v7226_v52  ;;  %v6973_v60 = vrot.slane %v14378_v51, 2  ;;  %v17417_v21 = vld [vmem:[#allocation22_spill] sm:$0xff] }
 0x513   :  { %v7347_v31 = vrot.slane %v8911_v17, 3  ;;  %v6142_v30 = vrot.slane %v14270_v24, 4  ;;  %v5930_v23 = vmul.f32 %v5894_v55, %v17415_v43  ;;  %v5892_v38 = vmax.f32 %v5774_v48, 0.0  ;;  %v5776_v12 = vpop.f32.mrf.mxu0  ;;  %v3176_v4 = vpop.permute.xlu0 %3175 }
 0x514   :  { %v5785_v39 = vadd.f32 %v13917_v33, %v9381_v34  ;;  %v3540_v61 = vsel %vm3532_vm2, %v3503_v28, %v3248_v53  ;;  %v7229_v26 = vsel %vm820_vm4, %v7225_v47, %v14407_v57  ;;  %v14418_v13 = vor.u32 %v6973_v60, %v6972_v49  ;;  %v3178_v27 = vpop.permute.xlu1 %3177 }
 0x515   :  { %vm17416_vm9 = vcmask 1044480   ;;  %v9086_v56 = vpack.c.bf16 %v5930_v23, %v5930_v23  ;;  %v5928_v10 = vmul.f32 %v5892_v38, %v17417_v21  ;;  %v5777_v15 = vadd.f32 %v13917_v33, %v5776_v12  ;;  %7308 = vrot.lane.b32.xlu1 %v7229_v26, %s9751_s26  ;;  %v17419_v33 = vld [vmem:[#allocation63_spill] sm:$0xff] }
 0x516   :  { %v7349_v17 = vsel %vm17416_vm9, %v7347_v31, %v7348_v62  ;;  %v5895_v32 = vmax.f32 %v5785_v39, 0.0  ;;  %v3542_v53 = vsel %vm3532_vm2, %v3505_v46, %v3250_v19  ;;  %vm17418_vm6 = vsmask.f32 6400  ;;  %v17420_v31 = vld [vmem:[#allocation38_spill] sm:$0xff]  ;;  %vm17421_vm8 = vmmov %vm17416_vm9 }
 0x517   :  { %v6975_v28 = vsel %vm17418_vm6, %v14267_v5, %v14418_v13  ;;  %v7093_v58 = vsel %vm690_vm3, %v7090_v14, %v14374_v20  ;;  %v7350_v59 = vrot.slane %v14410_v6, 3  ;;  %v6164_v8 = vshrl.u32 %v9086_v56, 16  ;;  %9333 = vmatmul.mubr.msk.bf16.gmra.mxu1 %vm4137_vm13, %v3540_v61  ;;  %v3252_v5 = vpop.permute.xlu0 %3251 }
 0x518   :  { %v6167_v52 = vshll.u32 %v9086_v56, 16  ;;  %v9084_v44 = vpack.c.bf16 %v5928_v10, %v5928_v10  ;;  %v5931_v55 = vmul.f32 %v5895_v32, %v17419_v33  ;;  %7052 = vrot.lane.b32.xlu0 %v6975_v28, %s9748_s8  ;;  %v5893_v46 = vmax.f32 %v5777_v15, 0.0  ;;  %9336 = vmatprep.mubr.msk.bf16.mxu1 %vm4137_vm13, %v3542_v53  ;;  %v3254_v38 = vpop.permute.xlu1 %3253 }
 0x519   :  { %v7094_v48 = vrot.slane %v14410_v6, 2  ;;  %v14441_v41 = vshll.u32 %v14410_v6, 16  ;;  %v14444_v14 = vshrl.u32 %v14410_v6, 16  ;;  %v6166_v49 = vrot.slane %v6164_v8, 6  ;;  %7384 = vrot.lane.b32.xlu1 %v7349_v17, %s9752_s15 }
 0x51a   :  { %v6169_v34 = vrot.slane %v6167_v52, 7  ;;  %v6144_v19 = vshrl.u32 %v9084_v44, 16  ;;  %v6147_v47 = vshll.u32 %v9084_v44, 16  ;;  %v9087_v60 = vpack.c.bf16 %v5931_v55, %v5931_v55 }
 0x51b   :  { %v5929_v43 = vmul.f32 %v5893_v46, %v17420_v31  ;;  %v3507_v23 = vsel %vm3495_vm14, %v14358_v40, %v3176_v4  ;;  %v7351_v39 = vsel %vm17421_vm8, %v7348_v62, %v7350_v59  ;;  %v7230_v17 = vrot.slane %v14444_v14, 2  ;;  %v3180_v32 = vpop.permute.xlu0 %3179 }
 0x51c   :  { %v6170_v61 = vor.u32 %v6169_v34, %v6166_v49  ;;  %v6146_v12 = vrot.slane %v6144_v19, 6  ;;  %v6149_v26 = vrot.slane %v6147_v47, 7  ;;  %7128 = vrot.lane.b32.xlu0 %v7093_v58, %s9749_s10  ;;  %v6174_v56 = vshrl.u32 %v9087_v60, 16  ;;  %v3182_v44 = vpop.permute.xlu1 %3181  ;;  %v17423_v49 = vld [vmem:[#allocation144_spill] sm:$0xff] }
 0x51d   :  { %v6177_v21 = vshll.u32 %v9087_v60, 16  ;;  %v9085_v10 = vpack.c.bf16 %v5929_v43, %v5929_v43  ;;  %v7231_v40 = vrot.slane %v14441_v41, 3  ;;  %v3509_v15 = vsel %vm3495_vm14, %v14354_v63, %v3178_v27  ;;  %7386 = vrot.lane.b32.xlu1 %v7351_v39, %s9752_s15  ;;  %v17424_v39 = vld [vmem:[#allocation81_spill] sm:$0xff] }
 0x51e   :  { %v6150_v4 = vor.u32 %v6149_v26, %v6146_v12  ;;  %v3544_v53 = vsel %vm3532_vm2, %v3507_v23, %v3252_v5  ;;  %v14466_v62 = vsel %vm690_vm3, %v14374_v20, %v7094_v48  ;;  %v6176_v28 = vrot.slane %v6174_v56, 6  ;;  %v17426_v12 = vld [vmem:[#allocation143_spill] sm:$0xff] }
 0x51f   :  { %v6179_v58 = vrot.slane %v6177_v21, 7  ;;  %v6154_v8 = vshrl.u32 %v9085_v10, 16  ;;  %v6157_v52 = vshll.u32 %v9085_v10, 16  ;;  %v6172_v33 = vrot.slane %v6170_v61, 4  ;;  %9337 = vmatmul.mubr.msk.bf16.gmra.mxu1 %vm4137_vm13, %v3544_v53  ;;  %v3256_v24 = vpop.permute.xlu0 %3255  ;;  %v17429_v10 = vld [vmem:[#allocation59_spill] sm:$0xff] }
 0x520   :  { %v6151_v63 = vsel %vm11365_vm12, %v6142_v30, %v6150_v4  ;;  %v3546_v27 = vsel %vm3532_vm2, %v3509_v15, %v3254_v38  ;;  %7181 = vrot.lane.b32.xlu0 %v14466_v62, %s9750_s12  ;;  %v14476_v20 = vor.u32 %v7231_v40, %v7230_v17  ;;  %vm17422_vm5 = vcmask 60416   ;;  %v3258_v23 = vpop.permute.xlu1 %3257  ;;  %v17431_v40 = vld [vmem:[#allocation94_spill] sm:$0xff] }
 0x521   :  { %6470 = vst.msk [vmem:[#allocation2 + $0x28] sm:$0xf] %vm17422_vm5, %v6151_v63  ;;  %v14479_v55 = vor.u32 %v6179_v58, %v6176_v28  ;;  %v6156_v46 = vrot.slane %v6154_v8, 6  ;;  %v6159_v5 = vrot.slane %v6157_v52, 7  ;;  %9340 = vmatprep.mubr.msk.bf16.mxu1 %vm4137_vm13, %v3546_v27  ;;  %v6838_v30 = vrot.slane %v14410_v6, 1  ;;  %6872 = vrot.lane.b32.xlu1 %v14396_v3, %s9743_s11  ;;  %vm17427_vm6 = vmmov %vm17422_vm5  ;;  %v17433_v28 = vld [vmem:[#allocation95_spill] sm:$0xff] }
 0x522   :  { %v3474_v34 = vsel %vm3458_vm1, %v14334_v45, %v17423_v49  ;;  %v6152_v19 = vrot.slane %v6150_v4, 4  ;;  %v7233_v47 = vsel %vm820_vm4, %v14407_v57, %v14476_v20  ;;  %v6976_v60 = vrot.slane %v14444_v14, 1  ;;  %v17435_v58 = vld [vmem:[#allocation96_spill] sm:$0xff] }
 0x523   :  { %v6181_v31 = vsel %vm11365_vm12, %v6172_v33, %v14479_v55  ;;  %v6160_v43 = vor.u32 %v6159_v5, %v6156_v46  ;;  %v6670_v38 = vrot.slane %v14378_v51, 1  ;;  %v6977_v45 = vrot.slane %v14441_v41, 2  ;;  %v3184_v21 = vpop.permute.xlu0 %3183  ;;  %v17440_v33 = vld [vmem:[#allocation109_spill] sm:$0xff]  ;;  %v17442_v46 = vld [vmem:[#allocation110_spill] sm:$0xff] }
 0x524   :  { %vm17425_vm9 = vcmask 195584   ;;  %v3476_v57 = vsel %vm3458_vm1, %v14325_v7, %v17426_v12  ;;  %6473 = vst.msk [vmem:[#allocation2 + $0x34] sm:$0xf] %vm17427_vm6, %v6181_v31  ;;  %v3511_v26 = vsel %vm3495_vm14, %v3474_v34, %v3180_v32  ;;  %7310 = vrot.lane.b32.xlu0 %v7233_v47, %s9751_s26  ;;  %v6666_v51 = vor.u32 %v6664_v25, %v14231_v1  ;;  %v3186_v15 = vpop.permute.xlu1 %3185  ;;  %v17444_v34 = vld [vmem:[#allocation112_spill] sm:$0xff]  ;;  %v17446_v47 = vld [vmem:[#allocation114_spill] sm:$0xff]  ;;  %v17450_v12 = vld [vmem:[#allocation129_spill] sm:$0xff] }
 0x525   :  { %v3368_v3 = vsel %vm17425_vm9, %v14031_v0, %v17424_v39  ;;  %v6161_v17 = vsel %vm11365_vm12, %v6152_v19, %v6160_v43  ;;  %v6162_v56 = vrot.slane %v6160_v43, 4  ;;  %vm17428_vm8 = vcmask 1046528   ;;  %vm17430_vm5 = vmmov %vm17425_vm9  ;;  %v17445_v19 = vld [vmem:[#allocation113_spill] sm:$0xff]  ;;  %v17447_v31 = vld [vmem:[#allocation116_spill] sm:$0xff] }
 0x526   :  { %v6839_v0 = vsel %vm17428_vm8, %v6836_v54, %v6838_v30  ;;  %v14516_v7 = vor.u32 %v6977_v45, %v6976_v60  ;;  %v3374_v32 = vsel %vm17430_vm5, %v14080_v35, %v17429_v10  ;;  %vm17432_vm9 = vmmov %vm17430_vm5  ;;  %6471 = vst.msk [vmem:[#allocation2 + $0x2c] sm:$0xf] %vm17427_vm6, %v6161_v17  ;;  %v3513_v25 = vsel %vm3495_vm14, %v3476_v57, %v3182_v44  ;;  %v17438_v44 = vld [vmem:[#allocation98_spill] sm:$0xff]  ;;  %v17448_v43 = vld [vmem:[#allocation128_spill] sm:$0xff] }
 0x527   :  { %v3372_v1 = vsel %vm17432_vm9, %v14035_v42, %v17431_v40  ;;  %v3548_v4 = vsel %vm3532_vm2, %v3511_v26, %v3256_v24  ;;  %6925 = vrot.lane.b32.xlu1 %v6839_v0, %s9745_s22  ;;  %v6171_v29 = vsel %vm11365_vm12, %v6162_v56, %v6170_v61  ;;  %v6671_v54 = vsel %vm242_vm0, %v6666_v51, %v6670_v38  ;;  %vm17434_vm8 = vmmov %vm17430_vm5  ;;  %v3260_v63 = vpop.permute.xlu0 %3259  ;;  %v17443_v24 = vld [vmem:[#allocation111_spill] sm:$0xff]  ;;  %v17451_v26 = vld [vmem:[#allocation130_spill] sm:$0xff] }
 0x528   :  { %v6674_v35 = vor.u32 %v14381_v16, %v6670_v38  ;;  %v6678_v53 = vrot.slane %v14441_v41, 1  ;;  %v3378_v42 = vsel %vm17434_vm8, %v14091_v36, %v17433_v28  ;;  %v3376_v8 = vsel %vm17430_vm5, %v14073_v50, %v17435_v58  ;;  %vm17436_vm9 = vmmov %vm17427_vm6  ;;  %6796 = vrot.lane.b32.xlu0 %v6671_v54, %s9741_s28  ;;  %9341 = vmatmul.mubr.msk.bf16.gmra.mxu1 %vm4137_vm13, %v3548_v4  ;;  %v9720_v16 = vld [vmem:[%s16530_s6] sm:$0x3]  ;;  %v3262_v45 = vpop.permute.xlu1 %3261  ;;  %v17449_v39 = vld [vmem:[#allocation127_spill] sm:$0xff] }
 0x529   :  { %6472 = vst.msk [vmem:[#allocation2 + $0x30] sm:$0xf] %vm17436_vm9, %v6171_v29  ;;  %v3550_v52 = vsel %vm3532_vm2, %v3513_v25, %v3258_v23  ;;  %vm17437_vm6 = vcmask 1041408   ;;  %vm17439_vm8 = vmmov %vm17430_vm5  ;;  %v3406_v50 = vsel %vm1283_vm15, %v14143_v9, %v17440_v33  ;;  %vm17441_vm5 = vsmask.f32 6400  ;;  %v17452_v17 = vld [vmem:[#allocation146_spill] sm:$0xff] }
 0x52a   :  { %v8064_v61 = vsel %vm17437_vm6, %v9720_v16, 0  ;;  %v3380_v36 = vsel %vm17439_vm8, %v14087_v18, %v17438_v44  ;;  %9344 = vmatprep.mubr.msk.bf16.mxu1 %vm4137_vm13, %v3550_v52  ;;  %v6979_v27 = vsel %vm17441_vm5, %v14418_v13, %v14516_v7  ;;  %v3404_v5 = vsel %vm1283_vm15, %v3368_v3, %v17442_v46  ;;  %v17453_v10 = vld [vmem:[#allocation131_spill] sm:$0xff]  ;;  %v17454_v40 = vld [vmem:[#allocation132_spill] sm:$0xff]  ;;  %v17455_v25 = vld [vmem:[#allocation145_spill] sm:$0xff] }
 0x52b   :  { %9407 = vmatpush3.bf16.msra.mxu1 %v8064_v61  ;;  %v3410_v49 = vsel %vm1283_vm15, %v3374_v32, %v17443_v24  ;;  %v3408_v18 = vsel %vm1283_vm15, %v3372_v1, %v17444_v34  ;;  %v3414_v9 = vsel %vm1283_vm15, %v3378_v42, %v17445_v19  ;;  %7054 = vrot.lane.b32.xlu1 %v6979_v27, %s9748_s8  ;;  %v3188_v54 = vpop.permute.xlu0 %3187  ;;  %v17456_v28 = vld [vmem:[#allocation147_spill] sm:$0xff]  ;;  %v17457_v58 = vld [vmem:[#allocation148_spill] sm:$0xff]  ;;  %v9384_v61 = vpop.f32.mrf.mxu0  ;;  %v17458_v27 = vld [vmem:[#allocation149_spill] sm:$0xff]  ;;  %vm17459_vm9 = vcmask 1046528  }
 0x52c   :  { %v3412_v60 = vsel %vm1283_vm15, %v3376_v8, %v17446_v47  ;;  %v14570_v13 = vsel %vm1283_vm15, %v3380_v36, %v17447_v31  ;;  %v3441_v23 = vsel %vm3421_vm7, %v3404_v5, %v17448_v43  ;;  %v6679_v38 = vsel %vm242_vm0, %v6674_v35, %v6678_v53  ;;  %v3190_v44 = vpop.permute.xlu1 %3189  ;;  %vm17464_vm8 = vmmov %vm17441_vm5 }
 0x52d   :  { %v3443_v3 = vsel %vm3421_vm7, %v3406_v50, %v17449_v39  ;;  %v3447_v57 = vsel %vm3421_vm7, %v3410_v49, %v17450_v12  ;;  %v3445_v51 = vsel %vm3421_vm7, %v3408_v18, %v17451_v26  ;;  %v3478_v56 = vsel %vm3458_vm1, %v3441_v23, %v17452_v17  ;;  %6798 = vrot.lane.b32.xlu0 %v6679_v38, %s9741_s28  ;;  %v14593_v35 = vld [vmem:[#allocation2 + $0x28] sm:$0xff]   ;;  %v5789_v24 = vpop.f32.mrf.mxu0 }
 0x52e   :  { %v3451_v32 = vsel %vm3421_vm7, %v3414_v9, %v17453_v10  ;;  %v3449_v1 = vsel %vm3421_vm7, %v3412_v60, %v17454_v40  ;;  %v3480_v4 = vsel %vm3458_vm1, %v3443_v3, %v17455_v25  ;;  %v3515_v29 = vsel %vm3495_vm14, %v3478_v56, %v3184_v21  ;;  %v17460_v9 = vld [vmem:[#allocation150_spill] sm:$0xff] }
 0x52f   :  { %v3484_v42 = vsel %vm3458_vm1, %v3447_v57, %v17456_v28  ;;  %v3482_v8 = vsel %vm3458_vm1, %v3445_v51, %v17457_v58  ;;  %v3517_v52 = vsel %vm3495_vm14, %v3480_v4, %v3186_v15  ;;  %v3552_v16 = vsel %vm3532_vm2, %v3515_v29, %v3260_v63  ;;  %7130 = vrot.lane.b32.xlu1 %v14466_v62, %s9749_s10  ;;  %v14620_v62 = vld [vmem:[%s16529_s3] ss:$0 sm:$0xff]  ;;  %v3264_v49 = vpop.permute.xlu0 %3263  ;;  %v9385_v23 = vpop.f32.mrf.mxu0  ;;  %v17461_v12 = vld [vmem:[#allocation66_spill] sm:$0xff] }
 0x530   :  { %v7096_v21 = vrot.slane %v14593_v35, 2  ;;  %v6840_v36 = vrot.slane %v14593_v35, 1  ;;  %v14606_v33 = vshll.u32 %v14593_v35, 16  ;;  %v14609_v50 = vshrl.u32 %v14593_v35, 16  ;;  %9345 = vmatmul.mubr.msk.bf16.gmra.mxu1 %vm4137_vm13, %v3552_v16  ;;  %v3266_v38 = vpop.permute.xlu1 %3265  ;;  %v14653_v3 = vld [vmem:[#allocation2 + $0x30] sm:$0xff]   ;;  %v17463_v29 = vld [vmem:[#allocation14_spill] sm:$0xff] }
 0x531   :  { %v14613_v15 = vsel %vm3458_vm1, %v3451_v32, %v17458_v27  ;;  %v3554_v63 = vsel %vm3532_vm2, %v3517_v52, %v3262_v45  ;;  %6874 = vrot.lane.b32.xlu0 %v6839_v0, %s9743_s11  ;;  %v5798_v46 = vadd.f32 %v14620_v62, %v9384_v61  ;;  %v7352_v5 = vrot.slane %v14593_v35, 3  ;;  %v5792_v10 = vpop.f32.mrf.mxu0 }
 0x532   :  { %9348 = vmatprep.mubr.msk.bf16.mxu1 %vm4137_vm13, %v3554_v63  ;;  %v14631_v0 = vsel %vm690_vm3, %v7094_v48, %v7096_v21  ;;  %v14638_v34 = vsel %vm17459_vm9, %v6838_v30, %v6840_v36  ;;  %v7234_v18 = vrot.slane %v14609_v50, 2  ;;  %v7235_v19 = vrot.slane %v14606_v33, 3 }
 0x533   :  { %v3486_v47 = vsel %vm3458_vm1, %v3449_v1, %v17460_v9  ;;  %v5898_v60 = vmax.f32 %v5798_v46, 0.0  ;;  %v5790_v31 = vadd.f32 %v14620_v62, %v5789_v24  ;;  %7183 = vrot.lane.b32.xlu1 %v14631_v0, %s9750_s12  ;;  %v6980_v48 = vrot.slane %v14609_v50, 1  ;;  %v3192_v32 = vpop.permute.xlu0 %3191 }
 0x534   :  { %v6182_v43 = vrot.slane %v14479_v55, 4  ;;  %v3519_v30 = vsel %vm3495_vm14, %v3482_v8, %v3188_v54  ;;  %v14650_v45 = vor.u32 %v7235_v19, %v7234_v18  ;;  %v6981_v39 = vrot.slane %v14606_v33, 2  ;;  %v3194_v8 = vpop.permute.xlu1 %3193 }
 0x535   :  { %v5934_v57 = vmul.f32 %v5898_v60, %v17461_v12  ;;  %v3521_v26 = vsel %vm3495_vm14, %v3484_v42, %v3190_v44  ;;  %v5896_v51 = vmax.f32 %v5790_v31, 0.0  ;;  %6927 = vrot.lane.b32.xlu0 %v14638_v34, %s9745_s22  ;;  %v5801_v17 = vadd.f32 %v14620_v62, %v9385_v23  ;;  %v17465_v44 = vld [vmem:[#allocation86_spill] sm:$0xff] }
 0x536   :  { %v3556_v56 = vsel %vm3532_vm2, %v3519_v30, %v3264_v49  ;;  %v7237_v40 = vsel %vm820_vm4, %v14476_v20, %v14650_v45  ;;  %v14664_v1 = vor.u32 %v6981_v39, %v6980_v48  ;;  %vm17462_vm6 = vcmask 1044480   ;;  %v17466_v48 = vld [vmem:[#allocation75_spill] sm:$0xff] }
 0x537   :  { %v7353_v25 = vsel %vm17462_vm6, %v7350_v59, %v7352_v5  ;;  %v9090_v4 = vpack.c.bf16 %v5934_v57, %v5934_v57  ;;  %v5932_v54 = vmul.f32 %v5896_v51, %v17463_v29  ;;  %v5899_v28 = vmax.f32 %v5801_v17, 0.0  ;;  %7312 = vrot.lane.b32.xlu1 %v7237_v40, %s9751_s26  ;;  %v3268_v46 = vpop.permute.xlu0 %3267  ;;  %vm17467_vm5 = vmmov %vm17462_vm6 }
 0x538   :  { %v5793_v42 = vadd.f32 %v14620_v62, %v5792_v10  ;;  %v3558_v58 = vsel %vm3532_vm2, %v3521_v26, %v3266_v38  ;;  %v6983_v20 = vsel %vm17464_vm8, %v14516_v7, %v14664_v1  ;;  %v7354_v52 = vrot.slane %v14653_v3, 3  ;;  %9349 = vmatmul.mubr.msk.bf16.gmra.mxu1 %vm4137_vm13, %v3556_v56  ;;  %v3270_v10 = vpop.permute.xlu1 %3269 }
 0x539   :  { %v14678_v6 = vshll.u32 %v14653_v3, 16  ;;  %v6204_v59 = vshrl.u32 %v9090_v4, 16  ;;  %v6207_v16 = vshll.u32 %v9090_v4, 16  ;;  %v9088_v61 = vpack.c.bf16 %v5932_v54, %v5932_v54  ;;  %7056 = vrot.lane.b32.xlu0 %v6983_v20, %s9748_s8  ;;  %9352 = vmatprep.mubr.msk.bf16.mxu1 %vm4137_vm13, %v3558_v58  ;;  %v17468_v58 = vld [vmem:[#allocation134_spill] sm:$0xff] }
 0x53a   :  { %v5935_v27 = vmul.f32 %v5899_v28, %v17465_v44  ;;  %v5897_v63 = vmax.f32 %v5793_v42, 0.0  ;;  %v7098_v7 = vrot.slane %v14653_v3, 2  ;;  %v14686_v24 = vshrl.u32 %v14653_v3, 16  ;;  %v14711_v42 = vpop.f32.mrf.mxu1 }
 0x53b   :  { %v7239_v49 = vrot.slane %v14678_v6, 3  ;;  %v6206_v18 = vrot.slane %v6204_v59, 6  ;;  %v6209_v19 = vrot.slane %v6207_v16, 7  ;;  %v6184_v9 = vshrl.u32 %v9088_v61, 16  ;;  %7388 = vrot.lane.b32.xlu1 %v7353_v25, %s9752_s15  ;;  %v3196_v40 = vpop.permute.xlu0 %3195 }
 0x53c   :  { %v6187_v60 = vshll.u32 %v9088_v61, 16  ;;  %v9091_v31 = vpack.c.bf16 %v5935_v27, %v5935_v27  ;;  %v5933_v30 = vmul.f32 %v5897_v63, %v17466_v48  ;;  %v7355_v23 = vsel %vm17467_vm5, %v7352_v5, %v7354_v52 }
 0x53d   :  { %v7238_v38 = vrot.slane %v14686_v24, 2  ;;  %v6210_v39 = vor.u32 %v6209_v19, %v6206_v18  ;;  %v6186_v12 = vrot.slane %v6184_v9, 6  ;;  %v3523_v26 = vsel %vm3495_vm14, %v3486_v47, %v3192_v32  ;;  %7132 = vrot.lane.b32.xlu0 %v14631_v0, %s9749_s10 }
 0x53e   :  { %v6189_v57 = vrot.slane %v6187_v60, 7  ;;  %v6214_v51 = vshrl.u32 %v9091_v31, 16  ;;  %v6217_v17 = vshll.u32 %v9091_v31, 16  ;;  %v9089_v56 = vpack.c.bf16 %v5933_v30, %v5933_v30  ;;  %v14742_v60 = vpop.f32.mrf.mxu1 }
 0x53f   :  { %v14703_v5 = vsel %vm690_vm3, %v7096_v21, %v7098_v7  ;;  %v3525_v4 = vsel %vm3495_vm14, %v14613_v15, %v3194_v8  ;;  %v3560_v47 = vsel %vm3532_vm2, %v3523_v26, %v3268_v46  ;;  %7390 = vrot.lane.b32.xlu1 %v7355_v23, %s9752_s15  ;;  %v14709_v0 = vor.u32 %v7239_v49, %v7238_v38  ;;  %v3272_v18 = vpop.permute.xlu0 %3271 }
 0x540   :  { %v6190_v25 = vor.u32 %v6189_v57, %v6186_v12  ;;  %v6216_v32 = vrot.slane %v6214_v51, 6  ;;  %v6219_v29 = vrot.slane %v6217_v17, 7  ;;  %v6194_v54 = vshrl.u32 %v9089_v56, 16  ;;  %9353 = vmatmul.mubr.msk.bf16.gmra.mxu1 %vm4137_vm13, %v3560_v47  ;;  %v14765_v35 = vpop.f32.mrf.mxu1  ;;  %v9722_v12 = vld [vmem:[#allocation2 + $0x80] sm:$0xff]   ;;  %v9723_v51 = vld [vmem:[#allocation2 + $0x88] sm:$0xff]   ;;  %v17478_v17 = vld [vmem:[#allocation60_spill] sm:$0xff] }
 0x541   :  { %v6197_v28 = vshll.u32 %v9089_v56, 16  ;;  %v3453_v21 = vsel %vm3421_vm7, %v14570_v13, %v17468_v58  ;;  %v6212_v20 = vrot.slane %v6210_v39, 4  ;;  %v3562_v8 = vsel %vm3532_vm2, %v3525_v4, %v3270_v10  ;;  %7185 = vrot.lane.b32.xlu0 %v14703_v5, %s9750_s12  ;;  %v17470_v13 = vld [vmem:[#allocation152_spill] sm:$0xff]  ;;  %v17482_v47 = vld [vmem:[#allocation97_spill] sm:$0xff] }
 0x542   :  { %v6191_v15 = vsel %vm11365_vm12, %v6182_v43, %v6190_v25  ;;  %vm17469_vm9 = vcmask 60416   ;;  %v14725_v59 = vor.u32 %v6219_v29, %v6216_v32  ;;  %v6196_v16 = vrot.slane %v6194_v54, 6  ;;  %9356 = vmatprep.mubr.msk.bf16.mxu1 %vm4137_vm13, %v3562_v8  ;;  %v14779_v26 = vpop.f32.mrf.mxu1  ;;  %v17480_v10 = vld [vmem:[#allocation28_spill] sm:$0xff] }
 0x543   :  { %6474 = vst.msk [vmem:[#allocation2 + $0x38] sm:$0xf] %vm17469_vm9, %v6191_v15  ;;  %v6199_v61 = vrot.slane %v6197_v28, 7  ;;  %v6842_v55 = vrot.slane %v14653_v3, 1  ;;  %v3490_v43 = vsel %vm3458_vm1, %v3453_v21, %v17470_v13  ;;  %v6192_v44 = vrot.slane %v6190_v25, 4  ;;  %6876 = vrot.lane.b32.xlu1 %v14638_v34, %s9743_s11  ;;  %vm17471_vm6 = vmmov %vm17469_vm9  ;;  %v17481_v25 = vld [vmem:[#allocation68_spill] sm:$0xff] }
 0x544   :  { %v6984_v27 = vrot.slane %v14686_v24, 1  ;;  %v6985_v63 = vrot.slane %v14678_v6, 2  ;;  %v6221_v46 = vsel %vm11365_vm12, %v6212_v20, %v14725_v59  ;;  %v7241_v19 = vsel %vm820_vm4, %v14650_v45, %v14709_v0  ;;  %vm17473_vm5 = vmmov %vm17471_vm6  ;;  %v14797_v29 = vld [vmem:[%s16526_s0 + $0xb4] sm:$0xfe]   ;;  %v14807_v15 = vpop.f32.mrf.mxu1 }
 0x545   :  { %v6200_v49 = vor.u32 %v6199_v61, %v6196_v16  ;;  %v6686_v9 = vrot.slane %v14606_v33, 1  ;;  %6477 = vst.msk [vmem:[#allocation2 + $0x44] sm:$0xf] %vm17471_vm6, %v6221_v46  ;;  %v3527_v34 = vsel %vm3495_vm14, %v3490_v43, %v3196_v40  ;;  %7314 = vrot.lane.b32.xlu0 %v7241_v19, %s9751_s26  ;;  %v6682_v31 = vor.u32 %v14444_v14, %v6678_v53  ;;  %vm17474_vm9 = vmmov %vm17473_vm5  ;;  %v17484_v8 = vld [vmem:[#allocation100_spill] sm:$0xff]  ;;  %v17486_v16 = vld [vmem:[#allocation115_spill] sm:$0xff] }
 0x546   :  { %vm17472_vm8 = vcmask 1046528   ;;  %v14755_v45 = vor.u32 %v6985_v63, %v6984_v27  ;;  %v3564_v23 = vsel %vm3532_vm2, %v3527_v34, %v3272_v18  ;;  %v6694_v38 = vrot.slane %v14678_v6, 1  ;;  %v14834_v18 = vld [vmem:[%s16526_s0 + $0xbc] sm:$0xff]  }
 0x547   :  { %v6201_v48 = vsel %vm11365_vm12, %v6192_v44, %v6200_v49  ;;  %v6202_v30 = vrot.slane %v6200_v49, 4  ;;  %v6843_v33 = vsel %vm17472_vm8, %v6840_v36, %v6842_v55  ;;  %v6687_v14 = vsel %vm242_vm0, %v6682_v31, %v6686_v9  ;;  %v17488_v34 = vld [vmem:[#allocation133_spill] sm:$0xff] }
 0x548   :  { %6475 = vst.msk [vmem:[#allocation2 + $0x3c] sm:$0xf] %vm17473_vm5, %v6201_v48  ;;  %6929 = vrot.lane.b32.xlu1 %v6843_v33, %s9745_s22  ;;  %v6690_v53 = vor.u32 %v14609_v50, %v6686_v9  ;;  %9357 = vmatmul.mubr.msk.bf16.gmra.mxu1 %vm4137_vm13, %v3564_v23  ;;  %vm17475_vm6 = vsmask.f32 6400  ;;  %vm17477_vm8 = vcmask 64512   ;;  %v14847_v23 = vpop.f32.mrf.mxu1 }
 0x549   :  { %v6211_v41 = vsel %vm11365_vm12, %v6202_v30, %v6210_v39  ;;  %6800 = vrot.lane.b32.xlu0 %v6687_v14, %s9741_s28  ;;  %v6987_v36 = vsel %vm17475_vm6, %v14664_v1, %v14755_v45  ;;  %v17476_v39 = vld [vmem:[#allocation11_spill] sm:$0xff]  ;;  %vm17479_vm5 = vmmov %vm17477_vm8  ;;  %v17489_v14 = vld [vmem:[#allocation88_spill] sm:$0xff] }
 0x54a   :  { %6476 = vst.msk [vmem:[#allocation2 + $0x40] sm:$0xf] %vm17474_vm9, %v6211_v41  ;;  %v3310_v57 = vsel %vm17477_vm8, %v9722_v12, %v17476_v39  ;;  %v6695_v50 = vsel %vm242_vm0, %v6690_v53, %v6694_v38  ;;  %v3312_v56 = vsel %vm17479_vm5, %v9723_v51, %v17478_v17  ;;  %vm17483_vm9 = vcmask 195584  }
 0x54b   :  { %v3346_v1 = vsel %vm1135_vm11, %v3310_v57, %v17480_v10  ;;  %v3348_v4 = vsel %vm1135_vm11, %v3312_v56, %v17481_v25  ;;  %v9388_v54 = vpop.f32.mrf.mxu0  ;;  %vm17485_vm6 = vmmov %vm17483_vm9  ;;  %vm17487_vm8 = vcmask 1046528   ;;  %v7840_v41 = vshrl.u32 %v14797_v29, 16 }
 0x54c   :  { %7058 = vrot.lane.b32.xlu1 %v6987_v36, %s9748_s8  ;;  %v3382_v32 = vsel %vm17483_vm9, %v3346_v1, %v17482_v47  ;;  %v5814_v13 = vadd.f32 %v14620_v62, %v9388_v54  ;;  %v7843_v17 = vshll.u32 %v14797_v29, 16  ;;  %v7848_v56 = vshrl.u32 %v14834_v18, 16  ;;  %v17490_v1 = vld [vmem:[#allocation77_spill] sm:$0xff] }
 0x54d   :  { %6802 = vrot.lane.b32.xlu0 %v6695_v50, %s9741_s28  ;;  %v3418_v61 = vsel %vm1283_vm15, %v3382_v32, %v17486_v16  ;;  %v5805_v43 = vpop.f32.mrf.mxu0  ;;  %vm17491_vm5 = vsmask.f32 6400  ;;  %vm17492_vm9 = vcmask 1044480   ;;  %v14877_v16 = vpop.f32.mrf.mxu1 }
 0x54e   :  { %v5902_v19 = vmax.f32 %v5814_v13, 0.0  ;;  %v5806_v9 = vadd.f32 %v14620_v62, %v5805_v43  ;;  %v14842_v31 = vsel %vm3421_vm7, %v3418_v61, %v17488_v34  ;;  %v14882_v61 = vld [vmem:[%s16526_s0 + $0xc4] sm:$0xff]  }
 0x54f   :  { %v14786_v40 = vld [vmem:[#allocation2 + $0x38] sm:$0xff]   ;;  %v9389_v48 = vpop.f32.mrf.mxu0 }
 0x550   :  { %7134 = vrot.lane.b32.xlu1 %v14703_v5, %s9749_s10  ;;  %v7100_v28 = vrot.slane %v14786_v40, 2  ;;  %v6844_v58 = vrot.slane %v14786_v40, 1  ;;  %v14802_v21 = vshll.u32 %v14786_v40, 16  ;;  %v14805_v20 = vshrl.u32 %v14786_v40, 16 }
 0x551   :  { %v14811_v5 = vsel %vm17485_vm6, %v3348_v4, %v17484_v8  ;;  %6878 = vrot.lane.b32.xlu0 %v6843_v33, %s9743_s11  ;;  %v14829_v49 = vld [vmem:[#allocation2 + $0x40] sm:$0xff]   ;;  %v7356_v33 = vrot.slane %v14786_v40, 3  ;;  %v5938_v53 = vmul.f32 %v5902_v19, %v17489_v14  ;;  %v5900_v36 = vmax.f32 %v5806_v9, 0.0  ;;  %v5808_v57 = vpop.f32.mrf.mxu0  ;;  %vm17495_vm6 = vmmov %vm17492_vm9 }
 0x552   :  { %v7101_v44 = vsel %vm690_vm3, %v7098_v7, %v7100_v28  ;;  %v14825_v27 = vsel %vm17487_vm8, %v6842_v55, %v6844_v58  ;;  %v7242_v63 = vrot.slane %v14805_v20, 2  ;;  %v7243_v46 = vrot.slane %v14802_v21, 3 }
 0x553   :  { %v6988_v7 = vrot.slane %v14805_v20, 1  ;;  %v6989_v55 = vrot.slane %v14802_v21, 2  ;;  %v5817_v12 = vadd.f32 %v14620_v62, %v9389_v48  ;;  %v14860_v51 = vshll.u32 %v14829_v49, 16 }
 0x554   :  { %7187 = vrot.lane.b32.xlu1 %v7101_v44, %s9750_s12  ;;  %v14844_v30 = vor.u32 %v7243_v46, %v7242_v63  ;;  %v9094_v10 = vpack.c.bf16 %v5938_v53, %v5938_v53  ;;  %v5936_v25 = vmul.f32 %v5900_v36, %v17490_v1  ;;  %v5809_v47 = vadd.f32 %v14620_v62, %v5808_v57  ;;  %v17494_v53 = vld [vmem:[#allocation55_spill] sm:$0xff] }
 0x555   :  { %6931 = vrot.lane.b32.xlu0 %v14825_v27, %s9745_s22  ;;  %v14854_v39 = vor.u32 %v6989_v55, %v6988_v7  ;;  %v5903_v4 = vmax.f32 %v5817_v12, 0.0  ;;  %v7358_v54 = vrot.slane %v14829_v49, 3  ;;  %v14875_v8 = vshrl.u32 %v14829_v49, 16  ;;  %v14891_v12 = vpop.f32.mrf.mxu1 }
 0x556   :  { %v7245_v50 = vsel %vm820_vm4, %v14709_v0, %v14844_v30  ;;  %v7357_v0 = vsel %vm17492_vm9, %v7354_v52, %v7356_v33  ;;  %v6244_v13 = vshrl.u32 %v9094_v10, 16  ;;  %v6247_v43 = vshll.u32 %v9094_v10, 16 }
 0x557   :  { %v6991_v32 = vsel %vm17491_vm5, %v14755_v45, %v14854_v39  ;;  %v9092_v63 = vpack.c.bf16 %v5936_v25, %v5936_v25  ;;  %v17493_v45 = vld [vmem:[#allocation24_spill] sm:$0xff]  ;;  %v5901_v3 = vmax.f32 %v5809_v47, 0.0  ;;  %v7102_v52 = vrot.slane %v14829_v49, 2 }
 0x558   :  { %7316 = vrot.lane.b32.xlu1 %v7245_v50, %s9751_s26  ;;  %v5939_v46 = vmul.f32 %v5903_v4, %v17493_v45  ;;  %v7246_v19 = vrot.slane %v14875_v8, 2  ;;  %v7247_v9 = vrot.slane %v14860_v51, 3  ;;  %v6246_v7 = vrot.slane %v6244_v13, 6 }
 0x559   :  { %7060 = vrot.lane.b32.xlu0 %v6991_v32, %s9748_s8  ;;  %v6249_v55 = vrot.slane %v6247_v43, 7  ;;  %v6224_v34 = vshrl.u32 %v9092_v63, 16  ;;  %v6227_v48 = vshll.u32 %v9092_v63, 16  ;;  %v5937_v36 = vmul.f32 %v5901_v3, %v17494_v53 }
 0x55a   :  { %v9095_v14 = vpack.c.bf16 %v5939_v46, %v5939_v46  ;;  %v7851_v57 = vshll.u32 %v14834_v18, 16  ;;  %v7857_v50 = vshrl.u32 %v14882_v61, 16  ;;  %v7860_v4 = vshll.u32 %v14882_v61, 16 }
 0x55b   :  { %v6250_v10 = vor.u32 %v6249_v55, %v6246_v7  ;;  %v6226_v1 = vrot.slane %v6224_v34, 6  ;;  %v6229_v25 = vrot.slane %v6227_v48, 7  ;;  %v9093_v13 = vpack.c.bf16 %v5937_v36, %v5937_v36  ;;  %v14911_v55 = vpop.f32.mrf.mxu1 }
 0x55c   :  { %7392 = vrot.lane.b32.xlu1 %v7357_v0, %s9752_s15  ;;  %v6254_v47 = vshrl.u32 %v9095_v14, 16  ;;  %v6257_v32 = vshll.u32 %v9095_v14, 16  ;;  %v7359_v0 = vsel %vm17495_vm6, %v7356_v33, %v7358_v54  ;;  %v6222_v43 = vrot.slane %v14725_v59, 4  ;;  %v14913_v33 = vpop.permute.xlu1 %3197 }
 0x55d   :  { %7136 = vrot.lane.b32.xlu0 %v7101_v44, %s9749_s10  ;;  %v6230_v63 = vor.u32 %v6229_v25, %v6226_v1  ;;  %v14907_v44 = vsel %vm690_vm3, %v7100_v28, %v7102_v52  ;;  %v14909_v61 = vor.u32 %v7247_v9, %v7246_v19  ;;  %v6234_v3 = vshrl.u32 %v9093_v13, 16  ;;  %v14950_v18 = vpop.f32.mrf.mxu1 }
 0x55e   :  { %v6256_v45 = vrot.slane %v6254_v47, 6  ;;  %v6259_v46 = vrot.slane %v6257_v32, 7  ;;  %v6237_v7 = vshll.u32 %v9093_v13, 16  ;;  %v6252_v59 = vrot.slane %v6250_v10, 4  ;;  %v9641_v32 = vld [vmem:[%s16526_s0 + $0xcc] sm:$0xff]  }
 0x55f   :  { %v6231_v34 = vsel %vm11365_vm12, %v6222_v43, %v6230_v63  ;;  %v6846_v28 = vrot.slane %v14829_v49, 1  ;;  %v6992_v19 = vrot.slane %v14875_v8, 1  ;;  %vm17496_vm8 = vcmask 60416  }
 0x560   :  { %7394 = vrot.lane.b32.xlu1 %v7359_v0, %s9752_s15  ;;  %6478 = vst.msk [vmem:[#allocation2 + $0x48] sm:$0xf] %vm17496_vm8, %v6231_v34  ;;  %v14922_v9 = vor.u32 %v6259_v46, %v6256_v45  ;;  %v6236_v48 = vrot.slane %v6234_v3, 6  ;;  %v6239_v14 = vrot.slane %v6237_v7, 7  ;;  %v6993_v53 = vrot.slane %v14860_v51, 2  ;;  %vm17497_vm5 = vmmov %vm17496_vm8  ;;  %v3200_v3 = vpop.permute.xlu1 %3199  ;;  %v17500_v34 = vld [vmem:[#allocation118_spill] sm:$0xff] }
 0x561   :  { %7189 = vrot.lane.b32.xlu0 %v14907_v44, %s9750_s12  ;;  %v6702_v36 = vrot.slane %v14802_v21, 1  ;;  %v14930_v1 = vrot.slane %v7840_v41, 1  ;;  %v14934_v25 = vrot.slane %v7843_v17, 2  ;;  %v7850_v47 = vrot.slane %v7848_v56, 1  ;;  %vm17499_vm6 = vmmov %vm17497_vm5 }
 0x562   :  { %v6232_v21 = vrot.slane %v6230_v63, 4  ;;  %v6261_v41 = vsel %vm11365_vm12, %v6252_v59, %v14922_v9  ;;  %v6240_v13 = vor.u32 %v6239_v14, %v6236_v48  ;;  %v7249_v29 = vsel %vm820_vm4, %v14844_v30, %v14909_v61  ;;  %v14975_v59 = vpop.f32.mrf.mxu1  ;;  %v17501_v48 = vld [vmem:[#allocation151_spill] sm:$0xff]  ;;  %vm17502_vm8 = vmmov %vm17497_vm5 }
 0x563   :  { %6481 = vst.msk [vmem:[#allocation2 + $0x54] sm:$0xf] %vm17497_vm5, %v6261_v41  ;;  %v6698_v17 = vor.u32 %v14686_v24, %v6694_v38  ;;  %v7853_v56 = vrot.slane %v7851_v57, 2  ;;  %v7859_v0 = vrot.slane %v7857_v50, 1  ;;  %v7862_v43 = vrot.slane %v7860_v4, 2 }
 0x564   :  { %6880 = vrot.lane.b32.xlu1 %v14825_v27, %s9743_s11  ;;  %v9642_v27 = vld [vmem:[%s16526_s0 + $0xd4] sm:$0xff]   ;;  %v6241_v63 = vsel %vm11365_vm12, %v6232_v21, %v6240_v13  ;;  %v6242_v45 = vrot.slane %v6240_v13, 4  ;;  %vm17498_vm9 = vcmask 1046528   ;;  %v14964_v46 = vor.u32 %v6993_v53, %v6992_v19  ;;  %v14999_v13 = vld [vmem:[%s16526_s0 + $0xe4] sm:$0xff]  }
 0x565   :  { %7318 = vrot.lane.b32.xlu0 %v7249_v29, %s9751_s26  ;;  %v6847_v30 = vsel %vm17498_vm9, %v6844_v58, %v6846_v28  ;;  %6479 = vst.msk [vmem:[#allocation2 + $0x4c] sm:$0xf] %vm17499_vm6, %v6241_v63  ;;  %v7866_v6 = vshrl.u32 %v9641_v32, 16  ;;  %v7869_v24 = vshll.u32 %v9641_v32, 16  ;;  %v7875_v38 = vshrl.u32 %v9642_v27, 16  ;;  %v17504_v29 = vld [vmem:[#allocation136_spill] sm:$0xff] }
 0x566   :  { %v7878_v57 = vshll.u32 %v9642_v27, 16  ;;  %v6251_v50 = vsel %vm11365_vm12, %v6242_v45, %v6250_v10  ;;  %v6703_v4 = vsel %vm242_vm0, %v6698_v17, %v6702_v36  ;;  %v14971_v7 = vpop.permute.xlu0 %6792  ;;  %v6706_v40 = vor.u32 %v14805_v20, %v6702_v36  ;;  %v9645_v20 = vld [vmem:[%s16526_s0 + $0xdc] sm:$0xff]   ;;  %v15008_v17 = vpop.f32.mrf.mxu1 }
 0x567   :  { %v16668_v58 = vrot.slane %v14860_v51, 1  ;;  %v3420_v19 = vsel %vm1283_vm15, %v14811_v5, %v17500_v34  ;;  %v3492_v14 = vsel %vm3458_vm1, %v14842_v31, %v17501_v48  ;;  %6480 = vst.msk [vmem:[#allocation2 + $0x50] sm:$0xf] %vm17502_vm8, %v6251_v50  ;;  %vm17503_vm5 = vsmask.f32 6400 }
 0x568   :  { %6933 = vrot.lane.b32.xlu1 %v6847_v30, %s9745_s22  ;;  %v6995_v10 = vsel %vm17503_vm5, %v14854_v39, %v14964_v46  ;;  %v7846_v53 = vor.u32 %v14934_v25, %v14930_v1  ;;  %v7854_v5 = vor.u32 %v7853_v56, %v7850_v47  ;;  %v7863_v36 = vor.u32 %v7862_v43, %v7859_v0  ;;  %v14993_v32 = vpop.permute.xlu1 %6794  ;;  %v17505_v56 = vld [vmem:[#allocation154_spill] sm:$0xff]  ;;  %vm17506_vm9 = vmmov %vm17503_vm5 }
 0x569   :  { %6804 = vrot.lane.b32.xlu0 %v6703_v4, %s9741_s28  ;;  %v7868_v31 = vrot.slane %v7866_v6, 1  ;;  %v7871_v27 = vrot.slane %v7869_v24, 2  ;;  %v7877_v21 = vrot.slane %v7875_v38, 1  ;;  %v7880_v41 = vrot.slane %v7878_v57, 2  ;;  %vm17507_vm6 = vmmov %vm17503_vm5 }
 0x56a   :  { %v3457_v39 = vsel %vm3421_vm7, %v3420_v19, %v17504_v29  ;;  %v3529_v1 = vsel %vm3495_vm14, %v3492_v14, %v14913_v33  ;;  %v6711_v25 = vsel %vm242_vm0, %v6706_v40, %v16668_v58  ;;  %v3274_v47 = vpop.permute.xlu0 %3273  ;;  %v7884_v63 = vshrl.u32 %v9645_v20, 16 }
 0x56b   :  { %v3494_v0 = vsel %vm3458_vm1, %v3457_v39, %v17505_v56  ;;  %v3566_v43 = vsel %vm3532_vm2, %v3529_v1, %v3274_v47  ;;  %v7887_v45 = vshll.u32 %v9645_v20, 16  ;;  %v7855_v24 = vsel %vm17506_vm9, %v7846_v53, %v7854_v5  ;;  %v9392_v34 = vpop.f32.mrf.mxu0  ;;  %v15033_v20 = vpop.f32.mrf.mxu1  ;;  %vm17510_vm9 = vmmov %vm17507_vm6 }
 0x56c   :  { %7062 = vrot.lane.b32.xlu1 %v6995_v10, %s9748_s8  ;;  %v3531_v6 = vsel %vm3495_vm14, %v3494_v0, %v3200_v3  ;;  %9360 = vmatprep.mubr.msk.bf16.mxu1 %vm4137_vm13, %v3566_v43  ;;  %v15016_v33 = vld [vmem:[#allocation2 + $0x48] sm:$0xff]   ;;  %v3276_v38 = vpop.permute.xlu1 %3275  ;;  %v15022_v57 = vsel %vm17507_vm6, %v7854_v5, %v7863_v36  ;;  %v7872_v50 = vor.u32 %v7871_v27, %v7868_v31  ;;  %v7893_v40 = vshrl.u32 %v14999_v13, 16 }
 0x56d   :  { %6806 = vrot.lane.b32.xlu0 %v6711_v25, %s9741_s28  ;;  %v15024_v4 = vor.u32 %v7880_v41, %v7877_v21  ;;  %v3568_v3 = vsel %vm3532_vm2, %v3531_v6, %v3276_v38  ;;  %v16669_v19 = vrot.slane %v15016_v33, 2  ;;  %v16667_v48 = vrot.slane %v15016_v33, 1  ;;  %v5821_v31 = vpop.f32.mrf.mxu0  ;;  %v15066_v56 = vpop.f32.mrf.mxu1 }
 0x56e   :  { %v15031_v14 = vshll.u32 %v15016_v33, 16  ;;  %9361 = vmatmul.mubr.msk.bf16.gmra.mxu1 %vm4137_vm13, %v3568_v3  ;;  %v15039_v10 = vshrl.u32 %v15016_v33, 16  ;;  %v7886_v53 = vrot.slane %v7884_v63, 1  ;;  %v7889_v5 = vrot.slane %v7887_v45, 2  ;;  %v15064_v47 = vld [vmem:[#allocation2 + $0x50] sm:$0xff]   ;;  %v17511_v45 = vld [vmem:[#allocation10_spill] sm:$0xff] }
 0x56f   :  { %v15046_v27 = vsel %vm690_vm3, %v7102_v52, %v16669_v19  ;;  %vm17508_vm8 = vcmask 1046528   ;;  %vm17509_vm5 = vcmask 31744   ;;  %v5822_v39 = vadd.f32 %v14620_v62, %v5821_v31 }
 0x570   :  { %7138 = vrot.lane.b32.xlu1 %v14907_v44, %s9749_s10  ;;  %v5830_v44 = vadd.f32 %v14620_v62, %v9392_v34  ;;  %v7251_v21 = vrot.slane %v15031_v14, 3  ;;  %v6997_v41 = vrot.slane %v15031_v14, 2  ;;  %9408 = vmatprep.mubr.msk.bf16.mxu1 %vm17509_vm5, %v7855_v24  ;;  %v7250_v52 = vrot.slane %v15039_v10, 2  ;;  %v15075_v24 = vpop.permute.xlu1 %6921 }
 0x571   :  { %6882 = vrot.lane.b32.xlu0 %v6847_v30, %s9743_s11  ;;  %v15053_v30 = vsel %vm17508_vm8, %v6846_v28, %v16667_v48  ;;  %v6996_v1 = vrot.slane %v15039_v10, 1  ;;  %v9393_v28 = vpop.f32.mrf.mxu0  ;;  %v7873_v0 = vsel %vm17510_vm9, %v7863_v36, %v7872_v50  ;;  %v15071_v43 = vsel %vm17507_vm6, %v7872_v50, %v15024_v4  ;;  %vm17513_vm8 = vmmov %vm17507_vm6 }
 0x572   :  { %v5906_v29 = vmax.f32 %v5830_v44, 0.0  ;;  %v7896_v63 = vshll.u32 %v14999_v13, 16  ;;  %v5904_v38 = vmax.f32 %v5822_v39, 0.0  ;;  %v5833_v3 = vadd.f32 %v14620_v62, %v9393_v28  ;;  %vm17515_vm9 = vmmov %vm17509_vm5 }
 0x573   :  { %v15080_v34 = vrot.slane %v7893_v40, 1  ;;  %v5824_v44 = vpop.f32.mrf.mxu0  ;;  %v15082_v36 = vor.u32 %v7251_v21, %v7250_v52  ;;  %v15084_v31 = vor.u32 %v6997_v41, %v6996_v1  ;;  %v7360_v50 = vrot.slane %v15016_v33, 3 }
 0x574   :  { %7191 = vrot.lane.b32.xlu1 %v15046_v27, %s9750_s12  ;;  %v5942_v6 = vmul.f32 %v5906_v29, %v17511_v45  ;;  %v15087_v13 = vor.u32 %v7889_v5, %v7886_v53  ;;  %v17512_v45 = vld [vmem:[#allocation56_spill] sm:$0xff]  ;;  %v5907_v39 = vmax.f32 %v5833_v3, 0.0  ;;  %v5825_v58 = vadd.f32 %v14620_v62, %v5824_v44  ;;  %v15101_v53 = vpop.f32.mrf.mxu1 }
 0x575   :  { %6935 = vrot.lane.b32.xlu0 %v15053_v30, %s9745_s22  ;;  %v5940_v48 = vmul.f32 %v5904_v38, %v17512_v45  ;;  %v7253_v40 = vsel %vm820_vm4, %v14909_v61, %v15082_v36  ;;  %v6999_v21 = vsel %vm17513_vm8, %v14964_v46, %v15084_v31  ;;  %v15099_v52 = vshll.u32 %v15064_v47, 16  ;;  %v6869_v45 = vpop.permute.xlu0 %6868 }
 0x576   :  { %v9098_v29 = vpack.c.bf16 %v5942_v6, %v5942_v6  ;;  %v17514_v6 = vld [vmem:[#allocation40_spill] sm:$0xff]  ;;  %v5905_v61 = vmax.f32 %v5825_v58, 0.0  ;;  %v15108_v46 = vshrl.u32 %v15064_v47, 16  ;;  %9409 = vmatmul.mubr.msk.bf16.vlgmr.msra.gmra.mxu1 %vm17509_vm5, %v15022_v57  ;;  %vm17517_vm6 = vcmask 1044480   ;;  %v15121_v41 = vpop.f32.mrf.mxu1 }
 0x577   :  { %v9096_v28 = vpack.c.bf16 %v5940_v48, %v5940_v48  ;;  %v5943_v38 = vmul.f32 %v5907_v39, %v17514_v6  ;;  %v7255_v44 = vrot.slane %v15099_v52, 3  ;;  %v15113_v6 = vpop.permute.xlu1 %7050  ;;  %9412 = vmatprep.mubr.msk.bf16.mxu1 %vm17515_vm9, %v7873_v0  ;;  %v7361_v19 = vsel %vm17517_vm6, %v7358_v54, %v7360_v50  ;;  %17518 = vst [vmem:[#allocation32_spill] sm:$0xff] %v15121_v41  ;;  %vm17520_vm5 = vmmov %vm17517_vm6 }
 0x578   :  { %v6284_v5 = vshrl.u32 %v9098_v29, 16  ;;  %v6287_v1 = vshll.u32 %v9098_v29, 16  ;;  %7320 = vrot.lane.b32.xlu1 %v7253_v40, %s9751_s26  ;;  %v17516_v40 = vld [vmem:[#allocation37_spill] sm:$0xff]  ;;  %v7254_v3 = vrot.slane %v15108_v46, 2  ;;  %v7898_v0 = vrot.slane %v7896_v63, 2  ;;  %v15141_v41 = vpop.f32.mrf.mxu1 }
 0x579   :  { %7064 = vrot.lane.b32.xlu0 %v6999_v21, %s9748_s8  ;;  %v6264_v25 = vshrl.u32 %v9096_v28, 16  ;;  %v6267_v39 = vshll.u32 %v9096_v28, 16  ;;  %v9099_v58 = vpack.c.bf16 %v5943_v38, %v5943_v38  ;;  %v5941_v21 = vmul.f32 %v5905_v61, %v17516_v40 }
 0x57a   :  { %v6286_v29 = vrot.slane %v6284_v5, 6  ;;  %v6289_v48 = vrot.slane %v6287_v1, 7  ;;  %v7891_v49 = vsel %vm17513_vm8, %v15024_v4, %v15087_v13  ;;  %v17519_v40 = vrot.slane %v15064_v47, 3 }
 0x57b   :  { %v6266_v5 = vrot.slane %v6264_v25, 6  ;;  %v6269_v1 = vrot.slane %v6267_v39, 7  ;;  %v6294_v28 = vshrl.u32 %v9099_v58, 16  ;;  %v6297_v38 = vshll.u32 %v9099_v58, 16 }
 0x57c   :  { %v6290_v57 = vor.u32 %v6289_v48, %v6286_v29  ;;  %7396 = vrot.lane.b32.xlu1 %v7361_v19, %s9752_s15  ;;  %v9097_v61 = vpack.c.bf16 %v5941_v21, %v5941_v21  ;;  %v7363_v29 = vsel %vm17520_vm5, %v7360_v50, %v17519_v40  ;;  %v17521_v25 = vrot.slane %v15064_v47, 2  ;;  %v7127_v40 = vpop.permute.xlu1 %7126 }
 0x57d   :  { %7140 = vrot.lane.b32.xlu0 %v15046_v27, %s9749_s10  ;;  %v6270_v54 = vor.u32 %v6269_v1, %v6266_v5  ;;  %v17522_v19 = vrot.slane %v15016_v33, 2  ;;  %v15139_v27 = vor.u32 %v7255_v44, %v7254_v3  ;;  %v6296_v63 = vrot.slane %v6294_v28, 6  ;;  %v15147_v1 = vpop.permute.xlu0 %6870 }
 0x57e   :  { %v6299_v39 = vrot.slane %v6297_v38, 7  ;;  %v6274_v58 = vshrl.u32 %v9097_v61, 16  ;;  %v6277_v21 = vshll.u32 %v9097_v61, 16  ;;  %v6292_v4 = vrot.slane %v6290_v57, 4 }
 0x57f   :  { %v15137_v48 = vsel %vm690_vm3, %v17522_v19, %v17521_v25  ;;  %v17523_v5 = vrot.slane %v14922_v9, 4  ;;  %v6850_v3 = vrot.slane %v15064_v47, 1  ;;  %v15154_v44 = vor.u32 %v7898_v0, %v15080_v34 }
 0x580   :  { %7398 = vrot.lane.b32.xlu1 %v7363_v29, %s9752_s15  ;;  %vm17524_vm9 = vcmask 60416   ;;  %v15157_v28 = vor.u32 %v6299_v39, %v6296_v63  ;;  %v6276_v9 = vrot.slane %v6274_v58, 6  ;;  %v6279_v38 = vrot.slane %v6277_v21, 7 }
 0x581   :  { %v6271_v50 = vsel %vm11365_vm12, %v17523_v5, %v6270_v54  ;;  %7193 = vrot.lane.b32.xlu0 %v15137_v48, %s9750_s12  ;;  %v6718_v61 = vrot.slane %v15031_v14, 1  ;;  %vm17525_vm6 = vcmask 31744   ;;  %vm17526_vm8 = vcmask 64512  }
 0x582   :  { %6482 = vst.msk [vmem:[#allocation2 + $0x58] sm:$0xf] %vm17524_vm9, %v6271_v50  ;;  %9413 = vmatmul.mubr.msk.bf16.gmra.mxu1 %vm17525_vm6, %v15071_v43  ;;  %v7421_v29 = vsel %vm17526_vm8, %v14060_v11, %v14971_v7  ;;  %v6272_v25 = vrot.slane %v6270_v54, 4  ;;  %v17527_v19 = vrot.slane %v14860_v51, 1  ;;  %v7000_v0 = vrot.slane %v15108_v46, 1  ;;  %vm17528_vm5 = vmmov %vm17525_vm6  ;;  %v15177_v7 = vpop.f32.mrf.mxu1  ;;  %v9649_v51 = vld [vmem:[%s16526_s0 + $0xec] sm:$0xff]  }
 0x583   :  { %9416 = vmatprep.mubr.msk.bf16.mxu1 %vm17528_vm5, %v7891_v49  ;;  %v6301_v14 = vsel %vm11365_vm12, %v6292_v4, %v15157_v28  ;;  %v6280_v63 = vor.u32 %v6279_v38, %v6276_v9  ;;  %v7257_v43 = vsel %vm820_vm4, %v15082_v36, %v15139_v27  ;;  %v7001_v11 = vrot.slane %v15099_v52, 2  ;;  %v7180_v36 = vpop.permute.xlu1 %7179  ;;  %vm17532_vm5 = vmmov %vm17524_vm9 }
 0x584   :  { %v6714_v34 = vor.u32 %v14875_v8, %v17527_v19  ;;  %v9650_v8 = vld [vmem:[%s16526_s0 + $0xf4] sm:$0xff]   ;;  %v7457_v49 = vsel %vm1135_vm11, %v7421_v29, %v6869_v45  ;;  %6485 = vst.msk [vmem:[#allocation2 + $0x64] sm:$0xf] %vm17524_vm9, %v6301_v14  ;;  %6884 = vrot.lane.b32.xlu1 %v15053_v30, %s9743_s11  ;;  %v6924_v54 = vpop.permute.xlu0 %6923  ;;  %vm17529_vm6 = vsmask.f32 6400  ;;  %v17530_v45 = vrot.slane %v15016_v33, 1  ;;  %v15208_v19 = vpop.f32.mrf.mxu1 }
 0x585   :  { %7322 = vrot.lane.b32.xlu0 %v7257_v43, %s9751_s26  ;;  %v7900_v39 = vsel %vm17529_vm6, %v15087_v13, %v15154_v44  ;;  %v6281_v58 = vsel %vm11365_vm12, %v6272_v25, %v6280_v63  ;;  %v6282_v21 = vrot.slane %v6280_v63, 4  ;;  %vm17531_vm8 = vcmask 1046528   ;;  %vm17534_vm6 = vmmov %vm17532_vm5 }
 0x586   :  { %v6851_v4 = vsel %vm17531_vm8, %v17530_v45, %v6850_v3  ;;  %v6719_v30 = vsel %vm242_vm0, %v6714_v34, %v6718_v61  ;;  %6483 = vst.msk [vmem:[#allocation2 + $0x5c] sm:$0xf] %vm17532_vm5, %v6281_v58  ;;  %v6722_v5 = vor.u32 %v15039_v10, %v6718_v61  ;;  %v7902_v50 = vshrl.u32 %v9649_v51, 16  ;;  %v15226_v58 = vpop.f32.mrf.mxu1 }
 0x587   :  { %v7905_v9 = vshll.u32 %v9649_v51, 16  ;;  %v7911_v38 = vshrl.u32 %v9650_v8, 16  ;;  %v6291_v13 = vsel %vm11365_vm12, %v6282_v21, %v6290_v57  ;;  %v15205_v29 = vor.u32 %v7001_v11, %v7000_v0  ;;  %v7309_v10 = vpop.permute.xlu1 %7308 }
 0x588   :  { %v16671_v25 = vrot.slane %v15099_v52, 1  ;;  %v7914_v33 = vshll.u32 %v9650_v8, 16  ;;  %vm17533_vm9 = vcmask 195584   ;;  %6484 = vst.msk [vmem:[#allocation2 + $0x60] sm:$0xf] %vm17534_vm6, %v6291_v13  ;;  %6937 = vrot.lane.b32.xlu1 %v6851_v4, %s9745_s22  ;;  %v7904_v61 = vrot.slane %v7902_v50, 1  ;;  %v15254_v13 = vpop.f32.mrf.mxu1 }
 0x589   :  { %v7493_v34 = vsel %vm17533_vm9, %v7457_v49, %v15075_v24  ;;  %6808 = vrot.lane.b32.xlu0 %v6719_v30, %s9741_s28  ;;  %v7907_v14 = vrot.slane %v7905_v9, 2  ;;  %v7913_v57 = vrot.slane %v7911_v38, 1  ;;  %vm17535_vm8 = vcmask 31744  }
 0x58a   :  { %v7529_v0 = vsel %vm1283_vm15, %v7493_v34, %v15113_v6  ;;  %9417 = vmatmul.mubr.msk.bf16.gmra.mxu1 %vm17535_vm8, %v7900_v39  ;;  %v7916_v63 = vrot.slane %v7914_v33, 2  ;;  %v7053_v11 = vpop.permute.xlu0 %7052  ;;  %vm17536_vm5 = vsmask.f32 6400  ;;  %v6727_v49 = vsel %vm242_vm0, %v6722_v5, %v16671_v25 }
 0x58b   :  { %v7565_v43 = vsel %vm3421_vm7, %v7529_v0, %v7127_v40  ;;  %v7908_v24 = vor.u32 %v7907_v14, %v7904_v61  ;;  %v7003_v8 = vsel %vm17536_vm5, %v15084_v31, %v15205_v29  ;;  %vm17537_vm9 = vcmask 64512   ;;  %vm17538_vm6 = vmmov %vm17536_vm5 }
 0x58c   :  { %v7601_v51 = vsel %vm3458_vm1, %v7565_v43, %v7180_v36  ;;  %v15228_v6 = vor.u32 %v7916_v63, %v7913_v57  ;;  %v7423_v40 = vsel %vm17537_vm9, %v14158_v37, %v14993_v32  ;;  %7066 = vrot.lane.b32.xlu1 %v7003_v8, %s9748_s8  ;;  %v7385_v36 = vpop.permute.xlu1 %7384  ;;  %vm17539_vm5 = vcmask 195584   ;;  %vm17540_vm9 = vmmov %vm17538_vm6 }
 0x58d   :  { %v7637_v39 = vsel %vm3495_vm14, %v7601_v51, %v7309_v10  ;;  %6810 = vrot.lane.b32.xlu0 %v6727_v49, %s9741_s28  ;;  %v7909_v31 = vsel %vm17538_vm6, %v15154_v44, %v7908_v24  ;;  %v7459_v21 = vsel %vm1135_vm11, %v7423_v40, %v15147_v1  ;;  %v15241_v30 = vld [vmem:[#allocation2 + $0x58] sm:$0xff]   ;;  %v9396_v44 = vpop.f32.mrf.mxu0  ;;  %v17541_v14 = vrot.slane %v15064_v47, 2 }
 0x58e   :  { %v7673_v45 = vsel %vm3532_vm2, %v7637_v39, %v7385_v36  ;;  %9420 = vmatprep.mubr.msk.bf16.mxu1 %vm17535_vm8, %v7909_v31  ;;  %v7495_v37 = vsel %vm17539_vm5, %v7459_v21, %v6924_v54  ;;  %v7129_v32 = vpop.permute.xlu0 %7128  ;;  %v7918_v5 = vsel %vm17540_vm9, %v7908_v24, %v15228_v6  ;;  %v16672_v9 = vrot.slane %v15241_v30, 2  ;;  %v15293_v39 = vpop.f32.mrf.mxu1  ;;  %v17543_v36 = vld [vmem:[#allocation48_spill] sm:$0xff]  ;;  %vm17545_vm5 = vmmov %vm17540_vm9 }
 0x58f   :  { %9454 = vmatprep.mubr.msk.bf16.mxu0 %vm4137_vm13, %v7673_v45  ;;  %v7531_v50 = vsel %vm1283_vm15, %v7495_v37, %v7053_v11  ;;  %v16670_v1 = vrot.slane %v15241_v30, 1  ;;  %v15252_v38 = vshll.u32 %v15241_v30, 16  ;;  %v5846_v33 = vadd.f32 %v14620_v62, %v9396_v44  ;;  %v5837_v61 = vpop.f32.mrf.mxu0  ;;  %v15280_v0 = vld [vmem:[#allocation2 + $0x60] sm:$0xff]  }
 0x590   :  { %v7567_v54 = vsel %vm3421_vm7, %v7531_v50, %v7129_v32  ;;  %7142 = vrot.lane.b32.xlu1 %v15137_v48, %s9749_s10  ;;  %v7387_v34 = vpop.permute.xlu1 %7386  ;;  %v15262_v10 = vshrl.u32 %v15241_v30, 16  ;;  %v15269_v57 = vsel %vm690_vm3, %v17541_v14, %v16672_v9  ;;  %vm17542_vm6 = vcmask 1046528   ;;  %v15286_v11 = vld [vmem:[%s16529_s3] ss:$0 sm:$0xff]  ;;  %v17544_v14 = vld [vmem:[#allocation15_spill] sm:$0xff] }
 0x591   :  { %6886 = vrot.lane.b32.xlu0 %v6851_v4, %s9743_s11  ;;  %v15276_v48 = vsel %vm17542_vm6, %v6850_v3, %v16670_v1  ;;  %v7259_v62 = vrot.slane %v15252_v38, 3  ;;  %v7005_v4 = vrot.slane %v15252_v38, 2  ;;  %v5910_v63 = vmax.f32 %v5846_v33, 0.0  ;;  %v9397_v49 = vpop.f32.mrf.mxu0 }
 0x592   :  { %9421 = vmatmul.mubr.msk.bf16.gmra.mxu1 %vm17535_vm8, %v7918_v5  ;;  %v7182_v43 = vpop.permute.xlu0 %7181  ;;  %v5838_v24 = vadd.f32 %v15286_v11, %v5837_v61  ;;  %v7258_v3 = vrot.slane %v15262_v10, 2  ;;  %v7004_v51 = vrot.slane %v15262_v10, 1  ;;  %v7364_v40 = vrot.slane %v15241_v30, 3 }
 0x593   :  { %v7603_v8 = vsel %vm3458_vm1, %v7567_v54, %v7182_v43  ;;  %v5946_v31 = vmul.f32 %v5910_v63, %v17543_v36  ;;  %v5849_v45 = vadd.f32 %v15286_v11, %v9397_v49  ;;  %v5840_v5 = vpop.f32.mrf.mxu0  ;;  %v15308_v33 = vshll.u32 %v15280_v0, 16  ;;  %v15322_v36 = vpop.f32.mrf.mxu1 }
 0x594   :  { %v5908_v21 = vmax.f32 %v5838_v24, 0.0  ;;  %7195 = vrot.lane.b32.xlu1 %v15269_v57, %s9750_s12  ;;  %v6873_v37 = vpop.permute.xlu1 %6872  ;;  %v15301_v32 = vor.u32 %v7259_v62, %v7258_v3  ;;  %v15303_v50 = vor.u32 %v7005_v4, %v7004_v51  ;;  %v5841_v49 = vadd.f32 %v15286_v11, %v5840_v5  ;;  %17546 = vst [vmem:[#allocation44_spill] sm:$0xff] %v15322_v36 }
 0x595   :  { %6939 = vrot.lane.b32.xlu0 %v15276_v48, %s9745_s22  ;;  %v9102_v61 = vpack.c.bf16 %v5946_v31, %v5946_v31  ;;  %v5911_v43 = vmax.f32 %v5849_v45, 0.0  ;;  %v15320_v51 = vshrl.u32 %v15280_v0, 16  ;;  %v7263_v1 = vrot.slane %v15308_v33, 3 }
 0x596   :  { %v5944_v63 = vmul.f32 %v5908_v21, %v17544_v14  ;;  %v7311_v24 = vpop.permute.xlu0 %7310  ;;  %v7261_v4 = vsel %vm820_vm4, %v15139_v27, %v15301_v32  ;;  %v7007_v3 = vsel %vm17545_vm5, %v15205_v29, %v15303_v50  ;;  %v17547_v14 = vld [vmem:[#allocation76_spill] sm:$0xff]  ;;  %vm17550_vm9 = vcmask 1044480  }
 0x597   :  { %v7639_v62 = vsel %vm3495_vm14, %v7603_v8, %v7311_v24  ;;  %v6324_v31 = vshrl.u32 %v9102_v61, 16  ;;  %v6327_v21 = vshll.u32 %v9102_v61, 16  ;;  %v5947_v5 = vmul.f32 %v5911_v43, %v17547_v14  ;;  %v17548_v43 = vld [vmem:[#allocation65_spill] sm:$0xff]  ;;  %vm17553_vm8 = vmmov %vm17550_vm9 }
 0x598   :  { %v9100_v45 = vpack.c.bf16 %v5944_v63, %v5944_v63  ;;  %7324 = vrot.lane.b32.xlu1 %v7261_v4, %s9751_s26  ;;  %v7675_v27 = vsel %vm3532_vm2, %v7639_v62, %v7387_v34  ;;  %v5909_v24 = vmax.f32 %v5841_v49, 0.0  ;;  %v7262_v29 = vrot.slane %v15320_v51, 2  ;;  %v15335_v34 = vpop.f32.mrf.mxu1 }
 0x599   :  { %7068 = vrot.lane.b32.xlu0 %v7007_v3, %s9748_s8  ;;  %v6926_v8 = vpop.permute.xlu1 %6925  ;;  %v6326_v25 = vrot.slane %v6324_v31, 6  ;;  %v6329_v9 = vrot.slane %v6327_v21, 7  ;;  %9455 = vmatmul.mubr.msk.bf16.vlgmr.msra.gmra.mxu0 %vm4137_vm13, %v7675_v27  ;;  %v9103_v63 = vpack.c.bf16 %v5947_v5, %v5947_v5  ;;  %v17549_v3 = vrot.slane %v15064_v47, 3 }
 0x59a   :  { %v6304_v54 = vshrl.u32 %v9100_v45, 16  ;;  %v6307_v44 = vshll.u32 %v9100_v45, 16  ;;  %v6797_v61 = vpop.permute.xlu0 %6796  ;;  %v5945_v4 = vmul.f32 %v5909_v24, %v17548_v43  ;;  %v6302_v49 = vrot.slane %v15157_v28, 4 }
 0x59b   :  { %v7365_v14 = vsel %vm17550_vm9, %v17549_v3, %v7364_v40  ;;  %v6330_v62 = vor.u32 %v6329_v9, %v6326_v25  ;;  %v6334_v45 = vshrl.u32 %v9103_v63, 16  ;;  %v6337_v5 = vshll.u32 %v9103_v63, 16 }
 0x59c   :  { %v6306_v36 = vrot.slane %v6304_v54, 6  ;;  %v6309_v31 = vrot.slane %v6307_v44, 7  ;;  %7400 = vrot.lane.b32.xlu1 %v7365_v14, %s9752_s15  ;;  %v9101_v27 = vpack.c.bf16 %v5945_v4, %v5945_v4  ;;  %vm17551_vm6 = vcmask 64512  }
 0x59d   :  { %7144 = vrot.lane.b32.xlu0 %v15269_v57, %s9749_s10  ;;  %v15341_v21 = vpop.permute.xlu1 %7054  ;;  %v7425_v47 = vsel %vm17551_vm6, %v14185_v2, %v6797_v61  ;;  %v17552_v28 = vrot.slane %v15280_v0, 3  ;;  %v17554_v9 = vrot.slane %v15280_v0, 2  ;;  %v17555_v44 = vrot.slane %v15241_v30, 2 }
 0x59e   :  { %v6310_v24 = vor.u32 %v6309_v31, %v6306_v36  ;;  %v15357_v54 = vor.u32 %v7263_v1, %v7262_v29  ;;  %v6336_v63 = vrot.slane %v6334_v45, 6  ;;  %v6339_v4 = vrot.slane %v6337_v5, 7  ;;  %v15359_v36 = vpop.f32.mrf.mxu1 }
 0x59f   :  { %v15345_v43 = vpop.permute.xlu0 %6798  ;;  %v7367_v25 = vsel %vm17553_vm8, %v7364_v40, %v17552_v28  ;;  %v15355_v57 = vsel %vm690_vm3, %v17555_v44, %v17554_v9  ;;  %v6314_v3 = vshrl.u32 %v9101_v27, 16  ;;  %v6317_v2 = vshll.u32 %v9101_v27, 16  ;;  %17556 = vst [vmem:[#allocation16_spill] sm:$0xff] %v15359_v36 }
 0x5a0   :  { %v6332_v61 = vrot.slane %v6330_v62, 4  ;;  %v6311_v14 = vsel %vm11365_vm12, %v6302_v49, %v6310_v24  ;;  %v7461_v40 = vsel %vm1135_vm11, %v7425_v47, %v6873_v37  ;;  %7402 = vrot.lane.b32.xlu1 %v7367_v25, %s9752_s15  ;;  %vm17557_vm5 = vcmask 60416  }
 0x5a1   :  { %7197 = vrot.lane.b32.xlu0 %v15355_v57, %s9750_s12  ;;  %v7131_v31 = vpop.permute.xlu1 %7130  ;;  %6486 = vst.msk [vmem:[#allocation2 + $0x68] sm:$0xf] %vm17557_vm5, %v6311_v14  ;;  %v15368_v1 = vor.u32 %v6339_v4, %v6336_v63  ;;  %v6316_v29 = vrot.slane %v6314_v3, 6  ;;  %v6319_v45 = vrot.slane %v6317_v2, 7  ;;  %v6854_v5 = vrot.slane %v15280_v0, 1  ;;  %v15380_v63 = vpop.f32.mrf.mxu1  ;;  %v9657_v4 = vld [vmem:[%s16526_s0 + $0x104] sm:$0xff]   ;;  %vm17559_vm9 = vmmov %vm17557_vm5 }
 0x5a2   :  { %v6734_v28 = vrot.slane %v15252_v38, 1  ;;  %v7008_v49 = vrot.slane %v15320_v51, 1  ;;  %v7009_v37 = vrot.slane %v15308_v33, 2  ;;  %v6312_v47 = vrot.slane %v6310_v24, 4  ;;  %17558 = vst [vmem:[#allocation72_spill] sm:$0xff] %v15380_v63  ;;  %v9656_v38 = vld [vmem:[%s16526_s0 + $0xfc] sm:$0xff]  }
 0x5a3   :  { %v6875_v27 = vpop.permute.xlu0 %6874  ;;  %v6341_v25 = vsel %vm11365_vm12, %v6332_v61, %v15368_v1  ;;  %v6320_v9 = vor.u32 %v6319_v45, %v6316_v29  ;;  %v7265_v44 = vsel %vm820_vm4, %v15301_v32, %v15357_v54  ;;  %vm17560_vm6 = vcmask 195584  }
 0x5a4   :  { %6489 = vst.msk [vmem:[#allocation2 + $0x74] sm:$0xf] %vm17559_vm9, %v6341_v25  ;;  %v7497_v24 = vsel %vm17560_vm6, %v7461_v40, %v6926_v8  ;;  %6888 = vrot.lane.b32.xlu1 %v15276_v48, %s9743_s11  ;;  %v17561_v3 = vrot.slane %v15099_v52, 1  ;;  %v17562_v29 = vrot.slane %v15241_v30, 1  ;;  %vm17563_vm8 = vcmask 1046528   ;;  %vm17565_vm9 = vmmov %vm17557_vm5 }
 0x5a5   :  { %7326 = vrot.lane.b32.xlu0 %v7265_v44, %s9751_s26  ;;  %v7184_v32 = vpop.permute.xlu1 %7183  ;;  %v6321_v61 = vsel %vm11365_vm12, %v6312_v47, %v6320_v9  ;;  %v6322_v14 = vrot.slane %v6320_v9, 4  ;;  %v7920_v40 = vshrl.u32 %v9656_v38, 16  ;;  %v15405_v25 = vor.u32 %v7009_v37, %v7008_v49  ;;  %v15411_v44 = vpop.f32.mrf.mxu1 }
 0x5a6   :  { %v6730_v2 = vor.u32 %v15108_v46, %v17561_v3  ;;  %v6855_v8 = vsel %vm17563_vm8, %v17562_v29, %v6854_v5  ;;  %6487 = vst.msk [vmem:[#allocation2 + $0x6c] sm:$0xf] %vm17557_vm5, %v6321_v61  ;;  %v6738_v52 = vor.u32 %v15262_v10, %v6734_v28  ;;  %v7923_v46 = vshll.u32 %v9656_v38, 16  ;;  %17564 = vst [vmem:[#allocation7_spill] sm:$0xff] %v15411_v44  ;;  %v9725_v29 = vld [vmem:[#allocation2 + $0x18] sm:$0xff]  }
 0x5a7   :  { %v6928_v48 = vpop.permute.xlu0 %6927  ;;  %v6331_v47 = vsel %vm11365_vm12, %v6322_v14, %v6330_v62  ;;  %v16674_v9 = vrot.slane %v15308_v33, 1  ;;  %v7922_v30 = vrot.slane %v7920_v40, 1  ;;  %v7929_v3 = vshrl.u32 %v9657_v4, 16 }
 0x5a8   :  { %v6735_v45 = vsel %vm242_vm0, %v6730_v2, %v6734_v28  ;;  %6488 = vst.msk [vmem:[#allocation2 + $0x70] sm:$0xf] %vm17565_vm9, %v6331_v47  ;;  %6941 = vrot.lane.b32.xlu1 %v6855_v8, %s9745_s22  ;;  %v7925_v37 = vrot.slane %v7923_v46, 2  ;;  %v7932_v2 = vshll.u32 %v9657_v4, 16  ;;  %v7533_v10 = vsel %vm1283_vm15, %v7497_v24, %v15341_v21  ;;  %v15428_v4 = vpop.f32.mrf.mxu1 }
 0x5a9   :  { %6812 = vrot.lane.b32.xlu0 %v6735_v45, %s9741_s28  ;;  %v7313_v49 = vpop.permute.xlu1 %7312  ;;  %v7931_v28 = vrot.slane %v7929_v3, 1  ;;  %v7569_v62 = vsel %vm3421_vm7, %v7533_v10, %v7131_v31  ;;  %vm17566_vm6 = vcmask 64512   ;;  %vm17567_vm8 = vsmask.f32 6400  ;;  %17568 = vst [vmem:[#allocation49_spill] sm:$0xff] %v15428_v4 }
 0x5aa   :  { %v7926_v61 = vor.u32 %v7925_v37, %v7922_v30  ;;  %v7934_v14 = vrot.slane %v7932_v2, 2  ;;  %v7427_v40 = vsel %vm17566_vm6, %v9725_v29, %v15345_v43  ;;  %v7605_v47 = vsel %vm3458_vm1, %v7569_v62, %v7184_v32  ;;  %vm17569_vm5 = vmmov %vm17567_vm8 }
 0x5ab   :  { %v7057_v38 = vpop.permute.xlu0 %7056  ;;  %v7011_v45 = vsel %vm17567_vm8, %v15303_v50, %v15405_v25  ;;  %v6743_v21 = vsel %vm242_vm0, %v6738_v52, %v16674_v9  ;;  %v7641_v31 = vsel %vm3495_vm14, %v7605_v47, %v7313_v49  ;;  %v7463_v50 = vsel %vm1135_vm11, %v7427_v40, %v6875_v27  ;;  %vm17572_vm8 = vmmov %vm17569_vm5  ;;  %v17582_v9 = vld [vmem:[#allocation26_spill] sm:$0xff] }
 0x5ac   :  { %7070 = vrot.lane.b32.xlu1 %v7011_v45, %s9748_s8  ;;  %v7927_v43 = vsel %vm17569_vm5, %v15228_v6, %v7926_v61  ;;  %v15435_v32 = vor.u32 %v7934_v14, %v7931_v28  ;;  %vm17570_vm9 = vcmask 31744   ;;  %vm17571_vm6 = vcmask 195584   ;;  %v15452_v28 = vpop.f32.mrf.mxu1 }
 0x5ad   :  { %6814 = vrot.lane.b32.xlu0 %v6743_v21, %s9741_s28  ;;  %v7389_v24 = vpop.permute.xlu1 %7388  ;;  %v15439_v30 = vld [vmem:[#allocation2 + $0x68] sm:$0xff]   ;;  %9424 = vmatprep.mubr.msk.bf16.mxu1 %vm17570_vm9, %v7927_v43  ;;  %v7499_v52 = vsel %vm17571_vm6, %v7463_v50, %v6928_v48  ;;  %17573 = vst [vmem:[#allocation21_spill] sm:$0xff] %v15452_v28  ;;  %vm17574_vm5 = vmmov %vm17570_vm9  ;;  %v17575_v29 = vrot.slane %v15280_v0, 2  ;;  %vm17576_vm9 = vcmask 1046528  }
 0x5ae   :  { %v7677_v46 = vsel %vm3532_vm2, %v7641_v31, %v7389_v24  ;;  %v7936_v49 = vsel %vm17572_vm8, %v7926_v61, %v15435_v32  ;;  %v7535_v6 = vsel %vm1283_vm15, %v7499_v52, %v7057_v38  ;;  %v16675_v2 = vrot.slane %v15439_v30, 2  ;;  %vm17580_vm6 = vmmov %vm17572_vm8 }
 0x5af   :  { %v7133_v3 = vpop.permute.xlu0 %7132  ;;  %9458 = vmatprep.mubr.msk.bf16.mxu0 %vm4137_vm13, %v7677_v46  ;;  %v9400_v37 = vpop.f32.mrf.mxu0  ;;  %v16673_v27 = vrot.slane %v15439_v30, 1  ;;  %v15450_v10 = vshll.u32 %v15439_v30, 16  ;;  %9425 = vmatmul.mubr.msk.bf16.gmra.mxu1 %vm17574_vm5, %v7936_v49  ;;  %v15461_v61 = vshrl.u32 %v15439_v30, 16  ;;  %v15479_v45 = vld [vmem:[#allocation2 + $0x70] sm:$0xff]   ;;  %v17578_v49 = vld [vmem:[#allocation90_spill] sm:$0xff]  ;;  %vm17585_vm8 = vcmask 1044480  }
 0x5b0   :  { %v7571_v48 = vsel %vm3421_vm7, %v7535_v6, %v7133_v3  ;;  %7146 = vrot.lane.b32.xlu1 %v15355_v57, %s9749_s10  ;;  %v5862_v62 = vadd.f32 %v15286_v11, %v9400_v37  ;;  %v15468_v40 = vsel %vm690_vm3, %v17575_v29, %v16675_v2  ;;  %v15486_v3 = vpop.f32.mrf.mxu1  ;;  %vm17586_vm5 = vcmask 64512  }
 0x5b1   :  { %6890 = vrot.lane.b32.xlu0 %v6855_v8, %s9743_s11  ;;  %v7391_v38 = vpop.permute.xlu1 %7390  ;;  %v5853_v14 = vpop.f32.mrf.mxu0  ;;  %v15475_v57 = vsel %vm17576_vm9, %v6854_v5, %v16673_v27  ;;  %v7267_v8 = vrot.slane %v15450_v10, 3  ;;  %v7013_v47 = vrot.slane %v15450_v10, 2  ;;  %v7266_v43 = vrot.slane %v15461_v61, 2  ;;  %17577 = vst [vmem:[#allocation93_spill] sm:$0xff] %v15486_v3  ;;  %vm17588_vm9 = vmmov %vm17585_vm8 }
 0x5b2   :  { %v5914_v21 = vmax.f32 %v5862_v62, 0.0  ;;  %v5854_v24 = vadd.f32 %v15286_v11, %v5853_v14  ;;  %v7012_v50 = vrot.slane %v15461_v61, 1  ;;  %v7368_v5 = vrot.slane %v15439_v30, 3 }
 0x5b3   :  { %v7186_v31 = vpop.permute.xlu0 %7185  ;;  %v9401_v52 = vpop.f32.mrf.mxu0  ;;  %v15494_v29 = vor.u32 %v7267_v8, %v7266_v43 }
 0x5b4   :  { %v7607_v46 = vsel %vm3458_vm1, %v7571_v48, %v7186_v31  ;;  %v5950_v6 = vmul.f32 %v5914_v21, %v17578_v49  ;;  %v5912_v37 = vmax.f32 %v5854_v24, 0.0  ;;  %7199 = vrot.lane.b32.xlu1 %v15468_v40, %s9750_s12  ;;  %v5865_v62 = vadd.f32 %v15286_v11, %v9401_v52  ;;  %v17579_v49 = vld [vmem:[#allocation79_spill] sm:$0xff] }
 0x5b5   :  { %6943 = vrot.lane.b32.xlu0 %v15475_v57, %s9745_s22  ;;  %v6877_v14 = vpop.permute.xlu1 %6876  ;;  %v5856_v48 = vpop.f32.mrf.mxu0  ;;  %v15496_v31 = vor.u32 %v7013_v47, %v7012_v50  ;;  %v15501_v21 = vshll.u32 %v15479_v45, 16  ;;  %v7269_v47 = vsel %vm820_vm4, %v15357_v54, %v15494_v29  ;;  %v15513_v50 = vshrl.u32 %v15479_v45, 16 }
 0x5b6   :  { %v9106_v24 = vpack.c.bf16 %v5950_v6, %v5950_v6  ;;  %v5948_v2 = vmul.f32 %v5912_v37, %v17579_v49  ;;  %v5915_v3 = vmax.f32 %v5865_v62, 0.0  ;;  %v5857_v52 = vadd.f32 %v15286_v11, %v5856_v48  ;;  %v15515_v6 = vpop.f32.mrf.mxu1 }
 0x5b7   :  { %v7315_v28 = vpop.permute.xlu0 %7314  ;;  %v7015_v43 = vsel %vm17580_vm6, %v15405_v25, %v15496_v31  ;;  %17581 = vst [vmem:[#allocation3_spill] sm:$0xff] %v15515_v6  ;;  %v7270_v25 = vrot.slane %v15513_v50, 2  ;;  %v7271_v27 = vrot.slane %v15501_v21, 3  ;;  %vm17592_vm6 = vcmask 60416  }
 0x5b8   :  { %v7643_v8 = vsel %vm3495_vm14, %v7607_v46, %v7315_v28  ;;  %v6364_v37 = vshrl.u32 %v9106_v24, 16  ;;  %v6367_v62 = vshll.u32 %v9106_v24, 16  ;;  %v9104_v49 = vpack.c.bf16 %v5948_v2, %v5948_v2  ;;  %7328 = vrot.lane.b32.xlu1 %v7269_v47, %s9751_s26  ;;  %v15530_v63 = vpop.f32.mrf.mxu1 }
 0x5b9   :  { %v5951_v48 = vmul.f32 %v5915_v3, %v17582_v9  ;;  %7072 = vrot.lane.b32.xlu0 %v7015_v43, %s9748_s8  ;;  %v5913_v54 = vmax.f32 %v5857_v52, 0.0  ;;  %v7679_v46 = vsel %vm3532_vm2, %v7643_v8, %v7391_v38  ;;  %v17583_v3 = vld [vmem:[#allocation23_spill] sm:$0xff]  ;;  %v17584_v43 = vrot.slane %v15280_v0, 3 }
 0x5ba   :  { %v15520_v28 = vpop.permute.xlu1 %6929  ;;  %v6366_v4 = vrot.slane %v6364_v37, 6  ;;  %v6369_v6 = vrot.slane %v6367_v62, 7  ;;  %v6344_v44 = vshrl.u32 %v9104_v49, 16  ;;  %v6347_v24 = vshll.u32 %v9104_v49, 16  ;;  %9459 = vmatmul.mubr.msk.bf16.gmra.mxu0 %vm4137_vm13, %v7679_v46  ;;  %v9726_v37 = vld [vmem:[#allocation2 + $0x20] sm:$0xff]  }
 0x5bb   :  { %v6801_v9 = vpop.permute.xlu0 %6800  ;;  %v9107_v2 = vpack.c.bf16 %v5951_v48, %v5951_v48  ;;  %v5949_v47 = vmul.f32 %v5913_v54, %v17583_v3  ;;  %v7369_v52 = vsel %vm17585_vm8, %v17584_v43, %v7368_v5  ;;  %v6342_v38 = vrot.slane %v15368_v1, 4  ;;  %vm17594_vm8 = vmmov %vm17592_vm6 }
 0x5bc   :  { %v6346_v8 = vrot.slane %v6344_v44, 6  ;;  %v6349_v36 = vrot.slane %v6347_v24, 7  ;;  %v7429_v62 = vsel %vm17586_vm5, %v9726_v37, %v6801_v9  ;;  %7404 = vrot.lane.b32.xlu1 %v7369_v52, %s9752_s15  ;;  %v6370_v48 = vor.u32 %v6369_v6, %v6366_v4  ;;  %vm17596_vm5 = vmmov %vm17592_vm6 }
 0x5bd   :  { %7148 = vrot.lane.b32.xlu0 %v15468_v40, %s9749_s10  ;;  %v6374_v0 = vshrl.u32 %v9107_v2, 16  ;;  %v6377_v54 = vshll.u32 %v9107_v2, 16  ;;  %v9105_v46 = vpack.c.bf16 %v5949_v47, %v5949_v47  ;;  %v17587_v1 = vrot.slane %v15479_v45, 3  ;;  %v15551_v47 = vpop.f32.mrf.mxu1 }
 0x5be   :  { %v15537_v49 = vpop.permute.xlu1 %7058  ;;  %v6350_v3 = vor.u32 %v6349_v36, %v6346_v8  ;;  %v17589_v24 = vrot.slane %v15479_v45, 2  ;;  %v17590_v9 = vrot.slane %v15439_v30, 2  ;;  %v15549_v40 = vor.u32 %v7271_v27, %v7270_v25  ;;  %17591 = vst [vmem:[#allocation69_spill] sm:$0xff] %v15551_v47 }
 0x5bf   :  { %v6803_v43 = vpop.permute.xlu0 %6802  ;;  %v7371_v44 = vsel %vm17588_vm9, %v7368_v5, %v17587_v1  ;;  %v6376_v37 = vrot.slane %v6374_v0, 6  ;;  %v6379_v4 = vrot.slane %v6377_v54, 7  ;;  %v6354_v6 = vshrl.u32 %v9105_v46, 16 }
 0x5c0   :  { %v15547_v52 = vsel %vm690_vm3, %v17590_v9, %v17589_v24  ;;  %v6357_v2 = vshll.u32 %v9105_v46, 16  ;;  %v6351_v36 = vsel %vm11365_vm12, %v6342_v38, %v6350_v3  ;;  %v7465_v5 = vsel %vm1135_vm11, %v7429_v62, %v6877_v14  ;;  %7406 = vrot.lane.b32.xlu1 %v7371_v44, %s9752_s15 }
 0x5c1   :  { %7201 = vrot.lane.b32.xlu0 %v15547_v52, %s9750_s12  ;;  %v6372_v1 = vrot.slane %v6370_v48, 4  ;;  %6490 = vst.msk [vmem:[#allocation2 + $0x78] sm:$0xf] %vm17592_vm6, %v6351_v36  ;;  %v15560_v27 = vor.u32 %v6379_v4, %v6376_v37  ;;  %v6356_v25 = vrot.slane %v6354_v6, 6  ;;  %v16676_v46 = vrot.slane %v15479_v45, 1  ;;  %v15572_v4 = vpop.f32.mrf.mxu1 }
 0x5c2   :  { %v7135_v8 = vpop.permute.xlu1 %7134  ;;  %v6359_v0 = vrot.slane %v6357_v2, 7  ;;  %v6750_v38 = vrot.slane %v15450_v10, 1  ;;  %v7016_v14 = vrot.slane %v15513_v50, 1  ;;  %v7017_v62 = vrot.slane %v15501_v21, 2  ;;  %17593 = vst [vmem:[#allocation80_spill] sm:$0xff] %v15572_v4  ;;  %v9660_v10 = vld [vmem:[%s16526_s0 + $0x10c] sm:$0xff]  }
 0x5c3   :  { %v6879_v54 = vpop.permute.xlu0 %6878  ;;  %v6352_v44 = vrot.slane %v6350_v3, 4  ;;  %v6381_v24 = vsel %vm11365_vm12, %v6372_v1, %v15560_v27  ;;  %v7273_v37 = vsel %vm820_vm4, %v15494_v29, %v15549_v40  ;;  %v17595_v6 = vrot.slane %v15308_v33, 1  ;;  %v9661_v29 = vld [vmem:[%s16526_s0 + $0x114] sm:$0xff]  }
 0x5c4   :  { %v6360_v9 = vor.u32 %v6359_v0, %v6356_v25  ;;  %6493 = vst.msk [vmem:[#allocation2 + $0x84] sm:$0xf] %vm17594_vm8, %v6381_v24  ;;  %6892 = vrot.lane.b32.xlu1 %v15475_v57, %s9743_s11  ;;  %vm17597_vm9 = vcmask 195584   ;;  %v17598_v33 = vrot.slane %v15439_v30, 1  ;;  %vm17599_vm6 = vcmask 1046528   ;;  %vm17601_vm8 = vmmov %vm17596_vm5 }
 0x5c5   :  { %7330 = vrot.lane.b32.xlu0 %v7273_v37, %s9751_s26  ;;  %v6746_v2 = vor.u32 %v15320_v51, %v17595_v6  ;;  %v7501_v57 = vsel %vm17597_vm9, %v7465_v5, %v15520_v28  ;;  %v15598_v24 = vor.u32 %v7017_v62, %v7016_v14  ;;  %v15604_v6 = vpop.f32.mrf.mxu1  ;;  %v7938_v28 = vshrl.u32 %v9660_v10, 16 }
 0x5c6   :  { %v7188_v3 = vpop.permute.xlu1 %7187  ;;  %v6361_v36 = vsel %vm11365_vm12, %v6352_v44, %v6360_v9  ;;  %v6362_v1 = vrot.slane %v6360_v9, 4  ;;  %v6859_v51 = vsel %vm17599_vm6, %v17598_v33, %v16676_v46  ;;  %v6754_v9 = vor.u32 %v15461_v61, %v6750_v38  ;;  %17600 = vst [vmem:[#allocation41_spill] sm:$0xff] %v15604_v6 }
 0x5c7   :  { %6491 = vst.msk [vmem:[#allocation2 + $0x7c] sm:$0xf] %vm17596_vm5, %v6361_v36  ;;  %v6932_v25 = vpop.permute.xlu0 %6931  ;;  %v6751_v0 = vsel %vm242_vm0, %v6746_v2, %v6750_v38  ;;  %v7941_v5 = vshll.u32 %v9660_v10, 16  ;;  %v7947_v14 = vshrl.u32 %v9661_v29, 16  ;;  %v7950_v62 = vshll.u32 %v9661_v29, 16  ;;  %v9727_v2 = vld [vmem:[#allocation2 + $0x28] sm:$0xff]  }
 0x5c8   :  { %v6371_v44 = vsel %vm11365_vm12, %v6362_v1, %v6370_v48  ;;  %6945 = vrot.lane.b32.xlu1 %v6859_v51, %s9745_s22  ;;  %v7537_v48 = vsel %vm1283_vm15, %v7501_v57, %v15537_v49  ;;  %vm17602_vm5 = vcmask 64512   ;;  %v7940_v38 = vrot.slane %v7938_v28, 1 }
 0x5c9   :  { %6492 = vst.msk [vmem:[#allocation2 + $0x80] sm:$0xf] %vm17601_vm8, %v6371_v44  ;;  %6816 = vrot.lane.b32.xlu0 %v6751_v0, %s9741_s28  ;;  %v7431_v61 = vsel %vm17602_vm5, %v9727_v2, %v6803_v43  ;;  %v7573_v36 = vsel %vm3421_vm7, %v7537_v48, %v7135_v8  ;;  %v7943_v33 = vrot.slane %v7941_v5, 2  ;;  %v7949_v44 = vrot.slane %v7947_v14, 1  ;;  %v15621_v43 = vpop.f32.mrf.mxu1 }
 0x5ca   :  { %v7317_v30 = vpop.permute.xlu1 %7316  ;;  %v7952_v46 = vrot.slane %v7950_v62, 2  ;;  %v7467_v37 = vsel %vm1135_vm11, %v7431_v61, %v6879_v54  ;;  %v7609_v0 = vsel %vm3458_vm1, %v7573_v36, %v7188_v3  ;;  %vm17603_vm9 = vsmask.f32 6400  ;;  %17605 = vst [vmem:[#allocation52_spill] sm:$0xff] %v15621_v43 }
 0x5cb   :  { %v7061_v1 = vpop.permute.xlu0 %7060  ;;  %v7019_v10 = vsel %vm17603_vm9, %v15496_v31, %v15598_v24  ;;  %v17604_v49 = vrot.slane %v15501_v21, 1  ;;  %v7645_v8 = vsel %vm3495_vm14, %v7609_v0, %v7317_v30  ;;  %v7944_v28 = vor.u32 %v7943_v33, %v7940_v38  ;;  %vm17607_vm8 = vmmov %vm17603_vm9 }
 0x5cc   :  { %7074 = vrot.lane.b32.xlu1 %v7019_v10, %s9748_s8  ;;  %v9404_v54 = vpop.f32.mrf.mxu0  ;;  %v15626_v3 = vor.u32 %v7952_v46, %v7949_v44  ;;  %vm17606_vm6 = vcmask 195584   ;;  %v15639_v46 = vld [vmem:[%s16532_s4] ss:$0 sm:$0xff]  ;;  %vm17608_vm5 = vmmov %vm17607_vm8  ;;  %vm17609_vm9 = vcmask 31744  }
 0x5cd   :  { %v6759_v29 = vsel %vm242_vm0, %v6754_v9, %v17604_v49  ;;  %v7503_v5 = vsel %vm17606_vm6, %v7467_v37, %v6932_v25  ;;  %v5878_v14 = vadd.f32 %v15286_v11, %v9404_v54  ;;  %v7945_v25 = vsel %vm17607_vm8, %v15435_v32, %v7944_v28  ;;  %vm17612_vm6 = vmmov %vm17609_vm9 }
 0x5ce   :  { %6818 = vrot.lane.b32.xlu0 %v6759_v29, %s9741_s28  ;;  %v7393_v57 = vpop.permute.xlu1 %7392  ;;  %v15631_v9 = vld [vmem:[#allocation2 + $0x78] sm:$0xff]   ;;  %v7539_v30 = vsel %vm1283_vm15, %v7503_v5, %v7061_v1  ;;  %v5869_v2 = vpop.f32.mrf.mxu0  ;;  %v7954_v37 = vsel %vm17608_vm5, %v7944_v28, %v15626_v3  ;;  %9428 = vmatprep.mubr.msk.bf16.mxu1 %vm17609_vm9, %v7945_v25  ;;  %v17610_v29 = vld [vmem:[#allocation31_spill] sm:$0xff]  ;;  %vm17614_vm8 = vcmask 1046528   ;;  %vm17617_vm5 = vcmask 64512  }
 0x5cf   :  { %v7681_v31 = vsel %vm3532_vm2, %v7645_v8, %v7393_v57  ;;  %v7137_v48 = vpop.permute.xlu0 %7136  ;;  %v5918_v61 = vmax.f32 %v5878_v14, 0.0  ;;  %v5870_v36 = vadd.f32 %v15286_v11, %v5869_v2  ;;  %v16677_v1 = vrot.slane %v15631_v9, 2  ;;  %v9330_v32 = vpop.f32.mrf.mxu1  ;;  %9429 = vmatmul.mubr.msk.bf16.gmra.mxu1 %vm17612_vm6, %v7954_v37  ;;  %vm17619_vm9 = vmmov %vm17617_vm5 }
 0x5d0   :  { %9462 = vmatprep.mubr.msk.bf16.mxu0 %vm4137_vm13, %v7681_v31  ;;  %v7575_v38 = vsel %vm3421_vm7, %v7539_v30, %v7137_v48  ;;  %7150 = vrot.lane.b32.xlu1 %v15547_v52, %s9749_s10  ;;  %v16678_v44 = vrot.slane %v15631_v9, 1  ;;  %v15656_v0 = vshll.u32 %v15631_v9, 16  ;;  %v15659_v10 = vshrl.u32 %v15631_v9, 16  ;;  %v9405_v54 = vpop.f32.mrf.mxu0  ;;  %vm17620_vm6 = vmmov %vm17617_vm5 }
 0x5d1   :  { %v5954_v8 = vmul.f32 %v5918_v61, %v17610_v29  ;;  %v5916_v57 = vmax.f32 %v5870_v36, 0.0  ;;  %v4221_v52 = vadd.f32 %v9330_v32, %v15639_v46  ;;  %v5881_v5 = vadd.f32 %v15286_v11, %v9405_v54  ;;  %v4212_v14 = vpop.f32.mrf.mxu1  ;;  %v17615_v36 = vld [vmem:[#allocation58_spill] sm:$0xff] }
 0x5d2   :  { %6894 = vrot.lane.b32.xlu0 %v6859_v51, %s9743_s11  ;;  %v15652_v33 = vpop.permute.xlu1 %7394  ;;  %v17611_v51 = vrot.slane %v15479_v45, 2  ;;  %v17613_v30 = vrot.slane %v15479_v45, 1  ;;  %v7274_v2 = vrot.slane %v15659_v10, 2  ;;  %v7275_v25 = vrot.slane %v15656_v0, 3  ;;  %v5872_v54 = vpop.f32.mrf.mxu0 }
 0x5d3   :  { %v7190_v31 = vpop.permute.xlu0 %7189  ;;  %v9110_v61 = vpack.c.bf16 %v5954_v8, %v5954_v8  ;;  %v5952_v32 = vmul.f32 %v5916_v57, %v17615_v36  ;;  %v4357_v37 = vadd.f32 %v14711_v42, %v4221_v52  ;;  %v9331_v8 = vpop.f32.mrf.mxu1 }
 0x5d4   :  { %v15669_v28 = vsel %vm690_vm3, %v17611_v51, %v16677_v1  ;;  %v15678_v48 = vsel %vm17614_vm8, %v17613_v30, %v16678_v44  ;;  %v7611_v29 = vsel %vm3458_vm1, %v7575_v38, %v7190_v31  ;;  %v5919_v51 = vmax.f32 %v5881_v5, 0.0  ;;  %v17616_v5 = vld [vmem:[#allocation47_spill] sm:$0xff] }
 0x5d5   :  { %7203 = vrot.lane.b32.xlu1 %v15669_v28, %s9750_s12  ;;  %v4213_v1 = vadd.f32 %v15639_v46, %v4212_v14  ;;  %v5873_v30 = vadd.f32 %v15286_v11, %v5872_v54  ;;  %v15693_v57 = vor.u32 %v7275_v25, %v7274_v2  ;;  %v6404_v42 = vshrl.u32 %v9110_v61, 16  ;;  %v4215_v54 = vpop.f32.mrf.mxu1 }
 0x5d6   :  { %6947 = vrot.lane.b32.xlu0 %v15678_v48, %s9745_s22  ;;  %v15691_v44 = vpop.permute.xlu1 %6880  ;;  %v6407_v52 = vshll.u32 %v9110_v61, 16  ;;  %v9108_v38 = vpack.c.bf16 %v5952_v32, %v5952_v32  ;;  %v4393_v31 = vmax.f32 %v4357_v37, 0.0  ;;  %v5955_v36 = vmul.f32 %v5919_v51, %v17616_v5  ;;  %v17618_v61 = vld [vmem:[#allocation39_spill] sm:$0xff] }
 0x5d7   :  { %v4355_v49 = vadd.f32 %v4213_v1, %v14742_v60  ;;  %v5917_v62 = vmax.f32 %v5873_v30, 0.0  ;;  %v4224_v14 = vadd.f32 %v9331_v8, %v15639_v46  ;;  %v7319_v11 = vpop.permute.xlu0 %7318  ;;  %v6406_v43 = vrot.slane %v6404_v42, 6  ;;  %v9334_v37 = vpop.f32.mrf.mxu1 }
 0x5d8   :  { %v6409_v6 = vrot.slane %v6407_v52, 7  ;;  %v6384_v4 = vshrl.u32 %v9108_v38, 16  ;;  %v6387_v47 = vshll.u32 %v9108_v38, 16  ;;  %4429 = vst.msk [vmem:[%s16533_s7 + $0x10] sm:$0xff] %vm17617_vm5, %v4393_v31  ;;  %v9111_v2 = vpack.c.bf16 %v5955_v36, %v5955_v36 }
 0x5d9   :  { %v4391_v25 = vmax.f32 %v4355_v49, 0.0  ;;  %v5953_v32 = vmul.f32 %v5917_v62, %v17618_v61  ;;  %v4358_v60 = vadd.f32 %v14765_v35, %v4224_v14  ;;  %v7647_v42 = vsel %vm3495_vm14, %v7611_v29, %v7319_v11  ;;  %v4228_v35 = vpop.f32.mrf.mxu1 }
 0x5da   :  { %v15704_v1 = vpop.permute.xlu1 %6933  ;;  %v15706_v51 = vor.u32 %v6409_v6, %v6406_v43  ;;  %v6386_v30 = vrot.slane %v6384_v4, 6  ;;  %v6389_v8 = vrot.slane %v6387_v47, 7  ;;  %v6414_v52 = vshrl.u32 %v9111_v2, 16 }
 0x5db   :  { %v6417_v38 = vshll.u32 %v9111_v2, 16  ;;  %4427 = vst.msk [vmem:[%s16533_s7] sm:$0xff] %vm17619_vm9, %v4391_v25  ;;  %v9109_v49 = vpack.c.bf16 %v5953_v32, %v5953_v32  ;;  %v4394_v62 = vmax.f32 %v4358_v60, 0.0  ;;  %v6805_v31 = vpop.permute.xlu0 %6804  ;;  %v7277_v47 = vsel %vm820_vm4, %v15549_v40, %v15693_v57  ;;  %v9335_v2 = vpop.f32.mrf.mxu1 }
 0x5dc   :  { %v6412_v5 = vrot.slane %v15706_v51, 4  ;;  %v6390_v36 = vor.u32 %v6389_v8, %v6386_v30  ;;  %v4216_v4 = vadd.f32 %v15639_v46, %v4215_v54  ;;  %v6416_v6 = vrot.slane %v6414_v52, 6  ;;  %7332 = vrot.lane.b32.xlu1 %v7277_v47, %s9751_s26 }
 0x5dd   :  { %v6419_v43 = vrot.slane %v6417_v38, 7  ;;  %v6394_v29 = vshrl.u32 %v9109_v49, 16  ;;  %v6397_v14 = vshll.u32 %v9109_v49, 16  ;;  %4430 = vst.msk [vmem:[%s16533_s7 + $0x18] sm:$0xff] %vm17620_vm6, %v4394_v62  ;;  %v17621_v25 = vrot.slane %v15560_v27, 4  ;;  %v4231_v49 = vpop.f32.mrf.mxu1  ;;  %vm17624_vm6 = vmmov %vm17617_vm5 }
 0x5de   :  { %v7063_v11 = vpop.permute.xlu1 %7062  ;;  %v6392_v61 = vrot.slane %v6390_v36, 4  ;;  %v4356_v54 = vadd.f32 %v4216_v4, %v14779_v26  ;;  %v7020_v32 = vrot.slane %v15659_v10, 1  ;;  %vm17622_vm8 = vcmask 60416  }
 0x5df   :  { %v6391_v40 = vsel %vm11365_vm12, %v17621_v25, %v6390_v36  ;;  %v6420_v60 = vor.u32 %v6419_v43, %v6416_v6  ;;  %v6396_v30 = vrot.slane %v6394_v29, 6  ;;  %v6399_v8 = vrot.slane %v6397_v14, 7  ;;  %v6807_v38 = vpop.permute.xlu0 %6806  ;;  %v9728_v36 = vld [vmem:[#allocation2 + $0x30] sm:$0xff]   ;;  %v15740_v29 = vld [vmem:[#allocation2 + $0x80] sm:$0xff]   ;;  %vm17623_vm9 = vmmov %vm17622_vm8 }
 0x5e0   :  { %6494 = vst.msk [vmem:[#allocation2 + $0x88] sm:$0xf] %vm17622_vm8, %v6391_v40  ;;  %v7021_v52 = vrot.slane %v15656_v0, 2  ;;  %v4392_v62 = vmax.f32 %v4356_v54, 0.0  ;;  %v7683_v27 = vsel %vm3532_vm2, %v7647_v42, %v15652_v33  ;;  %v4237_v47 = vadd.f32 %v9334_v37, %v15639_v46  ;;  %v9338_v40 = vpop.f32.mrf.mxu1  ;;  %v6498_v33 = vld [vmem:[#allocation2 + $0x98] sm:$0x3] }
 0x5e1   :  { %v7433_v26 = vsel %vm17617_vm5, %v9728_v36, %v6805_v31  ;;  %v6421_v4 = vsel %vm11365_vm12, %v6412_v5, %v6420_v60  ;;  %v6422_v25 = vrot.slane %v6420_v60, 4  ;;  %v6400_v6 = vor.u32 %v6399_v8, %v6396_v30  ;;  %9463 = vmatmul.mubr.msk.bf16.gmra.mxu0 %vm4137_vm13, %v7683_v27 }
 0x5e2   :  { %v15737_v43 = vor.u32 %v7021_v52, %v7020_v32  ;;  %v7139_v14 = vpop.permute.xlu1 %7138  ;;  %6497 = vst.msk [vmem:[#allocation2 + $0x94] sm:$0xf] %vm17623_vm9, %v6421_v4  ;;  %v4361_v37 = vadd.f32 %v14807_v15, %v4237_v47  ;;  %v7469_v42 = vsel %vm1135_vm11, %v7433_v26, %v15691_v44  ;;  %v17625_v31 = vrot.slane %v15631_v9, 3 }
 0x5e3   :  { %4428 = vst.msk [vmem:[%s16533_s7 + $0x8] sm:$0xff] %vm17624_vm6, %v4392_v62  ;;  %v17626_v5 = vrot.slane %v15479_v45, 3  ;;  %vm17627_vm8 = vcmask 1044480   ;;  %v4229_v32 = vadd.f32 %v15639_v46, %v4228_v35  ;;  %v6499_v30 = vsel %vm11308_vm10, %v6422_v25, %v6498_v33  ;;  %v6883_v44 = vpop.permute.xlu0 %6882  ;;  %v4244_v62 = vpop.f32.mrf.mxu1  ;;  %vm17631_vm6 = vmmov %vm17623_vm9 }
 0x5e4   :  { %v6401_v8 = vsel %vm11365_vm12, %v6392_v61, %v6400_v6  ;;  %v6402_v52 = vrot.slane %v6400_v6, 4  ;;  %vm17629_vm5 = vsmask.f32 6400  ;;  %6500 = vst [vmem:[#allocation2 + $0x98] sm:$0x3] %v6499_v30  ;;  %v4397_v45 = vmax.f32 %v4361_v37, 0.0 }
 0x5e5   :  { %v7373_v54 = vsel %vm17627_vm8, %v17626_v5, %v17625_v31  ;;  %v7023_v15 = vsel %vm17629_vm5, %v15598_v24, %v15737_v43  ;;  %6495 = vst.msk [vmem:[#allocation2 + $0x8c] sm:$0xf] %vm17623_vm9, %v6401_v8  ;;  %v4359_v35 = vadd.f32 %v4229_v32, %v14847_v23  ;;  %vm17630_vm10 = vcmask 195584   ;;  %v9339_v26 = vpop.f32.mrf.mxu1 }
 0x5e6   :  { %7408 = vrot.lane.b32.xlu1 %v7373_v54, %s9752_s15  ;;  %7076 = vrot.lane.b32.xlu0 %v7023_v15, %s9748_s8  ;;  %v7505_v61 = vsel %vm17630_vm10, %v7469_v42, %v15704_v1  ;;  %v4240_v27 = vadd.f32 %v9335_v2, %v15639_v46  ;;  %v6411_v24 = vsel %vm11365_vm12, %v6402_v52, %v15706_v51  ;;  %v7374_v47 = vrot.slane %v15740_v29, 3  ;;  %v7192_v36 = vpop.permute.xlu1 %7191 }
 0x5e7   :  { %6496 = vst.msk [vmem:[#allocation2 + $0x90] sm:$0xf] %vm17631_vm6, %v6411_v24  ;;  %vm17632_vm8 = vcmask 64512   ;;  %v4395_v23 = vmax.f32 %v4359_v35, 0.0  ;;  %v4232_v2 = vadd.f32 %v15639_v46, %v4231_v49  ;;  %v7118_v4 = vrot.slane %v15740_v29, 2  ;;  %v15789_v33 = vpop.permute.xlu0 %6935  ;;  %v4247_v37 = vpop.f32.mrf.mxu1  ;;  %v9729_v49 = vld [vmem:[#allocation2 + $0x38] sm:$0xff]  }
 0x5e8   :  { %4433 = vst.msk [vmem:[%s16533_s7 + $0x30] sm:$0xff] %vm17632_vm8, %v4397_v45  ;;  %v4362_v1 = vadd.f32 %v14877_v16, %v4240_v27  ;;  %v7541_v22 = vsel %vm1283_vm15, %v7505_v61, %v7063_v11  ;;  %v17633_v51 = vmov %v17625_v31  ;;  %vm17634_vm12 = vcmask 1044480   ;;  %vm17636_vm5 = vmmov %vm17632_vm8 }
 0x5e9   :  { %v7375_v25 = vsel %vm17634_vm12, %v17633_v51, %v7374_v47  ;;  %v4253_v6 = vadd.f32 %v9338_v40, %v15639_v46  ;;  %v17635_v42 = vrot.slane %v15501_v21, 1  ;;  %4431 = vst.msk [vmem:[%s16533_s7 + $0x20] sm:$0xff] %vm17636_vm5, %v4395_v23  ;;  %vm17637_vm9 = vmmov %vm17636_vm5  ;;  %v4360_v31 = vadd.f32 %v4232_v2, %v14891_v12 }
 0x5ea   :  { %7152 = vrot.lane.b32.xlu0 %v15669_v28, %s9749_s10  ;;  %v4398_v11 = vmax.f32 %v4362_v1, 0.0  ;;  %v7435_v40 = vsel %vm17637_vm9, %v9729_v49, %v6807_v38  ;;  %7410 = vrot.lane.b32.xlu1 %v7375_v25, %s9752_s15  ;;  %v4245_v21 = vadd.f32 %v15639_v46, %v4244_v62  ;;  %v15809_v54 = vshll.u32 %v15740_v29, 16  ;;  %v9342_v28 = vpop.f32.mrf.mxu1  ;;  %vm17638_vm10 = vmmov %vm17636_vm5  ;;  %v7321_v62 = vpop.permute.xlu1 %7320 }
 0x5eb   :  { %v15794_v16 = vor.u32 %v15513_v50, %v17635_v42  ;;  %v7577_v50 = vsel %vm3421_vm7, %v7541_v22, %v7139_v14  ;;  %v4365_v5 = vadd.f32 %v14911_v55, %v4253_v6  ;;  %v15812_v32 = vshrl.u32 %v15740_v29, 16  ;;  %v7065_v45 = vpop.permute.xlu0 %7064  ;;  %vm17640_vm6 = vmmov %vm17636_vm5 }
 0x5ec   :  { %4434 = vst.msk [vmem:[%s16533_s7 + $0x38] sm:$0xff] %vm17638_vm10, %v4398_v11  ;;  %v4396_v38 = vmax.f32 %v4360_v31, 0.0  ;;  %v17639_v12 = vrot.slane %v15631_v9, 2  ;;  %v4363_v55 = vadd.f32 %v4245_v21, %v14950_v18  ;;  %v4256_v60 = vadd.f32 %v9339_v26, %v15639_v46  ;;  %v4260_v24 = vpop.f32.mrf.mxu1  ;;  %vm17641_vm8 = vmmov %vm17636_vm5 }
 0x5ed   :  { %v4401_v30 = vmax.f32 %v4365_v5, 0.0  ;;  %v7278_v8 = vrot.slane %v15812_v32, 2  ;;  %v7279_v52 = vrot.slane %v15809_v54, 3  ;;  %v6862_v15 = vrot.slane %v15740_v29, 1  ;;  %vm17642_vm12 = vmmov %vm17636_vm5 }
 0x5ee   :  { %v15823_v14 = vsel %vm690_vm3, %v17639_v12, %v7118_v4  ;;  %4432 = vst.msk [vmem:[%s16533_s7 + $0x28] sm:$0xff] %vm17640_vm6, %v4396_v38  ;;  %6896 = vrot.lane.b32.xlu1 %v15678_v48, %s9743_s11  ;;  %v4399_v18 = vmax.f32 %v4363_v55, 0.0  ;;  %v4366_v35 = vadd.f32 %v14975_v59, %v4256_v60  ;;  %v4248_v61 = vadd.f32 %v15639_v46, %v4247_v37  ;;  %v7397_v42 = vpop.permute.xlu1 %7396  ;;  %vm17645_vm9 = vmmov %vm17640_vm6  ;;  %v15892_v12 = vld [vmem:[#allocation2 + $0x88] sm:$0xff]  }
 0x5ef   :  { %7205 = vrot.lane.b32.xlu0 %v15823_v14, %s9750_s12  ;;  %v6766_v27 = vrot.slane %v15656_v0, 1  ;;  %4437 = vst.msk [vmem:[%s16533_s7 + $0x50] sm:$0xff] %vm17641_vm8, %v4401_v30  ;;  %v7471_v26 = vsel %vm1135_vm11, %v7435_v40, %v6883_v44  ;;  %v15846_v23 = vor.u32 %v7279_v52, %v7278_v8  ;;  %v7613_v1 = vsel %vm3458_vm1, %v7577_v50, %v7192_v36  ;;  %v9343_v36 = vpop.f32.mrf.mxu1  ;;  %vm17647_vm8 = vmmov %vm17640_vm6 }
 0x5f0   :  { %v4269_v48 = vadd.f32 %v9342_v28, %v15639_v46  ;;  %4435 = vst.msk [vmem:[%s16533_s7 + $0x40] sm:$0xff] %vm17642_vm12, %v4399_v18  ;;  %v4402_v59 = vmax.f32 %v4366_v35, 0.0  ;;  %v17643_v0 = vrot.slane %v15631_v9, 1  ;;  %vm17644_vm5 = vcmask 1046528   ;;  %v7141_v9 = vpop.permute.xlu0 %7140  ;;  %v17649_v18 = vld [vmem:[#allocation32_spill] sm:$0xff] }
 0x5f1   :  { %v4364_v44 = vadd.f32 %v4248_v61, %v15008_v17  ;;  %v7649_v22 = vsel %vm3495_vm14, %v7613_v1, %v7321_v62  ;;  %v7281_v51 = vsel %vm820_vm4, %v15693_v57, %v15846_v23  ;;  %v7024_v6 = vrot.slane %v15812_v32, 1  ;;  %v4263_v49 = vpop.f32.mrf.mxu1 }
 0x5f2   :  { %v15859_v2 = vsel %vm17644_vm5, %v17643_v0, %v6862_v15  ;;  %v4369_v25 = vadd.f32 %v15033_v20, %v4269_v48  ;;  %v7025_v37 = vrot.slane %v15809_v54, 2  ;;  %4438 = vst.msk [vmem:[%s16533_s7 + $0x58] sm:$0xff] %vm17645_vm9, %v4402_v59  ;;  %v4261_v57 = vadd.f32 %v15639_v46, %v4260_v24  ;;  %v7399_v60 = vpop.permute.xlu1 %7398  ;;  %vm17650_vm5 = vmmov %vm17640_vm6 }
 0x5f3   :  { %7334 = vrot.lane.b32.xlu0 %v7281_v51, %s9751_s26  ;;  %6949 = vrot.lane.b32.xlu1 %v15859_v2, %s9745_s22  ;;  %v4400_v17 = vmax.f32 %v4364_v44, 0.0  ;;  %v6770_v20 = vor.u32 %v15659_v10, %v6766_v27  ;;  %v6774_v11 = vrot.slane %v15809_v54, 1  ;;  %v7685_v21 = vsel %vm3532_vm2, %v7649_v22, %v7397_v42  ;;  %v9346_v38 = vpop.f32.mrf.mxu1  ;;  %vm17651_vm9 = vmmov %vm17650_vm5 }
 0x5f4   :  { %v4405_v40 = vmax.f32 %v4369_v25, 0.0  ;;  %v15879_v31 = vor.u32 %v7025_v37, %v7024_v6  ;;  %v4272_v50 = vadd.f32 %v9343_v36, %v15639_v46  ;;  %vm17646_vm10 = vcmask 195584   ;;  %9466 = vmatprep.mubr.msk.bf16.mxu0 %vm4137_vm13, %v7685_v21  ;;  %v7194_v8 = vpop.permute.xlu0 %7193 }
 0x5f5   :  { %v7507_v5 = vsel %vm17646_vm10, %v7471_v26, %v15789_v33  ;;  %4436 = vst.msk [vmem:[%s16533_s7 + $0x48] sm:$0xff] %vm17640_vm6, %v4400_v17  ;;  %v4367_v10 = vadd.f32 %v4261_v57, %v15066_v56  ;;  %v4264_v28 = vadd.f32 %v15639_v46, %v4263_v49  ;;  %v6767_v55 = vsel %vm242_vm0, %v15794_v16, %v6766_v27  ;;  %vm17652_vm10 = vmmov %vm17650_vm5 }
 0x5f6   :  { %4441 = vst.msk [vmem:[%s16533_s7 + $0x70] sm:$0xff] %vm17647_vm8, %v4405_v40  ;;  %vm17648_vm12 = vsmask.f32 6400  ;;  %v4370_v56 = vadd.f32 %v15101_v53, %v4272_v50  ;;  %v4285_v30 = vadd.f32 %v9346_v38, %v15639_v46  ;;  %v7543_v52 = vsel %vm1283_vm15, %v7507_v5, %v7065_v45  ;;  %v6885_v22 = vpop.permute.xlu1 %6884  ;;  %vm17653_vm6 = vmmov %vm17650_vm5 }
 0x5f7   :  { %v7027_v33 = vsel %vm17648_vm12, %v15737_v43, %v15879_v31  ;;  %6820 = vrot.lane.b32.xlu0 %v6767_v55, %s9741_s28  ;;  %v4403_v16 = vmax.f32 %v4367_v10, 0.0  ;;  %v6775_v62 = vsel %vm242_vm0, %v6770_v20, %v6774_v11  ;;  %v4368_v35 = vadd.f32 %v4264_v28, %v17649_v18  ;;  %v4276_v43 = vpop.f32.mrf.mxu1  ;;  %vm17654_vm8 = vmmov %vm17650_vm5  ;;  %v15975_v55 = vld [vmem:[#allocation2 + $0x90] sm:$0xff]  }
 0x5f8   :  { %7078 = vrot.lane.b32.xlu1 %v7027_v33, %s9748_s8  ;;  %v4406_v61 = vmax.f32 %v4370_v56, 0.0  ;;  %v7579_v53 = vsel %vm3421_vm7, %v7543_v52, %v7141_v9  ;;  %v4373_v27 = vadd.f32 %v15141_v41, %v4285_v30  ;;  %v4277_v24 = vadd.f32 %v15639_v46, %v4276_v43  ;;  %v7323_v51 = vpop.permute.xlu0 %7322  ;;  %vm17655_vm12 = vmmov %vm17650_vm5 }
 0x5f9   :  { %4439 = vst.msk [vmem:[%s16533_s7 + $0x60] sm:$0xff] %vm17650_vm5, %v4403_v16  ;;  %v4404_v45 = vmax.f32 %v4368_v35, 0.0  ;;  %v7120_v26 = vrot.slane %v15892_v12, 2  ;;  %v9347_v1 = vpop.f32.mrf.mxu1  ;;  %v15921_v48 = vshll.u32 %v15892_v12, 16  ;;  %v15924_v59 = vshrl.u32 %v15892_v12, 16 }
 0x5fa   :  { %4442 = vst.msk [vmem:[%s16533_s7 + $0x78] sm:$0xff] %vm17651_vm9, %v4406_v61  ;;  %v4409_v41 = vmax.f32 %v4373_v27, 0.0  ;;  %v7615_v0 = vsel %vm3458_vm1, %v7579_v53, %v7194_v8  ;;  %v4371_v44 = vadd.f32 %v4277_v24, %v15177_v7  ;;  %v4288_v36 = vadd.f32 %v9347_v1, %v15639_v46  ;;  %vm17657_vm9 = vmmov %vm17653_vm6  ;;  %v17659_v27 = vld [vmem:[#allocation44_spill] sm:$0xff] }
 0x5fb   :  { %6822 = vrot.lane.b32.xlu0 %v6775_v62, %s9741_s28  ;;  %4440 = vst.msk [vmem:[%s16533_s7 + $0x68] sm:$0xff] %vm17652_vm10, %v4404_v45  ;;  %v7651_v25 = vsel %vm3495_vm14, %v7615_v0, %v7323_v51  ;;  %v7282_v6 = vrot.slane %v15924_v59, 2  ;;  %v7283_v7 = vrot.slane %v15921_v48, 3  ;;  %v4279_v37 = vpop.f32.mrf.mxu1  ;;  %v15957_v57 = vsel %vm690_vm3, %v7118_v4, %v7120_v26  ;;  %v6938_v4 = vpop.permute.xlu1 %6937  ;;  %vm17658_vm10 = vmmov %vm17653_vm6 }
 0x5fc   :  { %7154 = vrot.lane.b32.xlu1 %v15823_v14, %s9749_s10  ;;  %4445 = vst.msk [vmem:[%s16533_s7 + $0x90] sm:$0xff] %vm17653_vm6, %v4409_v41  ;;  %v4407_v42 = vmax.f32 %v4371_v44, 0.0  ;;  %v15948_v14 = vrot.slane %v15892_v12, 1  ;;  %v4374_v9 = vadd.f32 %v15208_v19, %v4288_v36  ;;  %v4280_v17 = vadd.f32 %v15639_v46, %v4279_v37  ;;  %v6809_v28 = vpop.permute.xlu0 %6808 }
 0x5fd   :  { %v7028_v20 = vrot.slane %v15924_v59, 1  ;;  %v7029_v49 = vrot.slane %v15921_v48, 2  ;;  %v7687_v40 = vsel %vm3532_vm2, %v7651_v25, %v7399_v60  ;;  %v9350_v21 = vpop.f32.mrf.mxu1  ;;  %v15966_v50 = vor.u32 %v7283_v7, %v7282_v6 }
 0x5fe   :  { %4443 = vst.msk [vmem:[%s16533_s7 + $0x80] sm:$0xff] %vm17654_vm8, %v4407_v42  ;;  %v4410_v19 = vmax.f32 %v4374_v9, 0.0  ;;  %v4372_v5 = vadd.f32 %v4280_v17, %v15226_v58  ;;  %9467 = vmatmul.mubr.msk.bf16.gmra.mxu0 %vm4137_vm13, %v7687_v40  ;;  %v4301_v10 = vadd.f32 %v9350_v21, %v15639_v46  ;;  %vm17656_vm5 = vcmask 1046528   ;;  %v17665_v42 = vld [vmem:[#allocation16_spill] sm:$0xff] }
 0x5ff   :  { %6898 = vrot.lane.b32.xlu0 %v15859_v2, %s9743_s11  ;;  %v4292_v38 = vpop.f32.mrf.mxu1  ;;  %v15986_v56 = vsel %vm17656_vm5, %v6862_v15, %v15948_v14  ;;  %v9730_v2 = vld [vmem:[#allocation2 + $0x40] sm:$0xff]   ;;  %v7376_v30 = vrot.slane %v15892_v12, 3  ;;  %v7285_v16 = vsel %vm820_vm4, %v15846_v23, %v15966_v50  ;;  %v7067_v62 = vpop.permute.xlu1 %7066  ;;  %v7033_v61 = vshrl.u32 %v15975_v55, 16  ;;  %vm17662_vm5 = vmmov %vm17653_vm6  ;;  %v16042_v21 = vld [vmem:[#allocation2 + $0x90] ss:$0 sps:$4 sm:$0x11]  }
 0x600   :  { %7207 = vrot.lane.b32.xlu1 %v15957_v57, %s9750_s12  ;;  %4446 = vst.msk [vmem:[%s16533_s7 + $0x98] sm:$0xff] %vm17655_vm12, %v4410_v19  ;;  %v4408_v58 = vmax.f32 %v4372_v5, 0.0  ;;  %v4377_v33 = vadd.f32 %v15254_v13, %v4301_v10  ;;  %v7437_v60 = vsel %vm17657_vm9, %v9730_v2, %v6809_v28  ;;  %v4293_v8 = vadd.f32 %v15639_v46, %v4292_v38  ;;  %v6811_v35 = vpop.permute.xlu0 %6810  ;;  %v17668_v5 = vld [vmem:[#allocation72_spill] sm:$0xff]  ;;  %v9731_v2 = vld [vmem:[#allocation2 + $0x48] sm:$0xff]  }
 0x601   :  { %v9351_v52 = vpop.f32.mrf.mxu1  ;;  %v15998_v13 = vor.u32 %v7029_v49, %v7028_v20  ;;  %v7473_v53 = vsel %vm1135_vm11, %v7437_v60, %v6885_v22  ;;  %v7036_v1 = vshll.u32 %v15975_v55, 16  ;;  %vm17660_vm8 = vcmask 1044480  }
 0x602   :  { %4444 = vst.msk [vmem:[%s16533_s7 + $0x88] sm:$0xff] %vm17658_vm10, %v4408_v58  ;;  %v4413_v15 = vmax.f32 %v4377_v33, 0.0  ;;  %v4304_v18 = vadd.f32 %v9351_v52, %v15639_v46  ;;  %v4375_v43 = vadd.f32 %v4293_v8, %v15293_v39  ;;  %v7377_v39 = vsel %vm17660_vm8, %v7374_v47, %v7376_v30  ;;  %vm17664_vm10 = vmmov %vm17662_vm5 }
 0x603   :  { %6951 = vrot.lane.b32.xlu0 %v15986_v56, %s9745_s22  ;;  %v4295_v23 = vpop.f32.mrf.mxu1  ;;  %v7378_v0 = vrot.slane %v15975_v55, 3  ;;  %vm17661_vm12 = vsmask.f32 6400  ;;  %v7143_v25 = vpop.permute.xlu1 %7142  ;;  %vm17663_vm9 = vcmask 195584   ;;  %v16031_v47 = vrot.slane %v15975_v55, 2 }
 0x604   :  { %7336 = vrot.lane.b32.xlu1 %v7285_v16, %s9751_s26  ;;  %4449 = vst.msk [vmem:[%s16533_s7 + $0xb0] sm:$0xff] %vm17653_vm6, %v4413_v15  ;;  %v4378_v24 = vadd.f32 %v17659_v27, %v4304_v18  ;;  %v4296_v45 = vadd.f32 %v15639_v46, %v4295_v23  ;;  %v4411_v41 = vmax.f32 %v4375_v43, 0.0  ;;  %v7031_v36 = vsel %vm17661_vm12, %v15879_v31, %v15998_v13  ;;  %v6887_v7 = vpop.permute.xlu0 %6886  ;;  %vm17666_vm6 = vmmov %vm17660_vm8  ;;  %v17670_v16 = vld [vmem:[#allocation7_spill] sm:$0xff] }
 0x605   :  { %v9354_v44 = vpop.f32.mrf.mxu1  ;;  %v7509_v29 = vsel %vm17663_vm9, %v7473_v53, %v6938_v4  ;;  %v7287_v20 = vrot.slane %v7036_v1, 3  ;;  %v7379_v49 = vsel %vm17666_vm6, %v7376_v30, %v7378_v0  ;;  %vm17667_vm8 = vmmov %vm17662_vm5  ;;  %v6917_v58 = vrot.slane %v15975_v55, 1 }
 0x606   :  { %v4414_v51 = vmax.f32 %v4378_v24, 0.0  ;;  %v4376_v22 = vadd.f32 %v4296_v45, %v15335_v34  ;;  %v4317_v6 = vadd.f32 %v9354_v44, %v15639_v46  ;;  %4447 = vst.msk [vmem:[%s16533_s7 + $0xa0] sm:$0xff] %vm17662_vm5, %v4411_v41  ;;  %v7286_v34 = vrot.slane %v7033_v61, 2  ;;  %vm17669_vm12 = vmmov %vm17662_vm5  ;;  %v17673_v24 = vld [vmem:[#allocation49_spill] sm:$0xff] }
 0x607   :  { %7080 = vrot.lane.b32.xlu0 %v7031_v36, %s9748_s8  ;;  %v4308_v31 = vpop.f32.mrf.mxu1  ;;  %v7196_v10 = vpop.permute.xlu1 %7195  ;;  %v7545_v33 = vsel %vm1283_vm15, %v7509_v29, %v7067_v62  ;;  %v7439_v60 = vsel %vm17669_vm12, %v9731_v2, %v6811_v35  ;;  %v16060_v30 = vsel %vm690_vm3, %v7120_v26, %v16031_v47  ;;  %v6782_v18 = vrot.slane %v15921_v48, 1  ;;  %vm17671_vm9 = vmmov %vm17662_vm5 }
 0x608   :  { %7412 = vrot.lane.b32.xlu1 %v7377_v39, %s9752_s15  ;;  %4450 = vst.msk [vmem:[%s16533_s7 + $0xb8] sm:$0xff] %vm17664_vm10, %v4414_v51  ;;  %v4412_v37 = vmax.f32 %v4376_v22, 0.0  ;;  %v4381_v9 = vadd.f32 %v17665_v42, %v4317_v6  ;;  %v4309_v17 = vadd.f32 %v15639_v46, %v4308_v31  ;;  %v6940_v38 = vpop.permute.xlu0 %6939  ;;  %v16066_v52 = vor.u32 %v7287_v20, %v7286_v34  ;;  %v16091_v51 = vld [vmem:[#allocation2 + $0x98] sm:$0xff]   ;;  %vm17674_vm6 = vmmov %vm17662_vm5 }
 0x609   :  { %v9355_v40 = vpop.f32.mrf.mxu1  ;;  %v7035_v43 = vrot.slane %v7033_v61, 1  ;;  %v7038_v23 = vrot.slane %v7036_v1, 2  ;;  %v6788_v26 = vshll.u32 %v16042_v21, 16  ;;  %vm17672_vm10 = vcmask 1046528   ;;  %v17675_v6 = vld [vmem:[#allocation21_spill] sm:$0xff] }
 0x60a   :  { %4448 = vst.msk [vmem:[%s16533_s7 + $0xa8] sm:$0xff] %vm17667_vm8, %v4412_v37  ;;  %v4417_v19 = vmax.f32 %v4381_v9, 0.0  ;;  %v4379_v4 = vadd.f32 %v4309_v17, %v17668_v5  ;;  %v4320_v28 = vadd.f32 %v9355_v40, %v15639_v46  ;;  %v6918_v27 = vsel %vm17672_vm10, %v15948_v14, %v6917_v58  ;;  %vm17676_vm8 = vmmov %vm17662_vm5  ;;  %v17677_v37 = vld [vmem:[#allocation93_spill] sm:$0xff] }
 0x60b   :  { %7156 = vrot.lane.b32.xlu0 %v15957_v57, %s9749_s10  ;;  %v4311_v8 = vpop.f32.mrf.mxu1  ;;  %v7325_v39 = vpop.permute.xlu1 %7324  ;;  %v7581_v1 = vsel %vm3421_vm7, %v7545_v33, %v7143_v25  ;;  %v7475_v41 = vsel %vm1135_vm11, %v7439_v60, %v6887_v7  ;;  %v6778_v44 = vor.u32 %v15812_v32, %v6774_v11  ;;  %v7289_v22 = vsel %vm820_vm4, %v15966_v50, %v16066_v52  ;;  %v17679_v33 = vld [vmem:[#allocation3_spill] sm:$0xff]  ;;  %vm17681_vm10 = vmmov %vm17662_vm5 }
 0x60c   :  { %7414 = vrot.lane.b32.xlu1 %v7379_v49, %s9752_s15  ;;  %4453 = vst.msk [vmem:[%s16533_s7 + $0xd0] sm:$0xff] %vm17662_vm5, %v4417_v19  ;;  %v4415_v57 = vmax.f32 %v4379_v4, 0.0  ;;  %v4382_v15 = vadd.f32 %v17670_v16, %v4320_v28  ;;  %v4312_v62 = vadd.f32 %v15639_v46, %v4311_v8  ;;  %v7069_v61 = vpop.permute.xlu0 %7068  ;;  %v7617_v54 = vsel %vm3458_vm1, %v7581_v1, %v7196_v10  ;;  %v9662_v4 = vld [vmem:[%s16526_s0 + $0x11c] sm:$0xff]   ;;  %v9663_v8 = vld [vmem:[%s16526_s0 + $0x124] sm:$0xff]  }
 0x60d   :  { %v9358_v35 = vpop.f32.mrf.mxu1  ;;  %v16103_v32 = vor.u32 %v7038_v23, %v7035_v43  ;;  %v6786_v11 = vor.u32 %v15924_v59, %v6782_v18  ;;  %v6790_v29 = vrot.slane %v6788_v26, 1  ;;  %v7653_v50 = vsel %vm3495_vm14, %v7617_v54, %v7325_v39 }
 0x60e   :  { %4451 = vst.msk [vmem:[%s16533_s7 + $0xc0] sm:$0xff] %vm17671_vm9, %v4415_v57  ;;  %v4418_v53 = vmax.f32 %v4382_v15, 0.0  ;;  %v4380_v45 = vadd.f32 %v4312_v62, %v17673_v24  ;;  %v4333_v48 = vadd.f32 %v9358_v35, %v15639_v46  ;;  %v6783_v59 = vsel %vm242_vm0, %v6778_v44, %v6782_v18  ;;  %v9665_v62 = vld [vmem:[%s16526_s0 + $0x134] sm:$0xff]  }
 0x60f   :  { %7209 = vrot.lane.b32.xlu0 %v16060_v30, %s9750_s12  ;;  %v4324_v36 = vpop.f32.mrf.mxu1  ;;  %v7401_v9 = vpop.permute.xlu1 %7400  ;;  %v6866_v19 = vrot.slane %v16042_v21, 1  ;;  %v7291_v5 = vshrl.u32 %v16091_v51, 16  ;;  %vm17678_vm12 = vcmask 195584   ;;  %vm17680_vm9 = vsmask.f32 6400 }
 0x610   :  { %6900 = vrot.lane.b32.xlu1 %v15986_v56, %s9743_s11  ;;  %4454 = vst.msk [vmem:[%s16533_s7 + $0xd8] sm:$0xff] %vm17674_vm6, %v4418_v53  ;;  %v4416_v25 = vmax.f32 %v4380_v45, 0.0  ;;  %v4385_v7 = vadd.f32 %v17675_v6, %v4333_v48  ;;  %v4325_v56 = vadd.f32 %v15639_v46, %v4324_v36  ;;  %v7145_v20 = vpop.permute.xlu0 %7144  ;;  %v7689_v49 = vsel %vm3532_vm2, %v7653_v50, %v7401_v9  ;;  %v16155_v24 = vld [vmem:[#allocation2 + $0x98] ss:$0 sps:$4 sm:$0x33]  }
 0x611   :  { %v9359_v31 = vpop.f32.mrf.mxu1  ;;  %v7511_v10 = vsel %vm17678_vm12, %v7475_v41, %v6940_v38  ;;  %9470 = vmatprep.mubr.msk.bf16.mxu0 %vm4137_vm13, %v7689_v49  ;;  %v9664_v38 = vld [vmem:[%s16526_s0 + $0x12c] sm:$0xff]   ;;  %v7040_v16 = vsel %vm17680_vm9, %v15998_v13, %v16103_v32  ;;  %v6791_v15 = vsel %vm242_vm0, %v6786_v11, %v6790_v29  ;;  %v7294_v26 = vshll.u32 %v16091_v51, 16  ;;  %vm17682_vm0 = vmmov %vm17662_vm5 }
 0x612   :  { %4452 = vst.msk [vmem:[%s16533_s7 + $0xc8] sm:$0xff] %vm17676_vm8, %v4416_v25  ;;  %v4421_v34 = vmax.f32 %v4385_v7, 0.0  ;;  %v4383_v42 = vadd.f32 %v4325_v56, %v17677_v37  ;;  %v4336_v17 = vadd.f32 %v9359_v31, %v15639_v46  ;;  %v7547_v57 = vsel %vm1283_vm15, %v7511_v10, %v7069_v61  ;;  %vm17683_vm6 = vmmov %vm17682_vm0  ;;  %v9654_v37 = vld [vmem:[#allocation2 + $0x98] ss:$0 sps:$4 sm:$0x11]  }
 0x613   :  { %7338 = vrot.lane.b32.xlu0 %v7289_v22, %s9751_s26  ;;  %v4327_v40 = vpop.f32.mrf.mxu1  ;;  %v7583_v35 = vsel %vm3421_vm7, %v7547_v57, %v7145_v20  ;;  %v7403_v23 = vpop.permute.xlu1 %7402  ;;  %v7956_v45 = vshrl.u32 %v9662_v4, 16  ;;  %v7959_v39 = vshll.u32 %v9662_v4, 16  ;;  %v7965_v48 = vshrl.u32 %v9663_v8, 16  ;;  %vm17684_vm8 = vmmov %vm17680_vm9 }
 0x614   :  { %6953 = vrot.lane.b32.xlu1 %v6918_v27, %s9745_s22  ;;  %4457 = vst.msk [vmem:[%s16533_s7 + $0xf0] sm:$0xff] %vm17662_vm5, %v4421_v34  ;;  %v4419_v28 = vmax.f32 %v4383_v42, 0.0  ;;  %v4386_v2 = vadd.f32 %v17679_v33, %v4336_v17  ;;  %v4328_v60 = vadd.f32 %v15639_v46, %v4327_v40  ;;  %v7175_v46 = vrot.slane %v16091_v51, 2  ;;  %v7198_v13 = vpop.permute.xlu0 %7197  ;;  %vm17687_vm9 = vmmov %vm17684_vm8 }
 0x615   :  { %v7619_v53 = vsel %vm3458_vm1, %v7583_v35, %v7198_v13  ;;  %v7293_v27 = vrot.slane %v7291_v5, 2  ;;  %v7968_v61 = vshll.u32 %v9663_v8, 16  ;;  %v7974_v1 = vshrl.u32 %v9664_v38, 16  ;;  %v9732_v13 = vld [vmem:[#allocation2 + $0x50] sm:$0xff]  }
 0x616   :  { %4455 = vst.msk [vmem:[%s16533_s7 + $0xe0] sm:$0xff] %vm17681_vm10, %v4419_v28  ;;  %v4422_v18 = vmax.f32 %v4386_v2, 0.0  ;;  %v4384_v43 = vadd.f32 %v4328_v60, %v15530_v63  ;;  %v7958_v41 = vrot.slane %v7956_v45, 1  ;;  %v7961_v44 = vrot.slane %v7959_v39, 2  ;;  %vm17688_vm10 = vmmov %vm17684_vm8  ;;  %v9666_v39 = vld [vmem:[%s16526_s0 + $0x13c] sm:$0xff]  }
 0x617   :  { %6824 = vrot.lane.b32.xlu0 %v6783_v59, %s9741_s28  ;;  %v7977_v36 = vshll.u32 %v9664_v38, 16  ;;  %v7983_v22 = vshrl.u32 %v9665_v62, 16  ;;  %v16165_v25 = vpop.permute.xlu1 %6888  ;;  %v7967_v7 = vrot.slane %v7965_v48, 1  ;;  %v7970_v56 = vrot.slane %v7968_v61, 2 }
 0x618   :  { %7082 = vrot.lane.b32.xlu1 %v7040_v16, %s9748_s8  ;;  %4458 = vst.msk [vmem:[%s16533_s7 + $0xf8] sm:$0xff] %vm17682_vm0, %v4422_v18  ;;  %v4420_v63 = vmax.f32 %v4384_v43, 0.0  ;;  %v7327_v6 = vpop.permute.xlu0 %7326  ;;  %v7976_v54 = vrot.slane %v7974_v1, 1  ;;  %v7986_v11 = vshll.u32 %v9665_v62, 16  ;;  %v7296_v31 = vrot.slane %v7294_v26, 3 }
 0x619   :  { %v7655_v29 = vsel %vm3495_vm14, %v7619_v53, %v7327_v6  ;;  %v7962_v50 = vor.u32 %v7961_v44, %v7958_v41  ;;  %v7979_v34 = vrot.slane %v7977_v36, 2  ;;  %v7042_v42 = vshrl.u32 %v16155_v24, 16  ;;  %v16193_v60 = vld [vmem:[#allocation2 + $0xa0] ss:$0 sps:$4 sm:$0x77]  }
 0x61a   :  { %4456 = vst.msk [vmem:[%s16533_s7 + $0xe8] sm:$0xff] %vm17683_vm6, %v4420_v63  ;;  %v7045_v9 = vshll.u32 %v16155_v24, 16  ;;  %v7691_v17 = vsel %vm3532_vm2, %v7655_v29, %v7403_v23  ;;  %v7971_v20 = vor.u32 %v7970_v56, %v7967_v7  ;;  %v7988_v40 = vrot.slane %v7986_v11, 2  ;;  %v9658_v62 = vld [vmem:[#allocation2 + $0xa0] ss:$0 sps:$4 sm:$0x33]  }
 0x61b   :  { %6826 = vrot.lane.b32.xlu0 %v6791_v15, %s9741_s28  ;;  %9471 = vmatmul.mubr.msk.bf16.gmra.mxu0 %vm4137_vm13, %v7691_v17  ;;  %v7963_v59 = vsel %vm17684_vm8, %v15626_v3, %v7962_v50  ;;  %v7980_v49 = vor.u32 %v7979_v34, %v7976_v54  ;;  %vm17685_vm12 = vcmask 1046528   ;;  %v7176_v4 = vsel %vm690_vm3, %v16031_v47, %v7175_v46  ;;  %v6942_v10 = vpop.permute.xlu1 %6941  ;;  %v9667_v63 = vld [vmem:[%s16526_s0 + $0x144] ss:$0 sps:$4 sm:$0x33]  }
 0x61c   :  { %7158 = vrot.lane.b32.xlu1 %v16060_v30, %s9749_s10  ;;  %v7985_v30 = vrot.slane %v7983_v22, 1  ;;  %v6867_v5 = vsel %vm17685_vm12, %v15948_v14, %v6866_v19  ;;  %v6813_v28 = vpop.permute.xlu0 %6812  ;;  %vm17686_vm5 = vcmask 31744   ;;  %v7972_v33 = vsel %vm17687_vm9, %v7962_v50, %v7971_v20  ;;  %vm17691_vm8 = vmmov %vm17685_vm12 }
 0x61d   :  { %9432 = vmatprep.mubr.msk.bf16.mxu1 %vm17686_vm5, %v7963_v59  ;;  %v7981_v3 = vsel %vm17688_vm10, %v7971_v20, %v7980_v49  ;;  %v6919_v21 = vrot.slane %v9654_v37, 1  ;;  %v16190_v2 = vor.u32 %v7296_v31, %v7293_v27  ;;  %v7044_v14 = vrot.slane %v7042_v42, 1  ;;  %vm17689_vm0 = vmmov %vm17686_vm5 }
 0x61e   :  { %v7047_v19 = vrot.slane %v7045_v9, 2  ;;  %9433 = vmatmul.mubr.msk.bf16.gmra.mxu1 %vm17689_vm0, %v7972_v33  ;;  %vm17690_vm6 = vmmov %vm17689_vm0  ;;  %v7989_v8 = vor.u32 %v7988_v40, %v7985_v30  ;;  %v7380_v35 = vrot.slane %v16091_v51, 3  ;;  %v7300_v43 = vshrl.u32 %v16193_v60, 16  ;;  %v9734_v33 = vld [vmem:[#allocation2 + $0x58] sm:$0xff]  }
 0x61f   :  { %6902 = vrot.lane.b32.xlu0 %v6867_v5, %s9743_s11  ;;  %9436 = vmatprep.mubr.msk.bf16.mxu1 %vm17690_vm6, %v7981_v3  ;;  %v6920_v38 = vsel %vm17691_vm8, %v6917_v58, %v6919_v21  ;;  %v7298_v57 = vsel %vm820_vm4, %v16066_v52, %v16190_v2  ;;  %v7071_v16 = vpop.permute.xlu1 %7070  ;;  %v7303_v23 = vshll.u32 %v16193_v60, 16  ;;  %vm17692_vm12 = vmmov %vm17687_vm9  ;;  %vm17695_vm10 = vcmask 1044480  }
 0x620   :  { %7211 = vrot.lane.b32.xlu1 %v7176_v4, %s9750_s12  ;;  %v16202_v15 = vpop.permute.xlu0 %6814  ;;  %v7048_v18 = vor.u32 %v7047_v19, %v7044_v14  ;;  %v7990_v58 = vsel %vm17692_vm12, %v7980_v49, %v7989_v8  ;;  %vm17693_vm5 = vmmov %vm17687_vm9  ;;  %vm17694_vm9 = vcmask 64512   ;;  %v7381_v53 = vsel %vm17695_vm10, %v7378_v0, %v7380_v35 }
 0x621   :  { %v7441_v26 = vsel %vm17694_vm9, %v9732_v13, %v6813_v28  ;;  %v7177_v48 = vrot.slane %v9658_v62, 2  ;;  %v7992_v55 = vshrl.u32 %v9666_v39, 16  ;;  %v7995_v0 = vshll.u32 %v9666_v39, 16  ;;  %vm17697_vm8 = vmmov %vm17693_vm5 }
 0x622   :  { %v7049_v52 = vsel %vm17693_vm5, %v16103_v32, %v7048_v18  ;;  %v7124_v32 = vrot.slane %v16155_v24, 2  ;;  %v8001_v61 = vshrl.u32 %v9667_v63, 16  ;;  %v8004_v1 = vshll.u32 %v9667_v63, 16  ;;  %vm17698_vm12 = vmmov %vm17693_vm5 }
 0x623   :  { %6955 = vrot.lane.b32.xlu0 %v6920_v38, %s9745_s22  ;;  %v7147_v27 = vpop.permute.xlu1 %7146  ;;  %v7477_v41 = vsel %vm1135_vm11, %v7441_v26, %v16165_v25  ;;  %v7302_v36 = vrot.slane %v7300_v43, 2  ;;  %v7305_v22 = vrot.slane %v7303_v23, 3  ;;  %v7994_v56 = vrot.slane %v7992_v55, 1  ;;  %vm17699_vm5 = vmmov %vm17689_vm0  ;;  %v17709_v55 = vld [vmem:[#allocation52_spill] sm:$0xff] }
 0x624   :  { %7340 = vrot.lane.b32.xlu1 %v7298_v57, %s9751_s26  ;;  %v6891_v45 = vpop.permute.xlu0 %6890  ;;  %v7125_v44 = vsel %vm690_vm3, %v16031_v47, %v7124_v32  ;;  %v7997_v54 = vrot.slane %v7995_v0, 2  ;;  %v8003_v24 = vrot.slane %v8001_v61, 1  ;;  %v8006_v11 = vrot.slane %v8004_v1, 2  ;;  %vm17700_vm9 = vmmov %vm17689_vm0 }
 0x625   :  { %vm17696_vm6 = vcmask 195584   ;;  %v7178_v25 = vsel %vm690_vm3, %v7175_v46, %v7177_v48  ;;  %v7306_v34 = vor.u32 %v7305_v22, %v7302_v36  ;;  %v7382_v59 = vrot.slane %v16193_v60, 3  ;;  %v17703_v60 = vld [vmem:[#allocation69_spill] sm:$0xff] }
 0x626   :  { %9437 = vmatmul.mubr.msk.bf16.gmra.mxu1 %vm17689_vm0, %v7990_v58  ;;  %v7513_v29 = vsel %vm17696_vm6, %v7477_v41, %v6942_v10  ;;  %v7998_v31 = vor.u32 %v7997_v54, %v7994_v56  ;;  %v8007_v50 = vor.u32 %v8006_v11, %v8003_v24  ;;  %v16253_v10 = vld [vmem:[%s16532_s4] ss:$0 sm:$0xff]  ;;  %vm17701_vm3 = vcmask 64512  }
 0x627   :  { %7084 = vrot.lane.b32.xlu0 %v7049_v52, %s9748_s8  ;;  %v7200_v6 = vpop.permute.xlu1 %7199  ;;  %v7549_v17 = vsel %vm1283_vm15, %v7513_v29, %v7071_v16  ;;  %v7307_v46 = vsel %vm820_vm4, %v16190_v2, %v7306_v34  ;;  %v7443_v3 = vsel %vm17701_vm3, %v9734_v33, %v16202_v15  ;;  %vm17702_vm4 = vmmov %vm17695_vm10  ;;  %v17705_v15 = vld [vmem:[#allocation80_spill] sm:$0xff] }
 0x628   :  { %7416 = vrot.lane.b32.xlu1 %v7381_v53, %s9752_s15  ;;  %v6944_v7 = vpop.permute.xlu0 %6943  ;;  %v7999_v42 = vsel %vm17697_vm8, %v7989_v8, %v7998_v31  ;;  %v8008_v9 = vsel %vm17698_vm12, %v7998_v31, %v8007_v50  ;;  %v7585_v20 = vsel %vm3421_vm7, %v7549_v17, %v7147_v27  ;;  %v7383_v21 = vsel %vm17702_vm4, %v7380_v35, %v7382_v59  ;;  %vm17704_vm10 = vmmov %vm17696_vm6  ;;  %v17707_v27 = vld [vmem:[#allocation41_spill] sm:$0xff] }
 0x629   :  { %9440 = vmatprep.mubr.msk.bf16.mxu1 %vm17699_vm5, %v7999_v42  ;;  %v7621_v51 = vsel %vm3458_vm1, %v7585_v20, %v7200_v6  ;;  %v7479_v19 = vsel %vm1135_vm11, %v7443_v3, %v6891_v45  ;;  %vm17706_vm0 = vmmov %vm17701_vm3 }
 0x62a   :  { %v7515_v16 = vsel %vm17704_vm10, %v7479_v19, %v6944_v7  ;;  %vm17708_vm6 = vmmov %vm17706_vm0  ;;  %v9735_v7 = vld [vmem:[#allocation2 + $0x60] sm:$0xff]  }
 0x62b   :  { %7160 = vrot.lane.b32.xlu0 %v7125_v44, %s9749_s10  ;;  %v7329_v47 = vpop.permute.xlu1 %7328  ;;  %vm17710_vm8 = vmmov %vm17706_vm0 }
 0x62c   :  { %v7073_v37 = vpop.permute.xlu0 %7072  ;;  %v7657_v49 = vsel %vm3495_vm14, %v7621_v51, %v7329_v47  ;;  %vm17711_vm12 = vmmov %vm17706_vm0 }
 0x62d   :  { %v7551_v18 = vsel %vm1283_vm15, %v7515_v16, %v7073_v37  ;;  %vm17712_vm5 = vmmov %vm17706_vm0 }
 0x62e   :  { %9441 = vmatmul.mubr.msk.bf16.gmra.mxu1 %vm17700_vm9, %v8008_v9  ;;  %v9362_v4 = vpop.f32.mrf.mxu1  ;;  %vm17713_vm9 = vmmov %vm17704_vm10 }
 0x62f   :  { %7213 = vrot.lane.b32.xlu0 %v7178_v25, %s9750_s12  ;;  %v7405_v30 = vpop.permute.xlu1 %7404  ;;  %v4349_v28 = vadd.f32 %v16253_v10, %v9362_v4  ;;  %vm17714_vm3 = vmmov %vm17706_vm0 }
 0x630   :  { %v7149_v40 = vpop.permute.xlu0 %7148  ;;  %v7693_v5 = vsel %vm3532_vm2, %v7657_v49, %v7405_v30  ;;  %v4340_v14 = vpop.f32.mrf.mxu1  ;;  %vm17715_vm4 = vmmov %vm17713_vm9 }
 0x631   :  { %9474 = vmatprep.mubr.msk.bf16.mxu0 %vm4137_vm13, %v7693_v5  ;;  %v4389_v8 = vadd.f32 %v17703_v60, %v4349_v28  ;;  %v4341_v38 = vadd.f32 %v16253_v10, %v4340_v14  ;;  %v7587_v58 = vsel %vm3421_vm7, %v7551_v18, %v7149_v40  ;;  %v9736_v40 = vld [vmem:[#allocation2 + $0x68] sm:$0xff]   ;;  %vm17716_vm10 = vmmov %vm17706_vm0 }
 0x632   :  { %v9363_v62 = vpop.f32.mrf.mxu1 }
 0x633   :  { %7342 = vrot.lane.b32.xlu0 %v7307_v46, %s9751_s26  ;;  %v7407_v2 = vpop.permute.xlu1 %7406  ;;  %v4425_v43 = vmax.f32 %v4389_v8, 0.0  ;;  %v4387_v23 = vadd.f32 %v4341_v38, %v17705_v15  ;;  %v4352_v35 = vadd.f32 %v16253_v10, %v9363_v62 }
 0x634   :  { %v7202_v57 = vpop.permute.xlu0 %7201  ;;  %v4343_v13 = vpop.f32.mrf.mxu1 }
 0x635   :  { %4461 = vst.msk [vmem:[%s16533_s7 + $0x110] sm:$0xff] %vm17706_vm0, %v4425_v43  ;;  %v4423_v26 = vmax.f32 %v4387_v23, 0.0  ;;  %v7623_v53 = vsel %vm3458_vm1, %v7587_v58, %v7202_v57  ;;  %v4390_v45 = vadd.f32 %v17707_v27, %v4352_v35  ;;  %v4344_v39 = vadd.f32 %v16253_v10, %v4343_v13 }
 0x636   :  { %v9410_v9 = vpop.f32.mrf.mxu1 }
 0x637   :  { %7418 = vrot.lane.b32.xlu0 %v7383_v21, %s9752_s15  ;;  %v6893_v52 = vpop.permute.xlu1 %6892  ;;  %4459 = vst.msk [vmem:[%s16533_s7 + $0x100] sm:$0xff] %vm17708_vm6, %v4423_v26  ;;  %v4426_v48 = vmax.f32 %v4390_v45, 0.0  ;;  %v4388_v0 = vadd.f32 %v4344_v39, %v17709_v55  ;;  %vm17717_vm6 = vmmov %vm17706_vm0 }
 0x638   :  { %v7331_v63 = vpop.permute.xlu0 %7330  ;;  %v8100_v51 = vpop.f32.mrf.mxu1 }
 0x639   :  { %v7659_v32 = vsel %vm3495_vm14, %v7623_v53, %v7331_v63  ;;  %4462 = vst.msk [vmem:[%s16533_s7 + $0x118] sm:$0xff] %vm17710_vm8, %v4426_v48  ;;  %v4424_v41 = vmax.f32 %v4388_v0, 0.0  ;;  %vm17718_vm8 = vmmov %vm17706_vm0  ;;  %v9737_v48 = vld [vmem:[#allocation2 + $0x70] sm:$0xff]  }
 0x63a   :  { %v7695_v61 = vsel %vm3532_vm2, %v7659_v32, %v7407_v2  ;;  %v9411_v28 = vpop.f32.mrf.mxu1 }
 0x63b   :  { %9475 = vmatmul.mubr.msk.bf16.gmra.mxu0 %vm4137_vm13, %v7695_v61  ;;  %v6946_v1 = vpop.permute.xlu1 %6945  ;;  %4460 = vst.msk [vmem:[%s16533_s7 + $0x108] sm:$0xff] %vm17711_vm12, %v4424_v41  ;;  %vm17719_vm12 = vmmov %vm17706_vm0 }
 0x63c   :  { %v6817_v44 = vpop.permute.xlu0 %6816  ;;  %v8103_v43 = vpop.f32.mrf.mxu1 }
 0x63d   :  { %v7445_v56 = vsel %vm17712_vm5, %v9735_v7, %v6817_v44  ;;  %vm17720_vm5 = vmmov %vm17715_vm4 }
 0x63e   :  { %v7481_v11 = vsel %vm1135_vm11, %v7445_v56, %v6893_v52 }
 0x63f   :  { %v7075_v36 = vpop.permute.xlu1 %7074  ;;  %v7517_v29 = vsel %vm17713_vm9, %v7481_v11, %v6946_v1  ;;  %vm17721_vm9 = vmmov %vm17706_vm0 }
 0x640   :  { %v6819_v6 = vpop.permute.xlu0 %6818  ;;  %v7553_v25 = vsel %vm1283_vm15, %v7517_v29, %v7075_v36 }
 0x641   :  { %v7447_v5 = vsel %vm17714_vm3, %v9736_v40, %v6819_v6  ;;  %vm17722_vm3 = vmmov %vm17715_vm4 }
 0x643   :  { %v7151_v22 = vpop.permute.xlu1 %7150 }
 0x644   :  { %v6895_v24 = vpop.permute.xlu0 %6894  ;;  %v7589_v34 = vsel %vm3421_vm7, %v7553_v25, %v7151_v22 }
 0x645   :  { %v7483_v33 = vsel %vm1135_vm11, %v7447_v5, %v6895_v24  ;;  %v9414_v24 = vpop.f32.mrf.mxu1 }
 0x647   :  { %v7204_v54 = vpop.permute.xlu1 %7203  ;;  %v8116_v25 = vpop.f32.mrf.mxu1 }
 0x648   :  { %v6948_v50 = vpop.permute.xlu0 %6947  ;;  %v7625_v47 = vsel %vm3458_vm1, %v7589_v34, %v7204_v54 }
 0x649   :  { %v7519_v19 = vsel %vm17715_vm4, %v7483_v33, %v6948_v50  ;;  %vm17723_vm4 = vmmov %vm17706_vm0 }
 0x64e   :  { %v7333_v31 = vpop.permute.xlu1 %7332 }
 0x64f   :  { %v7661_v37 = vsel %vm3495_vm14, %v7625_v47, %v7333_v31 }
 0x658   :  { %v7409_v42 = vpop.permute.xlu1 %7408  ;;  %v7077_v17 = vpop.permute.xlu0 %7076 }
 0x659   :  { %v7697_v20 = vsel %vm3532_vm2, %v7661_v37, %v7409_v42  ;;  %v9456_v49 = vpop.f32.mrf.mxu0  ;;  %v7555_v8 = vsel %vm1283_vm15, %v7519_v19, %v7077_v17 }
 0x65a   :  { %9478 = vmatprep.mubr.msk.bf16.mxu0 %vm4137_vm13, %v7697_v20  ;;  %v8322_v30 = vadd.f32 %v16253_v10, %v9456_v49 }
 0x65b   :  { %v8313_v4 = vpop.f32.mrf.mxu0 }
 0x65c   :  { %v7153_v46 = vpop.permute.xlu0 %7152  ;;  %v7411_v59 = vpop.permute.xlu1 %7410  ;;  %v8458_v2 = vadd.f32 %v9410_v9, %v8322_v30  ;;  %v8314_v14 = vadd.f32 %v16253_v10, %v8313_v4  ;;  %v9738_v9 = vld [vmem:[#allocation2 + $0x78] sm:$0xff]  }
 0x65d   :  { %v9457_v60 = vpop.f32.mrf.mxu0  ;;  %v7591_v62 = vsel %vm3421_vm7, %v7555_v8, %v7153_v46 }
 0x65e   :  { %v8494_v38 = vmax.f32 %v8458_v2, 0.0  ;;  %v8456_v57 = vadd.f32 %v8314_v14, %v8100_v51  ;;  %v8325_v16 = vadd.f32 %v16253_v10, %v9457_v60  ;;  %v9415_v51 = vpop.f32.mrf.mxu1 }
 0x65f   :  { %v8316_v18 = vpop.f32.mrf.mxu0 }
 0x660   :  { %v6897_v21 = vpop.permute.xlu1 %6896  ;;  %9006 = vst.msk [vmem:[%s16533_s7 + $0x130] sm:$0xff] %vm17716_vm10, %v8494_v38  ;;  %v8492_v58 = vmax.f32 %v8456_v57, 0.0  ;;  %v8459_v52 = vadd.f32 %v9411_v28, %v8325_v16  ;;  %v8317_v13 = vadd.f32 %v16253_v10, %v8316_v18  ;;  %v8119_v19 = vpop.f32.mrf.mxu1  ;;  %vm17724_vm10 = vmmov %vm17706_vm0 }
 0x661   :  { %v7206_v3 = vpop.permute.xlu0 %7205 }
 0x662   :  { %v7627_v15 = vsel %vm3458_vm1, %v7591_v62, %v7206_v3  ;;  %9004 = vst.msk [vmem:[%s16533_s7 + $0x120] sm:$0xff] %vm17706_vm0, %v8492_v58  ;;  %v8495_v27 = vmax.f32 %v8459_v52, 0.0  ;;  %v8457_v45 = vadd.f32 %v8317_v13, %v8103_v43  ;;  %v9739_v13 = vld [vmem:[#allocation2 + $0x80] sm:$0xff]  }
 0x664   :  { %9007 = vst.msk [vmem:[%s16533_s7 + $0x138] sm:$0xff] %vm17717_vm6, %v8495_v27  ;;  %v8493_v32 = vmax.f32 %v8457_v45, 0.0  ;;  %vm17725_vm6 = vmmov %vm17706_vm0 }
 0x665   :  { %v7335_v23 = vpop.permute.xlu0 %7334  ;;  %v6950_v35 = vpop.permute.xlu1 %6949 }
 0x666   :  { %v7663_v26 = vsel %vm3495_vm14, %v7627_v15, %v7335_v23  ;;  %9005 = vst.msk [vmem:[%s16533_s7 + $0x128] sm:$0xff] %vm17718_vm8, %v8493_v32  ;;  %vm17726_vm8 = vmmov %vm17706_vm0 }
 0x667   :  { %v7699_v53 = vsel %vm3532_vm2, %v7663_v26, %v7411_v59 }
 0x668   :  { %9479 = vmatmul.mubr.msk.bf16.gmra.mxu0 %vm4137_vm13, %v7699_v53 }
 0x669   :  { %v6821_v39 = vpop.permute.xlu0 %6820 }
 0x66a   :  { %v7079_v63 = vpop.permute.xlu1 %7078  ;;  %v7449_v55 = vsel %vm17719_vm12, %v9737_v48, %v6821_v39  ;;  %vm17727_vm12 = vmmov %vm17722_vm3 }
 0x66b   :  { %v7485_v1 = vsel %vm1135_vm11, %v7449_v55, %v6897_v21 }
 0x66c   :  { %v7521_v36 = vsel %vm17720_vm5, %v7485_v1, %v6950_v35  ;;  %vm17728_vm5 = vmmov %vm17706_vm0 }
 0x66d   :  { %v6823_v0 = vpop.permute.xlu0 %6822  ;;  %v7557_v7 = vsel %vm1283_vm15, %v7521_v36, %v7079_v63 }
 0x66e   :  { %v7155_v61 = vpop.permute.xlu1 %7154  ;;  %v7451_v17 = vsel %vm17721_vm9, %v9738_v9, %v6823_v0  ;;  %vm17729_vm9 = vmmov %vm17722_vm3 }
 0x66f   :  { %v7593_v56 = vsel %vm3421_vm7, %v7557_v7, %v7155_v61  ;;  %v9418_v7 = vpop.f32.mrf.mxu1 }
 0x671   :  { %v6899_v41 = vpop.permute.xlu0 %6898 }
 0x672   :  { %v7208_v44 = vpop.permute.xlu1 %7207  ;;  %v7487_v46 = vsel %vm1135_vm11, %v7451_v17, %v6899_v41 }
 0x673   :  { %v7629_v54 = vsel %vm3458_vm1, %v7593_v56, %v7208_v44 }
 0x675   :  { %v6952_v22 = vpop.permute.xlu0 %6951 }
 0x676   :  { %v7337_v6 = vpop.permute.xlu1 %7336  ;;  %v7523_v5 = vsel %vm17722_vm3, %v7487_v46, %v6952_v22  ;;  %vm17737_vm3 = vmmov %vm17706_vm0 }
 0x677   :  { %v7665_v11 = vsel %vm3495_vm14, %v7629_v54, %v7337_v6  ;;  %v8132_v54 = vpop.f32.mrf.mxu1 }
 0x679   :  { %v7081_v29 = vpop.permute.xlu0 %7080 }
 0x67a   :  { %v7413_v31 = vpop.permute.xlu1 %7412  ;;  %v9460_v37 = vpop.f32.mrf.mxu0  ;;  %v7559_v28 = vsel %vm1283_vm15, %v7523_v5, %v7081_v29 }
 0x67b   :  { %v7701_v50 = vsel %vm3532_vm2, %v7665_v11, %v7413_v31  ;;  %v8338_v42 = vadd.f32 %v16253_v10, %v9460_v37  ;;  %v9419_v37 = vpop.f32.mrf.mxu1 }
 0x67c   :  { %9482 = vmatprep.mubr.msk.bf16.mxu0 %vm4137_vm13, %v7701_v50  ;;  %v8329_v20 = vpop.f32.mrf.mxu0 }
 0x67d   :  { %v7157_v34 = vpop.permute.xlu0 %7156  ;;  %v8462_v30 = vadd.f32 %v9414_v24, %v8338_v42  ;;  %v8330_v40 = vadd.f32 %v16253_v10, %v8329_v20 }
 0x67e   :  { %v7415_v47 = vpop.permute.xlu1 %7414  ;;  %v9461_v4 = vpop.f32.mrf.mxu0  ;;  %v7595_v2 = vsel %vm3421_vm7, %v7559_v28, %v7157_v34 }
 0x67f   :  { %v8498_v33 = vmax.f32 %v8462_v30, 0.0  ;;  %v8460_v3 = vadd.f32 %v8330_v40, %v8116_v25  ;;  %v8341_v21 = vadd.f32 %v16253_v10, %v9461_v4  ;;  %v8135_v4 = vpop.f32.mrf.mxu1 }
 0x680   :  { %v8332_v14 = vpop.f32.mrf.mxu0 }
 0x681   :  { %v7210_v59 = vpop.permute.xlu0 %7209  ;;  %9010 = vst.msk [vmem:[%s16533_s7 + $0x150] sm:$0xff] %vm17723_vm4, %v8498_v33  ;;  %v8496_v57 = vmax.f32 %v8460_v3, 0.0  ;;  %v8463_v16 = vadd.f32 %v9415_v51, %v8341_v21  ;;  %v8333_v62 = vadd.f32 %v16253_v10, %v8332_v14  ;;  %vm17738_vm4 = vmmov %vm17706_vm0 }
 0x682   :  { %v6901_v49 = vpop.permute.xlu1 %6900  ;;  %v7631_v60 = vsel %vm3458_vm1, %v7595_v2, %v7210_v59 }
 0x683   :  { %9008 = vst.msk [vmem:[%s16533_s7 + $0x140] sm:$0xff] %vm17724_vm10, %v8496_v57  ;;  %v8499_v15 = vmax.f32 %v8463_v16, 0.0  ;;  %v8461_v23 = vadd.f32 %v8333_v62, %v8119_v19  ;;  %v9422_v19 = vpop.f32.mrf.mxu1  ;;  %vm17739_vm10 = vmmov %vm17706_vm0 }
 0x685   :  { %v7339_v8 = vpop.permute.xlu0 %7338  ;;  %9011 = vst.msk [vmem:[%s16533_s7 + $0x158] sm:$0xff] %vm17706_vm0, %v8499_v15  ;;  %v8497_v52 = vmax.f32 %v8461_v23, 0.0 }
 0x686   :  { %v6954_v38 = vpop.permute.xlu1 %6953  ;;  %v7667_v18 = vsel %vm3495_vm14, %v7631_v60, %v7339_v8  ;;  %v8148_v60 = vpop.f32.mrf.mxu1 }
 0x687   :  { %v7703_v43 = vsel %vm3532_vm2, %v7667_v18, %v7415_v47  ;;  %9009 = vst.msk [vmem:[%s16533_s7 + $0x148] sm:$0xff] %vm17725_vm6, %v8497_v52  ;;  %vm17740_vm6 = vmmov %vm17706_vm0 }
 0x688   :  { %9483 = vmatmul.mubr.msk.bf16.gmra.mxu0 %vm4137_vm13, %v7703_v43  ;;  %v9423_v16 = vpop.f32.mrf.mxu1 }
 0x689   :  { %v6825_v35 = vpop.permute.xlu0 %6824 }
 0x68a   :  { %v7083_v58 = vpop.permute.xlu1 %7082  ;;  %v7453_v26 = vsel %vm17726_vm8, %v9739_v13, %v6825_v35  ;;  %v8151_v52 = vpop.f32.mrf.mxu1  ;;  %vm17741_vm8 = vmmov %vm17706_vm0 }
 0x68b   :  { %v7489_v45 = vsel %vm1135_vm11, %v7453_v26, %v6901_v49 }
 0x68c   :  { %v7525_v32 = vsel %vm17727_vm12, %v7489_v45, %v6954_v38  ;;  %vm17742_vm12 = vmmov %vm17706_vm0 }
 0x68d   :  { %v6827_v53 = vpop.permute.xlu0 %6826  ;;  %v7561_v0 = vsel %vm1283_vm15, %v7525_v32, %v7083_v58 }
 0x68e   :  { %v7159_v27 = vpop.permute.xlu1 %7158  ;;  %v7455_v24 = vsel %vm17728_vm5, %v15892_v12, %v6827_v53  ;;  %vm17743_vm5 = vmmov %vm17706_vm0 }
 0x68f   :  { %v7597_v61 = vsel %vm3421_vm7, %v7561_v0, %v7159_v27 }
 0x691   :  { %v6903_v39 = vpop.permute.xlu0 %6902 }
 0x692   :  { %v7212_v63 = vpop.permute.xlu1 %7211  ;;  %v7491_v11 = vsel %vm1135_vm11, %v7455_v24, %v6903_v39  ;;  %vm17730_vm11 = vmmov %vm17706_vm0 }
 0x693   :  { %v7633_v1 = vsel %vm3458_vm1, %v7597_v61, %v7212_v63  ;;  %v9426_v63 = vpop.f32.mrf.mxu1 }
 0x695   :  { %v6956_v48 = vpop.permute.xlu0 %6955  ;;  %v8164_v32 = vpop.f32.mrf.mxu1 }
 0x696   :  { %v7341_v55 = vpop.permute.xlu1 %7340  ;;  %v7527_v31 = vsel %vm17729_vm9, %v7491_v11, %v6956_v48  ;;  %vm17744_vm9 = vmmov %vm17706_vm0 }
 0x697   :  { %v7669_v41 = vsel %vm3495_vm14, %v7633_v1, %v7341_v55  ;;  %v9427_v61 = vpop.f32.mrf.mxu1 }
 0x699   :  { %v7085_v44 = vpop.permute.xlu0 %7084 }
 0x69a   :  { %v7417_v36 = vpop.permute.xlu1 %7416  ;;  %v7563_v34 = vsel %vm1283_vm15, %v7527_v31, %v7085_v44  ;;  %vm17731_vm15 = vmmov %vm17706_vm0 }
 0x69b   :  { %v7705_v22 = vsel %vm3532_vm2, %v7669_v41, %v7417_v36 }
 0x69c   :  { %9486 = vmatprep.mubr.msk.bf16.mxu0 %vm4137_vm13, %v7705_v22 }
 0x69d   :  { %v7161_v6 = vpop.permute.xlu0 %7160 }
 0x69e   :  { %v7599_v42 = vsel %vm3421_vm7, %v7563_v34, %v7161_v6  ;;  %vm17732_vm7 = vmmov %vm17706_vm0 }
 0x6a1   :  { %v7214_v56 = vpop.permute.xlu0 %7213  ;;  %v9464_v29 = vpop.f32.mrf.mxu0 }
 0x6a2   :  { %v8354_v25 = vadd.f32 %v16253_v10, %v9464_v29  ;;  %v7635_v20 = vsel %vm3458_vm1, %v7599_v42, %v7214_v56  ;;  %vm17733_vm1 = vmmov %vm17706_vm0  ;;  %v8167_v56 = vpop.f32.mrf.mxu1 }
 0x6a3   :  { %v8345_v47 = vpop.f32.mrf.mxu0 }
 0x6a4   :  { %v8466_v9 = vadd.f32 %v9418_v7, %v8354_v25  ;;  %v8346_v17 = vadd.f32 %v16253_v10, %v8345_v47  ;;  %v9430_v25 = vpop.f32.mrf.mxu1 }
 0x6a5   :  { %v7343_v50 = vpop.permute.xlu0 %7342  ;;  %v9465_v12 = vpop.f32.mrf.mxu0 }
 0x6a6   :  { %v7671_v51 = vsel %vm3495_vm14, %v7635_v20, %v7343_v50  ;;  %v8502_v59 = vmax.f32 %v8466_v9, 0.0  ;;  %v8464_v49 = vadd.f32 %v8346_v17, %v8132_v54  ;;  %v8357_v30 = vadd.f32 %v16253_v10, %v9465_v12  ;;  %vm17734_vm14 = vmmov %vm17706_vm0  ;;  %v8180_v34 = vpop.f32.mrf.mxu1 }
 0x6a7   :  { %v8348_v5 = vpop.f32.mrf.mxu0 }
 0x6a8   :  { %9014 = vst.msk [vmem:[%s16533_s7 + $0x170] sm:$0xff] %vm17730_vm11, %v8502_v59  ;;  %v8500_v28 = vmax.f32 %v8464_v49, 0.0  ;;  %v8467_v33 = vadd.f32 %v9419_v37, %v8357_v30  ;;  %v8349_v3 = vadd.f32 %v16253_v10, %v8348_v5  ;;  %v9431_v9 = vpop.f32.mrf.mxu1  ;;  %vm17745_vm11 = vmmov %vm17706_vm0 }
 0x6a9   :  { %v7419_v46 = vpop.permute.xlu0 %7418 }
 0x6aa   :  { %v7707_v40 = vsel %vm3532_vm2, %v7671_v51, %v7419_v46  ;;  %9012 = vst.msk [vmem:[%s16533_s7 + $0x160] sm:$0xff] %vm17731_vm15, %v8500_v28  ;;  %v8503_v21 = vmax.f32 %v8467_v33, 0.0  ;;  %v8465_v2 = vadd.f32 %v8349_v3, %v8135_v4  ;;  %vm17735_vm2 = vmmov %vm17706_vm0  ;;  %v8183_v30 = vpop.f32.mrf.mxu1 }
 0x6ab   :  { %9487 = vmatmul.mubr.msk.bf16.gmra.mxu0 %vm4137_vm13, %v7707_v40  ;;  %vm17736_vm13 = vmmov %vm17706_vm0 }
 0x6ac   :  { %9015 = vst.msk [vmem:[%s16533_s7 + $0x178] sm:$0xff] %vm17732_vm7, %v8503_v21  ;;  %v8501_v14 = vmax.f32 %v8465_v2, 0.0  ;;  %vm17746_vm15 = vmmov %vm17706_vm0 }
 0x6ad   :  { %vm17747_vm7 = vmmov %vm17706_vm0 }
 0x6ae   :  { %9013 = vst.msk [vmem:[%s16533_s7 + $0x168] sm:$0xff] %vm17733_vm1, %v8501_v14  ;;  %vm17748_vm1 = vmmov %vm17706_vm0 }
 0x6be   :  { %v9468_v8 = vpop.f32.mrf.mxu0 }
 0x6bf   :  { %v8370_v38 = vadd.f32 %v16253_v10, %v9468_v8 }
 0x6c0   :  { %v8361_v57 = vpop.f32.mrf.mxu0 }
 0x6c1   :  { %v8470_v62 = vadd.f32 %v9422_v19, %v8370_v38  ;;  %v8362_v18 = vadd.f32 %v16253_v10, %v8361_v57 }
 0x6c2   :  { %v9469_v43 = vpop.f32.mrf.mxu0 }
 0x6c3   :  { %v8506_v15 = vmax.f32 %v8470_v62, 0.0  ;;  %v8468_v23 = vadd.f32 %v8362_v18, %v8148_v60  ;;  %v8373_v35 = vadd.f32 %v16253_v10, %v9469_v43 }
 0x6c4   :  { %v8364_v58 = vpop.f32.mrf.mxu0 }
 0x6c5   :  { %9018 = vst.msk [vmem:[%s16533_s7 + $0x190] sm:$0xff] %vm17734_vm14, %v8506_v15  ;;  %v8504_v13 = vmax.f32 %v8468_v23, 0.0  ;;  %v8471_v26 = vadd.f32 %v9423_v16, %v8373_v35  ;;  %v8365_v53 = vadd.f32 %v16253_v10, %v8364_v58  ;;  %vm17749_vm14 = vmmov %vm17706_vm0 }
 0x6c7   :  { %9016 = vst.msk [vmem:[%s16533_s7 + $0x180] sm:$0xff] %vm17735_vm2, %v8504_v13  ;;  %v8507_v27 = vmax.f32 %v8471_v26, 0.0  ;;  %v8469_v45 = vadd.f32 %v8365_v53, %v8151_v52  ;;  %vm17750_vm2 = vmmov %vm17706_vm0 }
 0x6c9   :  { %9019 = vst.msk [vmem:[%s16533_s7 + $0x198] sm:$0xff] %vm17736_vm13, %v8507_v27  ;;  %v8505_v39 = vmax.f32 %v8469_v45, 0.0  ;;  %vm17751_vm13 = vmmov %vm17706_vm0 }
 0x6cb   :  { %9017 = vst.msk [vmem:[%s16533_s7 + $0x188] sm:$0xff] %vm17737_vm3, %v8505_v39  ;;  %vm17752_vm3 = vmmov %vm17706_vm0 }
 0x6db   :  { %v9472_v48 = vpop.f32.mrf.mxu0 }
 0x6dc   :  { %v8386_v55 = vadd.f32 %v16253_v10, %v9472_v48 }
 0x6dd   :  { %v8377_v0 = vpop.f32.mrf.mxu0 }
 0x6de   :  { %v8474_v1 = vadd.f32 %v9426_v63, %v8386_v55  ;;  %v8378_v41 = vadd.f32 %v16253_v10, %v8377_v0  ;;  %v9434_v21 = vpop.f32.mrf.mxu1 }
 0x6df   :  { %v9473_v44 = vpop.f32.mrf.mxu0 }
 0x6e0   :  { %v8510_v36 = vmax.f32 %v8474_v1, 0.0  ;;  %v8472_v22 = vadd.f32 %v8378_v41, %v8164_v32  ;;  %v8389_v6 = vadd.f32 %v16253_v10, %v9473_v44  ;;  %v8196_v2 = vpop.f32.mrf.mxu1 }
 0x6e1   :  { %v8380_v7 = vpop.f32.mrf.mxu0 }
 0x6e2   :  { %9022 = vst.msk [vmem:[%s16533_s7 + $0x1b0] sm:$0xff] %vm17738_vm4, %v8510_v36  ;;  %v8508_v54 = vmax.f32 %v8472_v22, 0.0  ;;  %v8475_v24 = vadd.f32 %v9427_v61, %v8389_v6  ;;  %v8381_v11 = vadd.f32 %v16253_v10, %v8380_v7  ;;  %v9435_v8 = vpop.f32.mrf.mxu1  ;;  %vm17753_vm4 = vmmov %vm17706_vm0 }
 0x6e4   :  { %9020 = vst.msk [vmem:[%s16533_s7 + $0x1a0] sm:$0xff] %vm17739_vm10, %v8508_v54  ;;  %v8511_v29 = vmax.f32 %v8475_v24, 0.0  ;;  %v8473_v31 = vadd.f32 %v8381_v11, %v8167_v56  ;;  %v8199_v23 = vpop.f32.mrf.mxu1  ;;  %vm17754_vm10 = vmmov %vm17706_vm0 }
 0x6e6   :  { %9023 = vst.msk [vmem:[%s16533_s7 + $0x1b8] sm:$0xff] %vm17706_vm0, %v8511_v29  ;;  %v8509_v50 = vmax.f32 %v8473_v31, 0.0  ;;  %v9438_v27 = vpop.f32.mrf.mxu1 }
 0x6e8   :  { %9021 = vst.msk [vmem:[%s16533_s7 + $0x1a8] sm:$0xff] %vm17740_vm6, %v8509_v50  ;;  %v8212_v45 = vpop.f32.mrf.mxu1  ;;  %vm17755_vm6 = vmmov %vm17706_vm0 }
 0x6ea   :  { %v9439_v48 = vpop.f32.mrf.mxu1 }
 0x6ec   :  { %v8215_v22 = vpop.f32.mrf.mxu1 }
 0x6ee   :  { %v9442_v29 = vpop.f32.mrf.mxu1 }
 0x6f0   :  { %v8228_v31 = vpop.f32.mrf.mxu1 }
 0x6fb   :  { %v9476_v47 = vpop.f32.mrf.mxu0 }
 0x6fc   :  { %v8402_v37 = vadd.f32 %v16253_v10, %v9476_v47 }
 0x6fd   :  { %v8393_v42 = vpop.f32.mrf.mxu0 }
 0x6fe   :  { %v8478_v17 = vadd.f32 %v9430_v25, %v8402_v37  ;;  %v8394_v20 = vadd.f32 %v16253_v10, %v8393_v42  ;;  %v9443_v42 = vpop.f32.mrf.mxu1 }
 0x6ff   :  { %v9477_v12 = vpop.f32.mrf.mxu0 }
 0x700   :  { %v8514_v51 = vmax.f32 %v8478_v17, 0.0  ;;  %v8476_v46 = vadd.f32 %v8394_v20, %v8180_v34  ;;  %v8405_v59 = vadd.f32 %v16253_v10, %v9477_v12 }
 0x701   :  { %v8396_v49 = vpop.f32.mrf.mxu0 }
 0x702   :  { %9026 = vst.msk [vmem:[%s16533_s7 + $0x1d0] sm:$0xff] %vm17741_vm8, %v8514_v51  ;;  %v8512_v40 = vmax.f32 %v8476_v46, 0.0  ;;  %v8479_v5 = vadd.f32 %v9431_v9, %v8405_v59  ;;  %v8397_v4 = vadd.f32 %v16253_v10, %v8396_v49 }
 0x704   :  { %9024 = vst.msk [vmem:[%s16533_s7 + $0x1c0] sm:$0xff] %vm17742_vm12, %v8512_v40  ;;  %v8515_v28 = vmax.f32 %v8479_v5, 0.0  ;;  %v8477_v33 = vadd.f32 %v8397_v4, %v8183_v30  ;;  %v8231_v30 = vpop.f32.mrf.mxu1 }
 0x706   :  { %9027 = vst.msk [vmem:[%s16533_s7 + $0x1d8] sm:$0xff] %vm17743_vm5, %v8515_v28  ;;  %v8513_v3 = vmax.f32 %v8477_v33, 0.0 }
 0x708   :  { %9025 = vst.msk [vmem:[%s16533_s7 + $0x1c8] sm:$0xff] %vm17744_vm9, %v8513_v3 }
 0x728   :  { %v9480_v14 = vpop.f32.mrf.mxu0 }
 0x729   :  { %v8418_v19 = vadd.f32 %v16253_v10, %v9480_v14 }
 0x72a   :  { %v8409_v60 = vpop.f32.mrf.mxu0 }
 0x72b   :  { %v8482_v38 = vadd.f32 %v9434_v21, %v8418_v19  ;;  %v8410_v57 = vadd.f32 %v16253_v10, %v8409_v60 }
 0x72c   :  { %v9481_v16 = vpop.f32.mrf.mxu0 }
 0x72d   :  { %v8518_v62 = vmax.f32 %v8482_v38, 0.0  ;;  %v8480_v18 = vadd.f32 %v8410_v57, %v8196_v2  ;;  %v8421_v43 = vadd.f32 %v16253_v10, %v9481_v16 }
 0x72e   :  { %v8412_v15 = vpop.f32.mrf.mxu0 }
 0x72f   :  { %9030 = vst.msk [vmem:[%s16533_s7 + $0x1f0] sm:$0xff] %vm17745_vm11, %v8518_v62  ;;  %v8516_v35 = vmax.f32 %v8480_v18, 0.0  ;;  %v8483_v58 = vadd.f32 %v9435_v8, %v8421_v43  ;;  %v8413_v52 = vadd.f32 %v16253_v10, %v8412_v15 }
 0x731   :  { %9028 = vst.msk [vmem:[%s16533_s7 + $0x1e0] sm:$0xff] %vm17746_vm15, %v8516_v35  ;;  %v8519_v13 = vmax.f32 %v8483_v58, 0.0  ;;  %v8481_v26 = vadd.f32 %v8413_v52, %v8199_v23 }
 0x733   :  { %9031 = vst.msk [vmem:[%s16533_s7 + $0x1f8] sm:$0xff] %vm17747_vm7, %v8519_v13  ;;  %v8517_v53 = vmax.f32 %v8481_v26, 0.0 }
 0x735   :  { %9029 = vst.msk [vmem:[%s16533_s7 + $0x1e8] sm:$0xff] %vm17748_vm1, %v8517_v53 }
 0x748   :  { %v9484_v39 = vpop.f32.mrf.mxu0 }
 0x749   :  { %v8434_v63 = vadd.f32 %v16253_v10, %v9484_v39 }
 0x74a   :  { %v8425_v32 = vpop.f32.mrf.mxu0 }
 0x74b   :  { %v8486_v55 = vadd.f32 %v9438_v27, %v8434_v63  ;;  %v8426_v0 = vadd.f32 %v16253_v10, %v8425_v32 }
 0x74c   :  { %v9485_v61 = vpop.f32.mrf.mxu0 }
 0x74d   :  { %v8522_v1 = vmax.f32 %v8486_v55, 0.0  ;;  %v8484_v41 = vadd.f32 %v8426_v0, %v8212_v45  ;;  %v8437_v44 = vadd.f32 %v16253_v10, %v9485_v61 }
 0x74e   :  { %v8428_v36 = vpop.f32.mrf.mxu0 }
 0x74f   :  { %9034 = vst.msk [vmem:[%s16533_s7 + $0x210] sm:$0xff] %vm17749_vm14, %v8522_v1  ;;  %v8520_v6 = vmax.f32 %v8484_v41, 0.0  ;;  %v8487_v7 = vadd.f32 %v9439_v48, %v8437_v44  ;;  %v8429_v56 = vadd.f32 %v16253_v10, %v8428_v36 }
 0x751   :  { %9032 = vst.msk [vmem:[%s16533_s7 + $0x200] sm:$0xff] %vm17750_vm2, %v8520_v6  ;;  %v8523_v54 = vmax.f32 %v8487_v7, 0.0  ;;  %v8485_v24 = vadd.f32 %v8429_v56, %v8215_v22 }
 0x753   :  { %9035 = vst.msk [vmem:[%s16533_s7 + $0x218] sm:$0xff] %vm17751_vm13, %v8523_v54  ;;  %v8521_v11 = vmax.f32 %v8485_v24, 0.0 }
 0x755   :  { %9033 = vst.msk [vmem:[%s16533_s7 + $0x208] sm:$0xff] %vm17752_vm3, %v8521_v11 }
 0x76b   :  { %v9488_v50 = vpop.f32.mrf.mxu0 }
 0x76c   :  { %v8450_v25 = vadd.f32 %v16253_v10, %v9488_v50 }
 0x76d   :  { %v8441_v34 = vpop.f32.mrf.mxu0 }
 0x76e   :  { %v8490_v47 = vadd.f32 %v9442_v29, %v8450_v25  ;;  %v8442_v37 = vadd.f32 %v16253_v10, %v8441_v34 }
 0x76f   :  { %v9489_v9 = vpop.f32.mrf.mxu0 }
 0x770   :  { %v8526_v17 = vmax.f32 %v8490_v47, 0.0  ;;  %v8488_v20 = vadd.f32 %v8442_v37, %v8228_v31  ;;  %v8453_v12 = vadd.f32 %v16253_v10, %v9489_v9 }
 0x771   :  { %v8444_v51 = vpop.f32.mrf.mxu0 }
 0x772   :  { %9038 = vst.msk [vmem:[%s16533_s7 + $0x230] sm:$0xff] %vm17753_vm4, %v8526_v17  ;;  %v8524_v46 = vmax.f32 %v8488_v20, 0.0  ;;  %v8491_v59 = vadd.f32 %v9443_v42, %v8453_v12  ;;  %v8445_v49 = vadd.f32 %v16253_v10, %v8444_v51 }
 0x774   :  { %9036 = vst.msk [vmem:[%s16533_s7 + $0x220] sm:$0xff] %vm17754_vm10, %v8524_v46  ;;  %v8527_v40 = vmax.f32 %v8491_v59, 0.0  ;;  %v8489_v5 = vadd.f32 %v8445_v49, %v8231_v30 }
 0x776   :  { %9039 = vst.msk [vmem:[%s16533_s7 + $0x238] sm:$0xff] %vm17706_vm0, %v8527_v40  ;;  %v8525_v4 = vmax.f32 %v8489_v5, 0.0 }
 0x778   :  { %9037 = vst.msk [vmem:[%s16533_s7 + $0x228] sm:$0xff] %vm17755_vm6, %v8525_v4 }

</bundles_post_ra>
